<compile_context>
chip_gen: v6e
topology: v6e:2x2x1
jax: 0.10.0
libtpu: 0.0.40
codegen_flags: <defaults>
</compile_context>

<pallas_src>
import numpy as np

import jax
import jax.numpy as jnp
from jax.experimental import pallas as pl
from jax.experimental.pallas import tpu as pltpu


_BLOCK_CFG = [
    # (in_planes, out_planes, stride)
    (1, 16, (2, 2)),
    (16, 32, (2, 2)),
    (32, 64, (2, 2)),
    (64, 128, (2, 1)),
    (128, 256, (2, 1)),
]
_EPS = 1e-5


# ----------------------------------------------------------------------------
# Parameter folding + int8 weight quantization (runs once; off the hot path)
# ----------------------------------------------------------------------------
def _conv_selection(hi, wi, stride):
    """0/1 tensor S[p, q, a, b]: input pixel p feeds output pixel q through tap (a, b)
    of a 3x3 / padding=1 convolution with the given stride."""
    sh, sw = stride
    ho = (hi + 2 - 3) // sh + 1
    wo = (wi + 2 - 3) // sw + 1
    S = np.zeros((hi * wi, ho * wo, 3, 3), np.float32)
    for oh in range(ho):
        for ow in range(wo):
            for a in range(3):
                for b in range(3):
                    ih = oh * sh + a - 1
                    iw = ow * sw + b - 1
                    if 0 <= ih < hi and 0 <= iw < wi:
                        S[ih * wi + iw, oh * wo + ow, a, b] = 1.0
    return S, ho, wo


def _fold_block(block_params, hi, wi, stride, nchw_rows=False):
    """Conv(3x3, pad=1, stride) + eval-mode BN folded into one dense matrix + bias.

    Returns:
      T    : (hi*wi*cin, ho*wo*cout) f32 with the BN scale folded in, so
             acts_flat @ T == scaled conv output flattened as (h, w, c).
             If nchw_rows, rows are ordered (c, h, w) so the kernel can consume the
             NCHW-flattened network input directly (no transpose in the wrapper).
      bias : (1, ho*wo*cout) f32, fused conv-bias + BN shift, tiled over spatial.
    """
    w, b, gamma, beta, run_mean, run_var = block_params
    cout, cin = int(w.shape[0]), int(w.shape[1])
    S_np, ho, wo = _conv_selection(hi, wi, stride)

    bn_scale = gamma / jnp.sqrt(run_var + _EPS)                      # (cout,)
    w_eff = w * bn_scale[:, None, None, None]                        # (cout, cin, 3, 3)
    if nchw_rows:
        T = jnp.einsum("pqab,ocab->cpqo", jnp.asarray(S_np), w_eff)  # rows = (c, h, w)
    else:
        T = jnp.einsum("pqab,ocab->pcqo", jnp.asarray(S_np), w_eff)  # rows = (h, w, c)
    T = T.reshape(hi * wi * cin, ho * wo * cout).astype(jnp.float32)

    bias_c = (b - run_mean) * bn_scale + beta                        # (cout,)
    bias = jnp.tile(bias_c, ho * wo).reshape(1, ho * wo * cout).astype(jnp.float32)
    return T, bias, ho, wo


def _quantize_int8_cols(T):
    """Symmetric per-column int8 quantization (the per-channel BN scale is exactly
    absorbed by the per-column scale, so only raw conv-weight values are rounded)."""
    amax = jnp.max(jnp.abs(T), axis=0, keepdims=True)                # (1, cols)
    scale = jnp.where(amax > 0.0, amax / 127.0, 1.0).astype(jnp.float32)
    q = jnp.clip(jnp.round(T / scale), -127.0, 127.0).astype(jnp.int8)
    return q, scale


def fold_convnet_params(params, h_in, w_in, quantized_layers=(0, 1, 2)):
    """Per layer: (T_int8, col_scale_f32, bias_f32) for the byte-inflated layers,
    (T_bf16, bias_f32) for the layers whose unrolled form is already compact."""
    folded = []
    hi, wi = h_in, w_in
    for l, (block_params, (_cin, _cout, stride)) in enumerate(zip(params, _BLOCK_CFG)):
        T, bias, hi, wi = _fold_block(block_params, hi, wi, stride, nchw_rows=(l == 0))
        if l in quantized_layers:
            q, scale = _quantize_int8_cols(T)
            folded.append((q, scale, bias))
        else:
            folded.append((T.astype(jnp.bfloat16), bias))
    return folded


# ----------------------------------------------------------------------------
# Single fused Pallas kernel: 5 x (GEMM + bias + ReLU) + adaptive avg-pool
# ----------------------------------------------------------------------------
def _make_convnet_kernel(layer_kinds, final_spatial, final_c):
    num_layers = len(layer_kinds)

    def kernel(*refs):
        x_ref, o_ref = refs[0], refs[-1]
        w_refs = refs[1:-1]

        a = x_ref[...]                                           # bf16 (tn, H*W*Cin)
        act = None
        idx = 0
        for l, kind in enumerate(layer_kinds):
            if kind == "q8":
                t_ref, s_ref, b_ref = w_refs[idx], w_refs[idx + 1], w_refs[idx + 2]
                idx += 3
                # int8 -> f32, per-column scale, -> bf16 for the MXU (cheap VPU pass,
                # hidden under the remaining weight DMA; halves HBM bytes for T).
                t = (t_ref[...].astype(jnp.float32) * s_ref[...]).astype(jnp.bfloat16)
            else:
                t_ref, b_ref = w_refs[idx], w_refs[idx + 1]
                idx += 2
                t = t_ref[...]
            acc = jnp.dot(a, t, preferred_element_type=jnp.float32)   # MXU, f32 acc
            act = jnp.maximum(acc + b_ref[...], 0.0)                  # f32 epilogue
            if l < num_layers - 1:
                a = act.astype(jnp.bfloat16)                          # single cast/layer

        # AdaptiveAvgPool2d((1,1)) + flatten: mean over the spatial positions of the
        # last activation, laid out (spatial, channel) along the lane axis.
        pooled = act[:, 0:final_c]
        for s in range(1, final_spatial):
            pooled = pooled + act[:, s * final_c:(s + 1) * final_c]
        o_ref[...] = pooled * (1.0 / final_spatial)

    return kernel


def convnet_pallas(x_flat, folded):
    N, d_in = x_flat.shape
    final_c = _BLOCK_CFG[-1][1]
    final_spatial = folded[-1][-1].shape[1] // final_c

    # 256-row batch tiles fill the 256x256 MXU on v6e/v7x and halve grid-step count;
    # at N <= 256 the grid is a single step (no forced multi-TC split at tiny batch).
    tn = N if N <= 256 else 256
    grid = (pl.cdiv(N, tn),)

    in_specs = [pl.BlockSpec((tn, d_in), lambda i: (i, 0))]
    flat_args = [x_flat]
    layer_kinds = []
    for entry in folded:
        layer_kinds.append("q8" if len(entry) == 3 else "bf16")
        for arr in entry:
            in_specs.append(pl.BlockSpec(arr.shape, lambda i: (0, 0)))
            flat_args.append(arr)

    kernel = _make_convnet_kernel(tuple(layer_kinds), final_spatial, final_c)

    return pl.pallas_call(
        kernel,
        out_shape=jax.ShapeDtypeStruct((N, final_c), jnp.float32),
        grid=grid,
        in_specs=in_specs,
        out_specs=pl.BlockSpec((tn, final_c), lambda i: (i, 0)),
        compiler_params=pltpu.CompilerParams(
            dimension_semantics=("parallel",)),    # batch tiles split across TCs when N grows
    )(*flat_args)


@jax.jit
def convnet_forward(x_nchw, folded):
    N = x_nchw.shape[0]
    # NCHW-flatten is a free reshape; the (c,h,w)->(h,w,c) permutation is folded into
    # layer 1's weight rows, so no transpose op touches HBM.  bf16 halves input DMA.
    x = x_nchw.reshape(N, -1).astype(jnp.bfloat16)
    return convnet_pallas(x, folded)


# ----------------------------------------------------------------------------
# Parameters (deterministic, matches nn.Module shapes) + pure-XLA reference
# ----------------------------------------------------------------------------
def init_params(key):
    params = []
    for (cin, cout, _stride) in _BLOCK_CFG:
        key, kw, kb = jax.random.split(key, 3)
        fan_in = cin * 9
        w = jax.random.normal(kw, (cout, cin, 3, 3), jnp.float32) / jnp.sqrt(fan_in)
        b = jax.random.normal(kb, (cout,), jnp.float32) * 0.01
        gamma = jnp.ones((cout,), jnp.float32)
        beta = jnp.zeros((cout,), jnp.float32)
        run_mean = jnp.zeros((cout,), jnp.float32)
        run_var = jnp.ones((cout,), jnp.float32)
        params.append((w, b, gamma, beta, run_mean, run_var))
    return params


def convnet_reference(x_nchw, params):
    """Pure-JAX f32 reference (conv + eval-mode BN + ReLU, avgpool, flatten)."""
    x = x_nchw.astype(jnp.float32)
    for (w, b, gamma, beta, run_mean, run_var), (_ci, _co, stride) in zip(params, _BLOCK_CFG):
        x = jax.lax.conv_general_dilated(
            x, w, window_strides=stride, padding=((1, 1), (1, 1)),
            dimension_numbers=("NCHW", "OIHW", "NCHW"))
        x = x + b[None, :, None, None]
        scale = gamma / jnp.sqrt(run_var + _EPS)
        x = (x - run_mean[None, :, None, None]) * scale[None, :, None, None] \
            + beta[None, :, None, None]
        x = jnp.maximum(x, 0.0)
    return jnp.mean(x, axis=(2, 3))


# ----------------------------------------------------------------------------
if __name__ == "__main__":
    key = jax.random.PRNGKey(0)
    k_x, k_p = jax.random.split(key)

    # Conv2d(1, 16, ...) implies a single input channel; 16x16 spatial works with
    # the stride schedule (16 -> 8 -> 4 -> 2 -> (1,2) -> (1,2)).
    x = jax.random.normal(k_x, (2, 1, 16, 16), jnp.float32)       # NCHW

    params = init_params(k_p)
    folded = fold_convnet_params(params, 16, 16)                  # one-time fold + quant

    out = convnet_forward(x, folded)
    out = jax.block_until_ready(out)

    assert out.shape == (2, 256), out.shape
    assert bool(jnp.all(jnp.isfinite(out)))

    # Loose tolerance: kernel uses bf16 GEMM operands (+ int8 weights for layers 1-3);
    # reference is full f32.
    ref = convnet_reference(x, params)
    max_err = float(jnp.max(jnp.abs(out - ref)))
    tol = 5e-2 * max(1.0, float(jnp.max(jnp.abs(ref))))
    assert max_err < tol, f"max abs err {max_err} (tol {tol})"

    print("KERNEL_OK")
</pallas_src>

<mosaic_0001>
module attributes {stable_mosaic.version = 11 : i64} {
  func.func @kernel(%arg0: i32, %arg1: memref<2x256xbf16, #tpu.memory_space<vmem>>, %arg2: memref<256x1024xi8, #tpu.memory_space<vmem>>, %arg3: memref<1x1024xf32, #tpu.memory_space<vmem>>, %arg4: memref<1x1024xf32, #tpu.memory_space<vmem>>, %arg5: memref<1024x512xi8, #tpu.memory_space<vmem>>, %arg6: memref<1x512xf32, #tpu.memory_space<vmem>>, %arg7: memref<1x512xf32, #tpu.memory_space<vmem>>, %arg8: memref<512x256xi8, #tpu.memory_space<vmem>>, %arg9: memref<1x256xf32, #tpu.memory_space<vmem>>, %arg10: memref<1x256xf32, #tpu.memory_space<vmem>>, %arg11: memref<256x256xbf16, #tpu.memory_space<vmem>>, %arg12: memref<1x256xf32, #tpu.memory_space<vmem>>, %arg13: memref<256x512xbf16, #tpu.memory_space<vmem>>, %arg14: memref<1x512xf32, #tpu.memory_space<vmem>>, %arg15: memref<2x256xf32, #tpu.memory_space<vmem>>) attributes {dimension_semantics = [#tpu.dimension_semantics<parallel>], iteration_bounds = array<i64: 1>, scalar_prefetch = 0 : i64, scratch_operands = 0 : i64, tpu.core_type = #tpu.core_type<tc>, window_params = [{transform_indices = @transform_0, window_bounds = array<i64: 2, 256>}, {pipeline_mode = #tpu.pipeline_mode<synchronous>, transform_indices = @transform_1, window_bounds = array<i64: 256, 1024>}, {pipeline_mode = #tpu.pipeline_mode<synchronous>, transform_indices = @transform_2, window_bounds = array<i64: 1, 1024>}, {pipeline_mode = #tpu.pipeline_mode<synchronous>, transform_indices = @transform_3, window_bounds = array<i64: 1, 1024>}, {pipeline_mode = #tpu.pipeline_mode<synchronous>, transform_indices = @transform_4, window_bounds = array<i64: 1024, 512>}, {pipeline_mode = #tpu.pipeline_mode<synchronous>, transform_indices = @transform_5, window_bounds = array<i64: 1, 512>}, {pipeline_mode = #tpu.pipeline_mode<synchronous>, transform_indices = @transform_6, window_bounds = array<i64: 1, 512>}, {pipeline_mode = #tpu.pipeline_mode<synchronous>, transform_indices = @transform_7, window_bounds = array<i64: 512, 256>}, {pipeline_mode = #tpu.pipeline_mode<synchronous>, transform_indices = @transform_8, window_bounds = array<i64: 1, 256>}, {pipeline_mode = #tpu.pipeline_mode<synchronous>, transform_indices = @transform_9, window_bounds = array<i64: 1, 256>}, {pipeline_mode = #tpu.pipeline_mode<synchronous>, transform_indices = @transform_10, window_bounds = array<i64: 256, 256>}, {pipeline_mode = #tpu.pipeline_mode<synchronous>, transform_indices = @transform_11, window_bounds = array<i64: 1, 256>}, {pipeline_mode = #tpu.pipeline_mode<synchronous>, transform_indices = @transform_12, window_bounds = array<i64: 256, 512>}, {pipeline_mode = #tpu.pipeline_mode<synchronous>, transform_indices = @transform_13, window_bounds = array<i64: 1, 512>}, {transform_indices = @transform_14, window_bounds = array<i64: 2, 256>}]} {
    %c0 = arith.constant 0 : index
    %c0_0 = arith.constant 0 : index
    %0 = vector.load %arg1[%c0, %c0_0] : memref<2x256xbf16, #tpu.memory_space<vmem>>, vector<2x256xbf16>
    %c0_1 = arith.constant 0 : index
    %c0_2 = arith.constant 0 : index
    %1 = vector.load %arg2[%c0_1, %c0_2] : memref<256x1024xi8, #tpu.memory_space<vmem>>, vector<256x1024xi8>
    %2 = arith.sitofp %1 : vector<256x1024xi8> to vector<256x1024xf32>
    %c0_3 = arith.constant 0 : index
    %c0_4 = arith.constant 0 : index
    %3 = vector.load %arg3[%c0_3, %c0_4] : memref<1x1024xf32, #tpu.memory_space<vmem>>, vector<1x1024xf32>
    %4 = vector.broadcast %3 : vector<1x1024xf32> to vector<256x1024xf32>
    %5 = arith.mulf %2, %4 : vector<256x1024xf32>
    %6 = arith.truncf %5 : vector<256x1024xf32> to vector<256x1024xbf16>
    %cst = arith.constant dense<0.000000e+00> : vector<2x1024xf32>
    %7 = tpu.matmul %0, %6, %cst {dimension_numbers = #tpu.dot_dimension_numbers<[1], [0], [0], [1], [0, 0, 1, 1], [], []>} : vector<2x256xbf16>, vector<256x1024xbf16>, vector<2x1024xf32> -> vector<2x1024xf32>
    %c0_5 = arith.constant 0 : index
    %c0_6 = arith.constant 0 : index
    %8 = vector.load %arg4[%c0_5, %c0_6] : memref<1x1024xf32, #tpu.memory_space<vmem>>, vector<1x1024xf32>
    %9 = vector.broadcast %8 : vector<1x1024xf32> to vector<2x1024xf32>
    %10 = arith.addf %7, %9 : vector<2x1024xf32>
    %cst_7 = arith.constant 0.000000e+00 : f32
    %11 = vector.broadcast %cst_7 : f32 to vector<2x1024xf32>
    %12 = arith.maximumf %10, %11 : vector<2x1024xf32>
    %13 = arith.truncf %12 : vector<2x1024xf32> to vector<2x1024xbf16>
    %c0_8 = arith.constant 0 : index
    %c0_9 = arith.constant 0 : index
    %14 = vector.load %arg5[%c0_8, %c0_9] : memref<1024x512xi8, #tpu.memory_space<vmem>>, vector<1024x512xi8>
    %15 = arith.sitofp %14 : vector<1024x512xi8> to vector<1024x512xf32>
    %c0_10 = arith.constant 0 : index
    %c0_11 = arith.constant 0 : index
    %16 = vector.load %arg6[%c0_10, %c0_11] : memref<1x512xf32, #tpu.memory_space<vmem>>, vector<1x512xf32>
    %17 = vector.broadcast %16 : vector<1x512xf32> to vector<1024x512xf32>
    %18 = arith.mulf %15, %17 : vector<1024x512xf32>
    %19 = arith.truncf %18 : vector<1024x512xf32> to vector<1024x512xbf16>
    %cst_12 = arith.constant dense<0.000000e+00> : vector<2x512xf32>
    %20 = tpu.matmul %13, %19, %cst_12 {dimension_numbers = #tpu.dot_dimension_numbers<[1], [0], [0], [1], [0, 0, 1, 1], [], []>} : vector<2x1024xbf16>, vector<1024x512xbf16>, vector<2x512xf32> -> vector<2x512xf32>
    %c0_13 = arith.constant 0 : index
    %c0_14 = arith.constant 0 : index
    %21 = vector.load %arg7[%c0_13, %c0_14] : memref<1x512xf32, #tpu.memory_space<vmem>>, vector<1x512xf32>
    %22 = vector.broadcast %21 : vector<1x512xf32> to vector<2x512xf32>
    %23 = arith.addf %20, %22 : vector<2x512xf32>
    %cst_15 = arith.constant 0.000000e+00 : f32
    %24 = vector.broadcast %cst_15 : f32 to vector<2x512xf32>
    %25 = arith.maximumf %23, %24 : vector<2x512xf32>
    %26 = arith.truncf %25 : vector<2x512xf32> to vector<2x512xbf16>
    %c0_16 = arith.constant 0 : index
    %c0_17 = arith.constant 0 : index
    %27 = vector.load %arg8[%c0_16, %c0_17] : memref<512x256xi8, #tpu.memory_space<vmem>>, vector<512x256xi8>
    %28 = arith.sitofp %27 : vector<512x256xi8> to vector<512x256xf32>
    %c0_18 = arith.constant 0 : index
    %c0_19 = arith.constant 0 : index
    %29 = vector.load %arg9[%c0_18, %c0_19] : memref<1x256xf32, #tpu.memory_space<vmem>>, vector<1x256xf32>
    %30 = vector.broadcast %29 : vector<1x256xf32> to vector<512x256xf32>
    %31 = arith.mulf %28, %30 : vector<512x256xf32>
    %32 = arith.truncf %31 : vector<512x256xf32> to vector<512x256xbf16>
    %cst_20 = arith.constant dense<0.000000e+00> : vector<2x256xf32>
    %33 = tpu.matmul %26, %32, %cst_20 {dimension_numbers = #tpu.dot_dimension_numbers<[1], [0], [0], [1], [0, 0, 1, 1], [], []>} : vector<2x512xbf16>, vector<512x256xbf16>, vector<2x256xf32> -> vector<2x256xf32>
    %c0_21 = arith.constant 0 : index
    %c0_22 = arith.constant 0 : index
    %34 = vector.load %arg10[%c0_21, %c0_22] : memref<1x256xf32, #tpu.memory_space<vmem>>, vector<1x256xf32>
    %35 = vector.broadcast %34 : vector<1x256xf32> to vector<2x256xf32>
    %36 = arith.addf %33, %35 : vector<2x256xf32>
    %cst_23 = arith.constant 0.000000e+00 : f32
    %37 = vector.broadcast %cst_23 : f32 to vector<2x256xf32>
    %38 = arith.maximumf %36, %37 : vector<2x256xf32>
    %39 = arith.truncf %38 : vector<2x256xf32> to vector<2x256xbf16>
    %c0_24 = arith.constant 0 : index
    %c0_25 = arith.constant 0 : index
    %40 = vector.load %arg11[%c0_24, %c0_25] : memref<256x256xbf16, #tpu.memory_space<vmem>>, vector<256x256xbf16>
    %cst_26 = arith.constant dense<0.000000e+00> : vector<2x256xf32>
    %41 = tpu.matmul %39, %40, %cst_26 {dimension_numbers = #tpu.dot_dimension_numbers<[1], [0], [0], [1], [0, 0, 1, 1], [], []>} : vector<2x256xbf16>, vector<256x256xbf16>, vector<2x256xf32> -> vector<2x256xf32>
    %c0_27 = arith.constant 0 : index
    %c0_28 = arith.constant 0 : index
    %42 = vector.load %arg12[%c0_27, %c0_28] : memref<1x256xf32, #tpu.memory_space<vmem>>, vector<1x256xf32>
    %43 = vector.broadcast %42 : vector<1x256xf32> to vector<2x256xf32>
    %44 = arith.addf %41, %43 : vector<2x256xf32>
    %cst_29 = arith.constant 0.000000e+00 : f32
    %45 = vector.broadcast %cst_29 : f32 to vector<2x256xf32>
    %46 = arith.maximumf %44, %45 : vector<2x256xf32>
    %47 = arith.truncf %46 : vector<2x256xf32> to vector<2x256xbf16>
    %c0_30 = arith.constant 0 : index
    %c0_31 = arith.constant 0 : index
    %48 = vector.load %arg13[%c0_30, %c0_31] : memref<256x512xbf16, #tpu.memory_space<vmem>>, vector<256x512xbf16>
    %cst_32 = arith.constant dense<0.000000e+00> : vector<2x512xf32>
    %49 = tpu.matmul %47, %48, %cst_32 {dimension_numbers = #tpu.dot_dimension_numbers<[1], [0], [0], [1], [0, 0, 1, 1], [], []>} : vector<2x256xbf16>, vector<256x512xbf16>, vector<2x512xf32> -> vector<2x512xf32>
    %c0_33 = arith.constant 0 : index
    %c0_34 = arith.constant 0 : index
    %50 = vector.load %arg14[%c0_33, %c0_34] : memref<1x512xf32, #tpu.memory_space<vmem>>, vector<1x512xf32>
    %51 = vector.broadcast %50 : vector<1x512xf32> to vector<2x512xf32>
    %52 = arith.addf %49, %51 : vector<2x512xf32>
    %cst_35 = arith.constant 0.000000e+00 : f32
    %53 = vector.broadcast %cst_35 : f32 to vector<2x512xf32>
    %54 = arith.maximumf %52, %53 : vector<2x512xf32>
    %55 = vector.extract_strided_slice %54 {offsets = [0, 0], sizes = [2, 256], strides = [1, 1]} : vector<2x512xf32> to vector<2x256xf32>
    %56 = vector.extract_strided_slice %54 {offsets = [0, 256], sizes = [2, 256], strides = [1, 1]} : vector<2x512xf32> to vector<2x256xf32>
    %57 = arith.addf %55, %56 : vector<2x256xf32>
    %cst_36 = arith.constant 5.000000e-01 : f32
    %58 = vector.broadcast %cst_36 : f32 to vector<2x256xf32>
    %59 = arith.mulf %57, %58 : vector<2x256xf32>
    %c0_37 = arith.constant 0 : index
    %c0_38 = arith.constant 0 : index
    %60 = vector.load %arg15[%c0_37, %c0_38] : memref<2x256xf32, #tpu.memory_space<vmem>>, vector<2x256xf32>
    tpu.vector_store %arg15[%c0_37, %c0_38], %59 {strides = array<i32>} : memref<2x256xf32, #tpu.memory_space<vmem>>, vector<2x256xf32>,
    return
  }
  func.func @transform_0(%arg0: i32) -> (i32, i32) {
    %c0_i32 = arith.constant 0 : i32
    %c0_i32_0 = arith.constant 0 : i32
    return %arg0, %c0_i32 : i32, i32
  }
  func.func @transform_1(%arg0: i32) -> (i32, i32) {
    %c0_i32 = arith.constant 0 : i32
    %c0_i32_0 = arith.constant 0 : i32
    %c0_i32_1 = arith.constant 0 : i32
    return %c0_i32, %c0_i32_0 : i32, i32
  }
  func.func @transform_2(%arg0: i32) -> (i32, i32) {
    %c0_i32 = arith.constant 0 : i32
    %c0_i32_0 = arith.constant 0 : i32
    %c0_i32_1 = arith.constant 0 : i32
    return %c0_i32, %c0_i32_0 : i32, i32
  }
  func.func @transform_3(%arg0: i32) -> (i32, i32) {
    %c0_i32 = arith.constant 0 : i32
    %c0_i32_0 = arith.constant 0 : i32
    %c0_i32_1 = arith.constant 0 : i32
    return %c0_i32, %c0_i32_0 : i32, i32
  }
  func.func @transform_4(%arg0: i32) -> (i32, i32) {
    %c0_i32 = arith.constant 0 : i32
    %c0_i32_0 = arith.constant 0 : i32
    %c0_i32_1 = arith.constant 0 : i32
    return %c0_i32, %c0_i32_0 : i32, i32
  }
  func.func @transform_5(%arg0: i32) -> (i32, i32) {
    %c0_i32 = arith.constant 0 : i32
    %c0_i32_0 = arith.constant 0 : i32
    %c0_i32_1 = arith.constant 0 : i32
    return %c0_i32, %c0_i32_0 : i32, i32
  }
  func.func @transform_6(%arg0: i32) -> (i32, i32) {
    %c0_i32 = arith.constant 0 : i32
    %c0_i32_0 = arith.constant 0 : i32
    %c0_i32_1 = arith.constant 0 : i32
    return %c0_i32, %c0_i32_0 : i32, i32
  }
  func.func @transform_7(%arg0: i32) -> (i32, i32) {
    %c0_i32 = arith.constant 0 : i32
    %c0_i32_0 = arith.constant 0 : i32
    %c0_i32_1 = arith.constant 0 : i32
    return %c0_i32, %c0_i32_0 : i32, i32
  }
  func.func @transform_8(%arg0: i32) -> (i32, i32) {
    %c0_i32 = arith.constant 0 : i32
    %c0_i32_0 = arith.constant 0 : i32
    %c0_i32_1 = arith.constant 0 : i32
    return %c0_i32, %c0_i32_0 : i32, i32
  }
  func.func @transform_9(%arg0: i32) -> (i32, i32) {
    %c0_i32 = arith.constant 0 : i32
    %c0_i32_0 = arith.constant 0 : i32
    %c0_i32_1 = arith.constant 0 : i32
    return %c0_i32, %c0_i32_0 : i32, i32
  }
  func.func @transform_10(%arg0: i32) -> (i32, i32) {
    %c0_i32 = arith.constant 0 : i32
    %c0_i32_0 = arith.constant 0 : i32
    %c0_i32_1 = arith.constant 0 : i32
    return %c0_i32, %c0_i32_0 : i32, i32
  }
  func.func @transform_11(%arg0: i32) -> (i32, i32) {
    %c0_i32 = arith.constant 0 : i32
    %c0_i32_0 = arith.constant 0 : i32
    %c0_i32_1 = arith.constant 0 : i32
    return %c0_i32, %c0_i32_0 : i32, i32
  }
  func.func @transform_12(%arg0: i32) -> (i32, i32) {
    %c0_i32 = arith.constant 0 : i32
    %c0_i32_0 = arith.constant 0 : i32
    %c0_i32_1 = arith.constant 0 : i32
    return %c0_i32, %c0_i32_0 : i32, i32
  }
  func.func @transform_13(%arg0: i32) -> (i32, i32) {
    %c0_i32 = arith.constant 0 : i32
    %c0_i32_0 = arith.constant 0 : i32
    %c0_i32_1 = arith.constant 0 : i32
    return %c0_i32, %c0_i32_0 : i32, i32
  }
  func.func @transform_14(%arg0: i32) -> (i32, i32) {
    %c0_i32 = arith.constant 0 : i32
    %c0_i32_0 = arith.constant 0 : i32
    return %arg0, %c0_i32 : i32, i32
  }
}

</mosaic_0001>

<bundles_post_ra>
// kernel: convnet_forward.1
= control target key start
LH: loop header
LB: loop body
LE: loop exit
PB: predicated region body
PF: predicated region fallthrough
CT: control target
= control target key end

     0   :  { %19 = vsyncpa [#allocation3], 0  ;;  %s6915_s0 = inlined_call_operand.vmem [shape: bf16[2,256], index: 0, kind: input, shape index: {}]   ;;  %s6916_s1 = inlined_call_operand.hbm [shape: s8[256,1024], index: 1, kind: input, shape index: {}]   ;;  %s6917_s2 = inlined_call_operand.vmem [shape: f32[1,1024], index: 2, kind: input, shape index: {}]   ;;  %s6918_s3 = inlined_call_operand.vmem [shape: f32[1,1024], index: 3, kind: input, shape index: {}]   ;;  %s6919_s4 = inlined_call_operand.hbm [shape: s8[1024,512], index: 4, kind: input, shape index: {}]   ;;  %s6920_s5 = inlined_call_operand.vmem [shape: f32[1,512], index: 5, kind: input, shape index: {}]   ;;  %s6921_s6 = inlined_call_operand.vmem [shape: f32[1,512], index: 6, kind: input, shape index: {}]   ;;  %s6922_s7 = inlined_call_operand.hbm [shape: s8[512,256], index: 7, kind: input, shape index: {}]   ;;  %s6923_s8 = inlined_call_operand.vmem [shape: f32[1,256], index: 8, kind: input, shape index: {}]   ;;  %s6924_s9 = inlined_call_operand.vmem [shape: f32[1,256], index: 9, kind: input, shape index: {}]   ;;  %s6925_s10 = inlined_call_operand.hbm [shape: bf16[256,256], index: 10, kind: input, shape index: {}]   ;;  %s6926_s11 = inlined_call_operand.vmem [shape: f32[1,256], index: 11, kind: input, shape index: {}]   ;;  %s6927_s12 = inlined_call_operand.hbm [shape: bf16[256,512], index: 12, kind: input, shape index: {}]   ;;  %s6928_s13 = inlined_call_operand.vmem [shape: f32[1,512], index: 13, kind: input, shape index: {}]   ;;  %s6929_s14 = inlined_call_operand.hbm [shape: f32[2,256], index: 14, kind: output, shape index: {}]  }
   0x1   :  { %20 = vsyncpa [#allocation6], 0 }
   0x2   :  { %21 = vsyncpa [#allocation9], 0 }
   0x3   :  { %22 = vsyncpa [#allocation4], 0  ;;  %s5417_s29 = smov [#allocation5]  }
   0x4   :  { %s46_s30 = sshll.u32 %s5417_s29, 4  ;;  %s47_s30 = int_to_ptr.vmem [resolvable:$true] %s46_s30 }
   0x5   :  { %s5297_s15 = scalar_lea.vmem %s47_s30, 16384  ;;  %p5302_p1 = scmp.lt.s32.totalorder %s47_s30, %s47_s30 }
   0x6   :  { %p5298_p0 = scmp.ne.s32.totalorder %s47_s30, %s5297_s15  ;;  %p5303_p2 = scmp.lt.s32.totalorder %s5297_s15, %s5297_s15 }
   0x8   :  { %p5304_p3 = por %p5303_p2, %p5302_p1 }
   0xa   :  { %p5305_p4 = pnand %p5304_p3, %p5298_p0 }
   0xc   :  { %5308 = shalt.err (!%p5305_p4)
}
   0xd   :  { %s5418_s16 = smov 512   ;;  %s5419_s17 = smov 32  }
   0xe   :  { %52 = dma.hbm_to_vmem [thread:$0]  %s6919_s4, 16384, %s47_s30, [#allocation6], %s5418_s16, %s5418_s16, %s5419_s17  }
   0xf   :  { %s5420_s20 = smov [#allocation8]  }
  0x10   :  { %s78_s21 = sshll.u32 %s5420_s20, 4  ;;  %s79_s21 = int_to_ptr.vmem [resolvable:$true] %s78_s21 }
  0x11   :  { %s5317_s22 = scalar_lea.vmem %s79_s21, 4096  ;;  %p5322_p6 = scmp.lt.s32.totalorder %s79_s21, %s79_s21 }
  0x12   :  { %p5318_p5 = scmp.ne.s32.totalorder %s79_s21, %s5317_s22  ;;  %p5323_p7 = scmp.lt.s32.totalorder %s5317_s22, %s5317_s22 }
  0x14   :  { %p5324_p8 = por %p5323_p7, %p5322_p6 }
  0x16   :  { %p5325_p9 = pnand %p5324_p8, %p5318_p5 }
  0x18   :  { %5328 = shalt.err (!%p5325_p9)
}
  0x19   :  { %s5421_s23 = smov 128   ;;  %s5422_s24 = smov 8  }
  0x1a   :  { %84 = dma.hbm_to_vmem [thread:$0]  %s6925_s10, 4096, %s79_s21, [#allocation9], %s5421_s23, %s5421_s23, %s5422_s24  }
  0x1b   :  { %s5423_s27 = smov [#allocation2]  }
  0x1c   :  { %s30_s28 = sshll.u32 %s5423_s27, 4  ;;  %s31_s28 = int_to_ptr.vmem [resolvable:$true] %s30_s28 }
  0x1d   :  { %s5337_s4 = scalar_lea.vmem %s31_s28, 8192  ;;  %p5342_p11 = scmp.lt.s32.totalorder %s31_s28, %s31_s28 }
  0x1e   :  { %p5338_p10 = scmp.ne.s32.totalorder %s31_s28, %s5337_s4  ;;  %p5343_p12 = scmp.lt.s32.totalorder %s5337_s4, %s5337_s4 }
  0x20   :  { %p5344_p13 = por %p5343_p12, %p5342_p11 }
  0x22   :  { %p5345_p0 = pnand %p5344_p13, %p5338_p10 }
  0x24   :  { %5348 = shalt.err (!%p5345_p0)
}
  0x25   :  { %s5424_s29 = smov 1024   ;;  %s5425_s30 = smov 64  }
  0x26   :  { %36 = dma.hbm_to_vmem [thread:$0]  %s6916_s1, 8192, %s31_s28, [#allocation3], %s5424_s29, %s5424_s29, %s5425_s30  }
  0x27   :  { %s5426_s17 = smov [#allocation7]  }
  0x28   :  { %s62_s18 = sshll.u32 %s5426_s17, 4  ;;  %s63_s18 = int_to_ptr.vmem [resolvable:$true] %s62_s18 }
  0x29   :  { %s5357_s10 = scalar_lea.vmem %s63_s18, 4096  ;;  %p5362_p2 = scmp.lt.s32.totalorder %s63_s18, %s63_s18 }
  0x2a   :  { %p5358_p1 = scmp.ne.s32.totalorder %s63_s18, %s5357_s10  ;;  %p5363_p3 = scmp.lt.s32.totalorder %s5357_s10, %s5357_s10 }
  0x2c   :  { %p5364_p4 = por %p5363_p3, %p5362_p2 }
  0x2e   :  { %p5365_p5 = pnand %p5364_p4, %p5358_p1 }
  0x30   :  { %5368 = shalt.err (!%p5365_p5)
}
  0x31   :  { %s5427_s19 = smov 256   ;;  %s5428_s20 = smov 16  }
  0x32   :  { %68 = dma.hbm_to_vmem [thread:$0]  %s6922_s7, 4096, %s63_s18, [#allocation6], %s5427_s19, %s5427_s19, %s5428_s20  }
  0x33   :  { %s5429_s23 = smov [#allocation10]  }
  0x34   :  { %s92_s24 = sshll.u32 %s5429_s23, 4  ;;  %s93_s24 = int_to_ptr.vmem [resolvable:$true] %s92_s24 }
  0x35   :  { %s5377_s1 = scalar_lea.vmem %s93_s24, 8192  ;;  %p5382_p7 = scmp.lt.s32.totalorder %s93_s24, %s93_s24 }
  0x36   :  { %p5378_p6 = scmp.ne.s32.totalorder %s93_s24, %s5377_s1  ;;  %p5383_p8 = scmp.lt.s32.totalorder %s5377_s1, %s5377_s1 }
  0x38   :  { %p5384_p9 = por %p5383_p8, %p5382_p7 }
  0x3a   :  { %p5385_p10 = pnand %p5384_p9, %p5378_p6 }
  0x3c   :  { %5388 = shalt.err (!%p5385_p10)
}
  0x3d   :  { %98 = dma.hbm_to_vmem [thread:$0]  %s6927_s12, 8192, %s93_s24, [#allocation9], %s5427_s19, %s5427_s19, %s5428_s20  }
  0x3e   :  { %5409 = dma.done.wait [#allocation3], 8192  }
  0x3f   :  { %5410 = vsyncadd [#allocation3], 4294959104 }
  0x40   :  { %5411 = dma.done.wait [#allocation6], 20480  }
  0x41   :  { %5412 = vsyncadd [#allocation6], 4294946816 }
  0x42   :  { %5413 = dma.done.wait [#allocation9], 12288  }
  0x43   :  { %5414 = vsyncadd [#allocation9], 4294955008  ;;  %v695_v0 = vlaneseq  ;;  %v5430_v1 = vmov 1966171168   ;;  %v142_v11 = vld [vmem:[#allocation2 + $0xc8] sm:$0xff]  ;;  %v693_v12 = vld [vmem:[%s6917_s2] sm:$0xff] }
  0x44   :  { %v1171_v2 = vunpack.c.l.s4 %v5430_v1  ;;  %v2518_v13 = vld [vmem:[%s6920_s5] sm:$0xf]  ;;  %v294_v17 = vunpack.c.2.s8 %v142_v11  ;;  %v302_v18 = vunpack.c.3.s8 %v142_v11  ;;  %v144_v22 = vld [vmem:[#allocation2 + $0xd8] sm:$0xff]  ;;  %v143_v36 = vld [vmem:[#allocation2 + $0xd0] sm:$0xff]  ;;  %v278_v55 = vunpack.c.0.s8 %v142_v11 }
  0x45   :  { %v5522_v3 = vshrl.u32 %v695_v0, 7  ;;  %v3954_v21 = vld [vmem:[%s6923_s8] sm:$0x3]  ;;  %v296_v25 = vunpack.c.2.s8 %v144_v22  ;;  %v304_v26 = vunpack.c.3.s8 %v144_v22  ;;  %v295_v47 = vunpack.c.2.s8 %v143_v36 }
  0x46   :  { %v1172_v4 = vunpack.c.0.s8 %v1171_v2  ;;  %v141_v23 = vld [vmem:[#allocation2 + $0xc0] sm:$0xff]  ;;  %v550_v28 = vcvt.s32.f32 %v294_v17  ;;  %v558_v29 = vcvt.s32.f32 %v302_v18  ;;  %v303_v48 = vunpack.c.3.s8 %v143_v36 }
  0x47   :  { %v5525_v5 = vsub.s32 1, %v5522_v3  ;;  %v5528_v6 = vsub.s32 3, %v5522_v3  ;;  %v5531_v7 = vsub.s32 0, %v5522_v3  ;;  %v5534_v8 = vsub.s32 2, %v5522_v3 }
  0x48   :  { %v717_v9 = vsub.s32 5, %v5522_v3  ;;  %v725_v10 = vsub.s32 7, %v5522_v3  ;;  %v5545_v14 = vsub.s32 %v1172_v4, %v5522_v3  ;;  %v713_v15 = vsub.s32 4, %v5522_v3 }
  0x49   :  { %v721_v16 = vsub.s32 6, %v5522_v3  ;;  %v5550_v19 = vrot.slane %v693_v12, %v5525_v5  ;;  %v5553_v20 = vrot.slane %v2518_v13, %v5525_v5  ;;  %v5559_v24 = vrot.slane %v3954_v21, %v5525_v5 }
  0x4a   :  { %v5562_v27 = vrot.slane %v693_v12, %v5528_v6  ;;  %v5565_v30 = vrot.slane %v2518_v13, %v5528_v6  ;;  %v293_v31 = vunpack.c.2.s8 %v141_v23  ;;  %v552_v32 = vcvt.s32.f32 %v296_v25 }
  0x4b   :  { %v560_v33 = vcvt.s32.f32 %v304_v26  ;;  %v301_v34 = vunpack.c.3.s8 %v141_v23  ;;  %v5568_v35 = vrot.slane %v693_v12, %v5531_v7  ;;  %v848_v37 = vmul.f32 %v5550_v19, %v550_v28 }
  0x4c   :  { %v856_v38 = vmul.f32 %v5550_v19, %v558_v29  ;;  %v549_v39 = vcvt.s32.f32 %v293_v31  ;;  %v5573_v40 = vrot.slane %v2518_v13, %v5531_v7  ;;  %v850_v41 = vmul.f32 %v5562_v27, %v552_v32  ;;  %v5595_v31 = vld [vmem:[#allocation2 + $0x80] sm:$0xff] }
  0x4d   :  { %v858_v42 = vmul.f32 %v5562_v27, %v560_v33  ;;  %v557_v43 = vcvt.s32.f32 %v301_v34  ;;  %v5578_v44 = vrot.slane %v3954_v21, %v5531_v7  ;;  %v5583_v51 = vrot.slane %v693_v12, %v5534_v8 }
  0x4e   :  { %v1048_v45 = vpack.c.bf16 %v856_v38, %v848_v37  ;;  %v847_v46 = vmul.f32 %v5568_v35, %v549_v39  ;;  %v5586_v52 = vrot.slane %v2518_v13, %v5534_v8  ;;  %v551_v53 = vcvt.s32.f32 %v295_v47  ;;  %v134_v13 = vld [vmem:[#allocation2 + $0x88] sm:$0xff]  ;;  %v135_v47 = vld [vmem:[#allocation2 + $0x90] sm:$0xff] }
  0x4f   :  { %v1050_v49 = vpack.c.bf16 %v858_v42, %v850_v41  ;;  %v855_v50 = vmul.f32 %v5568_v35, %v557_v43  ;;  %v559_v54 = vcvt.s32.f32 %v303_v48  ;;  %v286_v56 = vunpack.c.1.s8 %v142_v11 }
  0x50   :  { %1186 = vmatprep.subr.bf16.mxu0 %v1048_v45  ;;  %v280_v58 = vunpack.c.0.s8 %v144_v22  ;;  %v288_v59 = vunpack.c.1.s8 %v144_v22  ;;  %v277_v60 = vunpack.c.0.s8 %v141_v23  ;;  %v849_v61 = vmul.f32 %v5583_v51, %v551_v53  ;;  %v136_v22 = vld [vmem:[#allocation2 + $0x98] sm:$0xff] }
  0x51   :  { %1227 = vmatprep.subr.bf16.mxu1 %v1050_v49  ;;  %v1047_v57 = vpack.c.bf16 %v855_v50, %v847_v46  ;;  %v857_v62 = vmul.f32 %v5583_v51, %v559_v54  ;;  %v534_v63 = vcvt.s32.f32 %v278_v55  ;;  %v542_v0 = vcvt.s32.f32 %v286_v56 }
  0x52   :  { %v536_v1 = vcvt.s32.f32 %v280_v58  ;;  %v544_v2 = vcvt.s32.f32 %v288_v59  ;;  %v285_v4 = vunpack.c.1.s8 %v141_v23  ;;  %v533_v12 = vcvt.s32.f32 %v277_v60 }
  0x53   :  { %1187 = vmatpush1.bf16.msra.mxu0 %v1047_v57  ;;  %v1049_v17 = vpack.c.bf16 %v857_v62, %v849_v61  ;;  %v832_v11 = vmul.f32 %v5550_v19, %v534_v63  ;;  %v840_v18 = vmul.f32 %v5550_v19, %v542_v0  ;;  %v279_v21 = vunpack.c.0.s8 %v143_v36 }
  0x54   :  { %v834_v25 = vmul.f32 %v5562_v27, %v536_v1  ;;  %v842_v26 = vmul.f32 %v5562_v27, %v544_v2  ;;  %v541_v28 = vcvt.s32.f32 %v285_v4  ;;  %v831_v29 = vmul.f32 %v5568_v35, %v533_v12 }
  0x55   :  { %1228 = vmatpush1.bf16.msra.mxu1 %v1049_v17  ;;  %v1040_v23 = vpack.c.bf16 %v840_v18, %v832_v11  ;;  %v287_v32 = vunpack.c.1.s8 %v143_v36  ;;  %v535_v33 = vcvt.s32.f32 %v279_v21  ;;  %v262_v34 = vunpack.c.2.s8 %v134_v13 }
  0x56   :  { %v1042_v37 = vpack.c.bf16 %v842_v26, %v834_v25  ;;  %v839_v38 = vmul.f32 %v5568_v35, %v541_v28  ;;  %v270_v39 = vunpack.c.3.s8 %v134_v13  ;;  %v264_v41 = vunpack.c.2.s8 %v136_v22 }
  0x57   :  { %1188 = vmatprep.subr.bf16.mxu0 %v1040_v23  ;;  %v543_v42 = vcvt.s32.f32 %v287_v32  ;;  %v833_v43 = vmul.f32 %v5583_v51, %v535_v33  ;;  %v518_v45 = vcvt.s32.f32 %v262_v34  ;;  %v272_v46 = vunpack.c.3.s8 %v136_v22  ;;  %v5609_v23 = vld [vmem:[#allocation2 + $0x48] sm:$0xff] }
  0x58   :  { %1229 = vmatprep.subr.bf16.mxu1 %v1042_v37  ;;  %v1039_v48 = vpack.c.bf16 %v839_v38, %v831_v29  ;;  %v526_v49 = vcvt.s32.f32 %v270_v39  ;;  %v520_v50 = vcvt.s32.f32 %v264_v41  ;;  %v261_v36 = vunpack.c.2.s8 %v5595_v31 }
  0x59   :  { %v841_v53 = vmul.f32 %v5583_v51, %v543_v42  ;;  %v816_v54 = vmul.f32 %v5550_v19, %v518_v45  ;;  %v528_v55 = vcvt.s32.f32 %v272_v46  ;;  %v269_v56 = vunpack.c.3.s8 %v5595_v31  ;;  %v5615_v42 = vld [vmem:[#allocation2 + $0x58] sm:$0xff] }
  0x5a   :  { %1189 = vmatpush1.bf16.msra.mxu0 %v1039_v48  ;;  %v824_v57 = vmul.f32 %v5550_v19, %v526_v49  ;;  %v818_v58 = vmul.f32 %v5562_v27, %v520_v50  ;;  %v517_v59 = vcvt.s32.f32 %v261_v36  ;;  %v263_v60 = vunpack.c.2.s8 %v135_v47  ;;  %v5618_v48 = vld [vmem:[#allocation2 + $0x40] sm:$0xff] }
  0x5b   :  { %v1041_v61 = vpack.c.bf16 %v841_v53, %v833_v43  ;;  %v826_v62 = vmul.f32 %v5562_v27, %v528_v55  ;;  %v525_v63 = vcvt.s32.f32 %v269_v56  ;;  %v271_v0 = vunpack.c.3.s8 %v135_v47 }
  0x5c   :  { %v1032_v1 = vpack.c.bf16 %v824_v57, %v816_v54  ;;  %v815_v2 = vmul.f32 %v5568_v35, %v517_v59  ;;  %v519_v4 = vcvt.s32.f32 %v263_v60  ;;  %v246_v12 = vunpack.c.0.s8 %v134_v13 }
  0x5d   :  { %1230 = vmatpush1.bf16.msra.mxu1 %v1041_v61  ;;  %v1034_v17 = vpack.c.bf16 %v826_v62, %v818_v58  ;;  %v823_v11 = vmul.f32 %v5568_v35, %v525_v63  ;;  %v527_v18 = vcvt.s32.f32 %v271_v0  ;;  %v254_v21 = vunpack.c.1.s8 %v134_v13  ;;  %v127_v0 = vld [vmem:[#allocation2 + $0x50] sm:$0xff] }
  0x5e   :  { %1190 = vmatprep.subr.bf16.mxu0 %v1032_v1  ;;  %v817_v25 = vmul.f32 %v5583_v51, %v519_v4  ;;  %v502_v26 = vcvt.s32.f32 %v246_v12  ;;  %v248_v28 = vunpack.c.0.s8 %v136_v22  ;;  %v256_v29 = vunpack.c.1.s8 %v136_v22 }
  0x5f   :  { %1231 = vmatprep.subr.bf16.mxu1 %v1034_v17  ;;  %v1031_v32 = vpack.c.bf16 %v823_v11, %v815_v2  ;;  %v825_v33 = vmul.f32 %v5583_v51, %v527_v18  ;;  %v510_v34 = vcvt.s32.f32 %v254_v21  ;;  %v245_v37 = vunpack.c.0.s8 %v5595_v31 }
  0x60   :  { %v800_v38 = vmul.f32 %v5550_v19, %v502_v26  ;;  %v504_v39 = vcvt.s32.f32 %v248_v28  ;;  %v512_v41 = vcvt.s32.f32 %v256_v29  ;;  %v253_v13 = vunpack.c.1.s8 %v5595_v31 }
  0x61   :  { %1191 = vmatpush1.bf16.msra.mxu0 %v1031_v32  ;;  %v1033_v43 = vpack.c.bf16 %v825_v33, %v817_v25  ;;  %v808_v22 = vmul.f32 %v5550_v19, %v510_v34  ;;  %v501_v45 = vcvt.s32.f32 %v245_v37  ;;  %v247_v46 = vunpack.c.0.s8 %v135_v47 }
  0x62   :  { %v802_v49 = vmul.f32 %v5562_v27, %v504_v39  ;;  %v810_v50 = vmul.f32 %v5562_v27, %v512_v41  ;;  %v509_v36 = vcvt.s32.f32 %v253_v13  ;;  %v255_v53 = vunpack.c.1.s8 %v135_v47 }
  0x63   :  { %1232 = vmatpush1.bf16.msra.mxu1 %v1033_v43  ;;  %v1024_v54 = vpack.c.bf16 %v808_v22, %v800_v38  ;;  %v799_v31 = vmul.f32 %v5568_v35, %v501_v45  ;;  %v503_v55 = vcvt.s32.f32 %v247_v46  ;;  %v230_v56 = vunpack.c.2.s8 %v5609_v23 }
  0x64   :  { %v1026_v57 = vpack.c.bf16 %v810_v50, %v802_v49  ;;  %v807_v58 = vmul.f32 %v5568_v35, %v509_v36  ;;  %v511_v59 = vcvt.s32.f32 %v255_v53  ;;  %v238_v60 = vunpack.c.3.s8 %v5609_v23 }
  0x65   :  { %1192 = vmatprep.subr.bf16.mxu0 %v1024_v54  ;;  %v801_v61 = vmul.f32 %v5583_v51, %v503_v55  ;;  %v486_v62 = vcvt.s32.f32 %v230_v56  ;;  %v232_v63 = vunpack.c.2.s8 %v5615_v42  ;;  %v240_v47 = vunpack.c.3.s8 %v5615_v42  ;;  %v5643_v54 = vld [vmem:[#allocation2 + $0x8] sm:$0xff] }
  0x66   :  { %1233 = vmatprep.subr.bf16.mxu1 %v1026_v57  ;;  %v1023_v1 = vpack.c.bf16 %v807_v58, %v799_v31  ;;  %v809_v2 = vmul.f32 %v5583_v51, %v511_v59  ;;  %v494_v4 = vcvt.s32.f32 %v238_v60  ;;  %v229_v12 = vunpack.c.2.s8 %v5618_v48 }
  0x67   :  { %v784_v17 = vmul.f32 %v5550_v19, %v486_v62  ;;  %v488_v11 = vcvt.s32.f32 %v232_v63  ;;  %v496_v18 = vcvt.s32.f32 %v240_v47  ;;  %v237_v21 = vunpack.c.3.s8 %v5618_v48 }
  0x68   :  { %1193 = vmatpush1.bf16.msra.mxu0 %v1023_v1  ;;  %v1025_v25 = vpack.c.bf16 %v809_v2, %v801_v61  ;;  %v792_v26 = vmul.f32 %v5550_v19, %v494_v4  ;;  %v485_v28 = vcvt.s32.f32 %v229_v12  ;;  %v231_v29 = vunpack.c.2.s8 %v127_v0  ;;  %v5649_v61 = vld [vmem:[#allocation2 + $0x18] sm:$0xff]  ;;  %v5652_v1 = vld [vmem:[#allocation2] sm:$0xff] }
  0x69   :  { %v786_v32 = vmul.f32 %v5562_v27, %v488_v11  ;;  %v794_v33 = vmul.f32 %v5562_v27, %v496_v18  ;;  %v493_v34 = vcvt.s32.f32 %v237_v21  ;;  %v239_v37 = vunpack.c.3.s8 %v127_v0 }
  0x6a   :  { %1234 = vmatpush1.bf16.msra.mxu1 %v1025_v25  ;;  %v1016_v38 = vpack.c.bf16 %v792_v26, %v784_v17  ;;  %v783_v39 = vmul.f32 %v5568_v35, %v485_v28  ;;  %v487_v41 = vcvt.s32.f32 %v231_v29  ;;  %v214_v13 = vunpack.c.0.s8 %v5609_v23 }
  0x6b   :  { %v1018_v43 = vpack.c.bf16 %v794_v33, %v786_v32  ;;  %v791_v22 = vmul.f32 %v5568_v35, %v493_v34  ;;  %v495_v45 = vcvt.s32.f32 %v239_v37  ;;  %v222_v46 = vunpack.c.1.s8 %v5609_v23  ;;  %v119_v37 = vld [vmem:[#allocation2 + $0x10] sm:$0xff] }
  0x6c   :  { %1194 = vmatprep.subr.bf16.mxu0 %v1016_v38  ;;  %v785_v49 = vmul.f32 %v5583_v51, %v487_v41  ;;  %v470_v50 = vcvt.s32.f32 %v214_v13  ;;  %v216_v36 = vunpack.c.0.s8 %v5615_v42  ;;  %v224_v53 = vunpack.c.1.s8 %v5615_v42 }
  0x6d   :  { %1235 = vmatprep.subr.bf16.mxu1 %v1018_v43  ;;  %v1015_v31 = vpack.c.bf16 %v791_v22, %v783_v39  ;;  %v793_v55 = vmul.f32 %v5583_v51, %v495_v45  ;;  %v478_v56 = vcvt.s32.f32 %v222_v46  ;;  %v213_v57 = vunpack.c.0.s8 %v5618_v48 }
  0x6e   :  { %v768_v58 = vmul.f32 %v5550_v19, %v470_v50  ;;  %v472_v23 = vcvt.s32.f32 %v216_v36  ;;  %v480_v59 = vcvt.s32.f32 %v224_v53  ;;  %v221_v60 = vunpack.c.1.s8 %v5618_v48 }
  0x6f   :  { %1195 = vmatpush1.bf16.msra.mxu0 %v1015_v31  ;;  %v1017_v62 = vpack.c.bf16 %v793_v55, %v785_v49  ;;  %v776_v42 = vmul.f32 %v5550_v19, %v478_v56  ;;  %v469_v63 = vcvt.s32.f32 %v213_v57  ;;  %v215_v47 = vunpack.c.0.s8 %v127_v0 }
  0x70   :  { %v770_v2 = vmul.f32 %v5562_v27, %v472_v23  ;;  %v778_v4 = vmul.f32 %v5562_v27, %v480_v59  ;;  %v477_v12 = vcvt.s32.f32 %v221_v60  ;;  %v223_v17 = vunpack.c.1.s8 %v127_v0 }
  0x71   :  { %1236 = vmatpush1.bf16.msra.mxu1 %v1017_v62  ;;  %v1008_v11 = vpack.c.bf16 %v776_v42, %v768_v58  ;;  %v767_v48 = vmul.f32 %v5568_v35, %v469_v63  ;;  %v471_v18 = vcvt.s32.f32 %v215_v47  ;;  %v198_v21 = vunpack.c.2.s8 %v5643_v54 }
  0x72   :  { %v1010_v25 = vpack.c.bf16 %v778_v4, %v770_v2  ;;  %v775_v26 = vmul.f32 %v5568_v35, %v477_v12  ;;  %v479_v28 = vcvt.s32.f32 %v223_v17  ;;  %v206_v29 = vunpack.c.3.s8 %v5643_v54 }
  0x73   :  { %1196 = vmatprep.subr.bf16.mxu0 %v1008_v11  ;;  %v769_v32 = vmul.f32 %v5583_v51, %v471_v18  ;;  %v454_v33 = vcvt.s32.f32 %v198_v21  ;;  %v200_v34 = vunpack.c.2.s8 %v5649_v61  ;;  %v208_v0 = vunpack.c.3.s8 %v5649_v61 }
  0x74   :  { %1237 = vmatprep.subr.bf16.mxu1 %v1010_v25  ;;  %v1007_v38 = vpack.c.bf16 %v775_v26, %v767_v48  ;;  %v777_v39 = vmul.f32 %v5583_v51, %v479_v28  ;;  %v462_v41 = vcvt.s32.f32 %v206_v29  ;;  %v197_v13 = vunpack.c.2.s8 %v5652_v1  ;;  %v174_v29 = vld [vmem:[#allocation2 + $0x1c8] sm:$0xff] }
  0x75   :  { %v752_v43 = vmul.f32 %v5550_v19, %v454_v33  ;;  %v456_v22 = vcvt.s32.f32 %v200_v34  ;;  %v464_v45 = vcvt.s32.f32 %v208_v0  ;;  %v205_v46 = vunpack.c.3.s8 %v5652_v1 }
  0x76   :  { %1197 = vmatpush1.bf16.msra.mxu0 %v1007_v38  ;;  %v1009_v49 = vpack.c.bf16 %v777_v39, %v769_v32  ;;  %v760_v50 = vmul.f32 %v5550_v19, %v462_v41  ;;  %v453_v36 = vcvt.s32.f32 %v197_v13  ;;  %v199_v53 = vunpack.c.2.s8 %v119_v37  ;;  %v176_v13 = vld [vmem:[#allocation2 + $0x1d8] sm:$0xff] }
  0x77   :  { %v754_v31 = vmul.f32 %v5562_v27, %v456_v22  ;;  %v762_v55 = vmul.f32 %v5562_v27, %v464_v45  ;;  %v461_v56 = vcvt.s32.f32 %v205_v46  ;;  %v207_v57 = vunpack.c.3.s8 %v119_v37  ;;  %v173_v46 = vld [vmem:[#allocation2 + $0x1c0] sm:$0xff] }
  0x78   :  { %1238 = vmatpush1.bf16.msra.mxu1 %v1009_v49  ;;  %v1000_v58 = vpack.c.bf16 %v760_v50, %v752_v43  ;;  %v751_v23 = vmul.f32 %v5568_v35, %v453_v36  ;;  %v455_v59 = vcvt.s32.f32 %v199_v53  ;;  %v182_v60 = vunpack.c.0.s8 %v5643_v54 }
  0x79   :  { %v1002_v62 = vpack.c.bf16 %v762_v55, %v754_v31  ;;  %v759_v42 = vmul.f32 %v5568_v35, %v461_v56  ;;  %v463_v63 = vcvt.s32.f32 %v207_v57  ;;  %v190_v47 = vunpack.c.1.s8 %v5643_v54 }
  0x7a   :  { %1198 = vmatprep.subr.bf16.mxu0 %v1000_v58  ;;  %v753_v2 = vmul.f32 %v5583_v51, %v455_v59  ;;  %v438_v4 = vcvt.s32.f32 %v182_v60  ;;  %v184_v12 = vunpack.c.0.s8 %v5649_v61  ;;  %v192_v17 = vunpack.c.1.s8 %v5649_v61 }
  0x7b   :  { %1239 = vmatprep.subr.bf16.mxu1 %v1002_v62  ;;  %v999_v11 = vpack.c.bf16 %v759_v42, %v751_v23  ;;  %v761_v48 = vmul.f32 %v5583_v51, %v463_v63  ;;  %v446_v18 = vcvt.s32.f32 %v190_v47  ;;  %v181_v21 = vunpack.c.0.s8 %v5652_v1 }
  0x7c   :  { %v736_v25 = vmul.f32 %v5550_v19, %v438_v4  ;;  %v440_v26 = vcvt.s32.f32 %v184_v12  ;;  %v448_v28 = vcvt.s32.f32 %v192_v17  ;;  %v189_v54 = vunpack.c.1.s8 %v5652_v1 }
  0x7d   :  { %1199 = vmatpush1.bf16.msra.mxu0 %v999_v11  ;;  %v1001_v32 = vpack.c.bf16 %v761_v48, %v753_v2  ;;  %v744_v33 = vmul.f32 %v5550_v19, %v446_v18  ;;  %v437_v34 = vcvt.s32.f32 %v181_v21  ;;  %v183_v61 = vunpack.c.0.s8 %v119_v37 }
  0x7e   :  { %v738_v0 = vmul.f32 %v5562_v27, %v440_v26  ;;  %v746_v38 = vmul.f32 %v5562_v27, %v448_v28  ;;  %v445_v39 = vcvt.s32.f32 %v189_v54  ;;  %v191_v41 = vunpack.c.1.s8 %v119_v37  ;;  %v175_v37 = vld [vmem:[#allocation2 + $0x1d0] sm:$0xff] }
  0x7f   :  { %1240 = vmatpush1.bf16.msra.mxu1 %v1001_v32  ;;  %v992_v43 = vpack.c.bf16 %v744_v33, %v736_v25  ;;  %v735_v22 = vmul.f32 %v5568_v35, %v437_v34  ;;  %v439_v45 = vcvt.s32.f32 %v183_v61  ;;  %v422_v1 = vunpack.c.2.s8 %v174_v29 }
  0x80   :  { %v994_v49 = vpack.c.bf16 %v746_v38, %v738_v0  ;;  %v743_v50 = vmul.f32 %v5568_v35, %v445_v39  ;;  %v447_v36 = vcvt.s32.f32 %v191_v41  ;;  %v430_v53 = vunpack.c.3.s8 %v174_v29 }
  0x81   :  { %1200 = vmatprep.subr.bf16.mxu0 %v992_v43  ;;  %v737_v31 = vmul.f32 %v5583_v51, %v439_v45  ;;  %v678_v55 = vcvt.s32.f32 %v422_v1  ;;  %v424_v56 = vunpack.c.2.s8 %v176_v13  ;;  %v432_v57 = vunpack.c.3.s8 %v176_v13 }
  0x82   :  { %1241 = vmatprep.subr.bf16.mxu1 %v994_v49  ;;  %v991_v58 = vpack.c.bf16 %v743_v50, %v735_v22  ;;  %v745_v23 = vmul.f32 %v5583_v51, %v447_v36  ;;  %v686_v59 = vcvt.s32.f32 %v430_v53  ;;  %v421_v60 = vunpack.c.2.s8 %v173_v46 }
  0x83   :  { %v976_v62 = vmul.f32 %v5550_v19, %v678_v55  ;;  %v680_v42 = vcvt.s32.f32 %v424_v56  ;;  %v688_v63 = vcvt.s32.f32 %v432_v57  ;;  %v429_v47 = vunpack.c.3.s8 %v173_v46 }
  0x84   :  { %1201 = vmatpush1.bf16.msra.mxu0 %v991_v58  ;;  %v993_v2 = vpack.c.bf16 %v745_v23, %v737_v31  ;;  %v984_v4 = vmul.f32 %v5550_v19, %v686_v59  ;;  %v677_v12 = vcvt.s32.f32 %v421_v60  ;;  %v423_v17 = vunpack.c.2.s8 %v175_v37  ;;  %v166_v31 = vld [vmem:[#allocation2 + $0x188] sm:$0xff]  ;;  %v168_v60 = vld [vmem:[#allocation2 + $0x198] sm:$0xff] }
  0x85   :  { %v978_v11 = vmul.f32 %v5562_v27, %v680_v42  ;;  %v986_v48 = vmul.f32 %v5562_v27, %v688_v63  ;;  %v685_v18 = vcvt.s32.f32 %v429_v47  ;;  %v431_v21 = vunpack.c.3.s8 %v175_v37  ;;  %v165_v47 = vld [vmem:[#allocation2 + $0x180] sm:$0xff] }
  0x86   :  { %1242 = vmatpush1.bf16.msra.mxu1 %v993_v2  ;;  %v1112_v25 = vpack.c.bf16 %v984_v4, %v976_v62  ;;  %v975_v26 = vmul.f32 %v5568_v35, %v677_v12  ;;  %v679_v28 = vcvt.s32.f32 %v423_v17  ;;  %v406_v54 = vunpack.c.0.s8 %v174_v29 }
  0x87   :  { %v1114_v32 = vpack.c.bf16 %v986_v48, %v978_v11  ;;  %v983_v33 = vmul.f32 %v5568_v35, %v685_v18  ;;  %v687_v34 = vcvt.s32.f32 %v431_v21  ;;  %v414_v61 = vunpack.c.1.s8 %v174_v29 }
  0x88   :  { %1202 = vmatprep.subr.bf16.mxu0 %v1112_v25  ;;  %v977_v0 = vmul.f32 %v5583_v51, %v679_v28  ;;  %v662_v38 = vcvt.s32.f32 %v406_v54  ;;  %v408_v39 = vunpack.c.0.s8 %v176_v13  ;;  %v416_v41 = vunpack.c.1.s8 %v176_v13 }
  0x89   :  { %1243 = vmatprep.subr.bf16.mxu1 %v1114_v32  ;;  %v1111_v43 = vpack.c.bf16 %v983_v33, %v975_v26  ;;  %v985_v22 = vmul.f32 %v5583_v51, %v687_v34  ;;  %v670_v45 = vcvt.s32.f32 %v414_v61  ;;  %v405_v1 = vunpack.c.0.s8 %v173_v46 }
  0x8a   :  { %v960_v49 = vmul.f32 %v5550_v19, %v662_v38  ;;  %v664_v50 = vcvt.s32.f32 %v408_v39  ;;  %v672_v36 = vcvt.s32.f32 %v416_v41  ;;  %v413_v53 = vunpack.c.1.s8 %v173_v46 }
  0x8b   :  { %1203 = vmatpush2.bf16.msra.mxu0 %v1111_v43  ;;  %v1113_v29 = vpack.c.bf16 %v985_v22, %v977_v0  ;;  %v968_v55 = vmul.f32 %v5550_v19, %v670_v45  ;;  %v661_v56 = vcvt.s32.f32 %v405_v1  ;;  %v407_v57 = vunpack.c.0.s8 %v175_v37 }
  0x8c   :  { %v962_v13 = vmul.f32 %v5562_v27, %v664_v50  ;;  %v970_v58 = vmul.f32 %v5562_v27, %v672_v36  ;;  %v669_v23 = vcvt.s32.f32 %v413_v53  ;;  %v415_v59 = vunpack.c.1.s8 %v175_v37  ;;  %v167_v37 = vld [vmem:[#allocation2 + $0x190] sm:$0xff] }
  0x8d   :  { %1244 = vmatpush2.bf16.msra.mxu1 %v1113_v29  ;;  %v1104_v62 = vpack.c.bf16 %v968_v55, %v960_v49  ;;  %v959_v42 = vmul.f32 %v5568_v35, %v661_v56  ;;  %v663_v63 = vcvt.s32.f32 %v407_v57  ;;  %v390_v46 = vunpack.c.2.s8 %v166_v31 }
  0x8e   :  { %v1106_v2 = vpack.c.bf16 %v970_v58, %v962_v13  ;;  %v967_v4 = vmul.f32 %v5568_v35, %v669_v23  ;;  %v671_v12 = vcvt.s32.f32 %v415_v59  ;;  %v398_v17 = vunpack.c.3.s8 %v166_v31 }
  0x8f   :  { %1204 = vmatprep.subr.bf16.mxu0 %v1104_v62  ;;  %v961_v11 = vmul.f32 %v5583_v51, %v663_v63  ;;  %v646_v48 = vcvt.s32.f32 %v390_v46  ;;  %v392_v18 = vunpack.c.2.s8 %v168_v60  ;;  %v400_v21 = vunpack.c.3.s8 %v168_v60 }
  0x90   :  { %1245 = vmatprep.subr.bf16.mxu1 %v1106_v2  ;;  %v1103_v25 = vpack.c.bf16 %v967_v4, %v959_v42  ;;  %v969_v26 = vmul.f32 %v5583_v51, %v671_v12  ;;  %v654_v28 = vcvt.s32.f32 %v398_v17  ;;  %v389_v54 = vunpack.c.2.s8 %v165_v47 }
  0x91   :  { %v944_v32 = vmul.f32 %v5550_v19, %v646_v48  ;;  %v648_v33 = vcvt.s32.f32 %v392_v18  ;;  %v656_v34 = vcvt.s32.f32 %v400_v21  ;;  %v397_v61 = vunpack.c.3.s8 %v165_v47 }
  0x92   :  { %1205 = vmatpush2.bf16.msra.mxu0 %v1103_v25  ;;  %v1105_v0 = vpack.c.bf16 %v969_v26, %v961_v11  ;;  %v952_v38 = vmul.f32 %v5550_v19, %v654_v28  ;;  %v645_v39 = vcvt.s32.f32 %v389_v54  ;;  %v391_v41 = vunpack.c.2.s8 %v167_v37  ;;  %v158_v11 = vld [vmem:[#allocation2 + $0x148] sm:$0xff]  ;;  %v160_v54 = vld [vmem:[#allocation2 + $0x158] sm:$0xff] }
  0x93   :  { %v946_v43 = vmul.f32 %v5562_v27, %v648_v33  ;;  %v954_v22 = vmul.f32 %v5562_v27, %v656_v34  ;;  %v653_v45 = vcvt.s32.f32 %v397_v61  ;;  %v399_v1 = vunpack.c.3.s8 %v167_v37  ;;  %v157_v61 = vld [vmem:[#allocation2 + $0x140] sm:$0xff] }
  0x94   :  { %1246 = vmatpush2.bf16.msra.mxu1 %v1105_v0  ;;  %v1096_v49 = vpack.c.bf16 %v952_v38, %v944_v32  ;;  %v943_v50 = vmul.f32 %v5568_v35, %v645_v39  ;;  %v647_v36 = vcvt.s32.f32 %v391_v41  ;;  %v374_v53 = vunpack.c.0.s8 %v166_v31 }
  0x95   :  { %v1098_v29 = vpack.c.bf16 %v954_v22, %v946_v43  ;;  %v951_v55 = vmul.f32 %v5568_v35, %v653_v45  ;;  %v655_v56 = vcvt.s32.f32 %v399_v1  ;;  %v382_v57 = vunpack.c.1.s8 %v166_v31 }
  0x96   :  { %1206 = vmatprep.subr.bf16.mxu0 %v1096_v49  ;;  %v945_v13 = vmul.f32 %v5583_v51, %v647_v36  ;;  %v630_v58 = vcvt.s32.f32 %v374_v53  ;;  %v376_v23 = vunpack.c.0.s8 %v168_v60  ;;  %v384_v59 = vunpack.c.1.s8 %v168_v60 }
  0x97   :  { %1247 = vmatprep.subr.bf16.mxu1 %v1098_v29  ;;  %v1095_v62 = vpack.c.bf16 %v951_v55, %v943_v50  ;;  %v953_v42 = vmul.f32 %v5583_v51, %v655_v56  ;;  %v638_v63 = vcvt.s32.f32 %v382_v57  ;;  %v373_v46 = vunpack.c.0.s8 %v165_v47 }
  0x98   :  { %v928_v2 = vmul.f32 %v5550_v19, %v630_v58  ;;  %v632_v4 = vcvt.s32.f32 %v376_v23  ;;  %v640_v12 = vcvt.s32.f32 %v384_v59  ;;  %v381_v17 = vunpack.c.1.s8 %v165_v47 }
  0x99   :  { %1207 = vmatpush2.bf16.msra.mxu0 %v1095_v62  ;;  %v1097_v31 = vpack.c.bf16 %v953_v42, %v945_v13  ;;  %v936_v48 = vmul.f32 %v5550_v19, %v638_v63  ;;  %v629_v18 = vcvt.s32.f32 %v373_v46  ;;  %v375_v21 = vunpack.c.0.s8 %v167_v37 }
  0x9a   :  { %v930_v60 = vmul.f32 %v5562_v27, %v632_v4  ;;  %v938_v25 = vmul.f32 %v5562_v27, %v640_v12  ;;  %v637_v26 = vcvt.s32.f32 %v381_v17  ;;  %v383_v28 = vunpack.c.1.s8 %v167_v37  ;;  %v159_v37 = vld [vmem:[#allocation2 + $0x150] sm:$0xff] }
  0x9b   :  { %1248 = vmatpush2.bf16.msra.mxu1 %v1097_v31  ;;  %v1088_v32 = vpack.c.bf16 %v936_v48, %v928_v2  ;;  %v927_v33 = vmul.f32 %v5568_v35, %v629_v18  ;;  %v631_v34 = vcvt.s32.f32 %v375_v21  ;;  %v358_v47 = vunpack.c.2.s8 %v158_v11 }
  0x9c   :  { %v1090_v0 = vpack.c.bf16 %v938_v25, %v930_v60  ;;  %v935_v38 = vmul.f32 %v5568_v35, %v637_v26  ;;  %v639_v39 = vcvt.s32.f32 %v383_v28  ;;  %v366_v41 = vunpack.c.3.s8 %v158_v11 }
  0x9d   :  { %1208 = vmatprep.subr.bf16.mxu0 %v1088_v32  ;;  %v929_v43 = vmul.f32 %v5583_v51, %v631_v34  ;;  %v614_v22 = vcvt.s32.f32 %v358_v47  ;;  %v360_v45 = vunpack.c.2.s8 %v160_v54  ;;  %v368_v1 = vunpack.c.3.s8 %v160_v54 }
  0x9e   :  { %1249 = vmatprep.subr.bf16.mxu1 %v1090_v0  ;;  %v1087_v49 = vpack.c.bf16 %v935_v38, %v927_v33  ;;  %v937_v50 = vmul.f32 %v5583_v51, %v639_v39  ;;  %v622_v36 = vcvt.s32.f32 %v366_v41  ;;  %v357_v53 = vunpack.c.2.s8 %v157_v61 }
  0x9f   :  { %v912_v29 = vmul.f32 %v5550_v19, %v614_v22  ;;  %v616_v55 = vcvt.s32.f32 %v360_v45  ;;  %v624_v56 = vcvt.s32.f32 %v368_v1  ;;  %v365_v57 = vunpack.c.3.s8 %v157_v61 }
  0xa0   :  { %1209 = vmatpush2.bf16.msra.mxu0 %v1087_v49  ;;  %v1089_v13 = vpack.c.bf16 %v937_v50, %v929_v43  ;;  %v920_v58 = vmul.f32 %v5550_v19, %v622_v36  ;;  %v613_v23 = vcvt.s32.f32 %v357_v53  ;;  %v359_v59 = vunpack.c.2.s8 %v159_v37  ;;  %v150_v43 = vld [vmem:[#allocation2 + $0x108] sm:$0xff]  ;;  %v152_v53 = vld [vmem:[#allocation2 + $0x118] sm:$0xff] }
  0xa1   :  { %v914_v62 = vmul.f32 %v5562_v27, %v616_v55  ;;  %v922_v42 = vmul.f32 %v5562_v27, %v624_v56  ;;  %v621_v63 = vcvt.s32.f32 %v365_v57  ;;  %v367_v46 = vunpack.c.3.s8 %v159_v37  ;;  %v149_v57 = vld [vmem:[#allocation2 + $0x100] sm:$0xff] }
  0xa2   :  { %1250 = vmatpush2.bf16.msra.mxu1 %v1089_v13  ;;  %v1080_v2 = vpack.c.bf16 %v920_v58, %v912_v29  ;;  %v911_v4 = vmul.f32 %v5568_v35, %v613_v23  ;;  %v615_v12 = vcvt.s32.f32 %v359_v59  ;;  %v342_v17 = vunpack.c.0.s8 %v158_v11 }
  0xa3   :  { %v1082_v31 = vpack.c.bf16 %v922_v42, %v914_v62  ;;  %v919_v48 = vmul.f32 %v5568_v35, %v621_v63  ;;  %v623_v18 = vcvt.s32.f32 %v367_v46  ;;  %v350_v21 = vunpack.c.1.s8 %v158_v11 }
  0xa4   :  { %1210 = vmatprep.subr.bf16.mxu0 %v1080_v2  ;;  %v913_v60 = vmul.f32 %v5583_v51, %v615_v12  ;;  %v598_v25 = vcvt.s32.f32 %v342_v17  ;;  %v344_v26 = vunpack.c.0.s8 %v160_v54  ;;  %v352_v28 = vunpack.c.1.s8 %v160_v54 }
  0xa5   :  { %1251 = vmatprep.subr.bf16.mxu1 %v1082_v31  ;;  %v1079_v32 = vpack.c.bf16 %v919_v48, %v911_v4  ;;  %v921_v33 = vmul.f32 %v5583_v51, %v623_v18  ;;  %v606_v34 = vcvt.s32.f32 %v350_v21  ;;  %v341_v47 = vunpack.c.0.s8 %v157_v61 }
  0xa6   :  { %v896_v0 = vmul.f32 %v5550_v19, %v598_v25  ;;  %v600_v38 = vcvt.s32.f32 %v344_v26  ;;  %v608_v39 = vcvt.s32.f32 %v352_v28  ;;  %v349_v41 = vunpack.c.1.s8 %v157_v61 }
  0xa7   :  { %1211 = vmatpush2.bf16.msra.mxu0 %v1079_v32  ;;  %v1081_v11 = vpack.c.bf16 %v921_v33, %v913_v60  ;;  %v904_v22 = vmul.f32 %v5550_v19, %v606_v34  ;;  %v597_v45 = vcvt.s32.f32 %v341_v47  ;;  %v343_v1 = vunpack.c.0.s8 %v159_v37 }
  0xa8   :  { %v898_v54 = vmul.f32 %v5562_v27, %v600_v38  ;;  %v906_v49 = vmul.f32 %v5562_v27, %v608_v39  ;;  %v605_v50 = vcvt.s32.f32 %v349_v41  ;;  %v351_v36 = vunpack.c.1.s8 %v159_v37  ;;  %v151_v37 = vld [vmem:[#allocation2 + $0x110] sm:$0xff] }
  0xa9   :  { %1252 = vmatpush2.bf16.msra.mxu1 %v1081_v11  ;;  %v1072_v29 = vpack.c.bf16 %v904_v22, %v896_v0  ;;  %v895_v55 = vmul.f32 %v5568_v35, %v597_v45  ;;  %v599_v56 = vcvt.s32.f32 %v343_v1  ;;  %v326_v61 = vunpack.c.2.s8 %v150_v43 }
  0xaa   :  { %v1074_v13 = vpack.c.bf16 %v906_v49, %v898_v54  ;;  %v903_v58 = vmul.f32 %v5568_v35, %v605_v50  ;;  %v607_v23 = vcvt.s32.f32 %v351_v36  ;;  %v334_v59 = vunpack.c.3.s8 %v150_v43 }
  0xab   :  { %1212 = vmatprep.subr.bf16.mxu0 %v1072_v29  ;;  %v897_v62 = vmul.f32 %v5583_v51, %v599_v56  ;;  %v582_v42 = vcvt.s32.f32 %v326_v61  ;;  %v328_v63 = vunpack.c.2.s8 %v152_v53  ;;  %v336_v46 = vunpack.c.3.s8 %v152_v53 }
  0xac   :  { %1253 = vmatprep.subr.bf16.mxu1 %v1074_v13  ;;  %v1071_v2 = vpack.c.bf16 %v903_v58, %v895_v55  ;;  %v905_v4 = vmul.f32 %v5583_v51, %v607_v23  ;;  %v590_v12 = vcvt.s32.f32 %v334_v59  ;;  %v325_v17 = vunpack.c.2.s8 %v149_v57 }
  0xad   :  { %v880_v31 = vmul.f32 %v5550_v19, %v582_v42  ;;  %v584_v48 = vcvt.s32.f32 %v328_v63  ;;  %v592_v18 = vcvt.s32.f32 %v336_v46  ;;  %v333_v21 = vunpack.c.3.s8 %v149_v57 }
  0xae   :  { %1213 = vmatpush2.bf16.msra.mxu0 %v1071_v2  ;;  %v1073_v60 = vpack.c.bf16 %v905_v4, %v897_v62  ;;  %v888_v25 = vmul.f32 %v5550_v19, %v590_v12  ;;  %v581_v26 = vcvt.s32.f32 %v325_v17  ;;  %v327_v28 = vunpack.c.2.s8 %v151_v37  ;;  %v5751_v17 = vld [vmem:[#allocation2 + $0xe8] sm:$0xff] }
  0xaf   :  { %v882_v32 = vmul.f32 %v5562_v27, %v584_v48  ;;  %v890_v33 = vmul.f32 %v5562_v27, %v592_v18  ;;  %v589_v34 = vcvt.s32.f32 %v333_v21  ;;  %v335_v47 = vunpack.c.3.s8 %v151_v37  ;;  %v5754_v21 = vld [vmem:[#allocation2 + $0xf8] sm:$0xff] }
  0xb0   :  { %1254 = vmatpush2.bf16.msra.mxu1 %v1073_v60  ;;  %v1064_v0 = vpack.c.bf16 %v888_v25, %v880_v31  ;;  %v879_v38 = vmul.f32 %v5568_v35, %v581_v26  ;;  %v583_v39 = vcvt.s32.f32 %v327_v28  ;;  %v310_v41 = vunpack.c.0.s8 %v150_v43 }
  0xb1   :  { %v1066_v11 = vpack.c.bf16 %v890_v33, %v882_v32  ;;  %v887_v22 = vmul.f32 %v5568_v35, %v589_v34  ;;  %v591_v45 = vcvt.s32.f32 %v335_v47  ;;  %v318_v1 = vunpack.c.1.s8 %v150_v43  ;;  %v5030_v43 = vld.sshfl [vmem:[%s6915_s0] sm:$0x11 pattern:$0x75316420] }
  0xb2   :  { %1214 = vmatprep.subr.bf16.mxu0 %v1064_v0  ;;  %v881_v54 = vmul.f32 %v5583_v51, %v583_v39  ;;  %v566_v49 = vcvt.s32.f32 %v310_v41  ;;  %v312_v50 = vunpack.c.0.s8 %v152_v53  ;;  %v320_v36 = vunpack.c.1.s8 %v152_v53  ;;  %v5764_v33 = vld [vmem:[#allocation2 + $0xe0] sm:$0xff] }
  0xb3   :  { %1255 = vmatprep.subr.bf16.mxu1 %v1066_v11  ;;  %v1063_v29 = vpack.c.bf16 %v887_v22, %v879_v38  ;;  %v889_v55 = vmul.f32 %v5583_v51, %v591_v45  ;;  %v574_v56 = vcvt.s32.f32 %v318_v1  ;;  %v309_v61 = vunpack.c.0.s8 %v149_v57 }
  0xb4   :  { %v864_v13 = vmul.f32 %v5550_v19, %v566_v49  ;;  %v568_v58 = vcvt.s32.f32 %v312_v50  ;;  %v576_v23 = vcvt.s32.f32 %v320_v36  ;;  %v317_v59 = vunpack.c.1.s8 %v149_v57 }
  0xb5   :  { %1215 = vmatpush2.bf16.msra.mxu0 %v1063_v29  ;;  %v1065_v62 = vpack.c.bf16 %v889_v55, %v881_v54  ;;  %v872_v42 = vmul.f32 %v5550_v19, %v574_v56  ;;  %v565_v53 = vcvt.s32.f32 %v309_v61  ;;  %v311_v63 = vunpack.c.0.s8 %v151_v37 }
  0xb6   :  { %v866_v46 = vmul.f32 %v5562_v27, %v568_v58  ;;  %v874_v2 = vmul.f32 %v5562_v27, %v576_v23  ;;  %v573_v4 = vcvt.s32.f32 %v317_v59  ;;  %v319_v12 = vunpack.c.1.s8 %v151_v37 }
  0xb7   :  { %1256 = vmatpush2.bf16.msra.mxu1 %v1065_v62  ;;  %v1056_v57 = vpack.c.bf16 %v872_v42, %v864_v13  ;;  %v863_v31 = vmul.f32 %v5568_v35, %v565_v53  ;;  %v567_v48 = vcvt.s32.f32 %v311_v63  ;;  %v1169_v18 = vcombine.high %v5030_v43, %v5030_v43 }
  0xb8   :  { %v1058_v60 = vpack.c.bf16 %v874_v2, %v866_v46  ;;  %v871_v19 = vmul.f32 %v5568_v35, %v573_v4  ;;  %v575_v25 = vcvt.s32.f32 %v319_v12  ;;  %v5758_v26 = vrot.slane %v5030_v43, %v5545_v14  ;;  %v5287_v35 = vld [vmem:[%s6917_s2] sm:$0xff] }
  0xb9   :  { %1216 = vmatprep.subr.bf16.mxu0 %v1056_v57  ;;  %v865_v27 = vmul.f32 %v5583_v51, %v567_v48  ;;  %v1183_v37 = vrot.slane %v1169_v18, %v5545_v14  ;;  %v298_v28 = vunpack.c.2.s8 %v5751_v17  ;;  %v306_v32 = vunpack.c.3.s8 %v5751_v17 }
  0xba   :  { %1257 = vmatprep.subr.bf16.mxu1 %v1058_v60  ;;  %v1055_v34 = vpack.c.bf16 %v871_v19, %v863_v31  ;;  %v873_v47 = vmul.f32 %v5583_v51, %v575_v25  ;;  %v5772_v0 = vrot.slane %v5287_v35, %v717_v9  ;;  %v300_v14 = vunpack.c.2.s8 %v5754_v21  ;;  %v5780_v51 = vld [vmem:[#allocation2 + $0xf0] sm:$0xff] }
  0xbb   :  { %1218 = vmatprep.mubr.bf16.mxu0 %v1183_v37  ;;  %1259 = vmatprep.mubr.bf16.mxu1 %v1183_v37  ;;  %v554_v38 = vcvt.s32.f32 %v298_v28  ;;  %v562_v39 = vcvt.s32.f32 %v306_v32  ;;  %v308_v41 = vunpack.c.3.s8 %v5754_v21  ;;  %v5778_v11 = vrot.slane %v5287_v35, %v725_v10 }
  0xbc   :  { %1217 = vmatpush2.bf16.msra.mxu0 %v1055_v34  ;;  %v1057_v22 = vpack.c.bf16 %v873_v47, %v865_v27  ;;  %v556_v45 = vcvt.s32.f32 %v300_v14  ;;  %v297_v1 = vunpack.c.2.s8 %v5764_v33  ;;  %v305_v54 = vunpack.c.3.s8 %v5764_v33  ;;  %v138_v47 = vld [vmem:[#allocation2 + $0xa8] sm:$0xff] }
  0xbd   :  { %v852_v49 = vmul.f32 %v5772_v0, %v554_v38  ;;  %v860_v50 = vmul.f32 %v5772_v0, %v562_v39  ;;  %v564_v36 = vcvt.s32.f32 %v308_v41  ;;  %v5788_v29 = vrot.slane %v5287_v35, %v713_v15 }
  0xbe   :  { %1258 = vmatpush2.bf16.msra.mxu1 %v1057_v22  ;;  %v854_v55 = vmul.f32 %v5778_v11, %v556_v45  ;;  %v553_v56 = vcvt.s32.f32 %v297_v1  ;;  %v561_v61 = vcvt.s32.f32 %v305_v54  ;;  %v299_v13 = vunpack.c.2.s8 %v5780_v51  ;;  %v140_v45 = vld [vmem:[#allocation2 + $0xb8] sm:$0xff] }
  0xbf   :  { %1219 = vmatmul.mubr.bf16.vlgmr.msra.gmra.mxu0 %v5758_v26  ;;  %v1052_v58 = vpack.c.bf16 %v860_v50, %v852_v49  ;;  %v862_v23 = vmul.f32 %v5778_v11, %v564_v36  ;;  %v307_v59 = vunpack.c.3.s8 %v5780_v51  ;;  %v5797_v43 = vrot.slane %v5287_v35, %v721_v16  ;;  %v137_v50 = vld [vmem:[#allocation2 + $0xa0] sm:$0xff] }
  0xc0   :  { %v851_v62 = vmul.f32 %v5788_v29, %v553_v56  ;;  %v859_v42 = vmul.f32 %v5788_v29, %v561_v61  ;;  %v555_v53 = vcvt.s32.f32 %v299_v13  ;;  %v282_v63 = vunpack.c.0.s8 %v5751_v17  ;;  %1300 = vmatprep.mubr.bf16.mxu0 %v1183_v37 }
  0xc1   :  { %1260 = vmatmul.mubr.bf16.vlgmr.msra.gmra.mxu1 %v5758_v26  ;;  %1268 = vmatprep.subr.bf16.mxu0 %v1052_v58  ;;  %v1054_v46 = vpack.c.bf16 %v862_v23, %v854_v55  ;;  %v563_v2 = vcvt.s32.f32 %v307_v59  ;;  %v290_v4 = vunpack.c.1.s8 %v5751_v17  ;;  %v284_v12 = vunpack.c.0.s8 %v5754_v21  ;;  %v139_v59 = vld [vmem:[#allocation2 + $0xb0] sm:$0xff] }
  0xc2   :  { %v1051_v57 = vpack.c.bf16 %v859_v42, %v851_v62  ;;  %v853_v31 = vmul.f32 %v5797_v43, %v555_v53  ;;  %v538_v48 = vcvt.s32.f32 %v282_v63  ;;  %v292_v18 = vunpack.c.1.s8 %v5754_v21  ;;  %1341 = vmatprep.mubr.bf16.mxu1 %v1183_v37 }
  0xc3   :  { %1309 = vmatprep.subr.bf16.mxu1 %v1054_v46  ;;  %v861_v60 = vmul.f32 %v5797_v43, %v563_v2  ;;  %v546_v19 = vcvt.s32.f32 %v290_v4  ;;  %v540_v25 = vcvt.s32.f32 %v284_v12  ;;  %v281_v27 = vunpack.c.0.s8 %v5764_v33 }
  0xc4   :  { %1269 = vmatpush1.bf16.msra.mxu0 %v1051_v57  ;;  %v836_v28 = vmul.f32 %v5772_v0, %v538_v48  ;;  %v548_v17 = vcvt.s32.f32 %v292_v18  ;;  %v289_v32 = vunpack.c.1.s8 %v5764_v33  ;;  %v283_v34 = vunpack.c.0.s8 %v5780_v51 }
  0xc5   :  { %v1053_v35 = vpack.c.bf16 %v861_v60, %v853_v31  ;;  %v844_v21 = vmul.f32 %v5772_v0, %v546_v19  ;;  %v838_v37 = vmul.f32 %v5778_v11, %v540_v25  ;;  %v537_v14 = vcvt.s32.f32 %v281_v27 }
  0xc6   :  { %v846_v38 = vmul.f32 %v5778_v11, %v548_v17  ;;  %v545_v39 = vcvt.s32.f32 %v289_v32  ;;  %v291_v41 = vunpack.c.1.s8 %v5780_v51  ;;  %v539_v22 = vcvt.s32.f32 %v283_v34 }
  0xc7   :  { %1310 = vmatpush1.bf16.msra.mxu1 %v1053_v35  ;;  %v1044_v1 = vpack.c.bf16 %v844_v21, %v836_v28  ;;  %v835_v33 = vmul.f32 %v5788_v29, %v537_v14  ;;  %v266_v54 = vunpack.c.2.s8 %v138_v47  ;;  %v274_v49 = vunpack.c.3.s8 %v138_v47 }
  0xc8   :  { %v1046_v36 = vpack.c.bf16 %v846_v38, %v838_v37  ;;  %v843_v55 = vmul.f32 %v5788_v29, %v545_v39  ;;  %v547_v56 = vcvt.s32.f32 %v291_v41  ;;  %v837_v61 = vmul.f32 %v5797_v43, %v539_v22 }
  0xc9   :  { %1270 = vmatprep.subr.bf16.mxu0 %v1044_v1  ;;  %v522_v13 = vcvt.s32.f32 %v266_v54  ;;  %v530_v58 = vcvt.s32.f32 %v274_v49  ;;  %v268_v23 = vunpack.c.2.s8 %v140_v45  ;;  %v276_v51 = vunpack.c.3.s8 %v140_v45 }
  0xca   :  { %1311 = vmatprep.subr.bf16.mxu1 %v1046_v36  ;;  %v1043_v62 = vpack.c.bf16 %v843_v55, %v835_v33  ;;  %v845_v42 = vmul.f32 %v5797_v43, %v547_v56  ;;  %v265_v53 = vunpack.c.2.s8 %v137_v50  ;;  %v273_v63 = vunpack.c.3.s8 %v137_v50 }
  0xcb   :  { %v820_v46 = vmul.f32 %v5772_v0, %v522_v13  ;;  %v828_v2 = vmul.f32 %v5772_v0, %v530_v58  ;;  %v524_v4 = vcvt.s32.f32 %v268_v23  ;;  %v532_v12 = vcvt.s32.f32 %v276_v51  ;;  %v130_v13 = vld [vmem:[#allocation2 + $0x68] sm:$0xff] }
  0xcc   :  { %1271 = vmatpush1.bf16.msra.mxu0 %v1043_v62  ;;  %v1045_v57 = vpack.c.bf16 %v845_v42, %v837_v61  ;;  %v521_v31 = vcvt.s32.f32 %v265_v53  ;;  %v529_v48 = vcvt.s32.f32 %v273_v63  ;;  %v267_v18 = vunpack.c.2.s8 %v139_v59  ;;  %v132_v63 = vld [vmem:[#allocation2 + $0x78] sm:$0xff] }
  0xcd   :  { %v1036_v60 = vpack.c.bf16 %v828_v2, %v820_v46  ;;  %v822_v19 = vmul.f32 %v5778_v11, %v524_v4  ;;  %v830_v25 = vmul.f32 %v5778_v11, %v532_v12  ;;  %v275_v27 = vunpack.c.3.s8 %v139_v59  ;;  %v129_v12 = vld [vmem:[#allocation2 + $0x60] sm:$0xff] }
  0xce   :  { %1312 = vmatpush1.bf16.msra.mxu1 %v1045_v57  ;;  %v819_v28 = vmul.f32 %v5788_v29, %v521_v31  ;;  %v827_v17 = vmul.f32 %v5788_v29, %v529_v48  ;;  %v523_v32 = vcvt.s32.f32 %v267_v18  ;;  %v250_v34 = vunpack.c.0.s8 %v138_v47 }
  0xcf   :  { %1272 = vmatprep.subr.bf16.mxu0 %v1036_v60  ;;  %v1038_v35 = vpack.c.bf16 %v830_v25, %v822_v19  ;;  %v531_v21 = vcvt.s32.f32 %v275_v27  ;;  %v258_v37 = vunpack.c.1.s8 %v138_v47  ;;  %v252_v14 = vunpack.c.0.s8 %v140_v45  ;;  %v131_v27 = vld [vmem:[#allocation2 + $0x70] sm:$0xff] }
  0xd0   :  { %v1035_v38 = vpack.c.bf16 %v827_v17, %v819_v28  ;;  %v821_v39 = vmul.f32 %v5797_v43, %v523_v32  ;;  %v506_v41 = vcvt.s32.f32 %v250_v34  ;;  %v260_v22 = vunpack.c.1.s8 %v140_v45 }
  0xd1   :  { %1313 = vmatprep.subr.bf16.mxu1 %v1038_v35  ;;  %v829_v1 = vmul.f32 %v5797_v43, %v531_v21  ;;  %v514_v33 = vcvt.s32.f32 %v258_v37  ;;  %v508_v54 = vcvt.s32.f32 %v252_v14  ;;  %v249_v49 = vunpack.c.0.s8 %v137_v50 }
  0xd2   :  { %1273 = vmatpush1.bf16.msra.mxu0 %v1035_v38  ;;  %v804_v36 = vmul.f32 %v5772_v0, %v506_v41  ;;  %v516_v55 = vcvt.s32.f32 %v260_v22  ;;  %v257_v56 = vunpack.c.1.s8 %v137_v50  ;;  %v251_v61 = vunpack.c.0.s8 %v139_v59 }
  0xd3   :  { %v1037_v47 = vpack.c.bf16 %v829_v1, %v821_v39  ;;  %v812_v58 = vmul.f32 %v5772_v0, %v514_v33  ;;  %v806_v23 = vmul.f32 %v5778_v11, %v508_v54  ;;  %v505_v51 = vcvt.s32.f32 %v249_v49 }
  0xd4   :  { %v814_v45 = vmul.f32 %v5778_v11, %v516_v55  ;;  %v513_v62 = vcvt.s32.f32 %v257_v56  ;;  %v259_v42 = vunpack.c.1.s8 %v139_v59  ;;  %v507_v53 = vcvt.s32.f32 %v251_v61 }
  0xd5   :  { %1314 = vmatpush1.bf16.msra.mxu1 %v1037_v47  ;;  %v1028_v46 = vpack.c.bf16 %v812_v58, %v804_v36  ;;  %v803_v2 = vmul.f32 %v5788_v29, %v505_v51  ;;  %v234_v4 = vunpack.c.2.s8 %v130_v13  ;;  %v242_v50 = vunpack.c.3.s8 %v130_v13 }
  0xd6   :  { %v1030_v57 = vpack.c.bf16 %v814_v45, %v806_v23  ;;  %v811_v31 = vmul.f32 %v5788_v29, %v513_v62  ;;  %v515_v48 = vcvt.s32.f32 %v259_v42  ;;  %v805_v18 = vmul.f32 %v5797_v43, %v507_v53 }
  0xd7   :  { %1274 = vmatprep.subr.bf16.mxu0 %v1028_v46  ;;  %v490_v60 = vcvt.s32.f32 %v234_v4  ;;  %v498_v19 = vcvt.s32.f32 %v242_v50  ;;  %v236_v25 = vunpack.c.2.s8 %v132_v63  ;;  %v244_v59 = vunpack.c.3.s8 %v132_v63 }
  0xd8   :  { %1315 = vmatprep.subr.bf16.mxu1 %v1030_v57  ;;  %v1027_v28 = vpack.c.bf16 %v811_v31, %v803_v2  ;;  %v813_v17 = vmul.f32 %v5797_v43, %v515_v48  ;;  %v233_v32 = vunpack.c.2.s8 %v129_v12  ;;  %v241_v34 = vunpack.c.3.s8 %v129_v12 }
  0xd9   :  { %v788_v35 = vmul.f32 %v5772_v0, %v490_v60  ;;  %v796_v21 = vmul.f32 %v5772_v0, %v498_v19  ;;  %v492_v37 = vcvt.s32.f32 %v236_v25  ;;  %v500_v14 = vcvt.s32.f32 %v244_v59  ;;  %v122_v60 = vld [vmem:[#allocation2 + $0x28] sm:$0xff] }
  0xda   :  { %1275 = vmatpush1.bf16.msra.mxu0 %v1027_v28  ;;  %v1029_v38 = vpack.c.bf16 %v813_v17, %v805_v18  ;;  %v489_v39 = vcvt.s32.f32 %v233_v32  ;;  %v497_v41 = vcvt.s32.f32 %v241_v34  ;;  %v235_v22 = vunpack.c.2.s8 %v131_v27  ;;  %v124_v34 = vld [vmem:[#allocation2 + $0x38] sm:$0xff] }
  0xdb   :  { %v1020_v1 = vpack.c.bf16 %v796_v21, %v788_v35  ;;  %v790_v33 = vmul.f32 %v5778_v11, %v492_v37  ;;  %v798_v54 = vmul.f32 %v5778_v11, %v500_v14  ;;  %v243_v49 = vunpack.c.3.s8 %v131_v27  ;;  %v121_v14 = vld [vmem:[#allocation2 + $0x20] sm:$0xff] }
  0xdc   :  { %1316 = vmatpush1.bf16.msra.mxu1 %v1029_v38  ;;  %v787_v36 = vmul.f32 %v5788_v29, %v489_v39  ;;  %v795_v55 = vmul.f32 %v5788_v29, %v497_v41  ;;  %v491_v56 = vcvt.s32.f32 %v235_v22  ;;  %v218_v61 = vunpack.c.0.s8 %v130_v13 }
  0xdd   :  { %1276 = vmatprep.subr.bf16.mxu0 %v1020_v1  ;;  %v1022_v47 = vpack.c.bf16 %v798_v54, %v790_v33  ;;  %v499_v58 = vcvt.s32.f32 %v243_v49  ;;  %v226_v23 = vunpack.c.1.s8 %v130_v13  ;;  %v220_v51 = vunpack.c.0.s8 %v132_v63  ;;  %v123_v49 = vld [vmem:[#allocation2 + $0x30] sm:$0xff] }
  0xde   :  { %v1019_v45 = vpack.c.bf16 %v795_v55, %v787_v36  ;;  %v789_v62 = vmul.f32 %v5797_v43, %v491_v56  ;;  %v474_v42 = vcvt.s32.f32 %v218_v61  ;;  %v228_v53 = vunpack.c.1.s8 %v132_v63 }
  0xdf   :  { %1317 = vmatprep.subr.bf16.mxu1 %v1022_v47  ;;  %v797_v46 = vmul.f32 %v5797_v43, %v499_v58  ;;  %v482_v2 = vcvt.s32.f32 %v226_v23  ;;  %v476_v4 = vcvt.s32.f32 %v220_v51  ;;  %v217_v50 = vunpack.c.0.s8 %v129_v12 }
  0xe0   :  { %1277 = vmatpush1.bf16.msra.mxu0 %v1019_v45  ;;  %v772_v57 = vmul.f32 %v5772_v0, %v474_v42  ;;  %v484_v31 = vcvt.s32.f32 %v228_v53  ;;  %v225_v48 = vunpack.c.1.s8 %v129_v12  ;;  %v219_v18 = vunpack.c.0.s8 %v131_v27 }
  0xe1   :  { %v1021_v13 = vpack.c.bf16 %v797_v46, %v789_v62  ;;  %v780_v19 = vmul.f32 %v5772_v0, %v482_v2  ;;  %v774_v25 = vmul.f32 %v5778_v11, %v476_v4  ;;  %v473_v59 = vcvt.s32.f32 %v217_v50 }
  0xe2   :  { %v782_v63 = vmul.f32 %v5778_v11, %v484_v31  ;;  %v481_v28 = vcvt.s32.f32 %v225_v48  ;;  %v227_v17 = vunpack.c.1.s8 %v131_v27  ;;  %v475_v32 = vcvt.s32.f32 %v219_v18 }
  0xe3   :  { %1318 = vmatpush1.bf16.msra.mxu1 %v1021_v13  ;;  %v1012_v35 = vpack.c.bf16 %v780_v19, %v772_v57  ;;  %v771_v21 = vmul.f32 %v5788_v29, %v473_v59  ;;  %v202_v37 = vunpack.c.2.s8 %v122_v60  ;;  %v210_v12 = vunpack.c.3.s8 %v122_v60 }
  0xe4   :  { %v1014_v38 = vpack.c.bf16 %v782_v63, %v774_v25  ;;  %v779_v39 = vmul.f32 %v5788_v29, %v481_v28  ;;  %v483_v41 = vcvt.s32.f32 %v227_v17  ;;  %v773_v22 = vmul.f32 %v5797_v43, %v475_v32 }
  0xe5   :  { %1278 = vmatprep.subr.bf16.mxu0 %v1012_v35  ;;  %v458_v1 = vcvt.s32.f32 %v202_v37  ;;  %v466_v33 = vcvt.s32.f32 %v210_v12  ;;  %v204_v54 = vunpack.c.2.s8 %v124_v34  ;;  %v212_v27 = vunpack.c.3.s8 %v124_v34 }
  0xe6   :  { %1319 = vmatprep.subr.bf16.mxu1 %v1014_v38  ;;  %v1011_v36 = vpack.c.bf16 %v779_v39, %v771_v21  ;;  %v781_v55 = vmul.f32 %v5797_v43, %v483_v41  ;;  %v201_v56 = vunpack.c.2.s8 %v121_v14  ;;  %v209_v61 = vunpack.c.3.s8 %v121_v14 }
  0xe7   :  { %v756_v47 = vmul.f32 %v5772_v0, %v458_v1  ;;  %v764_v58 = vmul.f32 %v5772_v0, %v466_v33  ;;  %v460_v23 = vcvt.s32.f32 %v204_v54  ;;  %v468_v51 = vcvt.s32.f32 %v212_v27  ;;  %v178_v1 = vld [vmem:[#allocation2 + $0x1e8] sm:$0xff] }
  0xe8   :  { %1279 = vmatpush1.bf16.msra.mxu0 %v1011_v36  ;;  %v1013_v45 = vpack.c.bf16 %v781_v55, %v773_v22  ;;  %v457_v62 = vcvt.s32.f32 %v201_v56  ;;  %v465_v42 = vcvt.s32.f32 %v209_v61  ;;  %v203_v53 = vunpack.c.2.s8 %v123_v49  ;;  %v180_v61 = vld [vmem:[#allocation2 + $0x1f8] sm:$0xff] }
  0xe9   :  { %v1004_v46 = vpack.c.bf16 %v764_v58, %v756_v47  ;;  %v758_v2 = vmul.f32 %v5778_v11, %v460_v23  ;;  %v766_v4 = vmul.f32 %v5778_v11, %v468_v51  ;;  %v211_v50 = vunpack.c.3.s8 %v123_v49  ;;  %v177_v51 = vld [vmem:[#allocation2 + $0x1e0] sm:$0xff] }
  0xea   :  { %1320 = vmatpush1.bf16.msra.mxu1 %v1013_v45  ;;  %v755_v57 = vmul.f32 %v5788_v29, %v457_v62  ;;  %v763_v31 = vmul.f32 %v5788_v29, %v465_v42  ;;  %v459_v48 = vcvt.s32.f32 %v203_v53  ;;  %v186_v18 = vunpack.c.0.s8 %v122_v60 }
  0xeb   :  { %1280 = vmatprep.subr.bf16.mxu0 %v1004_v46  ;;  %v1006_v13 = vpack.c.bf16 %v766_v4, %v758_v2  ;;  %v467_v19 = vcvt.s32.f32 %v211_v50  ;;  %v194_v25 = vunpack.c.1.s8 %v122_v60  ;;  %v188_v59 = vunpack.c.0.s8 %v124_v34  ;;  %v179_v50 = vld [vmem:[#allocation2 + $0x1f0] sm:$0xff] }
  0xec   :  { %v1003_v63 = vpack.c.bf16 %v763_v31, %v755_v57  ;;  %v757_v28 = vmul.f32 %v5797_v43, %v459_v48  ;;  %v442_v17 = vcvt.s32.f32 %v186_v18  ;;  %v196_v32 = vunpack.c.1.s8 %v124_v34 }
  0xed   :  { %1321 = vmatprep.subr.bf16.mxu1 %v1006_v13  ;;  %v765_v35 = vmul.f32 %v5797_v43, %v467_v19  ;;  %v450_v21 = vcvt.s32.f32 %v194_v25  ;;  %v444_v37 = vcvt.s32.f32 %v188_v59  ;;  %v185_v12 = vunpack.c.0.s8 %v121_v14 }
  0xee   :  { %1281 = vmatpush1.bf16.msra.mxu0 %v1003_v63  ;;  %v740_v38 = vmul.f32 %v5772_v0, %v442_v17  ;;  %v452_v39 = vcvt.s32.f32 %v196_v32  ;;  %v193_v41 = vunpack.c.1.s8 %v121_v14  ;;  %v187_v22 = vunpack.c.0.s8 %v123_v49 }
  0xef   :  { %v1005_v60 = vpack.c.bf16 %v765_v35, %v757_v28  ;;  %v748_v33 = vmul.f32 %v5772_v0, %v450_v21  ;;  %v742_v54 = vmul.f32 %v5778_v11, %v444_v37  ;;  %v441_v27 = vcvt.s32.f32 %v185_v12 }
  0xf0   :  { %v750_v34 = vmul.f32 %v5778_v11, %v452_v39  ;;  %v449_v36 = vcvt.s32.f32 %v193_v41  ;;  %v195_v55 = vunpack.c.1.s8 %v123_v49  ;;  %v443_v56 = vcvt.s32.f32 %v187_v22 }
  0xf1   :  { %1322 = vmatpush1.bf16.msra.mxu1 %v1005_v60  ;;  %v996_v47 = vpack.c.bf16 %v748_v33, %v740_v38  ;;  %v739_v58 = vmul.f32 %v5788_v29, %v441_v27  ;;  %v426_v23 = vunpack.c.2.s8 %v178_v1  ;;  %v434_v14 = vunpack.c.3.s8 %v178_v1 }
  0xf2   :  { %v998_v45 = vpack.c.bf16 %v750_v34, %v742_v54  ;;  %v747_v62 = vmul.f32 %v5788_v29, %v449_v36  ;;  %v451_v42 = vcvt.s32.f32 %v195_v55  ;;  %v741_v53 = vmul.f32 %v5797_v43, %v443_v56 }
  0xf3   :  { %1282 = vmatprep.subr.bf16.mxu0 %v996_v47  ;;  %v682_v46 = vcvt.s32.f32 %v426_v23  ;;  %v690_v2 = vcvt.s32.f32 %v434_v14  ;;  %v428_v4 = vunpack.c.2.s8 %v180_v61  ;;  %v436_v49 = vunpack.c.3.s8 %v180_v61 }
  0xf4   :  { %1323 = vmatprep.subr.bf16.mxu1 %v998_v45  ;;  %v995_v57 = vpack.c.bf16 %v747_v62, %v739_v58  ;;  %v749_v31 = vmul.f32 %v5797_v43, %v451_v42  ;;  %v425_v48 = vunpack.c.2.s8 %v177_v51  ;;  %v433_v18 = vunpack.c.3.s8 %v177_v51 }
  0xf5   :  { %v980_v13 = vmul.f32 %v5772_v0, %v682_v46  ;;  %v988_v19 = vmul.f32 %v5772_v0, %v690_v2  ;;  %v684_v25 = vcvt.s32.f32 %v428_v4  ;;  %v692_v59 = vcvt.s32.f32 %v436_v49  ;;  %v170_v46 = vld [vmem:[#allocation2 + $0x1a8] sm:$0xff] }
  0xf6   :  { %1283 = vmatpush1.bf16.msra.mxu0 %v995_v57  ;;  %v997_v63 = vpack.c.bf16 %v749_v31, %v741_v53  ;;  %v681_v28 = vcvt.s32.f32 %v425_v48  ;;  %v689_v17 = vcvt.s32.f32 %v433_v18  ;;  %v427_v32 = vunpack.c.2.s8 %v179_v50  ;;  %v172_v18 = vld [vmem:[#allocation2 + $0x1b8] sm:$0xff] }
  0xf7   :  { %v1116_v35 = vpack.c.bf16 %v988_v19, %v980_v13  ;;  %v982_v21 = vmul.f32 %v5778_v11, %v684_v25  ;;  %v990_v37 = vmul.f32 %v5778_v11, %v692_v59  ;;  %v435_v12 = vunpack.c.3.s8 %v179_v50  ;;  %v169_v59 = vld [vmem:[#allocation2 + $0x1a0] sm:$0xff] }
  0xf8   :  { %1324 = vmatpush1.bf16.msra.mxu1 %v997_v63  ;;  %v979_v38 = vmul.f32 %v5788_v29, %v681_v28  ;;  %v987_v39 = vmul.f32 %v5788_v29, %v689_v17  ;;  %v683_v41 = vcvt.s32.f32 %v427_v32  ;;  %v410_v22 = vunpack.c.0.s8 %v178_v1 }
  0xf9   :  { %1284 = vmatprep.subr.bf16.mxu0 %v1116_v35  ;;  %v1118_v60 = vpack.c.bf16 %v990_v37, %v982_v21  ;;  %v691_v33 = vcvt.s32.f32 %v435_v12  ;;  %v418_v54 = vunpack.c.1.s8 %v178_v1  ;;  %v412_v27 = vunpack.c.0.s8 %v180_v61  ;;  %v171_v12 = vld [vmem:[#allocation2 + $0x1b0] sm:$0xff] }
  0xfa   :  { %v1115_v34 = vpack.c.bf16 %v987_v39, %v979_v38  ;;  %v981_v36 = vmul.f32 %v5797_v43, %v683_v41  ;;  %v666_v55 = vcvt.s32.f32 %v410_v22  ;;  %v420_v56 = vunpack.c.1.s8 %v180_v61 }
  0xfb   :  { %1325 = vmatprep.subr.bf16.mxu1 %v1118_v60  ;;  %v989_v47 = vmul.f32 %v5797_v43, %v691_v33  ;;  %v674_v58 = vcvt.s32.f32 %v418_v54  ;;  %v668_v23 = vcvt.s32.f32 %v412_v27  ;;  %v409_v14 = vunpack.c.0.s8 %v177_v51 }
  0xfc   :  { %1285 = vmatpush2.bf16.msra.mxu0 %v1115_v34  ;;  %v964_v45 = vmul.f32 %v5772_v0, %v666_v55  ;;  %v676_v62 = vcvt.s32.f32 %v420_v56  ;;  %v417_v42 = vunpack.c.1.s8 %v177_v51  ;;  %v411_v53 = vunpack.c.0.s8 %v179_v50 }
  0xfd   :  { %v1117_v1 = vpack.c.bf16 %v989_v47, %v981_v36  ;;  %v972_v2 = vmul.f32 %v5772_v0, %v674_v58  ;;  %v966_v4 = vmul.f32 %v5778_v11, %v668_v23  ;;  %v665_v49 = vcvt.s32.f32 %v409_v14 }
  0xfe   :  { %v974_v61 = vmul.f32 %v5778_v11, %v676_v62  ;;  %v673_v57 = vcvt.s32.f32 %v417_v42  ;;  %v419_v31 = vunpack.c.1.s8 %v179_v50  ;;  %v667_v48 = vcvt.s32.f32 %v411_v53 }
  0xff   :  { %1326 = vmatpush2.bf16.msra.mxu1 %v1117_v1  ;;  %v1108_v13 = vpack.c.bf16 %v972_v2, %v964_v45  ;;  %v963_v19 = vmul.f32 %v5788_v29, %v665_v49  ;;  %v394_v25 = vunpack.c.2.s8 %v170_v46  ;;  %v402_v51 = vunpack.c.3.s8 %v170_v46 }
 0x100   :  { %v1110_v63 = vpack.c.bf16 %v974_v61, %v966_v4  ;;  %v971_v28 = vmul.f32 %v5788_v29, %v673_v57  ;;  %v675_v17 = vcvt.s32.f32 %v419_v31  ;;  %v965_v32 = vmul.f32 %v5797_v43, %v667_v48 }
 0x101   :  { %1286 = vmatprep.subr.bf16.mxu0 %v1108_v13  ;;  %v650_v35 = vcvt.s32.f32 %v394_v25  ;;  %v658_v21 = vcvt.s32.f32 %v402_v51  ;;  %v396_v37 = vunpack.c.2.s8 %v172_v18  ;;  %v404_v50 = vunpack.c.3.s8 %v172_v18 }
 0x102   :  { %1327 = vmatprep.subr.bf16.mxu1 %v1110_v63  ;;  %v1107_v38 = vpack.c.bf16 %v971_v28, %v963_v19  ;;  %v973_v39 = vmul.f32 %v5797_v43, %v675_v17  ;;  %v393_v41 = vunpack.c.2.s8 %v169_v59  ;;  %v401_v22 = vunpack.c.3.s8 %v169_v59 }
 0x103   :  { %v948_v60 = vmul.f32 %v5772_v0, %v650_v35  ;;  %v956_v33 = vmul.f32 %v5772_v0, %v658_v21  ;;  %v652_v54 = vcvt.s32.f32 %v396_v37  ;;  %v660_v27 = vcvt.s32.f32 %v404_v50  ;;  %v162_v35 = vld [vmem:[#allocation2 + $0x168] sm:$0xff] }
 0x104   :  { %1287 = vmatpush2.bf16.msra.mxu0 %v1107_v38  ;;  %v1109_v34 = vpack.c.bf16 %v973_v39, %v965_v32  ;;  %v649_v36 = vcvt.s32.f32 %v393_v41  ;;  %v657_v55 = vcvt.s32.f32 %v401_v22  ;;  %v395_v56 = vunpack.c.2.s8 %v171_v12  ;;  %v164_v22 = vld [vmem:[#allocation2 + $0x178] sm:$0xff] }
 0x105   :  { %v1100_v47 = vpack.c.bf16 %v956_v33, %v948_v60  ;;  %v950_v58 = vmul.f32 %v5778_v11, %v652_v54  ;;  %v958_v23 = vmul.f32 %v5778_v11, %v660_v27  ;;  %v403_v14 = vunpack.c.3.s8 %v171_v12  ;;  %v161_v27 = vld [vmem:[#allocation2 + $0x160] sm:$0xff] }
 0x106   :  { %1328 = vmatpush2.bf16.msra.mxu1 %v1109_v34  ;;  %v947_v45 = vmul.f32 %v5788_v29, %v649_v36  ;;  %v955_v62 = vmul.f32 %v5788_v29, %v657_v55  ;;  %v651_v42 = vcvt.s32.f32 %v395_v56  ;;  %v378_v53 = vunpack.c.0.s8 %v170_v46 }
 0x107   :  { %1288 = vmatprep.subr.bf16.mxu0 %v1100_v47  ;;  %v1102_v1 = vpack.c.bf16 %v958_v23, %v950_v58  ;;  %v659_v2 = vcvt.s32.f32 %v403_v14  ;;  %v386_v4 = vunpack.c.1.s8 %v170_v46  ;;  %v380_v49 = vunpack.c.0.s8 %v172_v18  ;;  %v163_v14 = vld [vmem:[#allocation2 + $0x170] sm:$0xff] }
 0x108   :  { %v1099_v61 = vpack.c.bf16 %v955_v62, %v947_v45  ;;  %v949_v57 = vmul.f32 %v5797_v43, %v651_v42  ;;  %v634_v31 = vcvt.s32.f32 %v378_v53  ;;  %v388_v48 = vunpack.c.1.s8 %v172_v18 }
 0x109   :  { %1329 = vmatprep.subr.bf16.mxu1 %v1102_v1  ;;  %v957_v13 = vmul.f32 %v5797_v43, %v659_v2  ;;  %v642_v19 = vcvt.s32.f32 %v386_v4  ;;  %v636_v25 = vcvt.s32.f32 %v380_v49  ;;  %v377_v51 = vunpack.c.0.s8 %v169_v59 }
 0x10a   :  { %1289 = vmatpush2.bf16.msra.mxu0 %v1099_v61  ;;  %v932_v63 = vmul.f32 %v5772_v0, %v634_v31  ;;  %v644_v28 = vcvt.s32.f32 %v388_v48  ;;  %v385_v17 = vunpack.c.1.s8 %v169_v59  ;;  %v379_v32 = vunpack.c.0.s8 %v171_v12 }
 0x10b   :  { %v1101_v46 = vpack.c.bf16 %v957_v13, %v949_v57  ;;  %v940_v21 = vmul.f32 %v5772_v0, %v642_v19  ;;  %v934_v37 = vmul.f32 %v5778_v11, %v636_v25  ;;  %v633_v50 = vcvt.s32.f32 %v377_v51 }
 0x10c   :  { %v942_v18 = vmul.f32 %v5778_v11, %v644_v28  ;;  %v641_v38 = vcvt.s32.f32 %v385_v17  ;;  %v387_v39 = vunpack.c.1.s8 %v171_v12  ;;  %v635_v41 = vcvt.s32.f32 %v379_v32 }
 0x10d   :  { %1330 = vmatpush2.bf16.msra.mxu1 %v1101_v46  ;;  %v1092_v60 = vpack.c.bf16 %v940_v21, %v932_v63  ;;  %v931_v33 = vmul.f32 %v5788_v29, %v633_v50  ;;  %v362_v54 = vunpack.c.2.s8 %v162_v35  ;;  %v370_v59 = vunpack.c.3.s8 %v162_v35 }
 0x10e   :  { %v1094_v34 = vpack.c.bf16 %v942_v18, %v934_v37  ;;  %v939_v36 = vmul.f32 %v5788_v29, %v641_v38  ;;  %v643_v55 = vcvt.s32.f32 %v387_v39  ;;  %v933_v56 = vmul.f32 %v5797_v43, %v635_v41 }
 0x10f   :  { %1290 = vmatprep.subr.bf16.mxu0 %v1092_v60  ;;  %v618_v47 = vcvt.s32.f32 %v362_v54  ;;  %v626_v58 = vcvt.s32.f32 %v370_v59  ;;  %v364_v23 = vunpack.c.2.s8 %v164_v22  ;;  %v372_v12 = vunpack.c.3.s8 %v164_v22 }
 0x110   :  { %1331 = vmatprep.subr.bf16.mxu1 %v1094_v34  ;;  %v1091_v45 = vpack.c.bf16 %v939_v36, %v931_v33  ;;  %v941_v62 = vmul.f32 %v5797_v43, %v643_v55  ;;  %v361_v42 = vunpack.c.2.s8 %v161_v27  ;;  %v369_v53 = vunpack.c.3.s8 %v161_v27 }
 0x111   :  { %v916_v1 = vmul.f32 %v5772_v0, %v618_v47  ;;  %v924_v2 = vmul.f32 %v5772_v0, %v626_v58  ;;  %v620_v4 = vcvt.s32.f32 %v364_v23  ;;  %v628_v49 = vcvt.s32.f32 %v372_v12  ;;  %v154_v47 = vld [vmem:[#allocation2 + $0x128] sm:$0xff] }
 0x112   :  { %1291 = vmatpush2.bf16.msra.mxu0 %v1091_v45  ;;  %v1093_v61 = vpack.c.bf16 %v941_v62, %v933_v56  ;;  %v617_v57 = vcvt.s32.f32 %v361_v42  ;;  %v625_v31 = vcvt.s32.f32 %v369_v53  ;;  %v363_v48 = vunpack.c.2.s8 %v163_v14  ;;  %v156_v53 = vld [vmem:[#allocation2 + $0x138] sm:$0xff] }
 0x113   :  { %v1084_v13 = vpack.c.bf16 %v924_v2, %v916_v1  ;;  %v918_v19 = vmul.f32 %v5778_v11, %v620_v4  ;;  %v926_v25 = vmul.f32 %v5778_v11, %v628_v49  ;;  %v371_v51 = vunpack.c.3.s8 %v163_v14  ;;  %v153_v49 = vld [vmem:[#allocation2 + $0x120] sm:$0xff] }
 0x114   :  { %1332 = vmatpush2.bf16.msra.mxu1 %v1093_v61  ;;  %v915_v63 = vmul.f32 %v5788_v29, %v617_v57  ;;  %v923_v28 = vmul.f32 %v5788_v29, %v625_v31  ;;  %v619_v17 = vcvt.s32.f32 %v363_v48  ;;  %v346_v32 = vunpack.c.0.s8 %v162_v35 }
 0x115   :  { %1292 = vmatprep.subr.bf16.mxu0 %v1084_v13  ;;  %v1086_v46 = vpack.c.bf16 %v926_v25, %v918_v19  ;;  %v627_v21 = vcvt.s32.f32 %v371_v51  ;;  %v354_v37 = vunpack.c.1.s8 %v162_v35  ;;  %v348_v50 = vunpack.c.0.s8 %v164_v22  ;;  %v155_v51 = vld [vmem:[#allocation2 + $0x130] sm:$0xff] }
 0x116   :  { %v1083_v18 = vpack.c.bf16 %v923_v28, %v915_v63  ;;  %v917_v38 = vmul.f32 %v5797_v43, %v619_v17  ;;  %v602_v39 = vcvt.s32.f32 %v346_v32  ;;  %v356_v41 = vunpack.c.1.s8 %v164_v22 }
 0x117   :  { %1333 = vmatprep.subr.bf16.mxu1 %v1086_v46  ;;  %v925_v60 = vmul.f32 %v5797_v43, %v627_v21  ;;  %v610_v33 = vcvt.s32.f32 %v354_v37  ;;  %v604_v54 = vcvt.s32.f32 %v348_v50  ;;  %v345_v59 = vunpack.c.0.s8 %v161_v27 }
 0x118   :  { %1293 = vmatpush2.bf16.msra.mxu0 %v1083_v18  ;;  %v900_v34 = vmul.f32 %v5772_v0, %v602_v39  ;;  %v612_v36 = vcvt.s32.f32 %v356_v41  ;;  %v353_v55 = vunpack.c.1.s8 %v161_v27  ;;  %v347_v56 = vunpack.c.0.s8 %v163_v14 }
 0x119   :  { %v1085_v35 = vpack.c.bf16 %v925_v60, %v917_v38  ;;  %v908_v58 = vmul.f32 %v5772_v0, %v610_v33  ;;  %v902_v23 = vmul.f32 %v5778_v11, %v604_v54  ;;  %v601_v12 = vcvt.s32.f32 %v345_v59 }
 0x11a   :  { %v910_v22 = vmul.f32 %v5778_v11, %v612_v36  ;;  %v609_v45 = vcvt.s32.f32 %v353_v55  ;;  %v355_v62 = vunpack.c.1.s8 %v163_v14  ;;  %v603_v42 = vcvt.s32.f32 %v347_v56 }
 0x11b   :  { %1334 = vmatpush2.bf16.msra.mxu1 %v1085_v35  ;;  %v1076_v1 = vpack.c.bf16 %v908_v58, %v900_v34  ;;  %v899_v2 = vmul.f32 %v5788_v29, %v601_v12  ;;  %v330_v4 = vunpack.c.2.s8 %v154_v47  ;;  %v338_v27 = vunpack.c.3.s8 %v154_v47 }
 0x11c   :  { %v1078_v61 = vpack.c.bf16 %v910_v22, %v902_v23  ;;  %v907_v57 = vmul.f32 %v5788_v29, %v609_v45  ;;  %v611_v31 = vcvt.s32.f32 %v355_v62  ;;  %v901_v48 = vmul.f32 %v5797_v43, %v603_v42 }
 0x11d   :  { %1294 = vmatprep.subr.bf16.mxu0 %v1076_v1  ;;  %v586_v13 = vcvt.s32.f32 %v330_v4  ;;  %v594_v19 = vcvt.s32.f32 %v338_v27  ;;  %v332_v25 = vunpack.c.2.s8 %v156_v53  ;;  %v340_v14 = vunpack.c.3.s8 %v156_v53 }
 0x11e   :  { %1335 = vmatprep.subr.bf16.mxu1 %v1078_v61  ;;  %v1075_v63 = vpack.c.bf16 %v907_v57, %v899_v2  ;;  %v909_v28 = vmul.f32 %v5797_v43, %v611_v31  ;;  %v329_v17 = vunpack.c.2.s8 %v153_v49  ;;  %v337_v32 = vunpack.c.3.s8 %v153_v49 }
 0x11f   :  { %v884_v46 = vmul.f32 %v5772_v0, %v586_v13  ;;  %v892_v21 = vmul.f32 %v5772_v0, %v594_v19  ;;  %v588_v37 = vcvt.s32.f32 %v332_v25  ;;  %v596_v50 = vcvt.s32.f32 %v340_v14  ;;  %v1379_v13 = vld [vmem:[#allocation5 + $0x68] sm:$0xff] }
 0x120   :  { %1295 = vmatpush2.bf16.msra.mxu0 %v1075_v63  ;;  %v1077_v18 = vpack.c.bf16 %v909_v28, %v901_v48  ;;  %v585_v38 = vcvt.s32.f32 %v329_v17  ;;  %v593_v39 = vcvt.s32.f32 %v337_v32  ;;  %v331_v41 = vunpack.c.2.s8 %v155_v51  ;;  %v1411_v32 = vld [vmem:[#allocation5 + $0x168] sm:$0xff] }
 0x121   :  { %v1068_v60 = vpack.c.bf16 %v892_v21, %v884_v46  ;;  %v886_v33 = vmul.f32 %v5778_v11, %v588_v37  ;;  %v894_v54 = vmul.f32 %v5778_v11, %v596_v50  ;;  %v339_v59 = vunpack.c.3.s8 %v155_v51  ;;  %v1378_v50 = vld [vmem:[#allocation5 + $0x60] sm:$0xff] }
 0x122   :  { %1336 = vmatpush2.bf16.msra.mxu1 %v1077_v18  ;;  %v883_v34 = vmul.f32 %v5788_v29, %v585_v38  ;;  %v891_v36 = vmul.f32 %v5788_v29, %v593_v39  ;;  %v587_v55 = vcvt.s32.f32 %v331_v41  ;;  %v314_v56 = vunpack.c.0.s8 %v154_v47 }
 0x123   :  { %1296 = vmatprep.subr.bf16.mxu0 %v1068_v60  ;;  %v1070_v35 = vpack.c.bf16 %v894_v54, %v886_v33  ;;  %v595_v58 = vcvt.s32.f32 %v339_v59  ;;  %v322_v23 = vunpack.c.1.s8 %v154_v47  ;;  %v316_v12 = vunpack.c.0.s8 %v156_v53  ;;  %v5931_v33 = vld [vmem:[#allocation5 + $0x160] sm:$0xff] }
 0x124   :  { %v1067_v22 = vpack.c.bf16 %v891_v36, %v883_v34  ;;  %v885_v45 = vmul.f32 %v5797_v43, %v587_v55  ;;  %v570_v62 = vcvt.s32.f32 %v314_v56  ;;  %v324_v42 = vunpack.c.1.s8 %v156_v53 }
 0x125   :  { %1337 = vmatprep.subr.bf16.mxu1 %v1070_v35  ;;  %v893_v1 = vmul.f32 %v5797_v43, %v595_v58  ;;  %v578_v2 = vcvt.s32.f32 %v322_v23  ;;  %v572_v4 = vcvt.s32.f32 %v316_v12  ;;  %v313_v27 = vunpack.c.0.s8 %v153_v49 }
 0x126   :  { %1297 = vmatpush2.bf16.msra.mxu0 %v1067_v22  ;;  %v868_v61 = vmul.f32 %v5772_v0, %v570_v62  ;;  %v580_v57 = vcvt.s32.f32 %v324_v42  ;;  %v321_v31 = vunpack.c.1.s8 %v153_v49  ;;  %v315_v48 = vunpack.c.0.s8 %v155_v51 }
 0x127   :  { %v1069_v47 = vpack.c.bf16 %v893_v1, %v885_v45  ;;  %v876_v19 = vmul.f32 %v5772_v0, %v578_v2  ;;  %v870_v25 = vmul.f32 %v5778_v11, %v572_v4  ;;  %v569_v14 = vcvt.s32.f32 %v313_v27 }
 0x128   :  { %v878_v53 = vmul.f32 %v5778_v11, %v580_v57  ;;  %v577_v63 = vcvt.s32.f32 %v321_v31  ;;  %v323_v28 = vunpack.c.1.s8 %v155_v51  ;;  %v571_v17 = vcvt.s32.f32 %v315_v48 }
 0x129   :  { %1338 = vmatpush2.bf16.msra.mxu1 %v1069_v47  ;;  %v1060_v46 = vpack.c.bf16 %v876_v19, %v868_v61  ;;  %v867_v21 = vmul.f32 %v5788_v29, %v569_v14  ;;  %v1551_v37 = vunpack.c.2.s8 %v1379_v13  ;;  %v1555_v49 = vunpack.c.3.s8 %v1379_v13 }
 0x12a   :  { %v1062_v18 = vpack.c.bf16 %v878_v53, %v870_v25  ;;  %v875_v38 = vmul.f32 %v5788_v29, %v577_v63  ;;  %v579_v0 = vcvt.s32.f32 %v323_v28  ;;  %v869_v39 = vmul.f32 %v5797_v43, %v571_v17 }
 0x12b   :  { %1298 = vmatprep.subr.bf16.mxu0 %v1060_v46  ;;  %v2063_v41 = vcvt.s32.f32 %v1551_v37  ;;  %v2067_v11 = vcvt.s32.f32 %v1555_v49  ;;  %v1679_v60 = vunpack.c.2.s8 %v1411_v32  ;;  %v1683_v51 = vunpack.c.3.s8 %v1411_v32  ;;  %v1375_v49 = vld [vmem:[#allocation5 + $0x48] sm:$0xff] }
 0x12c   :  { %1339 = vmatprep.subr.bf16.mxu1 %v1062_v18  ;;  %v1059_v54 = vpack.c.bf16 %v875_v38, %v867_v21  ;;  %v877_v59 = vmul.f32 %v5797_v43, %v579_v0  ;;  %v1550_v34 = vunpack.c.2.s8 %v1378_v50  ;;  %v1554_v36 = vunpack.c.3.s8 %v1378_v50 }
 0x12d   :  { %v2597_v55 = vmul.f32 %v5553_v20, %v2063_v41  ;;  %v2601_v29 = vmul.f32 %v5553_v20, %v2067_v11  ;;  %v2191_v56 = vcvt.s32.f32 %v1679_v60  ;;  %v2195_v35 = vcvt.s32.f32 %v1683_v51  ;;  %v1407_v60 = vld [vmem:[#allocation5 + $0x148] sm:$0xff] }
 0x12e   :  { %1299 = vmatpush2.bf16.msra.mxu0 %v1059_v54  ;;  %v1061_v58 = vpack.c.bf16 %v877_v59, %v869_v39  ;;  %v2062_v23 = vcvt.s32.f32 %v1550_v34  ;;  %v2066_v12 = vcvt.s32.f32 %v1554_v36  ;;  %v1678_v22 = vunpack.c.2.s8 %v5931_v33  ;;  %v1374_v34 = vld [vmem:[#allocation5 + $0x40] sm:$0xff] }
 0x12f   :  { %v3081_v45 = vpack.c.bf16 %v2601_v29, %v2597_v55  ;;  %v2725_v62 = vmul.f32 %v5553_v20, %v2191_v56  ;;  %v2729_v42 = vmul.f32 %v5553_v20, %v2195_v35  ;;  %v1682_v43 = vunpack.c.3.s8 %v5931_v33 }
 0x130   :  { %1340 = vmatpush2.bf16.msra.mxu1 %v1061_v58  ;;  %v2596_v1 = vmul.f32 %v5573_v40, %v2062_v23  ;;  %v2600_v2 = vmul.f32 %v5573_v40, %v2066_v12  ;;  %v2190_v4 = vcvt.s32.f32 %v1678_v22  ;;  %v1543_v27 = vunpack.c.0.s8 %v1379_v13  ;;  %v1406_v12 = vld [vmem:[#allocation5 + $0x140] sm:$0xff] }
 0x131   :  { %1301 = vmatmul.mubr.bf16.vlgmr.msra.gmra.mxu0 %v5758_v26  ;;  %3330 = vmatprep.subr.bf16.mxu0 %v3081_v45  ;;  %v3145_v61 = vpack.c.bf16 %v2729_v42, %v2725_v62  ;;  %v2194_v57 = vcvt.s32.f32 %v1682_v43  ;;  %v1547_v31 = vunpack.c.1.s8 %v1379_v13  ;;  %v1671_v48 = vunpack.c.0.s8 %v1411_v32 }
 0x132   :  { %v3080_v47 = vpack.c.bf16 %v2600_v2, %v2596_v1  ;;  %v2724_v19 = vmul.f32 %v5573_v40, %v2190_v4  ;;  %v2055_v25 = vcvt.s32.f32 %v1543_v27  ;;  %v1675_v14 = vunpack.c.1.s8 %v1411_v32 }
 0x133   :  { %1342 = vmatmul.mubr.bf16.vlgmr.msra.gmra.mxu1 %v5758_v26  ;;  %3371 = vmatprep.subr.bf16.mxu1 %v3145_v61  ;;  %v2728_v53 = vmul.f32 %v5573_v40, %v2194_v57  ;;  %v2059_v63 = vcvt.s32.f32 %v1547_v31  ;;  %v2183_v28 = vcvt.s32.f32 %v1671_v48  ;;  %v1542_v17 = vunpack.c.0.s8 %v1378_v50 }
 0x134   :  { %3331 = vmatpush1.bf16.msra.mxu0 %v3080_v47  ;;  %v2589_v46 = vmul.f32 %v5553_v20, %v2055_v25  ;;  %v2187_v21 = vcvt.s32.f32 %v1675_v14  ;;  %v1546_v37 = vunpack.c.1.s8 %v1378_v50  ;;  %v1670_v13 = vunpack.c.0.s8 %v5931_v33 }
 0x135   :  { %v3144_v18 = vpack.c.bf16 %v2728_v53, %v2724_v19  ;;  %v2593_v38 = vmul.f32 %v5553_v20, %v2059_v63  ;;  %v2717_v32 = vmul.f32 %v5553_v20, %v2183_v28  ;;  %v2054_v26 = vcvt.s32.f32 %v1542_v17 }
 0x136   :  { %v2721_v0 = vmul.f32 %v5553_v20, %v2187_v21  ;;  %v2058_v39 = vcvt.s32.f32 %v1546_v37  ;;  %v1674_v41 = vunpack.c.1.s8 %v5931_v33  ;;  %v2182_v11 = vcvt.s32.f32 %v1670_v13 }
 0x137   :  { %3372 = vmatpush1.bf16.msra.mxu1 %v3144_v18  ;;  %v3077_v51 = vpack.c.bf16 %v2593_v38, %v2589_v46  ;;  %v2588_v50 = vmul.f32 %v5573_v40, %v2054_v26  ;;  %v1535_v54 = vunpack.c.2.s8 %v1375_v49  ;;  %v1539_v59 = vunpack.c.3.s8 %v1375_v49 }
 0x138   :  { %v3141_v36 = vpack.c.bf16 %v2721_v0, %v2717_v32  ;;  %v2592_v55 = vmul.f32 %v5573_v40, %v2058_v39  ;;  %v2186_v29 = vcvt.s32.f32 %v1674_v41  ;;  %v2716_v56 = vmul.f32 %v5573_v40, %v2182_v11 }
 0x139   :  { %3332 = vmatprep.subr.bf16.mxu0 %v3077_v51  ;;  %v2047_v35 = vcvt.s32.f32 %v1535_v54  ;;  %v2051_v58 = vcvt.s32.f32 %v1539_v59  ;;  %v1663_v23 = vunpack.c.2.s8 %v1407_v60  ;;  %v1667_v33 = vunpack.c.3.s8 %v1407_v60  ;;  %v1371_v59 = vld [vmem:[#allocation5 + $0x28] sm:$0xff] }
 0x13a   :  { %3373 = vmatprep.subr.bf16.mxu1 %v3141_v36  ;;  %v3076_v22 = vpack.c.bf16 %v2592_v55, %v2588_v50  ;;  %v2720_v45 = vmul.f32 %v5573_v40, %v2186_v29  ;;  %v1534_v62 = vunpack.c.2.s8 %v1374_v34  ;;  %v1538_v42 = vunpack.c.3.s8 %v1374_v34 }
 0x13b   :  { %v2581_v43 = vmul.f32 %v5553_v20, %v2047_v35  ;;  %v2585_v1 = vmul.f32 %v5553_v20, %v2051_v58  ;;  %v2175_v2 = vcvt.s32.f32 %v1663_v23  ;;  %v2179_v4 = vcvt.s32.f32 %v1667_v33  ;;  %v1403_v23 = vld [vmem:[#allocation5 + $0x128] sm:$0xff] }
 0x13c   :  { %3333 = vmatpush1.bf16.msra.mxu0 %v3076_v22  ;;  %v3140_v27 = vpack.c.bf16 %v2720_v45, %v2716_v56  ;;  %v2046_v61 = vcvt.s32.f32 %v1534_v62  ;;  %v2050_v57 = vcvt.s32.f32 %v1538_v42  ;;  %v1662_v31 = vunpack.c.2.s8 %v1406_v12  ;;  %v1370_v62 = vld [vmem:[#allocation5 + $0x20] sm:$0xff] }
 0x13d   :  { %v3073_v48 = vpack.c.bf16 %v2585_v1, %v2581_v43  ;;  %v2709_v47 = vmul.f32 %v5553_v20, %v2175_v2  ;;  %v2713_v19 = vmul.f32 %v5553_v20, %v2179_v4  ;;  %v1666_v25 = vunpack.c.3.s8 %v1406_v12 }
 0x13e   :  { %3374 = vmatpush1.bf16.msra.mxu1 %v3140_v27  ;;  %v2580_v14 = vmul.f32 %v5573_v40, %v2046_v61  ;;  %v2584_v53 = vmul.f32 %v5573_v40, %v2050_v57  ;;  %v2174_v63 = vcvt.s32.f32 %v1662_v31  ;;  %v1527_v28 = vunpack.c.0.s8 %v1375_v49  ;;  %v1402_v57 = vld [vmem:[#allocation5 + $0x120] sm:$0xff] }
 0x13f   :  { %3334 = vmatprep.subr.bf16.mxu0 %v3073_v48  ;;  %v3137_v17 = vpack.c.bf16 %v2713_v19, %v2709_v47  ;;  %v2178_v46 = vcvt.s32.f32 %v1666_v25  ;;  %v1531_v21 = vunpack.c.1.s8 %v1375_v49  ;;  %v1655_v37 = vunpack.c.0.s8 %v1407_v60 }
 0x140   :  { %v3072_v13 = vpack.c.bf16 %v2584_v53, %v2580_v14  ;;  %v2708_v18 = vmul.f32 %v5573_v40, %v2174_v63  ;;  %v2039_v38 = vcvt.s32.f32 %v1527_v28  ;;  %v1659_v32 = vunpack.c.1.s8 %v1407_v60 }
 0x141   :  { %3375 = vmatprep.subr.bf16.mxu1 %v3137_v17  ;;  %v2712_v26 = vmul.f32 %v5573_v40, %v2178_v46  ;;  %v2043_v0 = vcvt.s32.f32 %v1531_v21  ;;  %v2167_v39 = vcvt.s32.f32 %v1655_v37  ;;  %v1526_v41 = vunpack.c.0.s8 %v1374_v34 }
 0x142   :  { %3335 = vmatpush1.bf16.msra.mxu0 %v3072_v13  ;;  %v2573_v11 = vmul.f32 %v5553_v20, %v2039_v38  ;;  %v2171_v51 = vcvt.s32.f32 %v1659_v32  ;;  %v1530_v50 = vunpack.c.1.s8 %v1374_v34  ;;  %v1654_v54 = vunpack.c.0.s8 %v1406_v12 }
 0x143   :  { %v3136_v49 = vpack.c.bf16 %v2712_v26, %v2708_v18  ;;  %v2577_v36 = vmul.f32 %v5553_v20, %v2043_v0  ;;  %v2701_v55 = vmul.f32 %v5553_v20, %v2167_v39  ;;  %v2038_v29 = vcvt.s32.f32 %v1526_v41 }
 0x144   :  { %v2705_v60 = vmul.f32 %v5553_v20, %v2171_v51  ;;  %v2042_v56 = vcvt.s32.f32 %v1530_v50  ;;  %v1658_v35 = vunpack.c.1.s8 %v1406_v12  ;;  %v2166_v58 = vcvt.s32.f32 %v1654_v54 }
 0x145   :  { %3376 = vmatpush1.bf16.msra.mxu1 %v3136_v49  ;;  %v3069_v33 = vpack.c.bf16 %v2577_v36, %v2573_v11  ;;  %v2572_v22 = vmul.f32 %v5573_v40, %v2038_v29  ;;  %v1519_v45 = vunpack.c.2.s8 %v1371_v59  ;;  %v1523_v34 = vunpack.c.3.s8 %v1371_v59 }
 0x146   :  { %v3133_v42 = vpack.c.bf16 %v2705_v60, %v2701_v55  ;;  %v2576_v43 = vmul.f32 %v5573_v40, %v2042_v56  ;;  %v2170_v1 = vcvt.s32.f32 %v1658_v35  ;;  %v2700_v2 = vmul.f32 %v5573_v40, %v2166_v58 }
 0x147   :  { %3336 = vmatprep.subr.bf16.mxu0 %v3069_v33  ;;  %v2031_v4 = vcvt.s32.f32 %v1519_v45  ;;  %v2035_v27 = vcvt.s32.f32 %v1523_v34  ;;  %v1647_v61 = vunpack.c.2.s8 %v1403_v23  ;;  %v1651_v12 = vunpack.c.3.s8 %v1403_v23  ;;  %v1367_v34 = vld [vmem:[#allocation5 + $0x8] sm:$0xff] }
 0x148   :  { %3377 = vmatprep.subr.bf16.mxu1 %v3133_v42  ;;  %v3068_v31 = vpack.c.bf16 %v2576_v43, %v2572_v22  ;;  %v2704_v48 = vmul.f32 %v5573_v40, %v2170_v1  ;;  %v1518_v47 = vunpack.c.2.s8 %v1370_v62  ;;  %v1522_v19 = vunpack.c.3.s8 %v1370_v62 }
 0x149   :  { %v2565_v25 = vmul.f32 %v5553_v20, %v2031_v4  ;;  %v2569_v14 = vmul.f32 %v5553_v20, %v2035_v27  ;;  %v2159_v53 = vcvt.s32.f32 %v1647_v61  ;;  %v2163_v63 = vcvt.s32.f32 %v1651_v12  ;;  %v1399_v61 = vld [vmem:[#allocation5 + $0x108] sm:$0xff] }
 0x14a   :  { %3337 = vmatpush1.bf16.msra.mxu0 %v3068_v31  ;;  %v3132_v28 = vpack.c.bf16 %v2704_v48, %v2700_v2  ;;  %v2030_v17 = vcvt.s32.f32 %v1518_v47  ;;  %v2034_v46 = vcvt.s32.f32 %v1522_v19  ;;  %v1646_v21 = vunpack.c.2.s8 %v1402_v57  ;;  %v1366_v47 = vld [vmem:[#allocation5] sm:$0xff] }
 0x14b   :  { %v3065_v37 = vpack.c.bf16 %v2569_v14, %v2565_v25  ;;  %v2693_v13 = vmul.f32 %v5553_v20, %v2159_v53  ;;  %v2697_v18 = vmul.f32 %v5553_v20, %v2163_v63  ;;  %v1650_v38 = vunpack.c.3.s8 %v1402_v57 }
 0x14c   :  { %3378 = vmatpush1.bf16.msra.mxu1 %v3132_v28  ;;  %v2564_v32 = vmul.f32 %v5573_v40, %v2030_v17  ;;  %v2568_v26 = vmul.f32 %v5573_v40, %v2034_v46  ;;  %v2158_v0 = vcvt.s32.f32 %v1646_v21  ;;  %v1511_v39 = vunpack.c.0.s8 %v1371_v59  ;;  %v1398_v46 = vld [vmem:[#allocation5 + $0x100] sm:$0xff] }
 0x14d   :  { %3338 = vmatprep.subr.bf16.mxu0 %v3065_v37  ;;  %v3129_v41 = vpack.c.bf16 %v2697_v18, %v2693_v13  ;;  %v2162_v11 = vcvt.s32.f32 %v1650_v38  ;;  %v1515_v51 = vunpack.c.1.s8 %v1371_v59  ;;  %v1639_v50 = vunpack.c.0.s8 %v1403_v23 }
 0x14e   :  { %v3064_v54 = vpack.c.bf16 %v2568_v26, %v2564_v32  ;;  %v2692_v49 = vmul.f32 %v5573_v40, %v2158_v0  ;;  %v2023_v36 = vcvt.s32.f32 %v1511_v39  ;;  %v1643_v55 = vunpack.c.1.s8 %v1403_v23 }
 0x14f   :  { %3379 = vmatprep.subr.bf16.mxu1 %v3129_v41  ;;  %v2696_v29 = vmul.f32 %v5573_v40, %v2162_v11  ;;  %v2027_v60 = vcvt.s32.f32 %v1515_v51  ;;  %v2151_v56 = vcvt.s32.f32 %v1639_v50  ;;  %v1510_v35 = vunpack.c.0.s8 %v1370_v62 }
 0x150   :  { %3339 = vmatpush1.bf16.msra.mxu0 %v3064_v54  ;;  %v2557_v58 = vmul.f32 %v5553_v20, %v2023_v36  ;;  %v2155_v33 = vcvt.s32.f32 %v1643_v55  ;;  %v1514_v22 = vunpack.c.1.s8 %v1370_v62  ;;  %v1638_v45 = vunpack.c.0.s8 %v1402_v57 }
 0x151   :  { %v3128_v59 = vpack.c.bf16 %v2696_v29, %v2692_v49  ;;  %v2561_v42 = vmul.f32 %v5553_v20, %v2027_v60  ;;  %v2685_v43 = vmul.f32 %v5553_v20, %v2151_v56  ;;  %v2022_v1 = vcvt.s32.f32 %v1510_v35 }
 0x152   :  { %v2689_v23 = vmul.f32 %v5553_v20, %v2155_v33  ;;  %v2026_v2 = vcvt.s32.f32 %v1514_v22  ;;  %v1642_v4 = vunpack.c.1.s8 %v1402_v57  ;;  %v2150_v27 = vcvt.s32.f32 %v1638_v45 }
 0x153   :  { %3380 = vmatpush1.bf16.msra.mxu1 %v3128_v59  ;;  %v3061_v12 = vpack.c.bf16 %v2561_v42, %v2557_v58  ;;  %v2556_v31 = vmul.f32 %v5573_v40, %v2022_v1  ;;  %v1503_v48 = vunpack.c.2.s8 %v1367_v34  ;;  %v1507_v62 = vunpack.c.3.s8 %v1367_v34 }
 0x154   :  { %v3125_v19 = vpack.c.bf16 %v2689_v23, %v2685_v43  ;;  %v2560_v25 = vmul.f32 %v5573_v40, %v2026_v2  ;;  %v2154_v14 = vcvt.s32.f32 %v1642_v4  ;;  %v2684_v53 = vmul.f32 %v5573_v40, %v2150_v27 }
 0x155   :  { %3340 = vmatprep.subr.bf16.mxu0 %v3061_v12  ;;  %v2015_v63 = vcvt.s32.f32 %v1503_v48  ;;  %v2019_v28 = vcvt.s32.f32 %v1507_v62  ;;  %v1631_v17 = vunpack.c.2.s8 %v1399_v61  ;;  %v1635_v57 = vunpack.c.3.s8 %v1399_v61  ;;  %v1395_v62 = vld [vmem:[#allocation5 + $0xe8] sm:$0xff] }
 0x156   :  { %3381 = vmatprep.subr.bf16.mxu1 %v3125_v19  ;;  %v3060_v21 = vpack.c.bf16 %v2560_v25, %v2556_v31  ;;  %v2688_v37 = vmul.f32 %v5573_v40, %v2154_v14  ;;  %v1502_v13 = vunpack.c.2.s8 %v1366_v47  ;;  %v1506_v18 = vunpack.c.3.s8 %v1366_v47 }
 0x157   :  { %v2549_v38 = vmul.f32 %v5553_v20, %v2015_v63  ;;  %v2553_v32 = vmul.f32 %v5553_v20, %v2019_v28  ;;  %v2143_v26 = vcvt.s32.f32 %v1631_v17  ;;  %v2147_v0 = vcvt.s32.f32 %v1635_v57  ;;  %v1427_v17 = vld [vmem:[#allocation5 + $0x1e8] sm:$0xff] }
 0x158   :  { %3341 = vmatpush1.bf16.msra.mxu0 %v3060_v21  ;;  %v3124_v39 = vpack.c.bf16 %v2688_v37, %v2684_v53  ;;  %v2014_v41 = vcvt.s32.f32 %v1502_v13  ;;  %v2018_v11 = vcvt.s32.f32 %v1506_v18  ;;  %v1630_v51 = vunpack.c.2.s8 %v1398_v46  ;;  %v1394_v13 = vld [vmem:[#allocation5 + $0xe0] sm:$0xff] }
 0x159   :  { %v3057_v50 = vpack.c.bf16 %v2553_v32, %v2549_v38  ;;  %v2677_v54 = vmul.f32 %v5553_v20, %v2143_v26  ;;  %v2681_v49 = vmul.f32 %v5553_v20, %v2147_v0  ;;  %v1634_v36 = vunpack.c.3.s8 %v1398_v46 }
 0x15a   :  { %3382 = vmatpush1.bf16.msra.mxu1 %v3124_v39  ;;  %v2548_v55 = vmul.f32 %v5573_v40, %v2014_v41  ;;  %v2552_v29 = vmul.f32 %v5573_v40, %v2018_v11  ;;  %v2142_v60 = vcvt.s32.f32 %v1630_v51  ;;  %v1495_v56 = vunpack.c.0.s8 %v1367_v34  ;;  %v1426_v11 = vld [vmem:[#allocation5 + $0x1e0] sm:$0xff] }
 0x15b   :  { %3342 = vmatprep.subr.bf16.mxu0 %v3057_v50  ;;  %v3121_v35 = vpack.c.bf16 %v2681_v49, %v2677_v54  ;;  %v2146_v58 = vcvt.s32.f32 %v1634_v36  ;;  %v1499_v33 = vunpack.c.1.s8 %v1367_v34  ;;  %v1623_v22 = vunpack.c.0.s8 %v1399_v61 }
 0x15c   :  { %v3056_v45 = vpack.c.bf16 %v2552_v29, %v2548_v55  ;;  %v2676_v59 = vmul.f32 %v5573_v40, %v2142_v60  ;;  %v2007_v42 = vcvt.s32.f32 %v1495_v56  ;;  %v1627_v43 = vunpack.c.1.s8 %v1399_v61 }
 0x15d   :  { %3383 = vmatprep.subr.bf16.mxu1 %v3121_v35  ;;  %v2680_v1 = vmul.f32 %v5573_v40, %v2146_v58  ;;  %v2011_v23 = vcvt.s32.f32 %v1499_v33  ;;  %v2135_v2 = vcvt.s32.f32 %v1623_v22  ;;  %v1494_v4 = vunpack.c.0.s8 %v1366_v47 }
 0x15e   :  { %3343 = vmatpush1.bf16.msra.mxu0 %v3056_v45  ;;  %v2541_v27 = vmul.f32 %v5553_v20, %v2007_v42  ;;  %v2139_v12 = vcvt.s32.f32 %v1627_v43  ;;  %v1498_v31 = vunpack.c.1.s8 %v1366_v47  ;;  %v1622_v48 = vunpack.c.0.s8 %v1398_v46 }
 0x15f   :  { %v3120_v34 = vpack.c.bf16 %v2680_v1, %v2676_v59  ;;  %v2545_v19 = vmul.f32 %v5553_v20, %v2011_v23  ;;  %v2669_v25 = vmul.f32 %v5553_v20, %v2135_v2  ;;  %v2006_v14 = vcvt.s32.f32 %v1494_v4 }
 0x160   :  { %v2673_v61 = vmul.f32 %v5553_v20, %v2139_v12  ;;  %v2010_v53 = vcvt.s32.f32 %v1498_v31  ;;  %v1626_v63 = vunpack.c.1.s8 %v1398_v46  ;;  %v2134_v28 = vcvt.s32.f32 %v1622_v48 }
 0x161   :  { %3384 = vmatpush1.bf16.msra.mxu1 %v3120_v34  ;;  %v3053_v57 = vpack.c.bf16 %v2545_v19, %v2541_v27  ;;  %v2540_v21 = vmul.f32 %v5573_v40, %v2006_v14  ;;  %v1615_v37 = vunpack.c.2.s8 %v1395_v62  ;;  %v1619_v47 = vunpack.c.3.s8 %v1395_v62 }
 0x162   :  { %v3117_v18 = vpack.c.bf16 %v2673_v61, %v2669_v25  ;;  %v2544_v38 = vmul.f32 %v5573_v40, %v2010_v53  ;;  %v2138_v32 = vcvt.s32.f32 %v1626_v63  ;;  %v2668_v26 = vmul.f32 %v5573_v40, %v2134_v28 }
 0x163   :  { %3344 = vmatprep.subr.bf16.mxu0 %v3053_v57  ;;  %v2127_v0 = vcvt.s32.f32 %v1615_v37  ;;  %v2131_v39 = vcvt.s32.f32 %v1619_v47  ;;  %v1743_v41 = vunpack.c.2.s8 %v1427_v17  ;;  %v1747_v46 = vunpack.c.3.s8 %v1427_v17  ;;  %v1391_v47 = vld [vmem:[#allocation5 + $0xc8] sm:$0xff] }
 0x164   :  { %3385 = vmatprep.subr.bf16.mxu1 %v3117_v18  ;;  %v3052_v51 = vpack.c.bf16 %v2544_v38, %v2540_v21  ;;  %v2672_v50 = vmul.f32 %v5573_v40, %v2138_v32  ;;  %v1614_v54 = vunpack.c.2.s8 %v1394_v13  ;;  %v1618_v49 = vunpack.c.3.s8 %v1394_v13 }
 0x165   :  { %v2661_v36 = vmul.f32 %v5553_v20, %v2127_v0  ;;  %v2665_v55 = vmul.f32 %v5553_v20, %v2131_v39  ;;  %v2255_v29 = vcvt.s32.f32 %v1743_v41  ;;  %v2259_v60 = vcvt.s32.f32 %v1747_v46  ;;  %v1423_v41 = vld [vmem:[#allocation5 + $0x1c8] sm:$0xff] }
 0x166   :  { %3345 = vmatpush1.bf16.msra.mxu0 %v3052_v51  ;;  %v3116_v56 = vpack.c.bf16 %v2672_v50, %v2668_v26  ;;  %v2126_v35 = vcvt.s32.f32 %v1614_v54  ;;  %v2130_v58 = vcvt.s32.f32 %v1618_v49  ;;  %v1742_v33 = vunpack.c.2.s8 %v1426_v11  ;;  %v1390_v54 = vld [vmem:[#allocation5 + $0xc0] sm:$0xff] }
 0x167   :  { %v3113_v22 = vpack.c.bf16 %v2665_v55, %v2661_v36  ;;  %v2789_v45 = vmul.f32 %v5553_v20, %v2255_v29  ;;  %v2793_v59 = vmul.f32 %v5553_v20, %v2259_v60  ;;  %v1746_v42 = vunpack.c.3.s8 %v1426_v11 }
 0x168   :  { %3386 = vmatpush1.bf16.msra.mxu1 %v3116_v56  ;;  %v2660_v43 = vmul.f32 %v5573_v40, %v2126_v35  ;;  %v2664_v1 = vmul.f32 %v5573_v40, %v2130_v58  ;;  %v2254_v23 = vcvt.s32.f32 %v1742_v33  ;;  %v1607_v2 = vunpack.c.0.s8 %v1395_v62  ;;  %v1422_v58 = vld [vmem:[#allocation5 + $0x1c0] sm:$0xff] }
 0x169   :  { %3346 = vmatprep.subr.bf16.mxu0 %v3113_v22  ;;  %v3177_v4 = vpack.c.bf16 %v2793_v59, %v2789_v45  ;;  %v2258_v27 = vcvt.s32.f32 %v1746_v42  ;;  %v1611_v12 = vunpack.c.1.s8 %v1395_v62  ;;  %v1735_v31 = vunpack.c.0.s8 %v1427_v17 }
 0x16a   :  { %v3112_v48 = vpack.c.bf16 %v2664_v1, %v2660_v43  ;;  %v2788_v34 = vmul.f32 %v5573_v40, %v2254_v23  ;;  %v2119_v19 = vcvt.s32.f32 %v1607_v2  ;;  %v1739_v25 = vunpack.c.1.s8 %v1427_v17 }
 0x16b   :  { %3387 = vmatprep.subr.bf16.mxu1 %v3177_v4  ;;  %v2792_v14 = vmul.f32 %v5573_v40, %v2258_v27  ;;  %v2123_v61 = vcvt.s32.f32 %v1611_v12  ;;  %v2247_v53 = vcvt.s32.f32 %v1735_v31  ;;  %v1606_v63 = vunpack.c.0.s8 %v1394_v13 }
 0x16c   :  { %3347 = vmatpush2.bf16.msra.mxu0 %v3112_v48  ;;  %v2653_v28 = vmul.f32 %v5553_v20, %v2119_v19  ;;  %v2251_v57 = vcvt.s32.f32 %v1739_v25  ;;  %v1610_v21 = vunpack.c.1.s8 %v1394_v13  ;;  %v1734_v37 = vunpack.c.0.s8 %v1426_v11 }
 0x16d   :  { %v3176_v62 = vpack.c.bf16 %v2792_v14, %v2788_v34  ;;  %v2657_v18 = vmul.f32 %v5553_v20, %v2123_v61  ;;  %v2781_v38 = vmul.f32 %v5553_v20, %v2247_v53  ;;  %v2118_v32 = vcvt.s32.f32 %v1606_v63 }
 0x16e   :  { %v2785_v17 = vmul.f32 %v5553_v20, %v2251_v57  ;;  %v2122_v26 = vcvt.s32.f32 %v1610_v21  ;;  %v1738_v0 = vunpack.c.1.s8 %v1426_v11  ;;  %v2246_v39 = vcvt.s32.f32 %v1734_v37 }
 0x16f   :  { %3388 = vmatpush2.bf16.msra.mxu1 %v3176_v62  ;;  %v3109_v46 = vpack.c.bf16 %v2657_v18, %v2653_v28  ;;  %v2652_v51 = vmul.f32 %v5573_v40, %v2118_v32  ;;  %v1599_v50 = vunpack.c.2.s8 %v1391_v47  ;;  %v1603_v13 = vunpack.c.3.s8 %v1391_v47 }
 0x170   :  { %v3173_v49 = vpack.c.bf16 %v2785_v17, %v2781_v38  ;;  %v2656_v36 = vmul.f32 %v5573_v40, %v2122_v26  ;;  %v2250_v55 = vcvt.s32.f32 %v1738_v0  ;;  %v2780_v29 = vmul.f32 %v5573_v40, %v2246_v39 }
 0x171   :  { %3348 = vmatprep.subr.bf16.mxu0 %v3109_v46  ;;  %v2111_v60 = vcvt.s32.f32 %v1599_v50  ;;  %v2115_v56 = vcvt.s32.f32 %v1603_v13  ;;  %v1727_v35 = vunpack.c.2.s8 %v1423_v41  ;;  %v1731_v11 = vunpack.c.3.s8 %v1423_v41  ;;  %v6029_v13 = vld [vmem:[#allocation5 + $0xa8] sm:$0xff] }
 0x172   :  { %3389 = vmatprep.subr.bf16.mxu1 %v3173_v49  ;;  %v3108_v33 = vpack.c.bf16 %v2656_v36, %v2652_v51  ;;  %v2784_v22 = vmul.f32 %v5573_v40, %v2250_v55  ;;  %v1598_v45 = vunpack.c.2.s8 %v1390_v54  ;;  %v1602_v59 = vunpack.c.3.s8 %v1390_v54 }
 0x173   :  { %v2645_v42 = vmul.f32 %v5553_v20, %v2111_v60  ;;  %v2649_v43 = vmul.f32 %v5553_v20, %v2115_v56  ;;  %v2239_v1 = vcvt.s32.f32 %v1727_v35  ;;  %v2243_v23 = vcvt.s32.f32 %v1731_v11  ;;  %v6034_v35 = vld [vmem:[#allocation5 + $0x1a8] sm:$0xff] }
 0x174   :  { %3349 = vmatpush2.bf16.msra.mxu0 %v3108_v33  ;;  %v3172_v2 = vpack.c.bf16 %v2784_v22, %v2780_v29  ;;  %v2110_v4 = vcvt.s32.f32 %v1598_v45  ;;  %v2114_v27 = vcvt.s32.f32 %v1602_v59  ;;  %v1726_v12 = vunpack.c.2.s8 %v1422_v58  ;;  %v6039_v45 = vld [vmem:[#allocation5 + $0xa0] sm:$0xff] }
 0x175   :  { %v3105_v31 = vpack.c.bf16 %v2649_v43, %v2645_v42  ;;  %v2773_v48 = vmul.f32 %v5553_v20, %v2239_v1  ;;  %v2777_v34 = vmul.f32 %v5553_v20, %v2243_v23  ;;  %v1730_v19 = vunpack.c.3.s8 %v1422_v58 }
 0x176   :  { %3390 = vmatpush2.bf16.msra.mxu1 %v3172_v2  ;;  %v2644_v25 = vmul.f32 %v5573_v40, %v2110_v4  ;;  %v2648_v14 = vmul.f32 %v5573_v40, %v2114_v27  ;;  %v2238_v61 = vcvt.s32.f32 %v1726_v12  ;;  %v1591_v53 = vunpack.c.0.s8 %v1391_v47  ;;  %v6045_v27 = vld [vmem:[#allocation5 + $0x1a0] sm:$0xff] }
 0x177   :  { %3350 = vmatprep.subr.bf16.mxu0 %v3105_v31  ;;  %v3169_v63 = vpack.c.bf16 %v2777_v34, %v2773_v48  ;;  %v2242_v28 = vcvt.s32.f32 %v1730_v19  ;;  %v1595_v57 = vunpack.c.1.s8 %v1391_v47  ;;  %v1719_v21 = vunpack.c.0.s8 %v1423_v41 }
 0x178   :  { %v3104_v37 = vpack.c.bf16 %v2648_v14, %v2644_v25  ;;  %v2772_v62 = vmul.f32 %v5573_v40, %v2238_v61  ;;  %v2103_v18 = vcvt.s32.f32 %v1591_v53  ;;  %v1723_v38 = vunpack.c.1.s8 %v1423_v41 }
 0x179   :  { %3391 = vmatprep.subr.bf16.mxu1 %v3169_v63  ;;  %v2776_v32 = vmul.f32 %v5573_v40, %v2242_v28  ;;  %v2107_v17 = vcvt.s32.f32 %v1595_v57  ;;  %v2231_v26 = vcvt.s32.f32 %v1719_v21  ;;  %v1590_v0 = vunpack.c.0.s8 %v1390_v54 }
 0x17a   :  { %3351 = vmatpush2.bf16.msra.mxu0 %v3104_v37  ;;  %v2637_v39 = vmul.f32 %v5553_v20, %v2103_v18  ;;  %v2235_v46 = vcvt.s32.f32 %v1723_v38  ;;  %v1594_v51 = vunpack.c.1.s8 %v1390_v54  ;;  %v1718_v50 = vunpack.c.0.s8 %v1422_v58 }
 0x17b   :  { %v3168_v47 = vpack.c.bf16 %v2776_v32, %v2772_v62  ;;  %v2641_v49 = vmul.f32 %v5553_v20, %v2107_v17  ;;  %v2765_v36 = vmul.f32 %v5553_v20, %v2231_v26  ;;  %v2102_v41 = vcvt.s32.f32 %v1590_v0 }
 0x17c   :  { %v2769_v55 = vmul.f32 %v5553_v20, %v2235_v46  ;;  %v2106_v29 = vcvt.s32.f32 %v1594_v51  ;;  %v1722_v60 = vunpack.c.1.s8 %v1422_v58  ;;  %v2230_v56 = vcvt.s32.f32 %v1718_v50 }
 0x17d   :  { %3392 = vmatpush2.bf16.msra.mxu1 %v3168_v47  ;;  %v3101_v11 = vpack.c.bf16 %v2641_v49, %v2637_v39  ;;  %v2636_v54 = vmul.f32 %v5573_v40, %v2102_v41  ;;  %v1583_v33 = vunpack.c.2.s8 %v6029_v13  ;;  %v1587_v22 = vunpack.c.3.s8 %v6029_v13 }
 0x17e   :  { %v3165_v59 = vpack.c.bf16 %v2769_v55, %v2765_v36  ;;  %v2640_v42 = vmul.f32 %v5573_v40, %v2106_v29  ;;  %v2234_v43 = vcvt.s32.f32 %v1722_v60  ;;  %v2764_v1 = vmul.f32 %v5573_v40, %v2230_v56 }
 0x17f   :  { %3352 = vmatprep.subr.bf16.mxu0 %v3101_v11  ;;  %v2095_v58 = vcvt.s32.f32 %v1583_v33  ;;  %v2099_v23 = vcvt.s32.f32 %v1587_v22  ;;  %v1711_v2 = vunpack.c.2.s8 %v6034_v35  ;;  %v1715_v4 = vunpack.c.3.s8 %v6034_v35  ;;  %v6047_v12 = vpop.f32.mrf.mxu0 }
 0x180   :  { %3393 = vmatprep.subr.bf16.mxu1 %v3165_v59  ;;  %v3100_v31 = vpack.c.bf16 %v2640_v42, %v2636_v54  ;;  %v2768_v48 = vmul.f32 %v5573_v40, %v2234_v43  ;;  %v1582_v34 = vunpack.c.2.s8 %v6039_v45  ;;  %v1586_v19 = vunpack.c.3.s8 %v6039_v45 }
 0x181   :  { %v2629_v25 = vmul.f32 %v5553_v20, %v2095_v58  ;;  %v2633_v14 = vmul.f32 %v5553_v20, %v2099_v23  ;;  %v2223_v61 = vcvt.s32.f32 %v1711_v2  ;;  %v2227_v53 = vcvt.s32.f32 %v1715_v4  ;;  %v1261_v63 = vpop.f32.mrf.mxu1  ;;  %v6054_v28 = vpop.f32.mrf.mxu0 }
 0x182   :  { %3353 = vmatpush2.bf16.msra.mxu0 %v3100_v31  ;;  %v3164_v57 = vpack.c.bf16 %v2768_v48, %v2764_v1  ;;  %v2094_v21 = vcvt.s32.f32 %v1582_v34  ;;  %v2098_v37 = vcvt.s32.f32 %v1586_v19  ;;  %v1710_v62 = vunpack.c.2.s8 %v6045_v27 }
 0x183   :  { %v3097_v18 = vpack.c.bf16 %v2633_v14, %v2629_v25  ;;  %v2757_v38 = vmul.f32 %v5553_v20, %v2223_v61  ;;  %v2761_v32 = vmul.f32 %v5553_v20, %v2227_v53  ;;  %v1714_v17 = vunpack.c.3.s8 %v6045_v27  ;;  %v6060_v26 = vpop.f32.mrf.mxu1  ;;  %v1224_v0 = vpop.f32.mrf.mxu0  ;;  %v6081_v61 = vld [vmem:[#allocation5 + $0x88] sm:$0xff] }
 0x184   :  { %3394 = vmatpush2.bf16.msra.mxu1 %v3164_v57  ;;  %v2628_v39 = vmul.f32 %v5573_v40, %v2094_v21  ;;  %v2632_v46 = vmul.f32 %v5573_v40, %v2098_v37  ;;  %v2222_v51 = vcvt.s32.f32 %v1710_v62  ;;  %v1575_v50 = vunpack.c.0.s8 %v6029_v13  ;;  %v6086_v37 = vld [vmem:[#allocation5 + $0x188] sm:$0xff] }
 0x185   :  { %3354 = vmatprep.subr.bf16.mxu0 %v3097_v18  ;;  %v3161_v47 = vpack.c.bf16 %v2761_v32, %v2757_v38  ;;  %v2226_v49 = vcvt.s32.f32 %v1714_v17  ;;  %v1579_v36 = vunpack.c.1.s8 %v6029_v13  ;;  %v1703_v41 = vunpack.c.0.s8 %v6034_v35  ;;  %v1265_v55 = vpop.f32.mrf.mxu1  ;;  %v1225_v29 = vpop.f32.mrf.mxu0 }
 0x186   :  { %v3096_v60 = vpack.c.bf16 %v2632_v46, %v2628_v39  ;;  %v2756_v56 = vmul.f32 %v5573_v40, %v2222_v51  ;;  %v2087_v11 = vcvt.s32.f32 %v1575_v50  ;;  %v1707_v54 = vunpack.c.1.s8 %v6034_v35  ;;  %v1119_v35 = vld [vmem:[%s6918_s3] sm:$0xff] }
 0x187   :  { %3395 = vmatprep.subr.bf16.mxu1 %v3161_v47  ;;  %v2760_v33 = vmul.f32 %v5573_v40, %v2226_v49  ;;  %v2091_v22 = vcvt.s32.f32 %v1579_v36  ;;  %v2215_v59 = vcvt.s32.f32 %v1703_v41  ;;  %v1574_v42 = vunpack.c.0.s8 %v6039_v45  ;;  %v1266_v43 = vpop.f32.mrf.mxu1 }
 0x188   :  { %3355 = vmatpush2.bf16.msra.mxu0 %v3096_v60  ;;  %v2621_v13 = vmul.f32 %v5553_v20, %v2087_v11  ;;  %v2219_v1 = vcvt.s32.f32 %v1707_v54  ;;  %v1578_v58 = vunpack.c.1.s8 %v6039_v45  ;;  %v1702_v23 = vunpack.c.0.s8 %v6045_v27  ;;  %v1414_v11 = vld [vmem:[#allocation5 + $0x180] sm:$0xff] }
 0x189   :  { %v3160_v2 = vpack.c.bf16 %v2760_v33, %v2756_v56  ;;  %v2625_v4 = vmul.f32 %v5553_v20, %v2091_v22  ;;  %v2749_v31 = vmul.f32 %v5553_v20, %v2215_v59  ;;  %v2086_v48 = vcvt.s32.f32 %v1574_v42  ;;  %v1382_v56 = vld [vmem:[#allocation5 + $0x80] sm:$0xff] }
 0x18a   :  { %v2753_v34 = vmul.f32 %v5553_v20, %v2219_v1  ;;  %v2090_v19 = vcvt.s32.f32 %v1578_v58  ;;  %v1706_v25 = vunpack.c.1.s8 %v6045_v27  ;;  %v2214_v14 = vcvt.s32.f32 %v1702_v23 }
 0x18b   :  { %3396 = vmatpush2.bf16.msra.mxu1 %v3160_v2  ;;  %v3093_v45 = vpack.c.bf16 %v2625_v4, %v2621_v13  ;;  %v2620_v53 = vmul.f32 %v5573_v40, %v2086_v48  ;;  %v1124_v57 = vrot.slane %v1119_v35, %v5531_v7  ;;  %v1132_v21 = vrot.slane %v1119_v35, %v5534_v8 }
 0x18c   :  { %v3157_v62 = vpack.c.bf16 %v2753_v34, %v2749_v31  ;;  %v2624_v18 = vmul.f32 %v5573_v40, %v2090_v19  ;;  %v2218_v38 = vcvt.s32.f32 %v1706_v25  ;;  %v2748_v32 = vmul.f32 %v5573_v40, %v2214_v14 }
 0x18d   :  { %3356 = vmatprep.subr.bf16.mxu0 %v3093_v45  ;;  %v1221_v27 = vadd.f32 %v6047_v12, %v1124_v57  ;;  %v1262_v17 = vadd.f32 %v1261_v63, %v1132_v21  ;;  %v1567_v0 = vunpack.c.2.s8 %v6081_v61  ;;  %v1571_v39 = vunpack.c.3.s8 %v6081_v61 }
 0x18e   :  { %3397 = vmatprep.subr.bf16.mxu1 %v3157_v62  ;;  %v3092_v46 = vpack.c.bf16 %v2624_v18, %v2620_v53  ;;  %v2752_v51 = vmul.f32 %v5573_v40, %v2218_v38  ;;  %v1695_v50 = vunpack.c.2.s8 %v6086_v37  ;;  %v1699_v47 = vunpack.c.3.s8 %v6086_v37 }
 0x18f   :  { %v1350_v49 = vmax.f32 %v1221_v27, 0.0  ;;  %v1352_v36 = vmax.f32 %v1262_v17, 0.0  ;;  %v2079_v41 = vcvt.s32.f32 %v1567_v0  ;;  %v2083_v55 = vcvt.s32.f32 %v1571_v39 }
 0x190   :  { %3357 = vmatpush2.bf16.msra.mxu0 %v3092_v46  ;;  %v3156_v29 = vpack.c.bf16 %v2752_v51, %v2748_v32  ;;  %v2207_v12 = vcvt.s32.f32 %v1695_v50  ;;  %v2211_v63 = vcvt.s32.f32 %v1699_v47  ;;  %v1128_v60 = vrot.slane %v1119_v35, %v5525_v5  ;;  %v6122_v50 = vld [vmem:[#allocation5 + $0x268] sm:$0xff] }
 0x191   :  { %v6097_v54 = vpack.c.bf16 %v1350_v49, %v1350_v49  ;;  %v6099_v33 = vpack.c.bf16 %v1352_v36, %v1352_v36  ;;  %v2613_v22 = vmul.f32 %v5553_v20, %v2079_v41  ;;  %v2617_v59 = vmul.f32 %v5553_v20, %v2083_v55 }
 0x192   :  { %3398 = vmatpush2.bf16.msra.mxu1 %v3156_v29  ;;  %v2741_v42 = vmul.f32 %v5553_v20, %v2207_v12  ;;  %v2745_v43 = vmul.f32 %v5553_v20, %v2211_v63  ;;  %v1223_v13 = vadd.f32 %v6054_v28, %v1128_v60  ;;  %v1136_v1 = vrot.slane %v1119_v35, %v5528_v6  ;;  %v6126_v60 = vld [vmem:[#allocation5 + $0x368] sm:$0xff] }
 0x193   :  { %v3089_v58 = vpack.c.bf16 %v2617_v59, %v2613_v22  ;;  %v1566_v23 = vunpack.c.2.s8 %v1382_v56  ;;  %v1570_v2 = vunpack.c.3.s8 %v1382_v56  ;;  %v1694_v4 = vunpack.c.2.s8 %v1414_v11 }
 0x194   :  { %v3153_v31 = vpack.c.bf16 %v2745_v43, %v2741_v42  ;;  %v1351_v48 = vmax.f32 %v1223_v13, 0.0  ;;  %v1264_v34 = vadd.f32 %v6060_v26, %v1136_v1  ;;  %v1698_v19 = vunpack.c.3.s8 %v1414_v11 }
 0x195   :  { %3358 = vmatprep.subr.bf16.mxu0 %v3089_v58  ;;  %v2078_v25 = vcvt.s32.f32 %v1566_v23  ;;  %v2082_v14 = vcvt.s32.f32 %v1570_v2  ;;  %v2206_v45 = vcvt.s32.f32 %v1694_v4  ;;  %v1559_v53 = vunpack.c.0.s8 %v6081_v61  ;;  %v1442_v4 = vld [vmem:[#allocation5 + $0x260] sm:$0xff] }
 0x196   :  { %3399 = vmatprep.subr.bf16.mxu1 %v3153_v31  ;;  %v6109_v57 = vpack.c.bf16 %v1351_v48, %v1351_v48  ;;  %v1353_v28 = vmax.f32 %v1264_v34, 0.0  ;;  %v2210_v35 = vcvt.s32.f32 %v1698_v19  ;;  %v1563_v21 = vunpack.c.1.s8 %v6081_v61 }
 0x197   :  { %v2612_v62 = vmul.f32 %v5573_v40, %v2078_v25  ;;  %v2616_v18 = vmul.f32 %v5573_v40, %v2082_v14  ;;  %v2740_v26 = vmul.f32 %v5573_v40, %v2206_v45  ;;  %v2071_v38 = vcvt.s32.f32 %v1559_v53  ;;  %v1474_v25 = vld [vmem:[#allocation5 + $0x360] sm:$0xff] }
 0x198   :  { %v6115_v32 = vpack.c.bf16 %v1353_v28, %v1353_v28  ;;  %v2744_v27 = vmul.f32 %v5573_v40, %v2210_v35  ;;  %v2075_v17 = vcvt.s32.f32 %v1563_v21  ;;  %v1687_v0 = vunpack.c.0.s8 %v6086_v37  ;;  %3362 = vmatprep.mubr.bf16.mxu0 %v6109_v57 }
 0x199   :  { %v3088_v39 = vpack.c.bf16 %v2616_v18, %v2612_v62  ;;  %v2605_v46 = vmul.f32 %v5553_v20, %v2071_v38  ;;  %v1691_v61 = vunpack.c.1.s8 %v6086_v37  ;;  %v1558_v51 = vunpack.c.0.s8 %v1382_v56 }
 0x19a   :  { %v3152_v47 = vpack.c.bf16 %v2744_v27, %v2740_v26  ;;  %v2609_v49 = vmul.f32 %v5553_v20, %v2075_v17  ;;  %v2199_v36 = vcvt.s32.f32 %v1687_v0  ;;  %v1562_v41 = vunpack.c.1.s8 %v1382_v56  ;;  %3403 = vmatprep.mubr.bf16.mxu1 %v6115_v32 }
 0x19b   :  { %3359 = vmatpush2.bf16.msra.mxu0 %v3088_v39  ;;  %v2203_v55 = vcvt.s32.f32 %v1691_v61  ;;  %v2070_v29 = vcvt.s32.f32 %v1558_v51  ;;  %v1686_v12 = vunpack.c.0.s8 %v1414_v11  ;;  %v1690_v63 = vunpack.c.1.s8 %v1414_v11 }
 0x19c   :  { %3400 = vmatpush2.bf16.msra.mxu1 %v3152_v47  ;;  %v3085_v22 = vpack.c.bf16 %v2609_v49, %v2605_v46  ;;  %v2733_v37 = vmul.f32 %v5553_v20, %v2199_v36  ;;  %v2074_v59 = vcvt.s32.f32 %v1562_v41  ;;  %v1807_v42 = vunpack.c.2.s8 %v6122_v50 }
 0x19d   :  { %v2737_v43 = vmul.f32 %v5553_v20, %v2203_v55  ;;  %v2604_v56 = vmul.f32 %v5573_v40, %v2070_v29  ;;  %v2198_v13 = vcvt.s32.f32 %v1686_v12  ;;  %v2202_v1 = vcvt.s32.f32 %v1690_v63 }
 0x19e   :  { %3360 = vmatprep.subr.bf16.mxu0 %v3085_v22  ;;  %v2608_v58 = vmul.f32 %v5573_v40, %v2074_v59  ;;  %v1811_v11 = vunpack.c.3.s8 %v6122_v50  ;;  %v2319_v23 = vcvt.s32.f32 %v1807_v42  ;;  %v1935_v2 = vunpack.c.2.s8 %v6126_v60 }
 0x19f   :  { %v3149_v31 = vpack.c.bf16 %v2737_v43, %v2733_v37  ;;  %v2732_v48 = vmul.f32 %v5573_v40, %v2198_v13  ;;  %v2736_v34 = vmul.f32 %v5573_v40, %v2202_v1  ;;  %v1939_v19 = vunpack.c.3.s8 %v6126_v60  ;;  %v1439_v13 = vld [vmem:[#allocation5 + $0x248] sm:$0xff] }
 0x1a0   :  { %v3084_v14 = vpack.c.bf16 %v2608_v58, %v2604_v56  ;;  %v2323_v45 = vcvt.s32.f32 %v1811_v11  ;;  %v2853_v53 = vmul.f32 %v5553_v20, %v2319_v23  ;;  %v2447_v28 = vcvt.s32.f32 %v1935_v2 }
 0x1a1   :  { %3401 = vmatprep.subr.bf16.mxu1 %v3149_v31  ;;  %v3148_v35 = vpack.c.bf16 %v2736_v34, %v2732_v48  ;;  %v2451_v21 = vcvt.s32.f32 %v1939_v19  ;;  %v1806_v62 = vunpack.c.2.s8 %v1442_v4  ;;  %v1810_v18 = vunpack.c.3.s8 %v1442_v4  ;;  %v6154_v19 = vld [vmem:[#allocation5 + $0x348] sm:$0xff] }
 0x1a2   :  { %3361 = vmatpush2.bf16.msra.mxu0 %v3084_v14  ;;  %v2857_v26 = vmul.f32 %v5553_v20, %v2323_v45  ;;  %v2981_v38 = vmul.f32 %v5553_v20, %v2447_v28  ;;  %v1934_v27 = vunpack.c.2.s8 %v1474_v25  ;;  %v1938_v17 = vunpack.c.3.s8 %v1474_v25 }
 0x1a3   :  { %3402 = vmatpush2.bf16.msra.mxu1 %v3148_v35  ;;  %v2985_v0 = vmul.f32 %v5553_v20, %v2451_v21  ;;  %v2318_v39 = vcvt.s32.f32 %v1806_v62  ;;  %v2322_v46 = vcvt.s32.f32 %v1810_v18  ;;  %v1799_v61 = vunpack.c.0.s8 %v6122_v50 }
 0x1a4   :  { %v3209_v51 = vpack.c.bf16 %v2857_v26, %v2853_v53  ;;  %v2446_v47 = vcvt.s32.f32 %v1934_v27  ;;  %v2450_v49 = vcvt.s32.f32 %v1938_v17  ;;  %v1803_v36 = vunpack.c.1.s8 %v6122_v50 }
 0x1a5   :  { %v3273_v41 = vpack.c.bf16 %v2985_v0, %v2981_v38  ;;  %3363 = vmatmul.mubr.bf16.vlgmr.msra.gmra.mxu0 %v6097_v54  ;;  %v2852_v55 = vmul.f32 %v5573_v40, %v2318_v39  ;;  %v2856_v29 = vmul.f32 %v5573_v40, %v2322_v46  ;;  %v2311_v12 = vcvt.s32.f32 %v1799_v61  ;;  %v1438_v38 = vld [vmem:[#allocation5 + $0x240] sm:$0xff] }
 0x1a6   :  { %3412 = vmatprep.subr.bf16.mxu0 %v3209_v51  ;;  %3404 = vmatmul.mubr.bf16.vlgmr.msra.gmra.mxu1 %v6099_v33  ;;  %v2980_v63 = vmul.f32 %v5573_v40, %v2446_v47  ;;  %v2984_v22 = vmul.f32 %v5573_v40, %v2450_v49  ;;  %v2315_v37 = vcvt.s32.f32 %v1803_v36  ;;  %v1927_v59 = vunpack.c.0.s8 %v6126_v60  ;;  %v1470_v46 = vld [vmem:[#allocation5 + $0x340] sm:$0xff] }
 0x1a7   :  { %3453 = vmatprep.subr.bf16.mxu1 %v3273_v41  ;;  %v3208_v50 = vpack.c.bf16 %v2856_v29, %v2852_v55  ;;  %v2845_v42 = vmul.f32 %v5553_v20, %v2311_v12  ;;  %v1931_v43 = vunpack.c.1.s8 %v6126_v60  ;;  %v1798_v56 = vunpack.c.0.s8 %v1442_v4 }
 0x1a8   :  { %v3272_v1 = vpack.c.bf16 %v2984_v22, %v2980_v63  ;;  %v2849_v58 = vmul.f32 %v5553_v20, %v2315_v37  ;;  %v2439_v11 = vcvt.s32.f32 %v1927_v59  ;;  %v1802_v23 = vunpack.c.1.s8 %v1442_v4 }
 0x1a9   :  { %3413 = vmatpush1.bf16.msra.mxu0 %v3208_v50  ;;  %v2443_v2 = vcvt.s32.f32 %v1931_v43  ;;  %v2310_v31 = vcvt.s32.f32 %v1798_v56  ;;  %v1926_v48 = vunpack.c.0.s8 %v1474_v25  ;;  %v1930_v34 = vunpack.c.1.s8 %v1474_v25 }
 0x1aa   :  { %3454 = vmatpush1.bf16.msra.mxu1 %v3272_v1  ;;  %v3205_v14 = vpack.c.bf16 %v2849_v58, %v2845_v42  ;;  %v2973_v45 = vmul.f32 %v5553_v20, %v2439_v11  ;;  %v2314_v53 = vcvt.s32.f32 %v1802_v23  ;;  %v1791_v60 = vunpack.c.2.s8 %v1439_v13 }
 0x1ab   :  { %v2977_v28 = vmul.f32 %v5553_v20, %v2443_v2  ;;  %v2844_v35 = vmul.f32 %v5573_v40, %v2310_v31  ;;  %v2438_v21 = vcvt.s32.f32 %v1926_v48  ;;  %v2442_v62 = vcvt.s32.f32 %v1930_v34 }
 0x1ac   :  { %3414 = vmatprep.subr.bf16.mxu0 %v3205_v14  ;;  %v2848_v4 = vmul.f32 %v5573_v40, %v2314_v53  ;;  %v1795_v18 = vunpack.c.3.s8 %v1439_v13  ;;  %v2303_v26 = vcvt.s32.f32 %v1791_v60  ;;  %v1919_v25 = vunpack.c.2.s8 %v6154_v19 }
 0x1ad   :  { %v3269_v27 = vpack.c.bf16 %v2977_v28, %v2973_v45  ;;  %v2972_v17 = vmul.f32 %v5573_v40, %v2438_v21  ;;  %v2976_v0 = vmul.f32 %v5573_v40, %v2442_v62  ;;  %v1923_v39 = vunpack.c.3.s8 %v6154_v19  ;;  %v1435_v21 = vld [vmem:[#allocation5 + $0x228] sm:$0xff] }
 0x1ae   :  { %v3204_v61 = vpack.c.bf16 %v2848_v4, %v2844_v35  ;;  %v2307_v51 = vcvt.s32.f32 %v1795_v18  ;;  %v2837_v47 = vmul.f32 %v5553_v20, %v2303_v26  ;;  %v2431_v49 = vcvt.s32.f32 %v1919_v25 }
 0x1af   :  { %3455 = vmatprep.subr.bf16.mxu1 %v3269_v27  ;;  %v3268_v36 = vpack.c.bf16 %v2976_v0, %v2972_v17  ;;  %v2435_v41 = vcvt.s32.f32 %v1923_v39  ;;  %v1790_v55 = vunpack.c.2.s8 %v1438_v38  ;;  %v1794_v29 = vunpack.c.3.s8 %v1438_v38  ;;  %v6176_v39 = vld [vmem:[#allocation5 + $0x328] sm:$0xff] }
 0x1b0   :  { %3415 = vmatpush1.bf16.msra.mxu0 %v3204_v61  ;;  %v2841_v12 = vmul.f32 %v5553_v20, %v2307_v51  ;;  %v2965_v63 = vmul.f32 %v5553_v20, %v2431_v49  ;;  %v1918_v22 = vunpack.c.2.s8 %v1470_v46  ;;  %v1922_v37 = vunpack.c.3.s8 %v1470_v46 }
 0x1b1   :  { %3456 = vmatpush1.bf16.msra.mxu1 %v3268_v36  ;;  %v2969_v59 = vmul.f32 %v5553_v20, %v2435_v41  ;;  %v2302_v50 = vcvt.s32.f32 %v1790_v55  ;;  %v2306_v42 = vcvt.s32.f32 %v1794_v29  ;;  %v1783_v43 = vunpack.c.0.s8 %v1439_v13 }
 0x1b2   :  { %v3201_v56 = vpack.c.bf16 %v2841_v12, %v2837_v47  ;;  %v2430_v1 = vcvt.s32.f32 %v1918_v22  ;;  %v2434_v58 = vcvt.s32.f32 %v1922_v37  ;;  %v1787_v11 = vunpack.c.1.s8 %v1439_v13 }
 0x1b3   :  { %v3265_v23 = vpack.c.bf16 %v2969_v59, %v2965_v63  ;;  %v2836_v2 = vmul.f32 %v5573_v40, %v2302_v50  ;;  %v2840_v31 = vmul.f32 %v5573_v40, %v2306_v42  ;;  %v2295_v48 = vcvt.s32.f32 %v1783_v43  ;;  %v1434_v63 = vld [vmem:[#allocation5 + $0x220] sm:$0xff] }
 0x1b4   :  { %3416 = vmatprep.subr.bf16.mxu0 %v3201_v56  ;;  %v2964_v34 = vmul.f32 %v5573_v40, %v2430_v1  ;;  %v2968_v14 = vmul.f32 %v5573_v40, %v2434_v58  ;;  %v2299_v45 = vcvt.s32.f32 %v1787_v11  ;;  %v1911_v53 = vunpack.c.0.s8 %v6154_v19  ;;  %v1466_v42 = vld [vmem:[#allocation5 + $0x320] sm:$0xff] }
 0x1b5   :  { %3457 = vmatprep.subr.bf16.mxu1 %v3265_v23  ;;  %v3200_v60 = vpack.c.bf16 %v2840_v31, %v2836_v2  ;;  %v2829_v28 = vmul.f32 %v5553_v20, %v2295_v48  ;;  %v1915_v13 = vunpack.c.1.s8 %v6154_v19  ;;  %v1782_v35 = vunpack.c.0.s8 %v1438_v38 }
 0x1b6   :  { %v3264_v62 = vpack.c.bf16 %v2968_v14, %v2964_v34  ;;  %v2833_v4 = vmul.f32 %v5553_v20, %v2299_v45  ;;  %v2423_v18 = vcvt.s32.f32 %v1911_v53  ;;  %v1786_v26 = vunpack.c.1.s8 %v1438_v38 }
 0x1b7   :  { %3417 = vmatpush1.bf16.msra.mxu0 %v3200_v60  ;;  %v2427_v25 = vcvt.s32.f32 %v1915_v13  ;;  %v2294_v27 = vcvt.s32.f32 %v1782_v35  ;;  %v1910_v17 = vunpack.c.0.s8 %v1470_v46  ;;  %v1914_v0 = vunpack.c.1.s8 %v1470_v46 }
 0x1b8   :  { %3458 = vmatpush1.bf16.msra.mxu1 %v3264_v62  ;;  %v3197_v61 = vpack.c.bf16 %v2833_v4, %v2829_v28  ;;  %v2957_v51 = vmul.f32 %v5553_v20, %v2423_v18  ;;  %v2298_v47 = vcvt.s32.f32 %v1786_v26  ;;  %v1775_v19 = vunpack.c.2.s8 %v1435_v21 }
 0x1b9   :  { %v2961_v49 = vmul.f32 %v5553_v20, %v2427_v25  ;;  %v2828_v36 = vmul.f32 %v5573_v40, %v2294_v27  ;;  %v2422_v41 = vcvt.s32.f32 %v1910_v17  ;;  %v2426_v55 = vcvt.s32.f32 %v1914_v0 }
 0x1ba   :  { %3418 = vmatprep.subr.bf16.mxu0 %v3197_v61  ;;  %v2832_v38 = vmul.f32 %v5573_v40, %v2298_v47  ;;  %v1779_v29 = vunpack.c.3.s8 %v1435_v21  ;;  %v2287_v12 = vcvt.s32.f32 %v1775_v19  ;;  %v1903_v46 = vunpack.c.2.s8 %v6176_v39 }
 0x1bb   :  { %v3261_v22 = vpack.c.bf16 %v2961_v49, %v2957_v51  ;;  %v2956_v37 = vmul.f32 %v5573_v40, %v2422_v41  ;;  %v2960_v59 = vmul.f32 %v5573_v40, %v2426_v55  ;;  %v1907_v50 = vunpack.c.3.s8 %v6176_v39  ;;  %v1431_v41 = vld [vmem:[#allocation5 + $0x208] sm:$0xff] }
 0x1bc   :  { %v3196_v43 = vpack.c.bf16 %v2832_v38, %v2828_v36  ;;  %v2291_v56 = vcvt.s32.f32 %v1779_v29  ;;  %v2821_v1 = vmul.f32 %v5553_v20, %v2287_v12  ;;  %v2415_v58 = vcvt.s32.f32 %v1903_v46 }
 0x1bd   :  { %3459 = vmatprep.subr.bf16.mxu1 %v3261_v22  ;;  %v3260_v11 = vpack.c.bf16 %v2960_v59, %v2956_v37  ;;  %v2419_v23 = vcvt.s32.f32 %v1907_v50  ;;  %v1774_v2 = vunpack.c.2.s8 %v1434_v63  ;;  %v1778_v31 = vunpack.c.3.s8 %v1434_v63  ;;  %v6198_v50 = vld [vmem:[#allocation5 + $0x308] sm:$0xff] }
 0x1be   :  { %3419 = vmatpush1.bf16.msra.mxu0 %v3196_v43  ;;  %v2825_v48 = vmul.f32 %v5553_v20, %v2291_v56  ;;  %v2949_v34 = vmul.f32 %v5553_v20, %v2415_v58  ;;  %v1902_v14 = vunpack.c.2.s8 %v1466_v42  ;;  %v1906_v45 = vunpack.c.3.s8 %v1466_v42 }
 0x1bf   :  { %3460 = vmatpush1.bf16.msra.mxu1 %v3260_v11  ;;  %v2953_v53 = vmul.f32 %v5553_v20, %v2419_v23  ;;  %v2286_v60 = vcvt.s32.f32 %v1774_v2  ;;  %v2290_v28 = vcvt.s32.f32 %v1778_v31  ;;  %v1767_v13 = vunpack.c.0.s8 %v1435_v21 }
 0x1c0   :  { %v3193_v35 = vpack.c.bf16 %v2825_v48, %v2821_v1  ;;  %v2414_v62 = vcvt.s32.f32 %v1902_v14  ;;  %v2418_v4 = vcvt.s32.f32 %v1906_v45  ;;  %v1771_v18 = vunpack.c.1.s8 %v1435_v21 }
 0x1c1   :  { %v3257_v26 = vpack.c.bf16 %v2953_v53, %v2949_v34  ;;  %v2820_v25 = vmul.f32 %v5573_v40, %v2286_v60  ;;  %v2824_v27 = vmul.f32 %v5573_v40, %v2290_v28  ;;  %v2279_v17 = vcvt.s32.f32 %v1767_v13  ;;  %v1430_v34 = vld [vmem:[#allocation5 + $0x200] sm:$0xff] }
 0x1c2   :  { %3420 = vmatprep.subr.bf16.mxu0 %v3193_v35  ;;  %v2948_v0 = vmul.f32 %v5573_v40, %v2414_v62  ;;  %v2952_v61 = vmul.f32 %v5573_v40, %v2418_v4  ;;  %v2283_v51 = vcvt.s32.f32 %v1771_v18  ;;  %v1895_v47 = vunpack.c.0.s8 %v6176_v39  ;;  %v1462_v28 = vld [vmem:[#allocation5 + $0x300] sm:$0xff] }
 0x1c3   :  { %3461 = vmatprep.subr.bf16.mxu1 %v3257_v26  ;;  %v3192_v19 = vpack.c.bf16 %v2824_v27, %v2820_v25  ;;  %v2813_v49 = vmul.f32 %v5553_v20, %v2279_v17  ;;  %v1899_v21 = vunpack.c.1.s8 %v6176_v39  ;;  %v1766_v36 = vunpack.c.0.s8 %v1434_v63 }
 0x1c4   :  { %v3256_v55 = vpack.c.bf16 %v2952_v61, %v2948_v0  ;;  %v2817_v38 = vmul.f32 %v5553_v20, %v2283_v51  ;;  %v2407_v29 = vcvt.s32.f32 %v1895_v47  ;;  %v1770_v12 = vunpack.c.1.s8 %v1434_v63 }
 0x1c5   :  { %3421 = vmatpush1.bf16.msra.mxu0 %v3192_v19  ;;  %v2411_v46 = vcvt.s32.f32 %v1899_v21  ;;  %v2278_v22 = vcvt.s32.f32 %v1766_v36  ;;  %v1894_v37 = vunpack.c.0.s8 %v1466_v42  ;;  %v1898_v59 = vunpack.c.1.s8 %v1466_v42 }
 0x1c6   :  { %3462 = vmatpush1.bf16.msra.mxu1 %v3256_v55  ;;  %v3189_v43 = vpack.c.bf16 %v2817_v38, %v2813_v49  ;;  %v2941_v56 = vmul.f32 %v5553_v20, %v2407_v29  ;;  %v2282_v1 = vcvt.s32.f32 %v1770_v12  ;;  %v1759_v39 = vunpack.c.2.s8 %v1431_v41 }
 0x1c7   :  { %v2945_v58 = vmul.f32 %v5553_v20, %v2411_v46  ;;  %v2812_v11 = vmul.f32 %v5573_v40, %v2278_v22  ;;  %v2406_v23 = vcvt.s32.f32 %v1894_v37  ;;  %v2410_v2 = vcvt.s32.f32 %v1898_v59 }
 0x1c8   :  { %3422 = vmatprep.subr.bf16.mxu0 %v3189_v43  ;;  %v2816_v63 = vmul.f32 %v5573_v40, %v2282_v1  ;;  %v1763_v31 = vunpack.c.3.s8 %v1431_v41  ;;  %v2271_v48 = vcvt.s32.f32 %v1759_v39  ;;  %v1887_v42 = vunpack.c.2.s8 %v6198_v50 }
 0x1c9   :  { %v3253_v14 = vpack.c.bf16 %v2945_v58, %v2941_v56  ;;  %v2940_v45 = vmul.f32 %v5573_v40, %v2406_v23  ;;  %v2944_v53 = vmul.f32 %v5573_v40, %v2410_v2  ;;  %v1891_v60 = vunpack.c.3.s8 %v6198_v50  ;;  %v1459_v23 = vld [vmem:[#allocation5 + $0x2e8] sm:$0xff] }
 0x1ca   :  { %v3188_v13 = vpack.c.bf16 %v2816_v63, %v2812_v11  ;;  %v2275_v35 = vcvt.s32.f32 %v1763_v31  ;;  %v2805_v62 = vmul.f32 %v5553_v20, %v2271_v48  ;;  %v2399_v4 = vcvt.s32.f32 %v1887_v42 }
 0x1cb   :  { %3463 = vmatprep.subr.bf16.mxu1 %v3253_v14  ;;  %v3252_v18 = vpack.c.bf16 %v2944_v53, %v2940_v45  ;;  %v2403_v26 = vcvt.s32.f32 %v1891_v60  ;;  %v1758_v25 = vunpack.c.2.s8 %v1430_v34  ;;  %v1762_v27 = vunpack.c.3.s8 %v1430_v34  ;;  %v6220_v60 = vld [vmem:[#allocation5 + $0x3e8] sm:$0xff] }
 0x1cc   :  { %3423 = vmatpush1.bf16.msra.mxu0 %v3188_v13  ;;  %v2809_v17 = vmul.f32 %v5553_v20, %v2275_v35  ;;  %v2933_v0 = vmul.f32 %v5553_v20, %v2399_v4  ;;  %v1886_v61 = vunpack.c.2.s8 %v1462_v28  ;;  %v1890_v51 = vunpack.c.3.s8 %v1462_v28 }
 0x1cd   :  { %3464 = vmatpush1.bf16.msra.mxu1 %v3252_v18  ;;  %v2937_v47 = vmul.f32 %v5553_v20, %v2403_v26  ;;  %v2270_v19 = vcvt.s32.f32 %v1758_v25  ;;  %v2274_v49 = vcvt.s32.f32 %v1762_v27  ;;  %v1751_v21 = vunpack.c.0.s8 %v1431_v41 }
 0x1ce   :  { %v3185_v36 = vpack.c.bf16 %v2809_v17, %v2805_v62  ;;  %v2398_v55 = vcvt.s32.f32 %v1886_v61  ;;  %v2402_v38 = vcvt.s32.f32 %v1890_v51  ;;  %v1755_v29 = vunpack.c.1.s8 %v1431_v41 }
 0x1cf   :  { %v3249_v12 = vpack.c.bf16 %v2937_v47, %v2933_v0  ;;  %v2804_v46 = vmul.f32 %v5573_v40, %v2270_v19  ;;  %v2808_v22 = vmul.f32 %v5573_v40, %v2274_v49  ;;  %v2263_v37 = vcvt.s32.f32 %v1751_v21  ;;  %v1458_v0 = vld [vmem:[#allocation5 + $0x2e0] sm:$0xff] }
 0x1d0   :  { %3424 = vmatprep.subr.bf16.mxu0 %v3185_v36  ;;  %v2932_v59 = vmul.f32 %v5573_v40, %v2398_v55  ;;  %v2936_v43 = vmul.f32 %v5573_v40, %v2402_v38  ;;  %v2267_v56 = vcvt.s32.f32 %v1755_v29  ;;  %v1879_v1 = vunpack.c.0.s8 %v6198_v50  ;;  %v1490_v49 = vld [vmem:[#allocation5 + $0x3e0] sm:$0xff] }
 0x1d1   :  { %3465 = vmatprep.subr.bf16.mxu1 %v3249_v12  ;;  %v3184_v39 = vpack.c.bf16 %v2808_v22, %v2804_v46  ;;  %v2797_v58 = vmul.f32 %v5553_v20, %v2263_v37  ;;  %v1883_v41 = vunpack.c.1.s8 %v6198_v50  ;;  %v1750_v11 = vunpack.c.0.s8 %v1430_v34 }
 0x1d2   :  { %v3248_v2 = vpack.c.bf16 %v2936_v43, %v2932_v59  ;;  %v2801_v63 = vmul.f32 %v5553_v20, %v2267_v56  ;;  %v2391_v31 = vcvt.s32.f32 %v1879_v1  ;;  %v1754_v48 = vunpack.c.1.s8 %v1430_v34 }
 0x1d3   :  { %3425 = vmatpush1.bf16.msra.mxu0 %v3184_v39  ;;  %v2395_v42 = vcvt.s32.f32 %v1883_v41  ;;  %v2262_v14 = vcvt.s32.f32 %v1750_v11  ;;  %v1878_v45 = vunpack.c.0.s8 %v1462_v28  ;;  %v1882_v53 = vunpack.c.1.s8 %v1462_v28 }
 0x1d4   :  { %3466 = vmatpush1.bf16.msra.mxu1 %v3248_v2  ;;  %v3181_v13 = vpack.c.bf16 %v2801_v63, %v2797_v58  ;;  %v2925_v35 = vmul.f32 %v5553_v20, %v2391_v31  ;;  %v2266_v62 = vcvt.s32.f32 %v1754_v48  ;;  %v1871_v50 = vunpack.c.2.s8 %v1459_v23 }
 0x1d5   :  { %v2929_v4 = vmul.f32 %v5553_v20, %v2395_v42  ;;  %v2796_v18 = vmul.f32 %v5573_v40, %v2262_v14  ;;  %v2390_v26 = vcvt.s32.f32 %v1878_v45  ;;  %v2394_v25 = vcvt.s32.f32 %v1882_v53 }
 0x1d6   :  { %3426 = vmatprep.subr.bf16.mxu0 %v3181_v13  ;;  %v2800_v34 = vmul.f32 %v5573_v40, %v2266_v62  ;;  %v1875_v27 = vunpack.c.3.s8 %v1459_v23  ;;  %v2383_v17 = vcvt.s32.f32 %v1871_v50  ;;  %v1999_v28 = vunpack.c.2.s8 %v6220_v60 }
 0x1d7   :  { %v3245_v61 = vpack.c.bf16 %v2929_v4, %v2925_v35  ;;  %v2924_v51 = vmul.f32 %v5573_v40, %v2390_v26  ;;  %v2928_v47 = vmul.f32 %v5573_v40, %v2394_v25  ;;  %v2003_v19 = vunpack.c.3.s8 %v6220_v60  ;;  %v1455_v26 = vld [vmem:[#allocation5 + $0x2c8] sm:$0xff] }
 0x1d8   :  { %v3180_v21 = vpack.c.bf16 %v2800_v34, %v2796_v18  ;;  %v2387_v36 = vcvt.s32.f32 %v1875_v27  ;;  %v2917_v55 = vmul.f32 %v5553_v20, %v2383_v17  ;;  %v2511_v38 = vcvt.s32.f32 %v1999_v28 }
 0x1d9   :  { %3467 = vmatprep.subr.bf16.mxu1 %v3245_v61  ;;  %v3244_v29 = vpack.c.bf16 %v2928_v47, %v2924_v51  ;;  %v2515_v12 = vcvt.s32.f32 %v2003_v19  ;;  %v1870_v46 = vunpack.c.2.s8 %v1458_v0  ;;  %v1874_v22 = vunpack.c.3.s8 %v1458_v0  ;;  %v6242_v19 = vld [vmem:[#allocation5 + $0x3c8] sm:$0xff] }
 0x1da   :  { %3427 = vmatpush1.bf16.msra.mxu0 %v3180_v21  ;;  %v2921_v37 = vmul.f32 %v5553_v20, %v2387_v36  ;;  %v3045_v59 = vmul.f32 %v5553_v20, %v2511_v38  ;;  %v1998_v43 = vunpack.c.2.s8 %v1490_v49  ;;  %v2002_v56 = vunpack.c.3.s8 %v1490_v49 }
 0x1db   :  { %3468 = vmatpush1.bf16.msra.mxu1 %v3244_v29  ;;  %v3049_v1 = vmul.f32 %v5553_v20, %v2515_v12  ;;  %v2382_v39 = vcvt.s32.f32 %v1870_v46  ;;  %v2386_v58 = vcvt.s32.f32 %v1874_v22  ;;  %v1863_v41 = vunpack.c.0.s8 %v1459_v23 }
 0x1dc   :  { %v3241_v11 = vpack.c.bf16 %v2921_v37, %v2917_v55  ;;  %v2510_v2 = vcvt.s32.f32 %v1998_v43  ;;  %v2514_v63 = vcvt.s32.f32 %v2002_v56  ;;  %v1867_v31 = vunpack.c.1.s8 %v1459_v23 }
 0x1dd   :  { %v3305_v48 = vpack.c.bf16 %v3049_v1, %v3045_v59  ;;  %v2916_v42 = vmul.f32 %v5573_v40, %v2382_v39  ;;  %v2920_v14 = vmul.f32 %v5573_v40, %v2386_v58  ;;  %v2375_v45 = vcvt.s32.f32 %v1863_v41  ;;  %v1454_v59 = vld [vmem:[#allocation5 + $0x2c0] sm:$0xff] }
 0x1de   :  { %3428 = vmatprep.subr.bf16.mxu0 %v3241_v11  ;;  %v3044_v53 = vmul.f32 %v5573_v40, %v2510_v2  ;;  %v3048_v13 = vmul.f32 %v5573_v40, %v2514_v63  ;;  %v2379_v35 = vcvt.s32.f32 %v1867_v31  ;;  %v1991_v62 = vunpack.c.0.s8 %v6220_v60  ;;  %v1486_v58 = vld [vmem:[#allocation5 + $0x3c0] sm:$0xff] }
 0x1df   :  { %3469 = vmatprep.subr.bf16.mxu1 %v3305_v48  ;;  %v3240_v50 = vpack.c.bf16 %v2920_v14, %v2916_v42  ;;  %v2909_v4 = vmul.f32 %v5553_v20, %v2375_v45  ;;  %v1995_v23 = vunpack.c.1.s8 %v6220_v60  ;;  %v1862_v18 = vunpack.c.0.s8 %v1458_v0 }
 0x1e0   :  { %v3304_v25 = vpack.c.bf16 %v3048_v13, %v3044_v53  ;;  %v2913_v34 = vmul.f32 %v5553_v20, %v2379_v35  ;;  %v2503_v27 = vcvt.s32.f32 %v1991_v62  ;;  %v1866_v17 = vunpack.c.1.s8 %v1458_v0 }
 0x1e1   :  { %3429 = vmatpush2.bf16.msra.mxu0 %v3240_v50  ;;  %v2507_v28 = vcvt.s32.f32 %v1995_v23  ;;  %v2374_v61 = vcvt.s32.f32 %v1862_v18  ;;  %v1990_v51 = vunpack.c.0.s8 %v1490_v49  ;;  %v1994_v47 = vunpack.c.1.s8 %v1490_v49 }
 0x1e2   :  { %3470 = vmatpush2.bf16.msra.mxu1 %v3304_v25  ;;  %v3237_v21 = vpack.c.bf16 %v2913_v34, %v2909_v4  ;;  %v3037_v36 = vmul.f32 %v5553_v20, %v2503_v27  ;;  %v2378_v55 = vcvt.s32.f32 %v1866_v17  ;;  %v1855_v60 = vunpack.c.2.s8 %v1455_v26 }
 0x1e3   :  { %v3041_v38 = vmul.f32 %v5553_v20, %v2507_v28  ;;  %v2908_v29 = vmul.f32 %v5573_v40, %v2374_v61  ;;  %v2502_v12 = vcvt.s32.f32 %v1990_v51  ;;  %v2506_v46 = vcvt.s32.f32 %v1994_v47 }
 0x1e4   :  { %3430 = vmatprep.subr.bf16.mxu0 %v3237_v21  ;;  %v2912_v0 = vmul.f32 %v5573_v40, %v2378_v55  ;;  %v1859_v22 = vunpack.c.3.s8 %v1455_v26  ;;  %v2367_v37 = vcvt.s32.f32 %v1855_v60  ;;  %v1983_v49 = vunpack.c.2.s8 %v6242_v19 }
 0x1e5   :  { %v3301_v43 = vpack.c.bf16 %v3041_v38, %v3037_v36  ;;  %v3036_v56 = vmul.f32 %v5573_v40, %v2502_v12  ;;  %v3040_v1 = vmul.f32 %v5573_v40, %v2506_v46  ;;  %v1987_v39 = vunpack.c.3.s8 %v6242_v19  ;;  %v6263_v12 = vld [vmem:[#allocation5 + $0x2a8] sm:$0xff] }
 0x1e6   :  { %v3236_v41 = vpack.c.bf16 %v2912_v0, %v2908_v29  ;;  %v2371_v11 = vcvt.s32.f32 %v1859_v22  ;;  %v2901_v2 = vmul.f32 %v5553_v20, %v2367_v37  ;;  %v2495_v63 = vcvt.s32.f32 %v1983_v49 }
 0x1e7   :  { %3471 = vmatprep.subr.bf16.mxu1 %v3301_v43  ;;  %v3300_v31 = vpack.c.bf16 %v3040_v1, %v3036_v56  ;;  %v2499_v48 = vcvt.s32.f32 %v1987_v39  ;;  %v1854_v42 = vunpack.c.2.s8 %v1454_v59  ;;  %v1858_v14 = vunpack.c.3.s8 %v1454_v59  ;;  %v6266_v39 = vld [vmem:[#allocation5 + $0x3a8] sm:$0xff] }
 0x1e8   :  { %3431 = vmatpush2.bf16.msra.mxu0 %v3236_v41  ;;  %v2905_v45 = vmul.f32 %v5553_v20, %v2371_v11  ;;  %v3029_v53 = vmul.f32 %v5553_v20, %v2495_v63  ;;  %v1982_v13 = vunpack.c.2.s8 %v1486_v58  ;;  %v1986_v35 = vunpack.c.3.s8 %v1486_v58 }
 0x1e9   :  { %3472 = vmatpush2.bf16.msra.mxu1 %v3300_v31  ;;  %v3033_v62 = vmul.f32 %v5553_v20, %v2499_v48  ;;  %v2366_v50 = vcvt.s32.f32 %v1854_v42  ;;  %v2370_v4 = vcvt.s32.f32 %v1858_v14  ;;  %v1847_v23 = vunpack.c.0.s8 %v1455_v26 }
 0x1ea   :  { %v3233_v18 = vpack.c.bf16 %v2905_v45, %v2901_v2  ;;  %v2494_v25 = vcvt.s32.f32 %v1982_v13  ;;  %v2498_v34 = vcvt.s32.f32 %v1986_v35  ;;  %v1851_v27 = vunpack.c.1.s8 %v1455_v26  ;;  %v6277_v13 = vld [vmem:[#allocation5 + $0x2a0] sm:$0xff] }
 0x1eb   :  { %v3297_v17 = vpack.c.bf16 %v3033_v62, %v3029_v53  ;;  %v2900_v28 = vmul.f32 %v5573_v40, %v2366_v50  ;;  %v2904_v61 = vmul.f32 %v5573_v40, %v2370_v4  ;;  %v2359_v51 = vcvt.s32.f32 %v1847_v23  ;;  %v6282_v23 = vld [vmem:[#allocation5 + $0x3a0] sm:$0xff] }
 0x1ec   :  { %3432 = vmatprep.subr.bf16.mxu0 %v3233_v18  ;;  %v3028_v47 = vmul.f32 %v5573_v40, %v2494_v25  ;;  %v3032_v21 = vmul.f32 %v5573_v40, %v2498_v34  ;;  %v2363_v36 = vcvt.s32.f32 %v1851_v27  ;;  %v1975_v55 = vunpack.c.0.s8 %v6242_v19 }
 0x1ed   :  { %3473 = vmatprep.subr.bf16.mxu1 %v3297_v17  ;;  %v3232_v60 = vpack.c.bf16 %v2904_v61, %v2900_v28  ;;  %v2893_v38 = vmul.f32 %v5553_v20, %v2359_v51  ;;  %v1979_v26 = vunpack.c.1.s8 %v6242_v19  ;;  %v1846_v29 = vunpack.c.0.s8 %v1454_v59 }
 0x1ee   :  { %v3296_v46 = vpack.c.bf16 %v3032_v21, %v3028_v47  ;;  %v2897_v0 = vmul.f32 %v5553_v20, %v2363_v36  ;;  %v2487_v22 = vcvt.s32.f32 %v1975_v55  ;;  %v1850_v37 = vunpack.c.1.s8 %v1454_v59 }
 0x1ef   :  { %3433 = vmatpush2.bf16.msra.mxu0 %v3232_v60  ;;  %v2491_v49 = vcvt.s32.f32 %v1979_v26  ;;  %v2358_v43 = vcvt.s32.f32 %v1846_v29  ;;  %v1974_v56 = vunpack.c.0.s8 %v1486_v58  ;;  %v1978_v1 = vunpack.c.1.s8 %v1486_v58 }
 0x1f0   :  { %3474 = vmatpush2.bf16.msra.mxu1 %v3296_v46  ;;  %v3229_v41 = vpack.c.bf16 %v2897_v0, %v2893_v38  ;;  %v3021_v11 = vmul.f32 %v5553_v20, %v2487_v22  ;;  %v2362_v19 = vcvt.s32.f32 %v1850_v37  ;;  %v1839_v2 = vunpack.c.2.s8 %v6263_v12 }
 0x1f1   :  { %v3025_v63 = vmul.f32 %v5553_v20, %v2491_v49  ;;  %v2892_v31 = vmul.f32 %v5573_v40, %v2358_v43  ;;  %v2486_v48 = vcvt.s32.f32 %v1974_v56  ;;  %v2490_v59 = vcvt.s32.f32 %v1978_v1  ;;  %v6272_v42 = vpop.f32.mrf.mxu0 }
 0x1f2   :  { %3434 = vmatprep.subr.bf16.mxu0 %v3229_v41  ;;  %v2896_v58 = vmul.f32 %v5573_v40, %v2362_v19  ;;  %v1843_v14 = vunpack.c.3.s8 %v6263_v12  ;;  %v2351_v45 = vcvt.s32.f32 %v1839_v2  ;;  %v1967_v53 = vunpack.c.2.s8 %v6266_v39 }
 0x1f3   :  { %v3293_v35 = vpack.c.bf16 %v3025_v63, %v3021_v11  ;;  %v3020_v62 = vmul.f32 %v5573_v40, %v2486_v48  ;;  %v3024_v50 = vmul.f32 %v5573_v40, %v2490_v59  ;;  %v1971_v4 = vunpack.c.3.s8 %v6266_v39  ;;  %v6284_v18 = vpop.f32.mrf.mxu1  ;;  %v6286_v25 = vpop.f32.mrf.mxu0 }
 0x1f4   :  { %v3228_v34 = vpack.c.bf16 %v2896_v58, %v2892_v31  ;;  %v2355_v27 = vcvt.s32.f32 %v1843_v14  ;;  %v2885_v17 = vmul.f32 %v5553_v20, %v2351_v45  ;;  %v2479_v28 = vcvt.s32.f32 %v1967_v53 }
 0x1f5   :  { %3475 = vmatprep.subr.bf16.mxu1 %v3293_v35  ;;  %v3292_v61 = vpack.c.bf16 %v3024_v50, %v3020_v62  ;;  %v2483_v51 = vcvt.s32.f32 %v1971_v4  ;;  %v1838_v47 = vunpack.c.2.s8 %v6277_v13  ;;  %v1842_v21 = vunpack.c.3.s8 %v6277_v13  ;;  %v6291_v36 = vpop.f32.mrf.mxu1  ;;  %v1306_v55 = vpop.f32.mrf.mxu0 }
 0x1f6   :  { %3435 = vmatpush2.bf16.msra.mxu0 %v3228_v34  ;;  %v2889_v60 = vmul.f32 %v5553_v20, %v2355_v27  ;;  %v3013_v38 = vmul.f32 %v5553_v20, %v2479_v28  ;;  %v1966_v26 = vunpack.c.2.s8 %v6282_v23  ;;  %v1970_v29 = vunpack.c.3.s8 %v6282_v23 }
 0x1f7   :  { %3476 = vmatpush2.bf16.msra.mxu1 %v3292_v61  ;;  %v3017_v46 = vmul.f32 %v5553_v20, %v2483_v51  ;;  %v2350_v0 = vcvt.s32.f32 %v1838_v47  ;;  %v2354_v22 = vcvt.s32.f32 %v1842_v21  ;;  %v1831_v37 = vunpack.c.0.s8 %v6263_v12  ;;  %v1347_v49 = vpop.f32.mrf.mxu1  ;;  %v1307_v43 = vpop.f32.mrf.mxu0  ;;  %v6312_v47 = vld [vmem:[#allocation5 + $0x288] sm:$0xff] }
 0x1f8   :  { %v3225_v56 = vpack.c.bf16 %v2889_v60, %v2885_v17  ;;  %v2478_v1 = vcvt.s32.f32 %v1966_v26  ;;  %v2482_v41 = vcvt.s32.f32 %v1970_v29  ;;  %v1835_v11 = vunpack.c.1.s8 %v6263_v12  ;;  %v5288_v60 = vld [vmem:[%s6918_s3] sm:$0xff]  ;;  %v6327_v49 = vld [vmem:[#allocation5 + $0x388] sm:$0xff] }
 0x1f9   :  { %v3289_v19 = vpack.c.bf16 %v3017_v46, %v3013_v38  ;;  %v2884_v2 = vmul.f32 %v5573_v40, %v2350_v0  ;;  %v2888_v63 = vmul.f32 %v5573_v40, %v2354_v22  ;;  %v2343_v31 = vcvt.s32.f32 %v1831_v37  ;;  %v1348_v48 = vpop.f32.mrf.mxu1 }
 0x1fa   :  { %3436 = vmatprep.subr.bf16.mxu0 %v3225_v56  ;;  %v3012_v59 = vmul.f32 %v5573_v40, %v2478_v1  ;;  %v3016_v58 = vmul.f32 %v5573_v40, %v2482_v41  ;;  %v2347_v14 = vcvt.s32.f32 %v1835_v11  ;;  %v1959_v45 = vunpack.c.0.s8 %v6266_v39  ;;  %v1446_v48 = vld [vmem:[#allocation5 + $0x280] sm:$0xff] }
 0x1fb   :  { %3477 = vmatprep.subr.bf16.mxu1 %v3289_v19  ;;  %v3224_v53 = vpack.c.bf16 %v2888_v63, %v2884_v2  ;;  %v2877_v35 = vmul.f32 %v5553_v20, %v2343_v31  ;;  %v1963_v12 = vunpack.c.1.s8 %v6266_v39  ;;  %v1830_v62 = vunpack.c.0.s8 %v6277_v13 }
 0x1fc   :  { %v3288_v50 = vpack.c.bf16 %v3016_v58, %v3012_v59  ;;  %v2881_v4 = vmul.f32 %v5553_v20, %v2347_v14  ;;  %v2471_v34 = vcvt.s32.f32 %v1959_v45  ;;  %v1834_v27 = vunpack.c.1.s8 %v6277_v13 }
 0x1fd   :  { %3437 = vmatpush2.bf16.msra.mxu0 %v3224_v53  ;;  %v2475_v17 = vcvt.s32.f32 %v1963_v12  ;;  %v2342_v28 = vcvt.s32.f32 %v1830_v62  ;;  %v1958_v61 = vunpack.c.0.s8 %v6282_v23  ;;  %v1962_v51 = vunpack.c.1.s8 %v6282_v23  ;;  %v1478_v62 = vld [vmem:[#allocation5 + $0x380] sm:$0xff] }
 0x1fe   :  { %3478 = vmatpush2.bf16.msra.mxu1 %v3288_v50  ;;  %v3221_v21 = vpack.c.bf16 %v2881_v4, %v2877_v35  ;;  %v3005_v39 = vmul.f32 %v5553_v20, %v2471_v34  ;;  %v2346_v55 = vcvt.s32.f32 %v1834_v27  ;;  %v1140_v13 = vrot.slane %v5288_v60, %v713_v15 }
 0x1ff   :  { %v3009_v38 = vmul.f32 %v5553_v20, %v2475_v17  ;;  %v2876_v26 = vmul.f32 %v5573_v40, %v2342_v28  ;;  %v2470_v29 = vcvt.s32.f32 %v1958_v61  ;;  %v2474_v23 = vcvt.s32.f32 %v1962_v51 }
 0x200   :  { %3438 = vmatprep.subr.bf16.mxu0 %v3221_v21  ;;  %v2880_v46 = vmul.f32 %v5573_v40, %v2346_v55  ;;  %v1303_v0 = vadd.f32 %v6272_v42, %v1140_v13  ;;  %v1148_v22 = vrot.slane %v5288_v60, %v721_v16  ;;  %v1823_v37 = vunpack.c.2.s8 %v6312_v47 }
 0x201   :  { %v3285_v43 = vpack.c.bf16 %v3009_v38, %v3005_v39  ;;  %v3004_v15 = vmul.f32 %v5573_v40, %v2470_v29  ;;  %v3008_v56 = vmul.f32 %v5573_v40, %v2474_v23  ;;  %v1827_v1 = vunpack.c.3.s8 %v6312_v47 }
 0x202   :  { %v3220_v41 = vpack.c.bf16 %v2880_v46, %v2876_v26  ;;  %v1354_v11 = vmax.f32 %v1303_v0, 0.0  ;;  %v1344_v19 = vadd.f32 %v6284_v18, %v1148_v22  ;;  %v2335_v2 = vcvt.s32.f32 %v1823_v37 }
 0x203   :  { %3479 = vmatprep.subr.bf16.mxu1 %v3285_v43  ;;  %v3284_v42 = vpack.c.bf16 %v3008_v56, %v3004_v15  ;;  %v2339_v63 = vcvt.s32.f32 %v1827_v1  ;;  %v1951_v16 = vunpack.c.2.s8 %v6327_v49  ;;  %v1955_v31 = vunpack.c.3.s8 %v6327_v49 }
 0x204   :  { %3439 = vmatpush2.bf16.msra.mxu0 %v3220_v41  ;;  %v6335_v59 = vpack.c.bf16 %v1354_v11, %v1354_v11  ;;  %v1356_v58 = vmax.f32 %v1344_v19, 0.0  ;;  %v2869_v14 = vmul.f32 %v5553_v20, %v2335_v2  ;;  %v1144_v45 = vrot.slane %v5288_v60, %v717_v9 }
 0x205   :  { %3480 = vmatpush2.bf16.msra.mxu1 %v3284_v42  ;;  %v2873_v18 = vmul.f32 %v5553_v20, %v2339_v63  ;;  %v2463_v53 = vcvt.s32.f32 %v1951_v16  ;;  %v2467_v35 = vcvt.s32.f32 %v1955_v31  ;;  %v1152_v12 = vrot.slane %v5288_v60, %v725_v10  ;;  %v6364_v63 = vld [vmem:[#allocation5 + $0x78] sm:$0xff] }
 0x206   :  { %v6343_v50 = vpack.c.bf16 %v1356_v58, %v1356_v58  ;;  %v1305_v4 = vadd.f32 %v6286_v25, %v1144_v45  ;;  %v1822_v34 = vunpack.c.2.s8 %v1446_v48  ;;  %v1826_v27 = vunpack.c.3.s8 %v1446_v48 }
 0x207   :  { %v3217_v17 = vpack.c.bf16 %v2873_v18, %v2869_v14  ;;  %v2997_v28 = vmul.f32 %v5553_v20, %v2463_v53  ;;  %v3001_v9 = vmul.f32 %v5553_v20, %v2467_v35  ;;  %v1346_v61 = vadd.f32 %v6291_v36, %v1152_v12  ;;  %v1413_v35 = vld [vmem:[#allocation5 + $0x178] sm:$0xff] }
 0x208   :  { %v1355_v51 = vmax.f32 %v1305_v4, 0.0  ;;  %v2334_v21 = vcvt.s32.f32 %v1822_v34  ;;  %v2338_v39 = vcvt.s32.f32 %v1826_v27  ;;  %v1950_v55 = vunpack.c.2.s8 %v1478_v62  ;;  %v6371_v27 = vld [vmem:[#allocation5 + $0x70] sm:$0xff] }
 0x209   :  { %3440 = vmatprep.subr.bf16.mxu0 %v3217_v17  ;;  %v3281_v3 = vpack.c.bf16 %v3001_v9, %v2997_v28  ;;  %v1357_v10 = vmax.f32 %v1346_v61, 0.0  ;;  %v1954_v60 = vunpack.c.3.s8 %v1478_v62  ;;  %v1815_v13 = vunpack.c.0.s8 %v6312_v47 }
 0x20a   :  { %v6350_v25 = vpack.c.bf16 %v1355_v51, %v1355_v51  ;;  %v2868_v38 = vmul.f32 %v5573_v40, %v2334_v21  ;;  %v2872_v26 = vmul.f32 %v5573_v40, %v2338_v39  ;;  %v2462_v29 = vcvt.s32.f32 %v1950_v55  ;;  %v1412_v39 = vld [vmem:[#allocation5 + $0x170] sm:$0xff] }
 0x20b   :  { %3481 = vmatprep.subr.bf16.mxu1 %v3281_v3  ;;  %v6354_v23 = vpack.c.bf16 %v1357_v10, %v1357_v10  ;;  %v2466_v36 = vcvt.s32.f32 %v1954_v60  ;;  %v1819_v46 = vunpack.c.1.s8 %v6312_v47  ;;  %v2327_v0 = vcvt.s32.f32 %v1815_v13 }
 0x20c   :  { %v3216_v22 = vpack.c.bf16 %v2872_v26, %v2868_v38  ;;  %v2996_v37 = vmul.f32 %v5573_v40, %v2462_v29  ;;  %v1943_v43 = vunpack.c.0.s8 %v6327_v49  ;;  %v1947_v15 = vunpack.c.1.s8 %v6327_v49  ;;  %3444 = vmatprep.mubr.bf16.mxu0 %v6350_v25 }
 0x20d   :  { %v3000_v56 = vmul.f32 %v5573_v40, %v2466_v36  ;;  %v2331_v1 = vcvt.s32.f32 %v1819_v46  ;;  %v2861_v41 = vmul.f32 %v5553_v20, %v2327_v0  ;;  %v1814_v11 = vunpack.c.0.s8 %v1446_v48  ;;  %3485 = vmatprep.mubr.bf16.mxu1 %v6354_v23 }
 0x20e   :  { %3441 = vmatpush2.bf16.msra.mxu0 %v3216_v22  ;;  %v2455_v47 = vcvt.s32.f32 %v1943_v43  ;;  %v2459_v19 = vcvt.s32.f32 %v1947_v15  ;;  %v1818_v2 = vunpack.c.1.s8 %v1446_v48  ;;  %v1942_v42 = vunpack.c.0.s8 %v1478_v62 }
 0x20f   :  { %v3280_v16 = vpack.c.bf16 %v3000_v56, %v2996_v37  ;;  %v2865_v49 = vmul.f32 %v5553_v20, %v2331_v1  ;;  %v2326_v31 = vcvt.s32.f32 %v1814_v11  ;;  %v1946_v58 = vunpack.c.1.s8 %v1478_v62 }
 0x210   :  { %v2989_v14 = vmul.f32 %v5553_v20, %v2455_v47  ;;  %v2993_v45 = vmul.f32 %v5553_v20, %v2459_v19  ;;  %v2330_v18 = vcvt.s32.f32 %v1818_v2  ;;  %v2454_v53 = vcvt.s32.f32 %v1942_v42 }
 0x211   :  { %3482 = vmatpush2.bf16.msra.mxu1 %v3280_v16  ;;  %v3213_v12 = vpack.c.bf16 %v2865_v49, %v2861_v41  ;;  %v2860_v4 = vmul.f32 %v5573_v40, %v2326_v31  ;;  %v2458_v48 = vcvt.s32.f32 %v1946_v58  ;;  %v1553_v34 = vunpack.c.2.s8 %v6364_v63 }
 0x212   :  { %v3277_v17 = vpack.c.bf16 %v2993_v45, %v2989_v14  ;;  %v2864_v28 = vmul.f32 %v5573_v40, %v2330_v18  ;;  %v2988_v62 = vmul.f32 %v5573_v40, %v2454_v53  ;;  %v1557_v9 = vunpack.c.3.s8 %v6364_v63 }
 0x213   :  { %3442 = vmatprep.subr.bf16.mxu0 %v3213_v12  ;;  %v2992_v20 = vmul.f32 %v5573_v40, %v2458_v48  ;;  %v2065_v61 = vcvt.s32.f32 %v1553_v34  ;;  %v1681_v51 = vunpack.c.2.s8 %v1413_v35  ;;  %v1685_v21 = vunpack.c.3.s8 %v1413_v35  ;;  %v1377_v34 = vld [vmem:[#allocation5 + $0x58] sm:$0xff] }
 0x214   :  { %3483 = vmatprep.subr.bf16.mxu1 %v3277_v17  ;;  %v3212_v55 = vpack.c.bf16 %v2864_v28, %v2860_v4  ;;  %v2069_v3 = vcvt.s32.f32 %v1557_v9  ;;  %v1552_v10 = vunpack.c.2.s8 %v6371_v27  ;;  %v1556_v60 = vunpack.c.3.s8 %v6371_v27 }
 0x215   :  { %v3276_v13 = vpack.c.bf16 %v2992_v20, %v2988_v62  ;;  %v2599_v38 = vmul.f32 %v5565_v30, %v2065_v61  ;;  %v2193_v26 = vcvt.s32.f32 %v1681_v51  ;;  %v2197_v29 = vcvt.s32.f32 %v1685_v21  ;;  %v1409_v51 = vld [vmem:[#allocation5 + $0x158] sm:$0xff] }
 0x216   :  { %3443 = vmatpush2.bf16.msra.mxu0 %v3212_v55  ;;  %v2603_v36 = vmul.f32 %v5565_v30, %v2069_v3  ;;  %v2064_v40 = vcvt.s32.f32 %v1552_v10  ;;  %v2068_v46 = vcvt.s32.f32 %v1556_v60  ;;  %v1680_v0 = vunpack.c.2.s8 %v1412_v39  ;;  %v1376_v3 = vld [vmem:[#allocation5 + $0x50] sm:$0xff] }
 0x217   :  { %3484 = vmatpush2.bf16.msra.mxu1 %v3276_v13  ;;  %v2727_v22 = vmul.f32 %v5565_v30, %v2193_v26  ;;  %v2731_v37 = vmul.f32 %v5565_v30, %v2197_v29  ;;  %v1684_v43 = vunpack.c.3.s8 %v1412_v39  ;;  %v1545_v15 = vunpack.c.0.s8 %v6364_v63 }
 0x218   :  { %v3083_v56 = vpack.c.bf16 %v2603_v36, %v2599_v38  ;;  %v2598_v1 = vmul.f32 %v5586_v52, %v2064_v40  ;;  %v2602_v41 = vmul.f32 %v5586_v52, %v2068_v46  ;;  %v2192_v11 = vcvt.s32.f32 %v1680_v0  ;;  %v1408_v40 = vld [vmem:[#allocation5 + $0x150] sm:$0xff] }
 0x219   :  { %v3147_v47 = vpack.c.bf16 %v2731_v37, %v2727_v22  ;;  %3445 = vmatmul.mubr.bf16.vlgmr.msra.gmra.mxu0 %v6335_v59  ;;  %v2196_v19 = vcvt.s32.f32 %v1684_v43  ;;  %v1549_v2 = vunpack.c.1.s8 %v6364_v63  ;;  %v2057_v42 = vcvt.s32.f32 %v1545_v15 }
 0x21a   :  { %3494 = vmatprep.subr.bf16.mxu0 %v3083_v56  ;;  %3486 = vmatmul.mubr.bf16.vlgmr.msra.gmra.mxu1 %v6343_v50  ;;  %v3082_v16 = vpack.c.bf16 %v2602_v41, %v2598_v1  ;;  %v2726_v49 = vmul.f32 %v5586_v52, %v2192_v11  ;;  %v1673_v31 = vunpack.c.0.s8 %v1413_v35  ;;  %v1677_v58 = vunpack.c.1.s8 %v1413_v35 }
 0x21b   :  { %3535 = vmatprep.subr.bf16.mxu1 %v3147_v47  ;;  %v2730_v14 = vmul.f32 %v5586_v52, %v2196_v19  ;;  %3526 = vmatprep.mubr.bf16.mxu0 %v6109_v57  ;;  %v2061_v45 = vcvt.s32.f32 %v1549_v2  ;;  %v2591_v18 = vmul.f32 %v5565_v30, %v2057_v42  ;;  %v1544_v53 = vunpack.c.0.s8 %v6371_v27 }
 0x21c   :  { %3495 = vmatpush1.bf16.msra.mxu0 %v3082_v16  ;;  %3567 = vmatprep.mubr.bf16.mxu1 %v6115_v32  ;;  %v2185_v63 = vcvt.s32.f32 %v1673_v31  ;;  %v2189_v12 = vcvt.s32.f32 %v1677_v58  ;;  %v1548_v4 = vunpack.c.1.s8 %v6371_v27  ;;  %v1672_v48 = vunpack.c.0.s8 %v1412_v39 }
 0x21d   :  { %v3146_v35 = vpack.c.bf16 %v2730_v14, %v2726_v49  ;;  %v2595_v17 = vmul.f32 %v5565_v30, %v2061_v45  ;;  %v2056_v28 = vcvt.s32.f32 %v1544_v53  ;;  %v1676_v62 = vunpack.c.1.s8 %v1412_v39 }
 0x21e   :  { %v2719_v57 = vmul.f32 %v5565_v30, %v2185_v63  ;;  %v2723_v9 = vmul.f32 %v5565_v30, %v2189_v12  ;;  %v2060_v20 = vcvt.s32.f32 %v1548_v4  ;;  %v2184_v61 = vcvt.s32.f32 %v1672_v48 }
 0x21f   :  { %3536 = vmatpush1.bf16.msra.mxu1 %v3146_v35  ;;  %v3079_v32 = vpack.c.bf16 %v2595_v17, %v2591_v18  ;;  %v2590_v21 = vmul.f32 %v5586_v52, %v2056_v28  ;;  %v2188_v55 = vcvt.s32.f32 %v1676_v62  ;;  %v1537_v27 = vunpack.c.2.s8 %v1377_v34 }
 0x220   :  { %v3143_v10 = vpack.c.bf16 %v2723_v9, %v2719_v57  ;;  %v2594_v60 = vmul.f32 %v5586_v52, %v2060_v20  ;;  %v2718_v13 = vmul.f32 %v5586_v52, %v2184_v61  ;;  %v1541_v39 = vunpack.c.3.s8 %v1377_v34 }
 0x221   :  { %3496 = vmatprep.subr.bf16.mxu0 %v3079_v32  ;;  %v2722_v38 = vmul.f32 %v5586_v52, %v2188_v55  ;;  %v2049_v26 = vcvt.s32.f32 %v1537_v27  ;;  %v1665_v29 = vunpack.c.2.s8 %v1409_v51  ;;  %v1669_v36 = vunpack.c.3.s8 %v1409_v51 }
 0x222   :  { %3537 = vmatprep.subr.bf16.mxu1 %v3143_v10  ;;  %v3078_v46 = vpack.c.bf16 %v2594_v60, %v2590_v21  ;;  %v2053_v0 = vcvt.s32.f32 %v1541_v39  ;;  %v1536_v22 = vunpack.c.2.s8 %v1376_v3  ;;  %v1540_v37 = vunpack.c.3.s8 %v1376_v3 }
 0x223   :  { %v3142_v43 = vpack.c.bf16 %v2722_v38, %v2718_v13  ;;  %v2583_v15 = vmul.f32 %v5565_v30, %v2049_v26  ;;  %v2177_v56 = vcvt.s32.f32 %v1665_v29  ;;  %v2181_v1 = vcvt.s32.f32 %v1669_v36  ;;  %v1405_v26 = vld [vmem:[#allocation5 + $0x138] sm:$0xff] }
 0x224   :  { %3497 = vmatpush1.bf16.msra.mxu0 %v3078_v46  ;;  %v2587_v41 = vmul.f32 %v5565_v30, %v2053_v0  ;;  %v2048_v11 = vcvt.s32.f32 %v1536_v22  ;;  %v2052_v47 = vcvt.s32.f32 %v1540_v37  ;;  %v1664_v19 = vunpack.c.2.s8 %v1408_v40  ;;  %v1372_v0 = vld [vmem:[#allocation5 + $0x30] sm:$0xff] }
 0x225   :  { %3538 = vmatpush1.bf16.msra.mxu1 %v3142_v43  ;;  %v2711_v2 = vmul.f32 %v5565_v30, %v2177_v56  ;;  %v2715_v42 = vmul.f32 %v5565_v30, %v2181_v1  ;;  %v1668_v16 = vunpack.c.3.s8 %v1408_v40  ;;  %v1529_v49 = vunpack.c.0.s8 %v1377_v34 }
 0x226   :  { %v3075_v31 = vpack.c.bf16 %v2587_v41, %v2583_v15  ;;  %v2582_v58 = vmul.f32 %v5586_v52, %v2048_v11  ;;  %v2586_v14 = vmul.f32 %v5586_v52, %v2052_v47  ;;  %v2176_v45 = vcvt.s32.f32 %v1664_v19  ;;  %v1404_v11 = vld [vmem:[#allocation5 + $0x130] sm:$0xff] }
 0x227   :  { %v3139_v18 = vpack.c.bf16 %v2715_v42, %v2711_v2  ;;  %v2180_v53 = vcvt.s32.f32 %v1668_v16  ;;  %v1533_v63 = vunpack.c.1.s8 %v1377_v34  ;;  %v2041_v12 = vcvt.s32.f32 %v1529_v49  ;;  %v1373_v34 = vld [vmem:[#allocation5 + $0x38] sm:$0xff] }
 0x228   :  { %3498 = vmatprep.subr.bf16.mxu0 %v3075_v31  ;;  %v3074_v4 = vpack.c.bf16 %v2586_v14, %v2582_v58  ;;  %v2710_v48 = vmul.f32 %v5586_v52, %v2176_v45  ;;  %v1657_v35 = vunpack.c.0.s8 %v1409_v51  ;;  %v1661_v17 = vunpack.c.1.s8 %v1409_v51 }
 0x229   :  { %3539 = vmatprep.subr.bf16.mxu1 %v3139_v18  ;;  %v2714_v28 = vmul.f32 %v5586_v52, %v2180_v53  ;;  %v2045_v62 = vcvt.s32.f32 %v1533_v63  ;;  %v2575_v57 = vmul.f32 %v5565_v30, %v2041_v12  ;;  %v1528_v9 = vunpack.c.0.s8 %v1376_v3 }
 0x22a   :  { %3499 = vmatpush1.bf16.msra.mxu0 %v3074_v4  ;;  %v2169_v20 = vcvt.s32.f32 %v1657_v35  ;;  %v2173_v61 = vcvt.s32.f32 %v1661_v17  ;;  %v1532_v32 = vunpack.c.1.s8 %v1376_v3  ;;  %v1656_v21 = vunpack.c.0.s8 %v1408_v40 }
 0x22b   :  { %v3138_v55 = vpack.c.bf16 %v2714_v28, %v2710_v48  ;;  %v2579_v27 = vmul.f32 %v5565_v30, %v2045_v62  ;;  %v2040_v10 = vcvt.s32.f32 %v1528_v9  ;;  %v1660_v60 = vunpack.c.1.s8 %v1408_v40 }
 0x22c   :  { %v2703_v51 = vmul.f32 %v5565_v30, %v2169_v20  ;;  %v2707_v13 = vmul.f32 %v5565_v30, %v2173_v61  ;;  %v2044_v39 = vcvt.s32.f32 %v1532_v32  ;;  %v2168_v38 = vcvt.s32.f32 %v1656_v21 }
 0x22d   :  { %3540 = vmatpush1.bf16.msra.mxu1 %v3138_v55  ;;  %v3071_v29 = vpack.c.bf16 %v2579_v27, %v2575_v57  ;;  %v2574_v36 = vmul.f32 %v5586_v52, %v2040_v10  ;;  %v2172_v46 = vcvt.s32.f32 %v1660_v60  ;;  %v1521_v3 = vunpack.c.2.s8 %v1373_v34 }
 0x22e   :  { %v3135_v22 = vpack.c.bf16 %v2707_v13, %v2703_v51  ;;  %v2578_v37 = vmul.f32 %v5586_v52, %v2044_v39  ;;  %v2702_v43 = vmul.f32 %v5586_v52, %v2168_v38  ;;  %v1525_v40 = vunpack.c.3.s8 %v1373_v34 }
 0x22f   :  { %3500 = vmatprep.subr.bf16.mxu0 %v3071_v29  ;;  %v2706_v15 = vmul.f32 %v5586_v52, %v2172_v46  ;;  %v2033_v56 = vcvt.s32.f32 %v1521_v3  ;;  %v1649_v1 = vunpack.c.2.s8 %v1405_v26  ;;  %v1653_v41 = vunpack.c.3.s8 %v1405_v26 }
 0x230   :  { %3541 = vmatprep.subr.bf16.mxu1 %v3135_v22  ;;  %v3070_v47 = vpack.c.bf16 %v2578_v37, %v2574_v36  ;;  %v2037_v19 = vcvt.s32.f32 %v1525_v40  ;;  %v1520_v2 = vunpack.c.2.s8 %v1372_v0  ;;  %v1524_v42 = vunpack.c.3.s8 %v1372_v0 }
 0x231   :  { %v3134_v16 = vpack.c.bf16 %v2706_v15, %v2702_v43  ;;  %v2567_v49 = vmul.f32 %v5565_v30, %v2033_v56  ;;  %v2161_v31 = vcvt.s32.f32 %v1649_v1  ;;  %v2165_v58 = vcvt.s32.f32 %v1653_v41  ;;  %v1401_v56 = vld [vmem:[#allocation5 + $0x118] sm:$0xff] }
 0x232   :  { %3501 = vmatpush1.bf16.msra.mxu0 %v3070_v47  ;;  %v2571_v14 = vmul.f32 %v5565_v30, %v2037_v19  ;;  %v2032_v45 = vcvt.s32.f32 %v1520_v2  ;;  %v2036_v18 = vcvt.s32.f32 %v1524_v42  ;;  %v1648_v53 = vunpack.c.2.s8 %v1404_v11  ;;  %v1368_v19 = vld [vmem:[#allocation5 + $0x10] sm:$0xff] }
 0x233   :  { %3542 = vmatpush1.bf16.msra.mxu1 %v3134_v16  ;;  %v2695_v63 = vmul.f32 %v5565_v30, %v2161_v31  ;;  %v2699_v12 = vmul.f32 %v5565_v30, %v2165_v58  ;;  %v1652_v4 = vunpack.c.3.s8 %v1404_v11  ;;  %v1513_v48 = vunpack.c.0.s8 %v1373_v34 }
 0x234   :  { %v3067_v35 = vpack.c.bf16 %v2571_v14, %v2567_v49  ;;  %v2566_v17 = vmul.f32 %v5586_v52, %v2032_v45  ;;  %v2570_v28 = vmul.f32 %v5586_v52, %v2036_v18  ;;  %v2160_v62 = vcvt.s32.f32 %v1648_v53  ;;  %v1400_v45 = vld [vmem:[#allocation5 + $0x110] sm:$0xff] }
 0x235   :  { %v3131_v57 = vpack.c.bf16 %v2699_v12, %v2695_v63  ;;  %v2164_v9 = vcvt.s32.f32 %v1652_v4  ;;  %v1517_v20 = vunpack.c.1.s8 %v1373_v34  ;;  %v2025_v61 = vcvt.s32.f32 %v1513_v48  ;;  %v1369_v34 = vld [vmem:[#allocation5 + $0x18] sm:$0xff] }
 0x236   :  { %3502 = vmatprep.subr.bf16.mxu0 %v3067_v35  ;;  %v3066_v32 = vpack.c.bf16 %v2570_v28, %v2566_v17  ;;  %v2694_v21 = vmul.f32 %v5586_v52, %v2160_v62  ;;  %v1641_v55 = vunpack.c.0.s8 %v1405_v26  ;;  %v1645_v27 = vunpack.c.1.s8 %v1405_v26 }
 0x237   :  { %3543 = vmatprep.subr.bf16.mxu1 %v3131_v57  ;;  %v2698_v10 = vmul.f32 %v5586_v52, %v2164_v9  ;;  %v2029_v60 = vcvt.s32.f32 %v1517_v20  ;;  %v2559_v51 = vmul.f32 %v5565_v30, %v2025_v61  ;;  %v1512_v13 = vunpack.c.0.s8 %v1372_v0 }
 0x238   :  { %3503 = vmatpush1.bf16.msra.mxu0 %v3066_v32  ;;  %v2153_v39 = vcvt.s32.f32 %v1641_v55  ;;  %v2157_v38 = vcvt.s32.f32 %v1645_v27  ;;  %v1516_v29 = vunpack.c.1.s8 %v1372_v0  ;;  %v1640_v36 = vunpack.c.0.s8 %v1404_v11 }
 0x239   :  { %v3130_v46 = vpack.c.bf16 %v2698_v10, %v2694_v21  ;;  %v2563_v3 = vmul.f32 %v5565_v30, %v2029_v60  ;;  %v2024_v22 = vcvt.s32.f32 %v1512_v13  ;;  %v1644_v37 = vunpack.c.1.s8 %v1404_v11 }
 0x23a   :  { %v2687_v26 = vmul.f32 %v5565_v30, %v2153_v39  ;;  %v2691_v43 = vmul.f32 %v5565_v30, %v2157_v38  ;;  %v2028_v40 = vcvt.s32.f32 %v1516_v29  ;;  %v2152_v15 = vcvt.s32.f32 %v1640_v36 }
 0x23b   :  { %3544 = vmatpush1.bf16.msra.mxu1 %v3130_v46  ;;  %v3063_v1 = vpack.c.bf16 %v2563_v3, %v2559_v51  ;;  %v2558_v41 = vmul.f32 %v5586_v52, %v2024_v22  ;;  %v2156_v47 = vcvt.s32.f32 %v1644_v37  ;;  %v1505_v0 = vunpack.c.2.s8 %v1369_v34 }
 0x23c   :  { %v3127_v2 = vpack.c.bf16 %v2691_v43, %v2687_v26  ;;  %v2562_v42 = vmul.f32 %v5586_v52, %v2028_v40  ;;  %v2686_v16 = vmul.f32 %v5586_v52, %v2152_v15  ;;  %v1509_v11 = vunpack.c.3.s8 %v1369_v34 }
 0x23d   :  { %3504 = vmatprep.subr.bf16.mxu0 %v3063_v1  ;;  %v2690_v49 = vmul.f32 %v5586_v52, %v2156_v47  ;;  %v2017_v31 = vcvt.s32.f32 %v1505_v0  ;;  %v1633_v58 = vunpack.c.2.s8 %v1401_v56  ;;  %v1637_v14 = vunpack.c.3.s8 %v1401_v56 }
 0x23e   :  { %3545 = vmatprep.subr.bf16.mxu1 %v3127_v2  ;;  %v3062_v18 = vpack.c.bf16 %v2562_v42, %v2558_v41  ;;  %v2021_v53 = vcvt.s32.f32 %v1509_v11  ;;  %v1504_v63 = vunpack.c.2.s8 %v1368_v19  ;;  %v1508_v12 = vunpack.c.3.s8 %v1368_v19 }
 0x23f   :  { %v3126_v4 = vpack.c.bf16 %v2690_v49, %v2686_v16  ;;  %v2551_v48 = vmul.f32 %v5565_v30, %v2017_v31  ;;  %v2145_v35 = vcvt.s32.f32 %v1633_v58  ;;  %v2149_v17 = vcvt.s32.f32 %v1637_v14  ;;  %v1429_v31 = vld [vmem:[#allocation5 + $0x1f8] sm:$0xff] }
 0x240   :  { %3505 = vmatpush1.bf16.msra.mxu0 %v3062_v18  ;;  %v2555_v28 = vmul.f32 %v5565_v30, %v2021_v53  ;;  %v2016_v62 = vcvt.s32.f32 %v1504_v63  ;;  %v2020_v57 = vcvt.s32.f32 %v1508_v12  ;;  %v1632_v9 = vunpack.c.2.s8 %v1400_v45  ;;  %v1396_v53 = vld [vmem:[#allocation5 + $0xf0] sm:$0xff] }
 0x241   :  { %3546 = vmatpush1.bf16.msra.mxu1 %v3126_v4  ;;  %v2679_v20 = vmul.f32 %v5565_v30, %v2145_v35  ;;  %v2683_v61 = vmul.f32 %v5565_v30, %v2149_v17  ;;  %v1636_v32 = vunpack.c.3.s8 %v1400_v45  ;;  %v1497_v21 = vunpack.c.0.s8 %v1369_v34 }
 0x242   :  { %v3059_v55 = vpack.c.bf16 %v2555_v28, %v2551_v48  ;;  %v2550_v27 = vmul.f32 %v5586_v52, %v2016_v62  ;;  %v2554_v10 = vmul.f32 %v5586_v52, %v2020_v57  ;;  %v2144_v60 = vcvt.s32.f32 %v1632_v9  ;;  %v1428_v62 = vld [vmem:[#allocation5 + $0x1f0] sm:$0xff] }
 0x243   :  { %v3123_v51 = vpack.c.bf16 %v2683_v61, %v2679_v20  ;;  %v2148_v13 = vcvt.s32.f32 %v1636_v32  ;;  %v1501_v39 = vunpack.c.1.s8 %v1369_v34  ;;  %v2009_v38 = vcvt.s32.f32 %v1497_v21  ;;  %v1397_v34 = vld [vmem:[#allocation5 + $0xf8] sm:$0xff] }
 0x244   :  { %3506 = vmatprep.subr.bf16.mxu0 %v3059_v55  ;;  %v3058_v29 = vpack.c.bf16 %v2554_v10, %v2550_v27  ;;  %v2678_v36 = vmul.f32 %v5586_v52, %v2144_v60  ;;  %v1625_v46 = vunpack.c.0.s8 %v1401_v56  ;;  %v1629_v3 = vunpack.c.1.s8 %v1401_v56 }
 0x245   :  { %3547 = vmatprep.subr.bf16.mxu1 %v3123_v51  ;;  %v2682_v22 = vmul.f32 %v5586_v52, %v2148_v13  ;;  %v2013_v37 = vcvt.s32.f32 %v1501_v39  ;;  %v2543_v26 = vmul.f32 %v5565_v30, %v2009_v38  ;;  %v1496_v43 = vunpack.c.0.s8 %v1368_v19 }
 0x246   :  { %3507 = vmatpush1.bf16.msra.mxu0 %v3058_v29  ;;  %v2137_v40 = vcvt.s32.f32 %v1625_v46  ;;  %v2141_v15 = vcvt.s32.f32 %v1629_v3  ;;  %v1500_v1 = vunpack.c.1.s8 %v1368_v19  ;;  %v1624_v41 = vunpack.c.0.s8 %v1400_v45 }
 0x247   :  { %v3122_v47 = vpack.c.bf16 %v2682_v22, %v2678_v36  ;;  %v2547_v0 = vmul.f32 %v5565_v30, %v2013_v37  ;;  %v2008_v2 = vcvt.s32.f32 %v1496_v43  ;;  %v1628_v42 = vunpack.c.1.s8 %v1400_v45 }
 0x248   :  { %v2671_v56 = vmul.f32 %v5565_v30, %v2137_v40  ;;  %v2675_v16 = vmul.f32 %v5565_v30, %v2141_v15  ;;  %v2012_v11 = vcvt.s32.f32 %v1500_v1  ;;  %v2136_v49 = vcvt.s32.f32 %v1624_v41 }
 0x249   :  { %3548 = vmatpush1.bf16.msra.mxu1 %v3122_v47  ;;  %v3055_v58 = vpack.c.bf16 %v2547_v0, %v2543_v26  ;;  %v2542_v14 = vmul.f32 %v5586_v52, %v2008_v2  ;;  %v2140_v18 = vcvt.s32.f32 %v1628_v42  ;;  %v1617_v19 = vunpack.c.2.s8 %v1397_v34 }
 0x24a   :  { %v3119_v63 = vpack.c.bf16 %v2675_v16, %v2671_v56  ;;  %v2546_v12 = vmul.f32 %v5586_v52, %v2012_v11  ;;  %v2670_v4 = vmul.f32 %v5586_v52, %v2136_v49  ;;  %v1621_v45 = vunpack.c.3.s8 %v1397_v34 }
 0x24b   :  { %3508 = vmatprep.subr.bf16.mxu0 %v3055_v58  ;;  %v2674_v48 = vmul.f32 %v5586_v52, %v2140_v18  ;;  %v2129_v35 = vcvt.s32.f32 %v1617_v19  ;;  %v1745_v17 = vunpack.c.2.s8 %v1429_v31  ;;  %v1749_v28 = vunpack.c.3.s8 %v1429_v31 }
 0x24c   :  { %3549 = vmatprep.subr.bf16.mxu1 %v3119_v63  ;;  %v3054_v57 = vpack.c.bf16 %v2546_v12, %v2542_v14  ;;  %v2133_v9 = vcvt.s32.f32 %v1621_v45  ;;  %v1616_v20 = vunpack.c.2.s8 %v1396_v53  ;;  %v1620_v61 = vunpack.c.3.s8 %v1396_v53 }
 0x24d   :  { %v3118_v32 = vpack.c.bf16 %v2674_v48, %v2670_v4  ;;  %v2663_v21 = vmul.f32 %v5565_v30, %v2129_v35  ;;  %v2257_v55 = vcvt.s32.f32 %v1745_v17  ;;  %v2261_v27 = vcvt.s32.f32 %v1749_v28  ;;  %v1425_v35 = vld [vmem:[#allocation5 + $0x1d8] sm:$0xff] }
 0x24e   :  { %3509 = vmatpush1.bf16.msra.mxu0 %v3054_v57  ;;  %v2667_v10 = vmul.f32 %v5565_v30, %v2133_v9  ;;  %v2128_v60 = vcvt.s32.f32 %v1616_v20  ;;  %v2132_v51 = vcvt.s32.f32 %v1620_v61  ;;  %v1744_v13 = vunpack.c.2.s8 %v1428_v62  ;;  %v1392_v9 = vld [vmem:[#allocation5 + $0xd0] sm:$0xff] }
 0x24f   :  { %3550 = vmatpush1.bf16.msra.mxu1 %v3118_v32  ;;  %v2791_v39 = vmul.f32 %v5565_v30, %v2257_v55  ;;  %v2795_v38 = vmul.f32 %v5565_v30, %v2261_v27  ;;  %v1748_v29 = vunpack.c.3.s8 %v1428_v62  ;;  %v1609_v36 = vunpack.c.0.s8 %v1397_v34 }
 0x250   :  { %v3115_v46 = vpack.c.bf16 %v2667_v10, %v2663_v21  ;;  %v2662_v3 = vmul.f32 %v5586_v52, %v2128_v60  ;;  %v2666_v22 = vmul.f32 %v5586_v52, %v2132_v51  ;;  %v2256_v37 = vcvt.s32.f32 %v1744_v13  ;;  %v1424_v60 = vld [vmem:[#allocation5 + $0x1d0] sm:$0xff] }
 0x251   :  { %v3179_v26 = vpack.c.bf16 %v2795_v38, %v2791_v39  ;;  %v2260_v43 = vcvt.s32.f32 %v1748_v29  ;;  %v1613_v40 = vunpack.c.1.s8 %v1397_v34  ;;  %v2121_v15 = vcvt.s32.f32 %v1609_v36  ;;  %v1393_v34 = vld [vmem:[#allocation5 + $0xd8] sm:$0xff] }
 0x252   :  { %3510 = vmatprep.subr.bf16.mxu0 %v3115_v46  ;;  %v3114_v1 = vpack.c.bf16 %v2666_v22, %v2662_v3  ;;  %v2790_v41 = vmul.f32 %v5586_v52, %v2256_v37  ;;  %v1737_v47 = vunpack.c.0.s8 %v1429_v31  ;;  %v1741_v0 = vunpack.c.1.s8 %v1429_v31 }
 0x253   :  { %3551 = vmatprep.subr.bf16.mxu1 %v3179_v26  ;;  %v2794_v2 = vmul.f32 %v5586_v52, %v2260_v43  ;;  %v2125_v42 = vcvt.s32.f32 %v1613_v40  ;;  %v2655_v56 = vmul.f32 %v5565_v30, %v2121_v15  ;;  %v1608_v16 = vunpack.c.0.s8 %v1396_v53 }
 0x254   :  { %3511 = vmatpush2.bf16.msra.mxu0 %v3114_v1  ;;  %v2249_v11 = vcvt.s32.f32 %v1737_v47  ;;  %v2253_v49 = vcvt.s32.f32 %v1741_v0  ;;  %v1612_v58 = vunpack.c.1.s8 %v1396_v53  ;;  %v1736_v14 = vunpack.c.0.s8 %v1428_v62 }
 0x255   :  { %v3178_v18 = vpack.c.bf16 %v2794_v2, %v2790_v41  ;;  %v2659_v19 = vmul.f32 %v5565_v30, %v2125_v42  ;;  %v2120_v63 = vcvt.s32.f32 %v1608_v16  ;;  %v1740_v12 = vunpack.c.1.s8 %v1428_v62 }
 0x256   :  { %v2783_v31 = vmul.f32 %v5565_v30, %v2249_v11  ;;  %v2787_v4 = vmul.f32 %v5565_v30, %v2253_v49  ;;  %v2124_v45 = vcvt.s32.f32 %v1612_v58  ;;  %v2248_v48 = vcvt.s32.f32 %v1736_v14 }
 0x257   :  { %3552 = vmatpush2.bf16.msra.mxu1 %v3178_v18  ;;  %v3111_v17 = vpack.c.bf16 %v2659_v19, %v2655_v56  ;;  %v2654_v28 = vmul.f32 %v5586_v52, %v2120_v63  ;;  %v2252_v57 = vcvt.s32.f32 %v1740_v12  ;;  %v1601_v53 = vunpack.c.2.s8 %v1393_v34 }
 0x258   :  { %v3175_v20 = vpack.c.bf16 %v2787_v4, %v2783_v31  ;;  %v2658_v61 = vmul.f32 %v5586_v52, %v2124_v45  ;;  %v2782_v32 = vmul.f32 %v5586_v52, %v2248_v48  ;;  %v1605_v62 = vunpack.c.3.s8 %v1393_v34 }
 0x259   :  { %3512 = vmatprep.subr.bf16.mxu0 %v3111_v17  ;;  %v2786_v21 = vmul.f32 %v5586_v52, %v2252_v57  ;;  %v2113_v55 = vcvt.s32.f32 %v1601_v53  ;;  %v1729_v27 = vunpack.c.2.s8 %v1425_v35  ;;  %v1733_v10 = vunpack.c.3.s8 %v1425_v35 }
 0x25a   :  { %3553 = vmatprep.subr.bf16.mxu1 %v3175_v20  ;;  %v3110_v51 = vpack.c.bf16 %v2658_v61, %v2654_v28  ;;  %v2117_v13 = vcvt.s32.f32 %v1605_v62  ;;  %v1600_v39 = vunpack.c.2.s8 %v1392_v9  ;;  %v1604_v38 = vunpack.c.3.s8 %v1392_v9 }
 0x25b   :  { %v3174_v29 = vpack.c.bf16 %v2786_v21, %v2782_v32  ;;  %v2647_v36 = vmul.f32 %v5565_v30, %v2113_v55  ;;  %v2241_v46 = vcvt.s32.f32 %v1729_v27  ;;  %v2245_v3 = vcvt.s32.f32 %v1733_v10  ;;  %v1421_v55 = vld [vmem:[#allocation5 + $0x1b8] sm:$0xff] }
 0x25c   :  { %3513 = vmatpush2.bf16.msra.mxu0 %v3110_v51  ;;  %v2651_v22 = vmul.f32 %v5565_v30, %v2117_v13  ;;  %v2112_v37 = vcvt.s32.f32 %v1600_v39  ;;  %v2116_v26 = vcvt.s32.f32 %v1604_v38  ;;  %v1728_v43 = vunpack.c.2.s8 %v1424_v60  ;;  %v1388_v13 = vld [vmem:[#allocation5 + $0xb0] sm:$0xff] }
 0x25d   :  { %3554 = vmatpush2.bf16.msra.mxu1 %v3174_v29  ;;  %v2775_v40 = vmul.f32 %v5565_v30, %v2241_v46  ;;  %v2779_v15 = vmul.f32 %v5565_v30, %v2245_v3  ;;  %v1732_v1 = vunpack.c.3.s8 %v1424_v60  ;;  %v1593_v41 = vunpack.c.0.s8 %v1393_v34 }
 0x25e   :  { %v3107_v47 = vpack.c.bf16 %v2651_v22, %v2647_v36  ;;  %v2646_v0 = vmul.f32 %v5586_v52, %v2112_v37  ;;  %v2650_v2 = vmul.f32 %v5586_v52, %v2116_v26  ;;  %v2240_v42 = vcvt.s32.f32 %v1728_v43  ;;  %v1420_v37 = vld [vmem:[#allocation5 + $0x1b0] sm:$0xff] }
 0x25f   :  { %v3171_v56 = vpack.c.bf16 %v2779_v15, %v2775_v40  ;;  %v2244_v16 = vcvt.s32.f32 %v1732_v1  ;;  %v1597_v11 = vunpack.c.1.s8 %v1393_v34  ;;  %v2105_v49 = vcvt.s32.f32 %v1593_v41  ;;  %v1389_v34 = vld [vmem:[#allocation5 + $0xb8] sm:$0xff] }
 0x260   :  { %3514 = vmatprep.subr.bf16.mxu0 %v3107_v47  ;;  %v3106_v58 = vpack.c.bf16 %v2650_v2, %v2646_v0  ;;  %v2774_v14 = vmul.f32 %v5586_v52, %v2240_v42  ;;  %v1721_v18 = vunpack.c.0.s8 %v1425_v35  ;;  %v1725_v19 = vunpack.c.1.s8 %v1425_v35 }
 0x261   :  { %3555 = vmatprep.subr.bf16.mxu1 %v3171_v56  ;;  %v2778_v63 = vmul.f32 %v5586_v52, %v2244_v16  ;;  %v2109_v12 = vcvt.s32.f32 %v1597_v11  ;;  %v2639_v31 = vmul.f32 %v5565_v30, %v2105_v49  ;;  %v1592_v4 = vunpack.c.0.s8 %v1392_v9 }
 0x262   :  { %3515 = vmatpush2.bf16.msra.mxu0 %v3106_v58  ;;  %v2233_v45 = vcvt.s32.f32 %v1721_v18  ;;  %v2237_v48 = vcvt.s32.f32 %v1725_v19  ;;  %v1596_v17 = vunpack.c.1.s8 %v1392_v9  ;;  %v1720_v28 = vunpack.c.0.s8 %v1424_v60 }
 0x263   :  { %v3170_v57 = vpack.c.bf16 %v2778_v63, %v2774_v14  ;;  %v2643_v53 = vmul.f32 %v5565_v30, %v2109_v12  ;;  %v2104_v20 = vcvt.s32.f32 %v1592_v4  ;;  %v1724_v61 = vunpack.c.1.s8 %v1424_v60 }
 0x264   :  { %v2767_v35 = vmul.f32 %v5565_v30, %v2233_v45  ;;  %v2771_v32 = vmul.f32 %v5565_v30, %v2237_v48  ;;  %v2108_v62 = vcvt.s32.f32 %v1596_v17  ;;  %v2232_v21 = vcvt.s32.f32 %v1720_v28 }
 0x265   :  { %3556 = vmatpush2.bf16.msra.mxu1 %v3170_v57  ;;  %v3103_v27 = vpack.c.bf16 %v2643_v53, %v2639_v31  ;;  %v2638_v10 = vmul.f32 %v5586_v52, %v2104_v20  ;;  %v2236_v51 = vcvt.s32.f32 %v1724_v61  ;;  %v1585_v9 = vunpack.c.2.s8 %v1389_v34 }
 0x266   :  { %v3167_v39 = vpack.c.bf16 %v2771_v32, %v2767_v35  ;;  %v2642_v38 = vmul.f32 %v5586_v52, %v2108_v62  ;;  %v2766_v29 = vmul.f32 %v5586_v52, %v2232_v21  ;;  %v1589_v60 = vunpack.c.3.s8 %v1389_v34 }
 0x267   :  { %3516 = vmatprep.subr.bf16.mxu0 %v3103_v27  ;;  %v2770_v36 = vmul.f32 %v5586_v52, %v2236_v51  ;;  %v2097_v46 = vcvt.s32.f32 %v1585_v9  ;;  %v1713_v3 = vunpack.c.2.s8 %v1421_v55  ;;  %v1717_v22 = vunpack.c.3.s8 %v1421_v55 }
 0x268   :  { %3557 = vmatprep.subr.bf16.mxu1 %v3167_v39  ;;  %v3102_v26 = vpack.c.bf16 %v2642_v38, %v2638_v10  ;;  %v2101_v43 = vcvt.s32.f32 %v1589_v60  ;;  %v1584_v40 = vunpack.c.2.s8 %v1388_v13  ;;  %v1588_v15 = vunpack.c.3.s8 %v1388_v13 }
 0x269   :  { %v3166_v1 = vpack.c.bf16 %v2770_v36, %v2766_v29  ;;  %v2631_v41 = vmul.f32 %v5565_v30, %v2097_v46  ;;  %v2225_v47 = vcvt.s32.f32 %v1713_v3  ;;  %v2229_v0 = vcvt.s32.f32 %v1717_v22  ;;  %v1417_v46 = vld [vmem:[#allocation5 + $0x198] sm:$0xff] }
 0x26a   :  { %3517 = vmatpush2.bf16.msra.mxu0 %v3102_v26  ;;  %v2635_v2 = vmul.f32 %v5565_v30, %v2101_v43  ;;  %v2096_v42 = vcvt.s32.f32 %v1584_v40  ;;  %v2100_v56 = vcvt.s32.f32 %v1588_v15  ;;  %v1712_v16 = vunpack.c.2.s8 %v1420_v37  ;;  %v6499_v43 = vld [vmem:[#allocation5 + $0x90] sm:$0xff] }
 0x26b   :  { %3558 = vmatpush2.bf16.msra.mxu1 %v3166_v1  ;;  %v2759_v11 = vmul.f32 %v5565_v30, %v2225_v47  ;;  %v2763_v49 = vmul.f32 %v5565_v30, %v2229_v0  ;;  %v1716_v58 = vunpack.c.3.s8 %v1420_v37  ;;  %v1577_v14 = vunpack.c.0.s8 %v1389_v34 }
 0x26c   :  { %v3099_v18 = vpack.c.bf16 %v2635_v2, %v2631_v41  ;;  %v2630_v19 = vmul.f32 %v5586_v52, %v2096_v42  ;;  %v2634_v63 = vmul.f32 %v5586_v52, %v2100_v56  ;;  %v2224_v12 = vcvt.s32.f32 %v1712_v16  ;;  %v6505_v42 = vld [vmem:[#allocation5 + $0x190] sm:$0xff] }
 0x26d   :  { %v3163_v31 = vpack.c.bf16 %v2763_v49, %v2759_v11  ;;  %v2228_v4 = vcvt.s32.f32 %v1716_v58  ;;  %v1581_v45 = vunpack.c.1.s8 %v1389_v34  ;;  %v2089_v48 = vcvt.s32.f32 %v1577_v14  ;;  %v6492_v34 = vld [vmem:[#allocation5 + $0x98] sm:$0xff] }
 0x26e   :  { %3518 = vmatprep.subr.bf16.mxu0 %v3099_v18  ;;  %v3098_v17 = vpack.c.bf16 %v2634_v63, %v2630_v19  ;;  %v2758_v28 = vmul.f32 %v5586_v52, %v2224_v12  ;;  %v1705_v57 = vunpack.c.0.s8 %v1421_v55  ;;  %v1709_v53 = vunpack.c.1.s8 %v1421_v55 }
 0x26f   :  { %3559 = vmatprep.subr.bf16.mxu1 %v3163_v31  ;;  %v2762_v20 = vmul.f32 %v5586_v52, %v2228_v4  ;;  %v2093_v61 = vcvt.s32.f32 %v1581_v45  ;;  %v2623_v35 = vmul.f32 %v5565_v30, %v2089_v48  ;;  %v1576_v32 = vunpack.c.0.s8 %v1388_v13 }
 0x270   :  { %3519 = vmatpush2.bf16.msra.mxu0 %v3098_v17  ;;  %v2217_v62 = vcvt.s32.f32 %v1705_v57  ;;  %v2221_v21 = vcvt.s32.f32 %v1709_v53  ;;  %v1580_v27 = vunpack.c.1.s8 %v1388_v13  ;;  %v1704_v10 = vunpack.c.0.s8 %v1420_v37 }
 0x271   :  { %v3162_v51 = vpack.c.bf16 %v2762_v20, %v2758_v28  ;;  %v2627_v9 = vmul.f32 %v5565_v30, %v2093_v61  ;;  %v2088_v39 = vcvt.s32.f32 %v1576_v32  ;;  %v1708_v38 = vunpack.c.1.s8 %v1420_v37  ;;  %v6520_v32 = vpop.f32.mrf.mxu1 }
 0x272   :  { %v2751_v55 = vmul.f32 %v5565_v30, %v2217_v62  ;;  %v2755_v29 = vmul.f32 %v5565_v30, %v2221_v21  ;;  %v2092_v60 = vcvt.s32.f32 %v1580_v27  ;;  %v2216_v36 = vcvt.s32.f32 %v1704_v10 }
 0x273   :  { %3560 = vmatpush2.bf16.msra.mxu1 %v3162_v51  ;;  %v3095_v3 = vpack.c.bf16 %v2627_v9, %v2623_v35  ;;  %v2622_v22 = vmul.f32 %v5586_v52, %v2088_v39  ;;  %v2220_v13 = vcvt.s32.f32 %v1708_v38  ;;  %v1569_v26 = vunpack.c.2.s8 %v6492_v34  ;;  %v6518_v35 = vpop.f32.mrf.mxu0 }
 0x274   :  { %v3159_v40 = vpack.c.bf16 %v2755_v29, %v2751_v55  ;;  %v2626_v15 = vmul.f32 %v5586_v52, %v2092_v60  ;;  %v2750_v37 = vmul.f32 %v5586_v52, %v2216_v36  ;;  %v1573_v1 = vunpack.c.3.s8 %v6492_v34  ;;  %v6526_v29 = vpop.f32.mrf.mxu1 }
 0x275   :  { %3520 = vmatprep.subr.bf16.mxu0 %v3095_v3  ;;  %v2754_v41 = vmul.f32 %v5586_v52, %v2220_v13  ;;  %v2081_v47 = vcvt.s32.f32 %v1569_v26  ;;  %v1697_v0 = vunpack.c.2.s8 %v1417_v46  ;;  %v1701_v2 = vunpack.c.3.s8 %v1417_v46  ;;  %v6524_v55 = vpop.f32.mrf.mxu0 }
 0x276   :  { %3561 = vmatprep.subr.bf16.mxu1 %v3159_v40  ;;  %v3094_v56 = vpack.c.bf16 %v2626_v15, %v2622_v22  ;;  %v2085_v16 = vcvt.s32.f32 %v1573_v1  ;;  %v1568_v11 = vunpack.c.2.s8 %v6499_v43  ;;  %v1572_v49 = vunpack.c.3.s8 %v6499_v43 }
 0x277   :  { %v3158_v58 = vpack.c.bf16 %v2754_v41, %v2750_v37  ;;  %v2615_v14 = vmul.f32 %v5565_v30, %v2081_v47  ;;  %v2209_v18 = vcvt.s32.f32 %v1697_v0  ;;  %v2213_v19 = vcvt.s32.f32 %v1701_v2  ;;  %v3368_v15 = vpop.f32.mrf.mxu0  ;;  %v3409_v37 = vpop.f32.mrf.mxu1 }
 0x278   :  { %3521 = vmatpush2.bf16.msra.mxu0 %v3094_v56  ;;  %v2619_v63 = vmul.f32 %v5565_v30, %v2085_v16  ;;  %v2080_v12 = vcvt.s32.f32 %v1568_v11  ;;  %v2084_v31 = vcvt.s32.f32 %v1572_v49  ;;  %v1696_v4 = vunpack.c.2.s8 %v6505_v42  ;;  %v1477_v49 = vld [vmem:[#allocation5 + $0x378] sm:$0xff] }
 0x279   :  { %3562 = vmatpush2.bf16.msra.mxu1 %v3158_v58  ;;  %v2743_v45 = vmul.f32 %v5565_v30, %v2209_v18  ;;  %v2747_v48 = vmul.f32 %v5565_v30, %v2213_v19  ;;  %v1700_v17 = vunpack.c.3.s8 %v6505_v42  ;;  %v1561_v28 = vunpack.c.0.s8 %v6492_v34  ;;  %v3410_v58 = vpop.f32.mrf.mxu1 }
 0x27a   :  { %v3091_v57 = vpack.c.bf16 %v2619_v63, %v2615_v14  ;;  %v2614_v53 = vmul.f32 %v5586_v52, %v2080_v12  ;;  %v2618_v20 = vmul.f32 %v5586_v52, %v2084_v31  ;;  %v2208_v61 = vcvt.s32.f32 %v1696_v4  ;;  %v6541_v12 = vld [vmem:[#allocation5 + $0x270] sm:$0xff] }
 0x27b   :  { %v3155_v62 = vpack.c.bf16 %v2747_v48, %v2743_v45  ;;  %v2212_v21 = vcvt.s32.f32 %v1700_v17  ;;  %v1565_v27 = vunpack.c.1.s8 %v6492_v34  ;;  %v2073_v10 = vcvt.s32.f32 %v1561_v28 }
 0x27c   :  { %3522 = vmatprep.subr.bf16.mxu0 %v3091_v57  ;;  %v3090_v51 = vpack.c.bf16 %v2618_v20, %v2614_v53  ;;  %v2742_v9 = vmul.f32 %v5586_v52, %v2208_v61  ;;  %v1689_v39 = vunpack.c.0.s8 %v1417_v46  ;;  %v1693_v38 = vunpack.c.1.s8 %v1417_v46  ;;  %v6533_v46 = vld [vmem:[#allocation5 + $0x278] sm:$0xff]  ;;  %v1476_v53 = vld [vmem:[#allocation5 + $0x370] sm:$0xff] }
 0x27d   :  { %3563 = vmatprep.subr.bf16.mxu1 %v3155_v62  ;;  %v2746_v60 = vmul.f32 %v5586_v52, %v2212_v21  ;;  %v2077_v36 = vcvt.s32.f32 %v1565_v27  ;;  %v2607_v3 = vmul.f32 %v5565_v30, %v2073_v10  ;;  %v1560_v22 = vunpack.c.0.s8 %v6499_v43 }
 0x27e   :  { %3523 = vmatpush2.bf16.msra.mxu0 %v3090_v51  ;;  %v2201_v34 = vcvt.s32.f32 %v1689_v39  ;;  %v2205_v13 = vcvt.s32.f32 %v1693_v38  ;;  %v1564_v26 = vunpack.c.1.s8 %v6499_v43  ;;  %v1688_v40 = vunpack.c.0.s8 %v6505_v42  ;;  %v3369_v43 = vpop.f32.mrf.mxu0 }
 0x27f   :  { %v3154_v1 = vpack.c.bf16 %v2746_v60, %v2742_v9  ;;  %v2611_v41 = vmul.f32 %v5565_v30, %v2077_v36  ;;  %v2072_v47 = vcvt.s32.f32 %v1560_v22  ;;  %v1692_v0 = vunpack.c.1.s8 %v6505_v42 }
 0x280   :  { %v2735_v2 = vmul.f32 %v5565_v30, %v2201_v34  ;;  %v2739_v56 = vmul.f32 %v5565_v30, %v2205_v13  ;;  %v2076_v16 = vcvt.s32.f32 %v1564_v26  ;;  %v2200_v11 = vcvt.s32.f32 %v1688_v40 }
 0x281   :  { %3564 = vmatpush2.bf16.msra.mxu1 %v3154_v1  ;;  %v3087_v14 = vpack.c.bf16 %v2611_v41, %v2607_v3  ;;  %v2606_v18 = vmul.f32 %v5586_v52, %v2072_v47  ;;  %v2204_v19 = vcvt.s32.f32 %v1692_v0  ;;  %v1809_v63 = vunpack.c.2.s8 %v6533_v46 }
 0x282   :  { %v3151_v31 = vpack.c.bf16 %v2739_v56, %v2735_v2  ;;  %v2610_v42 = vmul.f32 %v5586_v52, %v2076_v16  ;;  %v2734_v4 = vmul.f32 %v5586_v52, %v2200_v11  ;;  %v1813_v45 = vunpack.c.3.s8 %v6533_v46 }
 0x283   :  { %3524 = vmatprep.subr.bf16.mxu0 %v3087_v14  ;;  %v2738_v48 = vmul.f32 %v5586_v52, %v2204_v19  ;;  %v2321_v17 = vcvt.s32.f32 %v1809_v63  ;;  %v1937_v28 = vunpack.c.2.s8 %v1477_v49  ;;  %v1941_v57 = vunpack.c.3.s8 %v1477_v49  ;;  %v1441_v63 = vld [vmem:[#allocation5 + $0x258] sm:$0xff] }
 0x284   :  { %3565 = vmatprep.subr.bf16.mxu1 %v3151_v31  ;;  %v3086_v20 = vpack.c.bf16 %v2610_v42, %v2606_v18  ;;  %v2325_v61 = vcvt.s32.f32 %v1813_v45  ;;  %v1808_v62 = vunpack.c.2.s8 %v6541_v12  ;;  %v1812_v21 = vunpack.c.3.s8 %v6541_v12 }
 0x285   :  { %v3150_v27 = vpack.c.bf16 %v2738_v48, %v2734_v4  ;;  %v2855_v10 = vmul.f32 %v5565_v30, %v2321_v17  ;;  %v2449_v51 = vcvt.s32.f32 %v1937_v28  ;;  %v2453_v9 = vcvt.s32.f32 %v1941_v57  ;;  %v1473_v28 = vld [vmem:[#allocation5 + $0x358] sm:$0xff] }
 0x286   :  { %3525 = vmatpush2.bf16.msra.mxu0 %v3086_v20  ;;  %v2859_v39 = vmul.f32 %v5565_v30, %v2325_v61  ;;  %v2320_v38 = vcvt.s32.f32 %v1808_v62  ;;  %v2324_v60 = vcvt.s32.f32 %v1812_v21  ;;  %v1936_v36 = vunpack.c.2.s8 %v1476_v53  ;;  %v1440_v61 = vld [vmem:[#allocation5 + $0x250] sm:$0xff] }
 0x287   :  { %3566 = vmatpush2.bf16.msra.mxu1 %v3150_v27  ;;  %v2983_v3 = vmul.f32 %v5565_v30, %v2449_v51  ;;  %v2987_v22 = vmul.f32 %v5565_v30, %v2453_v9  ;;  %v1940_v34 = vunpack.c.3.s8 %v1476_v53  ;;  %v1801_v13 = vunpack.c.0.s8 %v6533_v46 }
 0x288   :  { %v3211_v26 = vpack.c.bf16 %v2859_v39, %v2855_v10  ;;  %v2854_v40 = vmul.f32 %v5586_v52, %v2320_v38  ;;  %v2858_v15 = vmul.f32 %v5586_v52, %v2324_v60  ;;  %v2448_v37 = vcvt.s32.f32 %v1936_v36  ;;  %v1472_v38 = vld [vmem:[#allocation5 + $0x350] sm:$0xff] }
 0x289   :  { %3527 = vmatmul.mubr.bf16.vlgmr.msra.gmra.mxu0 %v6097_v54  ;;  %v3275_v1 = vpack.c.bf16 %v2987_v22, %v2983_v3  ;;  %v2452_v41 = vcvt.s32.f32 %v1940_v34  ;;  %v1805_v47 = vunpack.c.1.s8 %v6533_v46  ;;  %v2313_v0 = vcvt.s32.f32 %v1801_v13 }
 0x28a   :  { %3568 = vmatmul.mubr.bf16.vlgmr.msra.gmra.mxu1 %v6099_v33  ;;  %3576 = vmatprep.subr.bf16.mxu0 %v3211_v26  ;;  %v3210_v2 = vpack.c.bf16 %v2858_v15, %v2854_v40  ;;  %v2982_v56 = vmul.f32 %v5586_v52, %v2448_v37  ;;  %v1929_v16 = vunpack.c.0.s8 %v1477_v49  ;;  %v1933_v11 = vunpack.c.1.s8 %v1477_v49 }
 0x28b   :  { %3617 = vmatprep.subr.bf16.mxu1 %v3275_v1  ;;  %3608 = vmatprep.mubr.bf16.mxu0 %v6350_v25  ;;  %v2986_v43 = vmul.f32 %v5586_v52, %v2452_v41  ;;  %v2317_v58 = vcvt.s32.f32 %v1805_v47  ;;  %v2847_v54 = vmul.f32 %v5565_v30, %v2313_v0  ;;  %v1800_v14 = vunpack.c.0.s8 %v6541_v12 }
 0x28c   :  { %3577 = vmatpush1.bf16.msra.mxu0 %v3210_v2  ;;  %3649 = vmatprep.mubr.bf16.mxu1 %v6354_v23  ;;  %v2441_v33 = vcvt.s32.f32 %v1929_v16  ;;  %v2445_v46 = vcvt.s32.f32 %v1933_v11  ;;  %v1804_v18 = vunpack.c.1.s8 %v6541_v12  ;;  %v1928_v19 = vunpack.c.0.s8 %v1476_v53 }
 0x28d   :  { %v3274_v49 = vpack.c.bf16 %v2986_v43, %v2982_v56  ;;  %v2851_v31 = vmul.f32 %v5565_v30, %v2317_v58  ;;  %v2312_v25 = vcvt.s32.f32 %v1800_v14  ;;  %v1932_v42 = vunpack.c.1.s8 %v1476_v53 }
 0x28e   :  { %v2975_v4 = vmul.f32 %v5565_v30, %v2441_v33  ;;  %v2979_v45 = vmul.f32 %v5565_v30, %v2445_v46  ;;  %v2316_v48 = vcvt.s32.f32 %v1804_v18  ;;  %v2440_v17 = vcvt.s32.f32 %v1928_v19 }
 0x28f   :  { %3618 = vmatpush1.bf16.msra.mxu1 %v3274_v49  ;;  %v3207_v23 = vpack.c.bf16 %v2851_v31, %v2847_v54  ;;  %v2846_v57 = vmul.f32 %v5586_v52, %v2312_v25  ;;  %v2444_v20 = vcvt.s32.f32 %v1932_v42  ;;  %v1793_v12 = vunpack.c.2.s8 %v1441_v63 }
 0x290   :  { %v3271_v62 = vpack.c.bf16 %v2979_v45, %v2975_v4  ;;  %v2850_v21 = vmul.f32 %v5586_v52, %v2316_v48  ;;  %v2974_v27 = vmul.f32 %v5586_v52, %v2440_v17  ;;  %v1797_v53 = vunpack.c.3.s8 %v1441_v63 }
 0x291   :  { %3578 = vmatprep.subr.bf16.mxu0 %v3207_v23  ;;  %v2978_v10 = vmul.f32 %v5586_v52, %v2444_v20  ;;  %v2305_v51 = vcvt.s32.f32 %v1793_v12  ;;  %v1921_v9 = vunpack.c.2.s8 %v1473_v28  ;;  %v1925_v39 = vunpack.c.3.s8 %v1473_v28 }
 0x292   :  { %3619 = vmatprep.subr.bf16.mxu1 %v3271_v62  ;;  %v3206_v60 = vpack.c.bf16 %v2850_v21, %v2846_v57  ;;  %v2309_v36 = vcvt.s32.f32 %v1797_v53  ;;  %v1792_v3 = vunpack.c.2.s8 %v1440_v61  ;;  %v1796_v22 = vunpack.c.3.s8 %v1440_v61 }
 0x293   :  { %v3270_v34 = vpack.c.bf16 %v2978_v10, %v2974_v27  ;;  %v2839_v13 = vmul.f32 %v5565_v30, %v2305_v51  ;;  %v2433_v26 = vcvt.s32.f32 %v1921_v9  ;;  %v2437_v40 = vcvt.s32.f32 %v1925_v39  ;;  %v1469_v51 = vld [vmem:[#allocation5 + $0x338] sm:$0xff] }
 0x294   :  { %3579 = vmatpush1.bf16.msra.mxu0 %v3206_v60  ;;  %v2843_v15 = vmul.f32 %v5565_v30, %v2309_v36  ;;  %v2304_v37 = vcvt.s32.f32 %v1792_v3  ;;  %v2308_v1 = vcvt.s32.f32 %v1796_v22  ;;  %v1920_v41 = vunpack.c.2.s8 %v1472_v38  ;;  %v1436_v36 = vld [vmem:[#allocation5 + $0x230] sm:$0xff] }
 0x295   :  { %3620 = vmatpush1.bf16.msra.mxu1 %v3270_v34  ;;  %v2967_v47 = vmul.f32 %v5565_v30, %v2433_v26  ;;  %v2971_v0 = vmul.f32 %v5565_v30, %v2437_v40  ;;  %v1924_v2 = vunpack.c.3.s8 %v1472_v38  ;;  %v1785_v56 = vunpack.c.0.s8 %v1441_v63 }
 0x296   :  { %v3203_v16 = vpack.c.bf16 %v2843_v15, %v2839_v13  ;;  %v2838_v11 = vmul.f32 %v5586_v52, %v2304_v37  ;;  %v2842_v43 = vmul.f32 %v5586_v52, %v2308_v1  ;;  %v2432_v58 = vcvt.s32.f32 %v1920_v41  ;;  %v1468_v37 = vld [vmem:[#allocation5 + $0x330] sm:$0xff] }
 0x297   :  { %v3267_v54 = vpack.c.bf16 %v2971_v0, %v2967_v47  ;;  %v2436_v14 = vcvt.s32.f32 %v1924_v2  ;;  %v1789_v33 = vunpack.c.1.s8 %v1441_v63  ;;  %v2297_v46 = vcvt.s32.f32 %v1785_v56  ;;  %v1437_v63 = vld [vmem:[#allocation5 + $0x238] sm:$0xff] }
 0x298   :  { %3580 = vmatprep.subr.bf16.mxu0 %v3203_v16  ;;  %v3202_v18 = vpack.c.bf16 %v2842_v43, %v2838_v11  ;;  %v2966_v19 = vmul.f32 %v5586_v52, %v2432_v58  ;;  %v1913_v49 = vunpack.c.0.s8 %v1473_v28  ;;  %v1917_v31 = vunpack.c.1.s8 %v1473_v28 }
 0x299   :  { %3621 = vmatprep.subr.bf16.mxu1 %v3267_v54  ;;  %v2970_v25 = vmul.f32 %v5586_v52, %v2436_v14  ;;  %v2301_v42 = vcvt.s32.f32 %v1789_v33  ;;  %v2831_v4 = vmul.f32 %v5565_v30, %v2297_v46  ;;  %v1784_v45 = vunpack.c.0.s8 %v1440_v61 }
 0x29a   :  { %3581 = vmatpush1.bf16.msra.mxu0 %v3202_v18  ;;  %v2425_v48 = vcvt.s32.f32 %v1913_v49  ;;  %v2429_v17 = vcvt.s32.f32 %v1917_v31  ;;  %v1788_v23 = vunpack.c.1.s8 %v1440_v61  ;;  %v1912_v57 = vunpack.c.0.s8 %v1472_v38 }
 0x29b   :  { %v3266_v20 = vpack.c.bf16 %v2970_v25, %v2966_v19  ;;  %v2835_v12 = vmul.f32 %v5565_v30, %v2301_v42  ;;  %v2296_v62 = vcvt.s32.f32 %v1784_v45  ;;  %v1916_v21 = vunpack.c.1.s8 %v1472_v38 }
 0x29c   :  { %v2959_v28 = vmul.f32 %v5565_v30, %v2425_v48  ;;  %v2963_v27 = vmul.f32 %v5565_v30, %v2429_v17  ;;  %v2300_v53 = vcvt.s32.f32 %v1788_v23  ;;  %v2424_v10 = vcvt.s32.f32 %v1912_v57 }
 0x29d   :  { %3622 = vmatpush1.bf16.msra.mxu1 %v3266_v20  ;;  %v3199_v9 = vpack.c.bf16 %v2835_v12, %v2831_v4  ;;  %v2830_v39 = vmul.f32 %v5586_v52, %v2296_v62  ;;  %v2428_v60 = vcvt.s32.f32 %v1916_v21  ;;  %v1777_v61 = vunpack.c.2.s8 %v1437_v63 }
 0x29e   :  { %v3263_v3 = vpack.c.bf16 %v2963_v27, %v2959_v28  ;;  %v2834_v22 = vmul.f32 %v5586_v52, %v2300_v53  ;;  %v2958_v34 = vmul.f32 %v5586_v52, %v2424_v10  ;;  %v1781_v38 = vunpack.c.3.s8 %v1437_v63 }
 0x29f   :  { %3582 = vmatprep.subr.bf16.mxu0 %v3199_v9  ;;  %v2962_v13 = vmul.f32 %v5586_v52, %v2428_v60  ;;  %v2289_v26 = vcvt.s32.f32 %v1777_v61  ;;  %v1905_v40 = vunpack.c.2.s8 %v1469_v51  ;;  %v1909_v15 = vunpack.c.3.s8 %v1469_v51 }
 0x2a0   :  { %3623 = vmatprep.subr.bf16.mxu1 %v3263_v3  ;;  %v3198_v1 = vpack.c.bf16 %v2834_v22, %v2830_v39  ;;  %v2293_v41 = vcvt.s32.f32 %v1781_v38  ;;  %v1776_v47 = vunpack.c.2.s8 %v1436_v36  ;;  %v1780_v0 = vunpack.c.3.s8 %v1436_v36 }
 0x2a1   :  { %v3262_v2 = vpack.c.bf16 %v2962_v13, %v2958_v34  ;;  %v2823_v56 = vmul.f32 %v5565_v30, %v2289_v26  ;;  %v2417_v16 = vcvt.s32.f32 %v1905_v40  ;;  %v2421_v11 = vcvt.s32.f32 %v1909_v15  ;;  %v1465_v26 = vld [vmem:[#allocation5 + $0x318] sm:$0xff] }
 0x2a2   :  { %3583 = vmatpush1.bf16.msra.mxu0 %v3198_v1  ;;  %v2827_v43 = vmul.f32 %v5565_v30, %v2293_v41  ;;  %v2288_v58 = vcvt.s32.f32 %v1776_v47  ;;  %v2292_v54 = vcvt.s32.f32 %v1780_v0  ;;  %v1904_v14 = vunpack.c.2.s8 %v1468_v37  ;;  %v1432_v41 = vld [vmem:[#allocation5 + $0x210] sm:$0xff] }
 0x2a3   :  { %3624 = vmatpush1.bf16.msra.mxu1 %v3262_v2  ;;  %v2951_v33 = vmul.f32 %v5565_v30, %v2417_v16  ;;  %v2955_v46 = vmul.f32 %v5565_v30, %v2421_v11  ;;  %v1908_v18 = vunpack.c.3.s8 %v1468_v37  ;;  %v1769_v19 = vunpack.c.0.s8 %v1437_v63 }
 0x2a4   :  { %v3195_v49 = vpack.c.bf16 %v2827_v43, %v2823_v56  ;;  %v2822_v31 = vmul.f32 %v5586_v52, %v2288_v58  ;;  %v2826_v25 = vmul.f32 %v5586_v52, %v2292_v54  ;;  %v2416_v42 = vcvt.s32.f32 %v1904_v14  ;;  %v1464_v58 = vld [vmem:[#allocation5 + $0x310] sm:$0xff] }
 0x2a5   :  { %v3259_v4 = vpack.c.bf16 %v2955_v46, %v2951_v33  ;;  %v2420_v45 = vcvt.s32.f32 %v1908_v18  ;;  %v1773_v48 = vunpack.c.1.s8 %v1437_v63  ;;  %v2281_v17 = vcvt.s32.f32 %v1769_v19  ;;  %v1433_v63 = vld [vmem:[#allocation5 + $0x218] sm:$0xff] }
 0x2a6   :  { %3584 = vmatprep.subr.bf16.mxu0 %v3195_v49  ;;  %v3194_v23 = vpack.c.bf16 %v2826_v25, %v2822_v31  ;;  %v2950_v57 = vmul.f32 %v5586_v52, %v2416_v42  ;;  %v1897_v20 = vunpack.c.0.s8 %v1469_v51  ;;  %v1901_v12 = vunpack.c.1.s8 %v1469_v51 }
 0x2a7   :  { %3625 = vmatprep.subr.bf16.mxu1 %v3259_v4  ;;  %v2954_v62 = vmul.f32 %v5586_v52, %v2420_v45  ;;  %v2285_v21 = vcvt.s32.f32 %v1773_v48  ;;  %v2815_v28 = vmul.f32 %v5565_v30, %v2281_v17  ;;  %v1768_v27 = vunpack.c.0.s8 %v1436_v36 }
 0x2a8   :  { %3585 = vmatpush1.bf16.msra.mxu0 %v3194_v23  ;;  %v2409_v53 = vcvt.s32.f32 %v1897_v20  ;;  %v2413_v10 = vcvt.s32.f32 %v1901_v12  ;;  %v1772_v9 = vunpack.c.1.s8 %v1436_v36  ;;  %v1896_v39 = vunpack.c.0.s8 %v1468_v37 }
 0x2a9   :  { %v3258_v60 = vpack.c.bf16 %v2954_v62, %v2950_v57  ;;  %v2819_v61 = vmul.f32 %v5565_v30, %v2285_v21  ;;  %v2280_v3 = vcvt.s32.f32 %v1768_v27  ;;  %v1900_v22 = vunpack.c.1.s8 %v1468_v37 }
 0x2aa   :  { %v2943_v51 = vmul.f32 %v5565_v30, %v2409_v53  ;;  %v2947_v34 = vmul.f32 %v5565_v30, %v2413_v10  ;;  %v2284_v38 = vcvt.s32.f32 %v1772_v9  ;;  %v2408_v13 = vcvt.s32.f32 %v1896_v39 }
 0x2ab   :  { %3626 = vmatpush1.bf16.msra.mxu1 %v3258_v60  ;;  %v3191_v40 = vpack.c.bf16 %v2819_v61, %v2815_v28  ;;  %v2814_v15 = vmul.f32 %v5586_v52, %v2280_v3  ;;  %v2412_v1 = vcvt.s32.f32 %v1900_v22  ;;  %v1761_v36 = vunpack.c.2.s8 %v1433_v63 }
 0x2ac   :  { %v3255_v47 = vpack.c.bf16 %v2947_v34, %v2943_v51  ;;  %v2818_v0 = vmul.f32 %v5586_v52, %v2284_v38  ;;  %v2942_v2 = vmul.f32 %v5586_v52, %v2408_v13  ;;  %v1765_v37 = vunpack.c.3.s8 %v1433_v63 }
 0x2ad   :  { %3586 = vmatprep.subr.bf16.mxu0 %v3191_v40  ;;  %v2946_v56 = vmul.f32 %v5586_v52, %v2412_v1  ;;  %v2273_v16 = vcvt.s32.f32 %v1761_v36  ;;  %v1889_v11 = vunpack.c.2.s8 %v1465_v26  ;;  %v1893_v43 = vunpack.c.3.s8 %v1465_v26 }
 0x2ae   :  { %3627 = vmatprep.subr.bf16.mxu1 %v3255_v47  ;;  %v3190_v54 = vpack.c.bf16 %v2818_v0, %v2814_v15  ;;  %v2277_v14 = vcvt.s32.f32 %v1765_v37  ;;  %v1760_v33 = vunpack.c.2.s8 %v1432_v41  ;;  %v1764_v46 = vunpack.c.3.s8 %v1432_v41 }
 0x2af   :  { %v3254_v18 = vpack.c.bf16 %v2946_v56, %v2942_v2  ;;  %v2807_v19 = vmul.f32 %v5565_v30, %v2273_v16  ;;  %v2401_v49 = vcvt.s32.f32 %v1889_v11  ;;  %v2405_v31 = vcvt.s32.f32 %v1893_v43  ;;  %v1493_v16 = vld [vmem:[#allocation5 + $0x3f8] sm:$0xff] }
 0x2b0   :  { %3587 = vmatpush1.bf16.msra.mxu0 %v3190_v54  ;;  %v2811_v25 = vmul.f32 %v5565_v30, %v2277_v14  ;;  %v2272_v42 = vcvt.s32.f32 %v1760_v33  ;;  %v2276_v4 = vcvt.s32.f32 %v1764_v46  ;;  %v1888_v45 = vunpack.c.2.s8 %v1464_v58  ;;  %v1460_v14 = vld [vmem:[#allocation5 + $0x2f0] sm:$0xff] }
 0x2b1   :  { %3628 = vmatpush1.bf16.msra.mxu1 %v3254_v18  ;;  %v2935_v48 = vmul.f32 %v5565_v30, %v2401_v49  ;;  %v2939_v17 = vmul.f32 %v5565_v30, %v2405_v31  ;;  %v1892_v23 = vunpack.c.3.s8 %v1464_v58  ;;  %v1753_v57 = vunpack.c.0.s8 %v1433_v63 }
 0x2b2   :  { %v3187_v20 = vpack.c.bf16 %v2811_v25, %v2807_v19  ;;  %v2806_v12 = vmul.f32 %v5586_v52, %v2272_v42  ;;  %v2810_v62 = vmul.f32 %v5586_v52, %v2276_v4  ;;  %v2400_v21 = vcvt.s32.f32 %v1888_v45  ;;  %v1492_v42 = vld [vmem:[#allocation5 + $0x3f0] sm:$0xff] }
 0x2b3   :  { %v3251_v28 = vpack.c.bf16 %v2939_v17, %v2935_v48  ;;  %v2404_v27 = vcvt.s32.f32 %v1892_v23  ;;  %v1757_v53 = vunpack.c.1.s8 %v1433_v63  ;;  %v2265_v10 = vcvt.s32.f32 %v1753_v57  ;;  %v1461_v63 = vld [vmem:[#allocation5 + $0x2f8] sm:$0xff] }
 0x2b4   :  { %3588 = vmatprep.subr.bf16.mxu0 %v3187_v20  ;;  %v3186_v9 = vpack.c.bf16 %v2810_v62, %v2806_v12  ;;  %v2934_v39 = vmul.f32 %v5586_v52, %v2400_v21  ;;  %v1881_v60 = vunpack.c.0.s8 %v1465_v26  ;;  %v1885_v61 = vunpack.c.1.s8 %v1465_v26 }
 0x2b5   :  { %3629 = vmatprep.subr.bf16.mxu1 %v3251_v28  ;;  %v2938_v3 = vmul.f32 %v5586_v52, %v2404_v27  ;;  %v2269_v22 = vcvt.s32.f32 %v1757_v53  ;;  %v2799_v51 = vmul.f32 %v5565_v30, %v2265_v10  ;;  %v1752_v34 = vunpack.c.0.s8 %v1432_v41 }
 0x2b6   :  { %3589 = vmatpush1.bf16.msra.mxu0 %v3186_v9  ;;  %v2393_v38 = vcvt.s32.f32 %v1881_v60  ;;  %v2397_v13 = vcvt.s32.f32 %v1885_v61  ;;  %v1756_v40 = vunpack.c.1.s8 %v1432_v41  ;;  %v1880_v15 = vunpack.c.0.s8 %v1464_v58 }
 0x2b7   :  { %v3250_v1 = vpack.c.bf16 %v2938_v3, %v2934_v39  ;;  %v2803_v36 = vmul.f32 %v5565_v30, %v2269_v22  ;;  %v2264_v47 = vcvt.s32.f32 %v1752_v34  ;;  %v1884_v0 = vunpack.c.1.s8 %v1464_v58 }
 0x2b8   :  { %v2927_v26 = vmul.f32 %v5565_v30, %v2393_v38  ;;  %v2931_v2 = vmul.f32 %v5565_v30, %v2397_v13  ;;  %v2268_v37 = vcvt.s32.f32 %v1756_v40  ;;  %v2392_v56 = vcvt.s32.f32 %v1880_v15 }
 0x2b9   :  { %3630 = vmatpush1.bf16.msra.mxu1 %v3250_v1  ;;  %v3183_v11 = vpack.c.bf16 %v2803_v36, %v2799_v51  ;;  %v2798_v43 = vmul.f32 %v5586_v52, %v2264_v47  ;;  %v2396_v54 = vcvt.s32.f32 %v1884_v0  ;;  %v1873_v41 = vunpack.c.2.s8 %v1461_v63 }
 0x2ba   :  { %v3247_v33 = vpack.c.bf16 %v2931_v2, %v2927_v26  ;;  %v2802_v46 = vmul.f32 %v5586_v52, %v2268_v37  ;;  %v2926_v18 = vmul.f32 %v5586_v52, %v2392_v56  ;;  %v1877_v58 = vunpack.c.3.s8 %v1461_v63 }
 0x2bb   :  { %3590 = vmatprep.subr.bf16.mxu0 %v3183_v11  ;;  %v2930_v19 = vmul.f32 %v5586_v52, %v2396_v54  ;;  %v2385_v49 = vcvt.s32.f32 %v1873_v41  ;;  %v2001_v31 = vunpack.c.2.s8 %v1493_v16  ;;  %v2005_v25 = vunpack.c.3.s8 %v1493_v16 }
 0x2bc   :  { %3631 = vmatprep.subr.bf16.mxu1 %v3247_v33  ;;  %v3182_v4 = vpack.c.bf16 %v2802_v46, %v2798_v43  ;;  %v2389_v45 = vcvt.s32.f32 %v1877_v58  ;;  %v1872_v48 = vunpack.c.2.s8 %v1460_v14  ;;  %v1876_v17 = vunpack.c.3.s8 %v1460_v14 }
 0x2bd   :  { %v3246_v23 = vpack.c.bf16 %v2930_v19, %v2926_v18  ;;  %v2919_v57 = vmul.f32 %v5565_v30, %v2385_v49  ;;  %v2513_v20 = vcvt.s32.f32 %v2001_v31  ;;  %v2517_v12 = vcvt.s32.f32 %v2005_v25  ;;  %v1489_v49 = vld [vmem:[#allocation5 + $0x3d8] sm:$0xff] }
 0x2be   :  { %3591 = vmatpush1.bf16.msra.mxu0 %v3182_v4  ;;  %v2923_v62 = vmul.f32 %v5565_v30, %v2389_v45  ;;  %v2384_v21 = vcvt.s32.f32 %v1872_v48  ;;  %v2388_v28 = vcvt.s32.f32 %v1876_v17  ;;  %v2000_v27 = vunpack.c.2.s8 %v1492_v42  ;;  %v1456_v45 = vld [vmem:[#allocation5 + $0x2d0] sm:$0xff] }
 0x2bf   :  { %3632 = vmatpush1.bf16.msra.mxu1 %v3246_v23  ;;  %v3047_v53 = vmul.f32 %v5565_v30, %v2513_v20  ;;  %v3051_v10 = vmul.f32 %v5565_v30, %v2517_v12  ;;  %v2004_v9 = vunpack.c.3.s8 %v1492_v42  ;;  %v1865_v39 = vunpack.c.0.s8 %v1461_v63 }
 0x2c0   :  { %v3243_v60 = vpack.c.bf16 %v2923_v62, %v2919_v57  ;;  %v2918_v61 = vmul.f32 %v5586_v52, %v2384_v21  ;;  %v2922_v3 = vmul.f32 %v5586_v52, %v2388_v28  ;;  %v2512_v22 = vcvt.s32.f32 %v2000_v27  ;;  %v1488_v21 = vld [vmem:[#allocation5 + $0x3d0] sm:$0xff] }
 0x2c1   :  { %v3307_v51 = vpack.c.bf16 %v3051_v10, %v3047_v53  ;;  %v2516_v34 = vcvt.s32.f32 %v2004_v9  ;;  %v1869_v38 = vunpack.c.1.s8 %v1461_v63  ;;  %v2377_v13 = vcvt.s32.f32 %v1865_v39  ;;  %v1457_v63 = vld [vmem:[#allocation5 + $0x2d8] sm:$0xff] }
 0x2c2   :  { %3592 = vmatprep.subr.bf16.mxu0 %v3243_v60  ;;  %v3242_v40 = vpack.c.bf16 %v2922_v3, %v2918_v61  ;;  %v3046_v15 = vmul.f32 %v5586_v52, %v2512_v22  ;;  %v1993_v1 = vunpack.c.0.s8 %v1493_v16  ;;  %v1997_v36 = vunpack.c.1.s8 %v1493_v16 }
 0x2c3   :  { %3633 = vmatprep.subr.bf16.mxu1 %v3307_v51  ;;  %v3050_v47 = vmul.f32 %v5586_v52, %v2516_v34  ;;  %v2381_v0 = vcvt.s32.f32 %v1869_v38  ;;  %v2911_v26 = vmul.f32 %v5565_v30, %v2377_v13  ;;  %v1864_v2 = vunpack.c.0.s8 %v1460_v14 }
 0x2c4   :  { %3593 = vmatpush2.bf16.msra.mxu0 %v3242_v40  ;;  %v2505_v37 = vcvt.s32.f32 %v1993_v1  ;;  %v2509_v56 = vcvt.s32.f32 %v1997_v36  ;;  %v1868_v11 = vunpack.c.1.s8 %v1460_v14  ;;  %v1992_v43 = vunpack.c.0.s8 %v1492_v42 }
 0x2c5   :  { %v3306_v54 = vpack.c.bf16 %v3050_v47, %v3046_v15  ;;  %v2915_v41 = vmul.f32 %v5565_v30, %v2381_v0  ;;  %v2376_v33 = vcvt.s32.f32 %v1864_v2  ;;  %v1996_v46 = vunpack.c.1.s8 %v1492_v42 }
 0x2c6   :  { %v3039_v16 = vmul.f32 %v5565_v30, %v2505_v37  ;;  %v3043_v18 = vmul.f32 %v5565_v30, %v2509_v56  ;;  %v2380_v58 = vcvt.s32.f32 %v1868_v11  ;;  %v2504_v19 = vcvt.s32.f32 %v1992_v43 }
 0x2c7   :  { %3634 = vmatpush2.bf16.msra.mxu1 %v3306_v54  ;;  %v3239_v31 = vpack.c.bf16 %v2915_v41, %v2911_v26  ;;  %v2910_v25 = vmul.f32 %v5586_v52, %v2376_v33  ;;  %v2508_v4 = vcvt.s32.f32 %v1996_v46  ;;  %v1857_v14 = vunpack.c.2.s8 %v1457_v63 }
 0x2c8   :  { %v3303_v48 = vpack.c.bf16 %v3043_v18, %v3039_v16  ;;  %v2914_v17 = vmul.f32 %v5586_v52, %v2380_v58  ;;  %v3038_v23 = vmul.f32 %v5586_v52, %v2504_v19  ;;  %v1861_v42 = vunpack.c.3.s8 %v1457_v63 }
 0x2c9   :  { %3594 = vmatprep.subr.bf16.mxu0 %v3239_v31  ;;  %v3042_v57 = vmul.f32 %v5586_v52, %v2508_v4  ;;  %v2369_v20 = vcvt.s32.f32 %v1857_v14  ;;  %v1985_v12 = vunpack.c.2.s8 %v1489_v49  ;;  %v1989_v62 = vunpack.c.3.s8 %v1489_v49 }
 0x2ca   :  { %3635 = vmatprep.subr.bf16.mxu1 %v3303_v48  ;;  %v3238_v28 = vpack.c.bf16 %v2914_v17, %v2910_v25  ;;  %v2373_v27 = vcvt.s32.f32 %v1861_v42  ;;  %v1856_v53 = vunpack.c.2.s8 %v1456_v45  ;;  %v1860_v10 = vunpack.c.3.s8 %v1456_v45 }
 0x2cb   :  { %v3302_v9 = vpack.c.bf16 %v3042_v57, %v3038_v23  ;;  %v2903_v39 = vmul.f32 %v5565_v30, %v2369_v20  ;;  %v2497_v60 = vcvt.s32.f32 %v1985_v12  ;;  %v2501_v61 = vcvt.s32.f32 %v1989_v62  ;;  %v6651_v20 = vld [vmem:[#allocation5 + $0x3b8] sm:$0xff] }
 0x2cc   :  { %3595 = vmatpush2.bf16.msra.mxu0 %v3238_v28  ;;  %v2907_v3 = vmul.f32 %v5565_v30, %v2373_v27  ;;  %v2368_v22 = vcvt.s32.f32 %v1856_v53  ;;  %v2372_v51 = vcvt.s32.f32 %v1860_v10  ;;  %v1984_v34 = vunpack.c.2.s8 %v1488_v21  ;;  %v6655_v27 = vld [vmem:[#allocation5 + $0x2b0] sm:$0xff] }
 0x2cd   :  { %3636 = vmatpush2.bf16.msra.mxu1 %v3302_v9  ;;  %v3031_v38 = vmul.f32 %v5565_v30, %v2497_v60  ;;  %v3035_v13 = vmul.f32 %v5565_v30, %v2501_v61  ;;  %v1988_v40 = vunpack.c.3.s8 %v1488_v21  ;;  %v1849_v15 = vunpack.c.0.s8 %v1457_v63 }
 0x2ce   :  { %v3235_v1 = vpack.c.bf16 %v2907_v3, %v2903_v39  ;;  %v2902_v36 = vmul.f32 %v5586_v52, %v2368_v22  ;;  %v2906_v47 = vmul.f32 %v5586_v52, %v2372_v51  ;;  %v2496_v0 = vcvt.s32.f32 %v1984_v34  ;;  %v6663_v22 = vld [vmem:[#allocation5 + $0x3b0] sm:$0xff] }
 0x2cf   :  { %v3299_v26 = vpack.c.bf16 %v3035_v13, %v3031_v38  ;;  %v2500_v2 = vcvt.s32.f32 %v1988_v40  ;;  %v1853_v37 = vunpack.c.1.s8 %v1457_v63  ;;  %v2361_v56 = vcvt.s32.f32 %v1849_v15  ;;  %v6646_v63 = vld [vmem:[#allocation5 + $0x2b8] sm:$0xff] }
 0x2d0   :  { %3596 = vmatprep.subr.bf16.mxu0 %v3235_v1  ;;  %v3234_v11 = vpack.c.bf16 %v2906_v47, %v2902_v36  ;;  %v3030_v43 = vmul.f32 %v5586_v52, %v2496_v0  ;;  %v1977_v54 = vunpack.c.0.s8 %v1489_v49  ;;  %v1981_v41 = vunpack.c.1.s8 %v1489_v49 }
 0x2d1   :  { %3637 = vmatprep.subr.bf16.mxu1 %v3299_v26  ;;  %v3034_v33 = vmul.f32 %v5586_v52, %v2500_v2  ;;  %v2365_v46 = vcvt.s32.f32 %v1853_v37  ;;  %v2895_v16 = vmul.f32 %v5565_v30, %v2361_v56  ;;  %v1848_v18 = vunpack.c.0.s8 %v1456_v45 }
 0x2d2   :  { %3597 = vmatpush2.bf16.msra.mxu0 %v3234_v11  ;;  %v2489_v58 = vcvt.s32.f32 %v1977_v54  ;;  %v2493_v19 = vcvt.s32.f32 %v1981_v41  ;;  %v1852_v31 = vunpack.c.1.s8 %v1456_v45  ;;  %v1976_v25 = vunpack.c.0.s8 %v1488_v21 }
 0x2d3   :  { %v3298_v4 = vpack.c.bf16 %v3034_v33, %v3030_v43  ;;  %v2899_v14 = vmul.f32 %v5565_v30, %v2365_v46  ;;  %v2360_v48 = vcvt.s32.f32 %v1848_v18  ;;  %v1980_v17 = vunpack.c.1.s8 %v1488_v21 }
 0x2d4   :  { %v3023_v49 = vmul.f32 %v5565_v30, %v2489_v58  ;;  %v3027_v23 = vmul.f32 %v5565_v30, %v2493_v19  ;;  %v2364_v42 = vcvt.s32.f32 %v1852_v31  ;;  %v2488_v57 = vcvt.s32.f32 %v1976_v25 }
 0x2d5   :  { %3638 = vmatpush2.bf16.msra.mxu1 %v3298_v4  ;;  %v3231_v12 = vpack.c.bf16 %v2899_v14, %v2895_v16  ;;  %v2894_v45 = vmul.f32 %v5586_v52, %v2360_v48  ;;  %v2492_v62 = vcvt.s32.f32 %v1980_v17  ;;  %v1841_v28 = vunpack.c.2.s8 %v6646_v63 }
 0x2d6   :  { %v3295_v53 = vpack.c.bf16 %v3027_v23, %v3023_v49  ;;  %v2898_v21 = vmul.f32 %v5586_v52, %v2364_v42  ;;  %v3022_v10 = vmul.f32 %v5586_v52, %v2488_v57  ;;  %v1845_v9 = vunpack.c.3.s8 %v6646_v63 }
 0x2d7   :  { %3598 = vmatprep.subr.bf16.mxu0 %v3231_v12  ;;  %v3026_v39 = vmul.f32 %v5586_v52, %v2492_v62  ;;  %v2353_v60 = vcvt.s32.f32 %v1841_v28  ;;  %v1969_v61 = vunpack.c.2.s8 %v6651_v20  ;;  %v1973_v3 = vunpack.c.3.s8 %v6651_v20 }
 0x2d8   :  { %3639 = vmatprep.subr.bf16.mxu1 %v3295_v53  ;;  %v3230_v51 = vpack.c.bf16 %v2898_v21, %v2894_v45  ;;  %v2357_v34 = vcvt.s32.f32 %v1845_v9  ;;  %v1840_v38 = vunpack.c.2.s8 %v6655_v27  ;;  %v1844_v13 = vunpack.c.3.s8 %v6655_v27 }
 0x2d9   :  { %v3294_v40 = vpack.c.bf16 %v3026_v39, %v3022_v10  ;;  %v2887_v15 = vmul.f32 %v5565_v30, %v2353_v60  ;;  %v2481_v1 = vcvt.s32.f32 %v1969_v61  ;;  %v2485_v36 = vcvt.s32.f32 %v1973_v3  ;;  %v6668_v47 = vpop.f32.mrf.mxu0  ;;  %v1449_v39 = vld [vmem:[#allocation5 + $0x298] sm:$0xff] }
 0x2da   :  { %3599 = vmatpush2.bf16.msra.mxu0 %v3230_v51  ;;  %v2891_v0 = vmul.f32 %v5565_v30, %v2357_v34  ;;  %v2352_v26 = vcvt.s32.f32 %v1840_v38  ;;  %v2356_v2 = vcvt.s32.f32 %v1844_v13  ;;  %v1968_v37 = vunpack.c.2.s8 %v6663_v22  ;;  %v6672_v56 = vpop.f32.mrf.mxu1 }
 0x2db   :  { %3640 = vmatpush2.bf16.msra.mxu1 %v3294_v40  ;;  %v3015_v11 = vmul.f32 %v5565_v30, %v2481_v1  ;;  %v3019_v43 = vmul.f32 %v5565_v30, %v2485_v36  ;;  %v1972_v54 = vunpack.c.3.s8 %v6663_v22  ;;  %v1833_v41 = vunpack.c.0.s8 %v6646_v63  ;;  %v6678_v33 = vpop.f32.mrf.mxu0 }
 0x2dc   :  { %v3227_v46 = vpack.c.bf16 %v2891_v0, %v2887_v15  ;;  %v2886_v16 = vmul.f32 %v5586_v52, %v2352_v26  ;;  %v2890_v18 = vmul.f32 %v5586_v52, %v2356_v2  ;;  %v2480_v58 = vcvt.s32.f32 %v1968_v37  ;;  %v6682_v19 = vpop.f32.mrf.mxu1  ;;  %v1481_v15 = vld [vmem:[#allocation5 + $0x398] sm:$0xff]  ;;  %v1448_v26 = vld [vmem:[#allocation5 + $0x290] sm:$0xff] }
 0x2dd   :  { %v3291_v31 = vpack.c.bf16 %v3019_v43, %v3015_v11  ;;  %v2484_v25 = vcvt.s32.f32 %v1972_v54  ;;  %v1837_v4 = vunpack.c.1.s8 %v6646_v63  ;;  %v2345_v14 = vcvt.s32.f32 %v1833_v41  ;;  %v3450_v48 = vpop.f32.mrf.mxu0 }
 0x2de   :  { %3600 = vmatprep.subr.bf16.mxu0 %v3227_v46  ;;  %v3226_v17 = vpack.c.bf16 %v2890_v18, %v2886_v16  ;;  %v3014_v49 = vmul.f32 %v5586_v52, %v2480_v58  ;;  %v1961_v23 = vunpack.c.0.s8 %v6651_v20  ;;  %v1965_v42 = vunpack.c.1.s8 %v6651_v20  ;;  %v3491_v57 = vpop.f32.mrf.mxu1  ;;  %v1480_v16 = vld [vmem:[#allocation5 + $0x390] sm:$0xff] }
 0x2df   :  { %3641 = vmatprep.subr.bf16.mxu1 %v3291_v31  ;;  %v3018_v12 = vmul.f32 %v5586_v52, %v2484_v25  ;;  %v2349_v45 = vcvt.s32.f32 %v1837_v4  ;;  %v2879_v62 = vmul.f32 %v5565_v30, %v2345_v14  ;;  %v1832_v28 = vunpack.c.0.s8 %v6655_v27  ;;  %v3451_v63 = vpop.f32.mrf.mxu0 }
 0x2e0   :  { %3601 = vmatpush2.bf16.msra.mxu0 %v3226_v17  ;;  %v2473_v53 = vcvt.s32.f32 %v1961_v23  ;;  %v2477_v21 = vcvt.s32.f32 %v1965_v42  ;;  %v1836_v10 = vunpack.c.1.s8 %v6655_v27  ;;  %v1960_v9 = vunpack.c.0.s8 %v6663_v22  ;;  %v3492_v60 = vpop.f32.mrf.mxu1 }
 0x2e1   :  { %v3290_v20 = vpack.c.bf16 %v3018_v12, %v3014_v49  ;;  %v2883_v61 = vmul.f32 %v5565_v30, %v2349_v45  ;;  %v2344_v3 = vcvt.s32.f32 %v1832_v28  ;;  %v1964_v51 = vunpack.c.1.s8 %v6663_v22 }
 0x2e2   :  { %v3007_v34 = vmul.f32 %v5565_v30, %v2473_v53  ;;  %v3011_v38 = vmul.f32 %v5565_v30, %v2477_v21  ;;  %v2348_v13 = vcvt.s32.f32 %v1836_v10  ;;  %v2472_v40 = vcvt.s32.f32 %v1960_v9 }
 0x2e3   :  { %3642 = vmatpush2.bf16.msra.mxu1 %v3290_v20  ;;  %v3223_v1 = vpack.c.bf16 %v2883_v61, %v2879_v62  ;;  %v2878_v27 = vmul.f32 %v5586_v52, %v2344_v3  ;;  %v2476_v36 = vcvt.s32.f32 %v1964_v51  ;;  %v1825_v0 = vunpack.c.2.s8 %v1449_v39 }
 0x2e4   :  { %v3287_v2 = vpack.c.bf16 %v3011_v38, %v3007_v34  ;;  %v2882_v37 = vmul.f32 %v5586_v52, %v2348_v13  ;;  %v3006_v11 = vmul.f32 %v5586_v52, %v2472_v40  ;;  %v1829_v22 = vunpack.c.3.s8 %v1449_v39 }
 0x2e5   :  { %3602 = vmatprep.subr.bf16.mxu0 %v3223_v1  ;;  %v3010_v43 = vmul.f32 %v5586_v52, %v2476_v36  ;;  %v2337_v54 = vcvt.s32.f32 %v1825_v0  ;;  %v1953_v41 = vunpack.c.2.s8 %v1481_v15  ;;  %v1957_v46 = vunpack.c.3.s8 %v1481_v15 }
 0x2e6   :  { %3643 = vmatprep.subr.bf16.mxu1 %v3287_v2  ;;  %v3222_v18 = vpack.c.bf16 %v2882_v37, %v2878_v27  ;;  %v2341_v58 = vcvt.s32.f32 %v1829_v22  ;;  %v1824_v31 = vunpack.c.2.s8 %v1448_v26  ;;  %v1828_v25 = vunpack.c.3.s8 %v1448_v26 }
 0x2e7   :  { %v3286_v4 = vpack.c.bf16 %v3010_v43, %v3006_v11  ;;  %v2871_v14 = vmul.f32 %v5565_v30, %v2337_v54  ;;  %v2465_v48 = vcvt.s32.f32 %v1953_v41  ;;  %v2469_v17 = vcvt.s32.f32 %v1957_v46 }
 0x2e8   :  { %3603 = vmatpush2.bf16.msra.mxu0 %v3222_v18  ;;  %v2875_v49 = vmul.f32 %v5565_v30, %v2341_v58  ;;  %v2336_v23 = vcvt.s32.f32 %v1824_v31  ;;  %v2340_v42 = vcvt.s32.f32 %v1828_v25  ;;  %v1952_v57 = vunpack.c.2.s8 %v1480_v16  ;;  %v3673_v58 = vld [vmem:[#allocation7 + $0x38] sm:$0xff] }
 0x2e9   :  { %3644 = vmatpush2.bf16.msra.mxu1 %v3286_v4  ;;  %v2999_v12 = vmul.f32 %v5565_v30, %v2465_v48  ;;  %v3003_v45 = vmul.f32 %v5565_v30, %v2469_v17  ;;  %v1956_v62 = vunpack.c.3.s8 %v1480_v16  ;;  %v1817_v28 = vunpack.c.0.s8 %v1449_v39 }
 0x2ea   :  { %v3219_v63 = vpack.c.bf16 %v2875_v49, %v2871_v14  ;;  %v2870_v53 = vmul.f32 %v5586_v52, %v2336_v23  ;;  %v2874_v21 = vmul.f32 %v5586_v52, %v2340_v42  ;;  %v2464_v10 = vcvt.s32.f32 %v1952_v57  ;;  %v3672_v14 = vld [vmem:[#allocation7 + $0x30] sm:$0xff] }
 0x2eb   :  { %v3283_v9 = vpack.c.bf16 %v3003_v45, %v2999_v12  ;;  %v2468_v60 = vcvt.s32.f32 %v1956_v62  ;;  %v1821_v20 = vunpack.c.1.s8 %v1449_v39  ;;  %v2329_v61 = vcvt.s32.f32 %v1817_v28  ;;  %v6713_v39 = vld [vmem:[%s6921_s6] sm:$0xf] }
 0x2ec   :  { %3604 = vmatprep.subr.bf16.mxu0 %v3219_v63  ;;  %v3218_v3 = vpack.c.bf16 %v2874_v21, %v2870_v53  ;;  %v2998_v51 = vmul.f32 %v5586_v52, %v2464_v10  ;;  %v1945_v34 = vunpack.c.0.s8 %v1481_v15  ;;  %v1949_v38 = vunpack.c.1.s8 %v1481_v15 }
 0x2ed   :  { %3645 = vmatprep.subr.bf16.mxu1 %v3283_v9  ;;  %v3002_v13 = vmul.f32 %v5586_v52, %v2468_v60  ;;  %v2333_v40 = vcvt.s32.f32 %v1821_v20  ;;  %v2863_v1 = vmul.f32 %v5565_v30, %v2329_v61  ;;  %v1816_v27 = vunpack.c.0.s8 %v1448_v26  ;;  %v3671_v20 = vld [vmem:[#allocation7 + $0x28] sm:$0xff] }
 0x2ee   :  { %3605 = vmatpush2.bf16.msra.mxu0 %v3218_v3  ;;  %v2457_v36 = vcvt.s32.f32 %v1945_v34  ;;  %v2461_v0 = vcvt.s32.f32 %v1949_v38  ;;  %v1820_v2 = vunpack.c.1.s8 %v1448_v26  ;;  %v1944_v37 = vunpack.c.0.s8 %v1480_v16 }
 0x2ef   :  { %v3282_v11 = vpack.c.bf16 %v3002_v13, %v2998_v51  ;;  %v2867_v15 = vmul.f32 %v5565_v30, %v2333_v40  ;;  %v2328_v22 = vcvt.s32.f32 %v1816_v27  ;;  %v1948_v43 = vunpack.c.1.s8 %v1480_v16  ;;  %v3670_v40 = vld [vmem:[#allocation7 + $0x20] sm:$0xff] }
 0x2f0   :  { %v2991_v54 = vmul.f32 %v5565_v30, %v2457_v36  ;;  %v2995_v41 = vmul.f32 %v5565_v30, %v2461_v0  ;;  %v2332_v46 = vcvt.s32.f32 %v1820_v2  ;;  %v2456_v18 = vcvt.s32.f32 %v1944_v37 }
 0x2f1   :  { %3646 = vmatpush2.bf16.msra.mxu1 %v3282_v11  ;;  %v3215_v26 = vpack.c.bf16 %v2867_v15, %v2863_v1  ;;  %v2862_v31 = vmul.f32 %v5586_v52, %v2328_v22  ;;  %v2460_v25 = vcvt.s32.f32 %v1948_v43  ;;  %v3313_v4 = vrot.slane %v6713_v39, %v5531_v7 }
 0x2f2   :  { %v3279_v48 = vpack.c.bf16 %v2995_v41, %v2991_v54  ;;  %v2866_v17 = vmul.f32 %v5586_v52, %v2332_v46  ;;  %v2990_v16 = vmul.f32 %v5586_v52, %v2456_v18  ;;  %v3317_v30 = vrot.slane %v6713_v39, %v5525_v5 }
 0x2f3   :  { %3606 = vmatprep.subr.bf16.mxu0 %v3215_v26  ;;  %v2994_v49 = vmul.f32 %v5586_v52, %v2460_v25  ;;  %v3365_v23 = vadd.f32 %v6518_v35, %v3313_v4  ;;  %v3727_v42 = vunpack.c.2.s8 %v3673_v58  ;;  %v3729_v57 = vunpack.c.3.s8 %v3673_v58  ;;  %v3669_v25 = vld [vmem:[#allocation7 + $0x18] sm:$0xff] }
 0x2f4   :  { %3647 = vmatprep.subr.bf16.mxu1 %v3279_v48  ;;  %v3214_v12 = vpack.c.bf16 %v2866_v17, %v2862_v31  ;;  %v3367_v45 = vadd.f32 %v6524_v55, %v3317_v30  ;;  %v3726_v62 = vunpack.c.2.s8 %v3672_v14  ;;  %v3728_v28 = vunpack.c.3.s8 %v3672_v14 }
 0x2f5   :  { %v3278_v63 = vpack.c.bf16 %v2994_v49, %v2990_v16  ;;  %v6729_v53 = vadd.f32 %v6520_v32, %v3365_v23  ;;  %v3855_v21 = vcvt.s32.f32 %v3727_v42  ;;  %v3857_v10 = vcvt.s32.f32 %v3729_v57  ;;  %v3668_v42 = vld [vmem:[#allocation7 + $0x10] sm:$0xff] }
 0x2f6   :  { %3607 = vmatpush2.bf16.msra.mxu0 %v3214_v12  ;;  %v6732_v9 = vadd.f32 %v6526_v29, %v3367_v45  ;;  %v3854_v52 = vcvt.s32.f32 %v3726_v62  ;;  %v3856_v35 = vcvt.s32.f32 %v3728_v28  ;;  %v3723_v60 = vunpack.c.0.s8 %v3673_v58 }
 0x2f7   :  { %3648 = vmatpush2.bf16.msra.mxu1 %v3278_v63  ;;  %v3995_v61 = vmul.f32 %v5559_v24, %v3855_v21  ;;  %v3997_v55 = vmul.f32 %v5559_v24, %v3857_v10  ;;  %v3725_v3 = vunpack.c.1.s8 %v3673_v58  ;;  %v3722_v51 = vunpack.c.0.s8 %v3672_v14 }
 0x2f8   :  { %v3994_v32 = vmul.f32 %v5578_v44, %v3854_v52  ;;  %v3996_v34 = vmul.f32 %v5578_v44, %v3856_v35  ;;  %v3851_v38 = vcvt.s32.f32 %v3723_v60  ;;  %v3724_v13 = vunpack.c.1.s8 %v3672_v14 }
 0x2f9   :  { %3609 = vmatmul.mubr.bf16.vlgmr.msra.gmra.mxu0 %v6335_v59  ;;  %v4109_v29 = vpack.c.bf16 %v3997_v55, %v3995_v61  ;;  %v3853_v1 = vcvt.s32.f32 %v3725_v3  ;;  %v3850_v27 = vcvt.s32.f32 %v3722_v51  ;;  %v3719_v36 = vunpack.c.2.s8 %v3671_v20 }
 0x2fa   :  { %3650 = vmatmul.mubr.bf16.vlgmr.msra.gmra.mxu1 %v6343_v50  ;;  %v4108_v0 = vpack.c.bf16 %v3996_v34, %v3994_v32  ;;  %v3991_v2 = vmul.f32 %v5559_v24, %v3851_v38  ;;  %v3852_v37 = vcvt.s32.f32 %v3724_v13  ;;  %v3721_v11 = vunpack.c.3.s8 %v3671_v20 }
 0x2fb   :  { %4170 = vmatprep.subr.bf16.mxu0 %v4109_v29  ;;  %v3993_v15 = vmul.f32 %v5559_v24, %v3853_v1  ;;  %v3990_v22 = vmul.f32 %v5578_v44, %v3850_v27  ;;  %v3847_v43 = vcvt.s32.f32 %v3719_v36  ;;  %v3718_v54 = vunpack.c.2.s8 %v3670_v40 }
 0x2fc   :  { %4171 = vmatpush1.bf16.msra.mxu0 %v4108_v0  ;;  %v3992_v59 = vmul.f32 %v5578_v44, %v3852_v37  ;;  %v3849_v41 = vcvt.s32.f32 %v3721_v11  ;;  %v3720_v46 = vunpack.c.3.s8 %v3670_v40  ;;  %v3715_v18 = vunpack.c.0.s8 %v3671_v20 }
 0x2fd   :  { %v4107_v58 = vpack.c.bf16 %v3993_v15, %v3991_v2  ;;  %v3987_v50 = vmul.f32 %v5559_v24, %v3847_v43  ;;  %v3846_v26 = vcvt.s32.f32 %v3718_v54  ;;  %v3717_v31 = vunpack.c.1.s8 %v3671_v20  ;;  %v3666_v15 = vld [vmem:[#allocation7] sm:$0xff] }
 0x2fe   :  { %v4106_v4 = vpack.c.bf16 %v3992_v59, %v3990_v22  ;;  %v3989_v14 = vmul.f32 %v5559_v24, %v3849_v41  ;;  %v3848_v48 = vcvt.s32.f32 %v3720_v46  ;;  %v3843_v17 = vcvt.s32.f32 %v3715_v18 }
 0x2ff   :  { %4172 = vmatprep.subr.bf16.mxu0 %v4107_v58  ;;  %v3986_v16 = vmul.f32 %v5578_v44, %v3846_v26  ;;  %v3845_v30 = vcvt.s32.f32 %v3717_v31  ;;  %v3714_v49 = vunpack.c.0.s8 %v3670_v40  ;;  %v3716_v23 = vunpack.c.1.s8 %v3670_v40  ;;  %v3667_v40 = vld [vmem:[#allocation7 + $0x8] sm:$0xff] }
 0x300   :  { %4173 = vmatpush1.bf16.msra.mxu0 %v4106_v4  ;;  %v4105_v57 = vpack.c.bf16 %v3989_v14, %v3987_v50  ;;  %v3988_v12 = vmul.f32 %v5578_v44, %v3848_v48  ;;  %v3983_v45 = vmul.f32 %v5559_v24, %v3843_v17  ;;  %v3711_v62 = vunpack.c.2.s8 %v3669_v25 }
 0x301   :  { %v3985_v28 = vmul.f32 %v5559_v24, %v3845_v30  ;;  %v3842_v63 = vcvt.s32.f32 %v3714_v49  ;;  %v3844_v21 = vcvt.s32.f32 %v3716_v23  ;;  %v3713_v10 = vunpack.c.3.s8 %v3669_v25 }
 0x302   :  { %4174 = vmatprep.subr.bf16.mxu0 %v4105_v57  ;;  %v4104_v52 = vpack.c.bf16 %v3988_v12, %v3986_v16  ;;  %v3839_v35 = vcvt.s32.f32 %v3711_v62  ;;  %v3710_v60 = vunpack.c.2.s8 %v3668_v42  ;;  %v3712_v20 = vunpack.c.3.s8 %v3668_v42 }
 0x303   :  { %v4103_v61 = vpack.c.bf16 %v3985_v28, %v3983_v45  ;;  %v3982_v55 = vmul.f32 %v5578_v44, %v3842_v63  ;;  %v3984_v3 = vmul.f32 %v5578_v44, %v3844_v21  ;;  %v3841_v51 = vcvt.s32.f32 %v3713_v10 }
 0x304   :  { %4175 = vmatpush1.bf16.msra.mxu0 %v4104_v52  ;;  %v3979_v32 = vmul.f32 %v5559_v24, %v3839_v35  ;;  %v3838_v34 = vcvt.s32.f32 %v3710_v60  ;;  %v3840_v38 = vcvt.s32.f32 %v3712_v20  ;;  %v3707_v13 = vunpack.c.0.s8 %v3669_v25  ;;  %v3680_v52 = vld [vmem:[#allocation7 + $0x70] sm:$0xff] }
 0x305   :  { %4176 = vmatprep.subr.bf16.mxu0 %v4103_v61  ;;  %v4102_v29 = vpack.c.bf16 %v3984_v3, %v3982_v55  ;;  %v3981_v1 = vmul.f32 %v5559_v24, %v3841_v51  ;;  %v3709_v27 = vunpack.c.1.s8 %v3669_v25  ;;  %v3706_v36 = vunpack.c.0.s8 %v3668_v42 }
 0x306   :  { %v3978_v0 = vmul.f32 %v5578_v44, %v3838_v34  ;;  %v3980_v2 = vmul.f32 %v5578_v44, %v3840_v38  ;;  %v3835_v37 = vcvt.s32.f32 %v3707_v13  ;;  %v3708_v11 = vunpack.c.1.s8 %v3668_v42  ;;  %v3681_v42 = vld [vmem:[#allocation7 + $0x78] sm:$0xff] }
 0x307   :  { %v4101_v22 = vpack.c.bf16 %v3981_v1, %v3979_v32  ;;  %v3837_v43 = vcvt.s32.f32 %v3709_v27  ;;  %v3834_v54 = vcvt.s32.f32 %v3706_v36  ;;  %v3703_v59 = vunpack.c.2.s8 %v3667_v40 }
 0x308   :  { %4177 = vmatpush1.bf16.msra.mxu0 %v4102_v29  ;;  %v4100_v41 = vpack.c.bf16 %v3980_v2, %v3978_v0  ;;  %v3975_v46 = vmul.f32 %v5559_v24, %v3835_v37  ;;  %v3836_v18 = vcvt.s32.f32 %v3708_v11  ;;  %v3705_v58 = vunpack.c.3.s8 %v3667_v40 }
 0x309   :  { %4178 = vmatprep.subr.bf16.mxu0 %v4101_v22  ;;  %v3977_v50 = vmul.f32 %v5559_v24, %v3837_v43  ;;  %v3974_v26 = vmul.f32 %v5578_v44, %v3834_v54  ;;  %v3831_v31 = vcvt.s32.f32 %v3703_v59  ;;  %v3702_v25 = vunpack.c.2.s8 %v3666_v15 }
 0x30a   :  { %v3976_v4 = vmul.f32 %v5578_v44, %v3836_v18  ;;  %v3833_v14 = vcvt.s32.f32 %v3705_v58  ;;  %v3704_v48 = vunpack.c.3.s8 %v3666_v15  ;;  %v3699_v17 = vunpack.c.0.s8 %v3667_v40 }
 0x30b   :  { %v4099_v16 = vpack.c.bf16 %v3977_v50, %v3975_v46  ;;  %v3971_v30 = vmul.f32 %v5559_v24, %v3831_v31  ;;  %v3830_v49 = vcvt.s32.f32 %v3702_v25  ;;  %v3701_v23 = vunpack.c.1.s8 %v3667_v40  ;;  %v3678_v50 = vld [vmem:[#allocation7 + $0x60] sm:$0xff] }
 0x30c   :  { %4179 = vmatpush1.bf16.msra.mxu0 %v4100_v41  ;;  %v4098_v57 = vpack.c.bf16 %v3976_v4, %v3974_v26  ;;  %v3973_v12 = vmul.f32 %v5559_v24, %v3833_v14  ;;  %v3832_v45 = vcvt.s32.f32 %v3704_v48  ;;  %v3827_v62 = vcvt.s32.f32 %v3699_v17 }
 0x30d   :  { %4180 = vmatprep.subr.bf16.mxu0 %v4099_v16  ;;  %v3970_v28 = vmul.f32 %v5578_v44, %v3830_v49  ;;  %v3829_v63 = vcvt.s32.f32 %v3701_v23  ;;  %v3698_v21 = vunpack.c.0.s8 %v3666_v15  ;;  %v3700_v10 = vunpack.c.1.s8 %v3666_v15  ;;  %v3679_v15 = vld [vmem:[#allocation7 + $0x68] sm:$0xff] }
 0x30e   :  { %v4097_v35 = vpack.c.bf16 %v3973_v12, %v3971_v30  ;;  %v3972_v60 = vmul.f32 %v5578_v44, %v3832_v45  ;;  %v3967_v20 = vmul.f32 %v5559_v24, %v3827_v62  ;;  %v3759_v61 = vunpack.c.2.s8 %v3681_v42 }
 0x30f   :  { %v3969_v55 = vmul.f32 %v5559_v24, %v3829_v63  ;;  %v3826_v3 = vcvt.s32.f32 %v3698_v21  ;;  %v3828_v51 = vcvt.s32.f32 %v3700_v10  ;;  %v3761_v32 = vunpack.c.3.s8 %v3681_v42 }
 0x310   :  { %4181 = vmatpush1.bf16.msra.mxu0 %v4098_v57  ;;  %v4096_v34 = vpack.c.bf16 %v3972_v60, %v3970_v28  ;;  %v3887_v38 = vcvt.s32.f32 %v3759_v61  ;;  %v3758_v13 = vunpack.c.2.s8 %v3680_v52  ;;  %v3760_v40 = vunpack.c.3.s8 %v3680_v52 }
 0x311   :  { %4182 = vmatprep.subr.bf16.mxu0 %v4097_v35  ;;  %v4095_v29 = vpack.c.bf16 %v3969_v55, %v3967_v20  ;;  %v3966_v1 = vmul.f32 %v5578_v44, %v3826_v3  ;;  %v3968_v27 = vmul.f32 %v5578_v44, %v3828_v51  ;;  %v3889_v36 = vcvt.s32.f32 %v3761_v32 }
 0x312   :  { %v4027_v0 = vmul.f32 %v5559_v24, %v3887_v38  ;;  %v3886_v2 = vcvt.s32.f32 %v3758_v13  ;;  %v3888_v37 = vcvt.s32.f32 %v3760_v40  ;;  %v3755_v11 = vunpack.c.0.s8 %v3681_v42 }
 0x313   :  { %v4094_v22 = vpack.c.bf16 %v3968_v27, %v3966_v1  ;;  %v4029_v43 = vmul.f32 %v5559_v24, %v3889_v36  ;;  %v3757_v54 = vunpack.c.1.s8 %v3681_v42  ;;  %v3754_v59 = vunpack.c.0.s8 %v3680_v52 }
 0x314   :  { %4183 = vmatpush1.bf16.msra.mxu0 %v4096_v34  ;;  %v4026_v41 = vmul.f32 %v5578_v44, %v3886_v2  ;;  %v4028_v46 = vmul.f32 %v5578_v44, %v3888_v37  ;;  %v3883_v18 = vcvt.s32.f32 %v3755_v11  ;;  %v3756_v58 = vunpack.c.1.s8 %v3680_v52  ;;  %v3677_v52 = vld [vmem:[#allocation7 + $0x58] sm:$0xff]  ;;  %v3676_v34 = vld [vmem:[#allocation7 + $0x50] sm:$0xff] }
 0x315   :  { %4184 = vmatprep.subr.bf16.mxu0 %v4095_v29  ;;  %v4125_v26 = vpack.c.bf16 %v4029_v43, %v4027_v0  ;;  %v3885_v31 = vcvt.s32.f32 %v3757_v54  ;;  %v3882_v25 = vcvt.s32.f32 %v3754_v59  ;;  %v3751_v4 = vunpack.c.2.s8 %v3679_v15 }
 0x316   :  { %v4124_v14 = vpack.c.bf16 %v4028_v46, %v4026_v41  ;;  %v4023_v48 = vmul.f32 %v5559_v24, %v3883_v18  ;;  %v3884_v17 = vcvt.s32.f32 %v3756_v58  ;;  %v3753_v16 = vunpack.c.3.s8 %v3679_v15 }
 0x317   :  { %v4025_v30 = vmul.f32 %v5559_v24, %v3885_v31  ;;  %v4022_v49 = vmul.f32 %v5578_v44, %v3882_v25  ;;  %v3879_v23 = vcvt.s32.f32 %v3751_v4  ;;  %v3750_v42 = vunpack.c.2.s8 %v3678_v50 }
 0x318   :  { %4185 = vmatpush1.bf16.msra.mxu0 %v4094_v22  ;;  %v4024_v57 = vmul.f32 %v5578_v44, %v3884_v17  ;;  %v3881_v12 = vcvt.s32.f32 %v3753_v16  ;;  %v3752_v45 = vunpack.c.3.s8 %v3678_v50  ;;  %v3747_v62 = vunpack.c.0.s8 %v3679_v15  ;;  %v3675_v16 = vld [vmem:[#allocation7 + $0x48] sm:$0xff] }
 0x319   :  { %4186 = vmatprep.subr.bf16.mxu0 %v4125_v26  ;;  %v4123_v28 = vpack.c.bf16 %v4025_v30, %v4023_v48  ;;  %v4019_v63 = vmul.f32 %v5559_v24, %v3879_v23  ;;  %v3878_v21 = vcvt.s32.f32 %v3750_v42  ;;  %v3749_v10 = vunpack.c.1.s8 %v3679_v15 }
 0x31a   :  { %v4122_v35 = vpack.c.bf16 %v4024_v57, %v4022_v49  ;;  %v4021_v60 = vmul.f32 %v5559_v24, %v3881_v12  ;;  %v3880_v20 = vcvt.s32.f32 %v3752_v45  ;;  %v3875_v61 = vcvt.s32.f32 %v3747_v62  ;;  %v3674_v45 = vld [vmem:[#allocation7 + $0x40] sm:$0xff] }
 0x31b   :  { %v4018_v55 = vmul.f32 %v5578_v44, %v3878_v21  ;;  %v3877_v3 = vcvt.s32.f32 %v3749_v10  ;;  %v3746_v51 = vunpack.c.0.s8 %v3678_v50  ;;  %v3748_v32 = vunpack.c.1.s8 %v3678_v50 }
 0x31c   :  { %4187 = vmatpush2.bf16.msra.mxu0 %v4124_v14  ;;  %v4121_v38 = vpack.c.bf16 %v4021_v60, %v4019_v63  ;;  %v4020_v13 = vmul.f32 %v5578_v44, %v3880_v20  ;;  %v4015_v40 = vmul.f32 %v5559_v24, %v3875_v61  ;;  %v3743_v29 = vunpack.c.2.s8 %v3677_v52 }
 0x31d   :  { %4188 = vmatprep.subr.bf16.mxu0 %v4123_v28  ;;  %v4017_v1 = vmul.f32 %v5559_v24, %v3877_v3  ;;  %v3874_v27 = vcvt.s32.f32 %v3746_v51  ;;  %v3876_v36 = vcvt.s32.f32 %v3748_v32  ;;  %v3745_v0 = vunpack.c.3.s8 %v3677_v52 }
 0x31e   :  { %v4120_v2 = vpack.c.bf16 %v4020_v13, %v4018_v55  ;;  %v3871_v37 = vcvt.s32.f32 %v3743_v29  ;;  %v3742_v11 = vunpack.c.2.s8 %v3676_v34  ;;  %v3744_v15 = vunpack.c.3.s8 %v3676_v34 }
 0x31f   :  { %v4119_v22 = vpack.c.bf16 %v4017_v1, %v4015_v40  ;;  %v4014_v43 = vmul.f32 %v5578_v44, %v3874_v27  ;;  %v4016_v54 = vmul.f32 %v5578_v44, %v3876_v36  ;;  %v3873_v59 = vcvt.s32.f32 %v3745_v0  ;;  %v3689_v40 = vld [vmem:[#allocation7 + $0xb8] sm:$0xff] }
 0x320   :  { %4189 = vmatpush2.bf16.msra.mxu0 %v4122_v35  ;;  %v4011_v41 = vmul.f32 %v5559_v24, %v3871_v37  ;;  %v3870_v46 = vcvt.s32.f32 %v3742_v11  ;;  %v3872_v18 = vcvt.s32.f32 %v3744_v15  ;;  %v3447_v58 = vadd.f32 %v6668_v47, %v6729_v53 }
 0x321   :  { %4190 = vmatprep.subr.bf16.mxu0 %v4121_v38  ;;  %v4118_v50 = vpack.c.bf16 %v4016_v54, %v4014_v43  ;;  %v4013_v26 = vmul.f32 %v5559_v24, %v3873_v59  ;;  %v3739_v31 = vunpack.c.0.s8 %v3677_v52  ;;  %v3741_v25 = vunpack.c.1.s8 %v3677_v52  ;;  %v3688_v54 = vld [vmem:[#allocation7 + $0xb0] sm:$0xff] }
 0x322   :  { %v4010_v4 = vmul.f32 %v5578_v44, %v3870_v46  ;;  %v4012_v14 = vmul.f32 %v5578_v44, %v3872_v18  ;;  %v3488_v48 = vadd.f32 %v6672_v56, %v3447_v58  ;;  %v3738_v17 = vunpack.c.0.s8 %v3676_v34 }
 0x323   :  { %v4117_v30 = vpack.c.bf16 %v4013_v26, %v4011_v41  ;;  %v3867_v49 = vcvt.s32.f32 %v3739_v31  ;;  %v3869_v23 = vcvt.s32.f32 %v3741_v25  ;;  %v3740_v42 = vunpack.c.1.s8 %v3676_v34 }
 0x324   :  { %4191 = vmatpush2.bf16.msra.mxu0 %v4120_v2  ;;  %v4116_v47 = vpack.c.bf16 %v4012_v14, %v4010_v4  ;;  %v3658_v53 = vmax.f32 %v3488_v48, 0.0  ;;  %v3866_v57 = vcvt.s32.f32 %v3738_v17  ;;  %v3449_v12 = vadd.f32 %v6678_v33, %v6732_v9 }
 0x325   :  { %4192 = vmatprep.subr.bf16.mxu0 %v4119_v22  ;;  %v4007_v62 = vmul.f32 %v5559_v24, %v3867_v49  ;;  %v4009_v28 = vmul.f32 %v5559_v24, %v3869_v23  ;;  %v3868_v56 = vcvt.s32.f32 %v3740_v42  ;;  %v3735_v63 = vunpack.c.2.s8 %v3675_v16  ;;  %v3687_v23 = vld [vmem:[#allocation7 + $0xa8] sm:$0xff] }
 0x326   :  { %v6795_v21 = vpack.c.bf16 %v3658_v53, %v3658_v53  ;;  %v4006_v10 = vmul.f32 %v5578_v44, %v3866_v57  ;;  %v3490_v52 = vadd.f32 %v6682_v19, %v3449_v12  ;;  %v3737_v35 = vunpack.c.3.s8 %v3675_v16 }
 0x327   :  { %v4115_v60 = vpack.c.bf16 %v4009_v28, %v4007_v62  ;;  %v4008_v20 = vmul.f32 %v5578_v44, %v3868_v56  ;;  %v3863_v61 = vcvt.s32.f32 %v3735_v63  ;;  %v3734_v33 = vunpack.c.2.s8 %v3674_v45 }
 0x328   :  { %4193 = vmatpush2.bf16.msra.mxu0 %v4118_v50  ;;  %v3659_v9 = vmax.f32 %v3490_v52, 0.0  ;;  %v3865_v55 = vcvt.s32.f32 %v3737_v35  ;;  %v3736_v3 = vunpack.c.3.s8 %v3674_v45  ;;  %v3731_v51 = vunpack.c.0.s8 %v3675_v16  ;;  %v3686_v35 = vld [vmem:[#allocation7 + $0xa0] sm:$0xff] }
 0x329   :  { %4194 = vmatprep.subr.bf16.mxu0 %v4117_v30  ;;  %v4114_v32 = vpack.c.bf16 %v4008_v20, %v4006_v10  ;;  %v4003_v34 = vmul.f32 %v5559_v24, %v3863_v61  ;;  %v3862_v38 = vcvt.s32.f32 %v3734_v33  ;;  %v3733_v13 = vunpack.c.1.s8 %v3675_v16 }
 0x32a   :  { %v3663_v29 = vpack.c.bf16 %v3659_v9, %v3659_v9  ;;  %v4005_v19 = vmul.f32 %v5559_v24, %v3865_v55  ;;  %v3864_v1 = vcvt.s32.f32 %v3736_v3  ;;  %v3859_v27 = vcvt.s32.f32 %v3731_v51 }
 0x32b   :  { %v4002_v36 = vmul.f32 %v5578_v44, %v3862_v38  ;;  %v3861_v0 = vcvt.s32.f32 %v3733_v13  ;;  %v3730_v2 = vunpack.c.0.s8 %v3674_v45  ;;  %v3732_v37 = vunpack.c.1.s8 %v3674_v45 }
 0x32c   :  { %4195 = vmatpush2.bf16.msra.mxu0 %v4116_v47  ;;  %v4113_v11 = vpack.c.bf16 %v4005_v19, %v4003_v34  ;;  %v4004_v15 = vmul.f32 %v5578_v44, %v3864_v1  ;;  %v3999_v22 = vmul.f32 %v5559_v24, %v3859_v27  ;;  %4202 = vmatprep.mubr.bf16.mxu0 %v3663_v29  ;;  %v3791_v43 = vunpack.c.2.s8 %v3689_v40  ;;  %v3685_v27 = vld [vmem:[#allocation7 + $0x98] sm:$0xff] }
 0x32d   :  { %4196 = vmatprep.subr.bf16.mxu0 %v4115_v60  ;;  %v4001_v59 = vmul.f32 %v5559_v24, %v3861_v0  ;;  %v3858_v41 = vcvt.s32.f32 %v3730_v2  ;;  %v3860_v46 = vcvt.s32.f32 %v3732_v37  ;;  %v3321_v18 = vrot.slane %v6713_v39, %v5534_v8 }
 0x32e   :  { %v4112_v58 = vpack.c.bf16 %v4004_v15, %v4002_v36  ;;  %v3325_v50 = vrot.slane %v6713_v39, %v5528_v6  ;;  %v3793_v26 = vunpack.c.3.s8 %v3689_v40  ;;  %v3919_v31 = vcvt.s32.f32 %v3791_v43 }
 0x32f   :  { %v4111_v25 = vpack.c.bf16 %v4001_v59, %v3999_v22  ;;  %v3998_v4 = vmul.f32 %v5578_v44, %v3858_v41  ;;  %v4000_v14 = vmul.f32 %v5578_v44, %v3860_v46  ;;  %v3790_v48 = vunpack.c.2.s8 %v3688_v54 }
 0x330   :  { %4197 = vmatpush2.bf16.msra.mxu0 %v4114_v32  ;;  %v3921_v17 = vcvt.s32.f32 %v3793_v26  ;;  %v4059_v16 = vmul.f32 %v5559_v24, %v3919_v31  ;;  %v3792_v30 = vunpack.c.3.s8 %v3688_v54  ;;  %v3787_v49 = vunpack.c.0.s8 %v3689_v40 }
 0x331   :  { %4198 = vmatprep.subr.bf16.mxu0 %v4113_v11  ;;  %v4110_v42 = vpack.c.bf16 %v4000_v14, %v3998_v4  ;;  %v3918_v47 = vcvt.s32.f32 %v3790_v48  ;;  %v3789_v53 = vunpack.c.1.s8 %v3689_v40  ;;  %v3786_v57 = vunpack.c.0.s8 %v3688_v54 }
 0x332   :  { %v4061_v12 = vmul.f32 %v5559_v24, %v3921_v17  ;;  %v3920_v45 = vcvt.s32.f32 %v3792_v30  ;;  %v3915_v62 = vcvt.s32.f32 %v3787_v49  ;;  %v3788_v28 = vunpack.c.1.s8 %v3688_v54 }
 0x333   :  { %v4058_v56 = vmul.f32 %v5578_v44, %v3918_v47  ;;  %v3917_v63 = vcvt.s32.f32 %v3789_v53  ;;  %v3914_v10 = vcvt.s32.f32 %v3786_v57  ;;  %v3783_v52 = vunpack.c.2.s8 %v3687_v23 }
 0x334   :  { %4199 = vmatpush2.bf16.msra.mxu0 %v4112_v58  ;;  %v4141_v60 = vpack.c.bf16 %v4061_v12, %v4059_v16  ;;  %v4060_v20 = vmul.f32 %v5578_v44, %v3920_v45  ;;  %v4055_v61 = vmul.f32 %v5559_v24, %v3915_v62  ;;  %v3916_v33 = vcvt.s32.f32 %v3788_v28  ;;  %v3684_v58 = vld [vmem:[#allocation7 + $0x90] sm:$0xff]  ;;  %v3683_v12 = vld [vmem:[#allocation7 + $0x88] sm:$0xff] }
 0x335   :  { %4200 = vmatprep.subr.bf16.mxu0 %v4111_v25  ;;  %v4057_v9 = vmul.f32 %v5559_v24, %v3917_v63  ;;  %v4054_v55 = vmul.f32 %v5578_v44, %v3914_v10  ;;  %v3785_v3 = vunpack.c.3.s8 %v3687_v23  ;;  %v3911_v51 = vcvt.s32.f32 %v3783_v52 }
 0x336   :  { %4211 = vmatprep.subr.bf16.mxu1 %v4141_v60  ;;  %v4140_v32 = vpack.c.bf16 %v4060_v20, %v4058_v56  ;;  %v4056_v34 = vmul.f32 %v5578_v44, %v3916_v33  ;;  %v3782_v38 = vunpack.c.2.s8 %v3686_v35  ;;  %v3784_v13 = vunpack.c.3.s8 %v3686_v35 }
 0x337   :  { %v4139_v40 = vpack.c.bf16 %v4057_v9, %v4055_v61  ;;  %v3913_v29 = vcvt.s32.f32 %v3785_v3  ;;  %v4051_v19 = vmul.f32 %v5559_v24, %v3911_v51  ;;  %v3779_v1 = vunpack.c.0.s8 %v3687_v23  ;;  %v3682_v9 = vld [vmem:[#allocation7 + $0x80] sm:$0xff] }
 0x338   :  { %4201 = vmatpush2.bf16.msra.mxu0 %v4110_v42  ;;  %4212 = vmatpush1.bf16.msra.mxu1 %v4140_v32  ;;  %v4138_v36 = vpack.c.bf16 %v4056_v34, %v4054_v55  ;;  %v3910_v0 = vcvt.s32.f32 %v3782_v38  ;;  %v3912_v2 = vcvt.s32.f32 %v3784_v13  ;;  %v3781_v37 = vunpack.c.1.s8 %v3687_v23 }
 0x339   :  { %4213 = vmatprep.subr.bf16.mxu1 %v4139_v40  ;;  %v4053_v11 = vmul.f32 %v5559_v24, %v3913_v29  ;;  %v3907_v15 = vcvt.s32.f32 %v3779_v1  ;;  %v3778_v22 = vunpack.c.0.s8 %v3686_v35  ;;  %v3780_v43 = vunpack.c.1.s8 %v3686_v35 }
 0x33a   :  { %v4050_v54 = vmul.f32 %v5578_v44, %v3910_v0  ;;  %v4052_v59 = vmul.f32 %v5578_v44, %v3912_v2  ;;  %v3909_v41 = vcvt.s32.f32 %v3781_v37  ;;  %v3775_v46 = vunpack.c.2.s8 %v3685_v27 }
 0x33b   :  { %4203 = vmatmul.mubr.bf16.vlgmr.msra.gmra.mxu0 %v6795_v21  ;;  %v4137_v26 = vpack.c.bf16 %v4053_v11, %v4051_v19  ;;  %v4047_v31 = vmul.f32 %v5559_v24, %v3907_v15  ;;  %v3906_v25 = vcvt.s32.f32 %v3778_v22  ;;  %v3908_v4 = vcvt.s32.f32 %v3780_v43  ;;  %v3697_v11 = vld [vmem:[#allocation7 + $0xf8] sm:$0xff] }
 0x33c   :  { %4214 = vmatpush1.bf16.msra.mxu1 %v4138_v36  ;;  %v4136_v14 = vpack.c.bf16 %v4052_v59, %v4050_v54  ;;  %v4049_v48 = vmul.f32 %v5559_v24, %v3909_v41  ;;  %v3777_v17 = vunpack.c.3.s8 %v3685_v27  ;;  %v3903_v16 = vcvt.s32.f32 %v3775_v46 }
 0x33d   :  { %4215 = vmatprep.subr.bf16.mxu1 %v4137_v26  ;;  %v4046_v30 = vmul.f32 %v5578_v44, %v3906_v25  ;;  %v4048_v49 = vmul.f32 %v5578_v44, %v3908_v4  ;;  %v3774_v23 = vunpack.c.2.s8 %v3684_v58  ;;  %v3776_v42 = vunpack.c.3.s8 %v3684_v58 }
 0x33e   :  { %v4135_v47 = vpack.c.bf16 %v4049_v48, %v4047_v31  ;;  %v3905_v21 = vcvt.s32.f32 %v3777_v17  ;;  %v4043_v53 = vmul.f32 %v5559_v24, %v3903_v16  ;;  %v3771_v57 = vunpack.c.0.s8 %v3685_v27 }
 0x33f   :  { %v4134_v45 = vpack.c.bf16 %v4048_v49, %v4046_v30  ;;  %v3902_v62 = vcvt.s32.f32 %v3774_v23  ;;  %v3904_v28 = vcvt.s32.f32 %v3776_v42  ;;  %v3773_v56 = vunpack.c.1.s8 %v3685_v27 }
 0x340   :  { %4216 = vmatpush1.bf16.msra.mxu1 %v4136_v14  ;;  %v4045_v63 = vmul.f32 %v5559_v24, %v3905_v21  ;;  %v3899_v10 = vcvt.s32.f32 %v3771_v57  ;;  %v3770_v52 = vunpack.c.0.s8 %v3684_v58  ;;  %v3772_v35 = vunpack.c.1.s8 %v3684_v58  ;;  %v3696_v14 = vld [vmem:[#allocation7 + $0xf0] sm:$0xff] }
 0x341   :  { %4217 = vmatprep.subr.bf16.mxu1 %v4135_v47  ;;  %v4042_v60 = vmul.f32 %v5578_v44, %v3902_v62  ;;  %v4044_v20 = vmul.f32 %v5578_v44, %v3904_v28  ;;  %v3901_v61 = vcvt.s32.f32 %v3773_v56  ;;  %v3767_v33 = vunpack.c.2.s8 %v3683_v12 }
 0x342   :  { %v4133_v55 = vpack.c.bf16 %v4045_v63, %v4043_v53  ;;  %v4039_v3 = vmul.f32 %v5559_v24, %v3899_v10  ;;  %v3898_v51 = vcvt.s32.f32 %v3770_v52  ;;  %v3900_v32 = vcvt.s32.f32 %v3772_v35 }
 0x343   :  { %v4132_v34 = vpack.c.bf16 %v4044_v20, %v4042_v60  ;;  %v4041_v38 = vmul.f32 %v5559_v24, %v3901_v61  ;;  %v3769_v13 = vunpack.c.3.s8 %v3683_v12  ;;  %v3895_v40 = vcvt.s32.f32 %v3767_v33 }
 0x344   :  { %4218 = vmatpush1.bf16.msra.mxu1 %v4134_v45  ;;  %v4038_v29 = vmul.f32 %v5578_v44, %v3898_v51  ;;  %v4040_v19 = vmul.f32 %v5578_v44, %v3900_v32  ;;  %v3766_v1 = vunpack.c.2.s8 %v3682_v9  ;;  %v3768_v27 = vunpack.c.3.s8 %v3682_v9 }
 0x345   :  { %4219 = vmatprep.subr.bf16.mxu1 %v4133_v55  ;;  %v4131_v36 = vpack.c.bf16 %v4041_v38, %v4039_v3  ;;  %v3897_v0 = vcvt.s32.f32 %v3769_v13  ;;  %v4035_v2 = vmul.f32 %v5559_v24, %v3895_v40  ;;  %v3763_v37 = vunpack.c.0.s8 %v3683_v12 }
 0x346   :  { %v4130_v15 = vpack.c.bf16 %v4040_v19, %v4038_v29  ;;  %v3894_v22 = vcvt.s32.f32 %v3766_v1  ;;  %v3896_v43 = vcvt.s32.f32 %v3768_v27  ;;  %v3765_v54 = vunpack.c.1.s8 %v3683_v12  ;;  %v3694_v29 = vld [vmem:[#allocation7 + $0xe0] sm:$0xff] }
 0x347   :  { %v4037_v59 = vmul.f32 %v5559_v24, %v3897_v0  ;;  %v3891_v41 = vcvt.s32.f32 %v3763_v37  ;;  %v3762_v46 = vunpack.c.0.s8 %v3682_v9  ;;  %v3764_v58 = vunpack.c.1.s8 %v3682_v9  ;;  %v3695_v9 = vld [vmem:[#allocation7 + $0xe8] sm:$0xff] }
 0x348   :  { %4220 = vmatpush1.bf16.msra.mxu1 %v4132_v34  ;;  %v4034_v26 = vmul.f32 %v5578_v44, %v3894_v22  ;;  %v4036_v31 = vmul.f32 %v5578_v44, %v3896_v43  ;;  %v3893_v25 = vcvt.s32.f32 %v3765_v54  ;;  %v3823_v4 = vunpack.c.2.s8 %v3697_v11 }
 0x349   :  { %v3528_v48 = vpop.f32.mrf.mxu0  ;;  %4221 = vmatprep.subr.bf16.mxu1 %v4131_v36  ;;  %v4129_v17 = vpack.c.bf16 %v4037_v59, %v4035_v2  ;;  %v4031_v16 = vmul.f32 %v5559_v24, %v3891_v41  ;;  %v3890_v30 = vcvt.s32.f32 %v3762_v46  ;;  %v3892_v49 = vcvt.s32.f32 %v3764_v58 }
 0x34a   :  { %v3529_v23 = vadd.f32 %v3528_v48, %v3321_v18  ;;  %v3569_v42 = vpop.f32.mrf.mxu1  ;;  %v4128_v47 = vpack.c.bf16 %v4036_v31, %v4034_v26  ;;  %v4033_v21 = vmul.f32 %v5559_v24, %v3893_v25  ;;  %v3825_v53 = vunpack.c.3.s8 %v3697_v11  ;;  %v3693_v48 = vld [vmem:[#allocation7 + $0xd8] sm:$0xff] }
 0x34b   :  { %v3530_v57 = vpop.f32.mrf.mxu0  ;;  %v4030_v12 = vmul.f32 %v5578_v44, %v3890_v30  ;;  %v4032_v45 = vmul.f32 %v5578_v44, %v3892_v49  ;;  %v3951_v62 = vcvt.s32.f32 %v3823_v4  ;;  %v3822_v28 = vunpack.c.2.s8 %v3696_v14 }
 0x34c   :  { %v6848_v56 = vadd.f32 %v3569_v42, %v3529_v23  ;;  %v3531_v63 = vadd.f32 %v3530_v57, %v3325_v50  ;;  %v3571_v10 = vpop.f32.mrf.mxu1  ;;  %4222 = vmatpush1.bf16.msra.mxu1 %v4130_v15  ;;  %v4127_v18 = vpack.c.bf16 %v4033_v21, %v4031_v16  ;;  %v3953_v52 = vcvt.s32.f32 %v3825_v53  ;;  %v3692_v53 = vld [vmem:[#allocation7 + $0xd0] sm:$0xff] }
 0x34d   :  { %v3532_v35 = vpop.f32.mrf.mxu0  ;;  %4223 = vmatprep.subr.bf16.mxu1 %v4129_v17  ;;  %v4126_v60 = vpack.c.bf16 %v4032_v45, %v4030_v12  ;;  %v4091_v20 = vmul.f32 %v5559_v24, %v3951_v62  ;;  %v3824_v61 = vunpack.c.3.s8 %v3696_v14  ;;  %v3950_v33 = vcvt.s32.f32 %v3822_v28 }
 0x34e   :  { %v6854_v55 = vadd.f32 %v3571_v10, %v3531_v63  ;;  %v3573_v3 = vpop.f32.mrf.mxu1  ;;  %v4093_v51 = vmul.f32 %v5559_v24, %v3953_v52  ;;  %v3819_v32 = vunpack.c.0.s8 %v3697_v11  ;;  %v3821_v39 = vunpack.c.1.s8 %v3697_v11 }
 0x34f   :  { %v3533_v50 = vpop.f32.mrf.mxu0  ;;  %v3952_v34 = vcvt.s32.f32 %v3824_v61  ;;  %v4090_v38 = vmul.f32 %v5578_v44, %v3950_v33  ;;  %v3818_v13 = vunpack.c.0.s8 %v3696_v14  ;;  %v3820_v40 = vunpack.c.1.s8 %v3696_v14 }
 0x350   :  { %v3574_v19 = vpop.f32.mrf.mxu1  ;;  %4224 = vmatpush1.bf16.msra.mxu1 %v4128_v47  ;;  %v4157_v1 = vpack.c.bf16 %v4093_v51, %v4091_v20  ;;  %v3947_v27 = vcvt.s32.f32 %v3819_v32  ;;  %v3949_v36 = vcvt.s32.f32 %v3821_v39  ;;  %v3815_v0 = vunpack.c.2.s8 %v3695_v9  ;;  %v3691_v39 = vld [vmem:[#allocation7 + $0xc8] sm:$0xff] }
 0x351   :  { %4225 = vmatprep.subr.bf16.mxu1 %v4127_v18  ;;  %v4092_v2 = vmul.f32 %v5578_v44, %v3952_v34  ;;  %v3946_v37 = vcvt.s32.f32 %v3818_v13  ;;  %v3948_v15 = vcvt.s32.f32 %v3820_v40  ;;  %v3817_v22 = vunpack.c.3.s8 %v3695_v9 }
 0x352   :  { %v4087_v11 = vmul.f32 %v5559_v24, %v3947_v27  ;;  %v4089_v43 = vmul.f32 %v5559_v24, %v3949_v36  ;;  %v3943_v54 = vcvt.s32.f32 %v3815_v0  ;;  %v3814_v59 = vunpack.c.2.s8 %v3694_v29  ;;  %v3690_v27 = vld [vmem:[#allocation7 + $0xc0] sm:$0xff] }
 0x353   :  { %v4156_v41 = vpack.c.bf16 %v4092_v2, %v4090_v38  ;;  %v4086_v46 = vmul.f32 %v5578_v44, %v3946_v37  ;;  %v4088_v58 = vmul.f32 %v5578_v44, %v3948_v15  ;;  %v3945_v26 = vcvt.s32.f32 %v3817_v22 }
 0x354   :  { %4226 = vmatpush1.bf16.msra.mxu1 %v4126_v60  ;;  %v4155_v31 = vpack.c.bf16 %v4089_v43, %v4087_v11  ;;  %v4083_v25 = vmul.f32 %v5559_v24, %v3943_v54  ;;  %v3816_v4 = vunpack.c.3.s8 %v3694_v29  ;;  %v3942_v14 = vcvt.s32.f32 %v3814_v59 }
 0x355   :  { %4227 = vmatprep.subr.bf16.mxu1 %v4157_v1  ;;  %v4154_v17 = vpack.c.bf16 %v4088_v58, %v4086_v46  ;;  %v4085_v16 = vmul.f32 %v5559_v24, %v3945_v26  ;;  %v3811_v30 = vunpack.c.0.s8 %v3695_v9  ;;  %v3813_v49 = vunpack.c.1.s8 %v3695_v9 }
 0x356   :  { %v3944_v23 = vcvt.s32.f32 %v3816_v4  ;;  %v4082_v42 = vmul.f32 %v5578_v44, %v3942_v14  ;;  %v3810_v47 = vunpack.c.0.s8 %v3694_v29  ;;  %v3812_v21 = vunpack.c.1.s8 %v3694_v29 }
 0x357   :  { %v4153_v57 = vpack.c.bf16 %v4085_v16, %v4083_v25  ;;  %v3939_v12 = vcvt.s32.f32 %v3811_v30  ;;  %v3941_v45 = vcvt.s32.f32 %v3813_v49  ;;  %v3807_v62 = vunpack.c.2.s8 %v3693_v48 }
 0x358   :  { %4228 = vmatpush2.bf16.msra.mxu1 %v4156_v41  ;;  %v4084_v28 = vmul.f32 %v5578_v44, %v3944_v23  ;;  %v3938_v63 = vcvt.s32.f32 %v3810_v47  ;;  %v3940_v10 = vcvt.s32.f32 %v3812_v21  ;;  %v3809_v18 = vunpack.c.3.s8 %v3693_v48 }
 0x359   :  { %4229 = vmatprep.subr.bf16.mxu1 %v4155_v31  ;;  %v4079_v52 = vmul.f32 %v5559_v24, %v3939_v12  ;;  %v4081_v35 = vmul.f32 %v5559_v24, %v3941_v45  ;;  %v3935_v60 = vcvt.s32.f32 %v3807_v62  ;;  %v3806_v20 = vunpack.c.2.s8 %v3692_v53 }
 0x35a   :  { %v4152_v61 = vpack.c.bf16 %v4084_v28, %v4082_v42  ;;  %v3937_v33 = vcvt.s32.f32 %v3809_v18  ;;  %v4078_v9 = vmul.f32 %v5578_v44, %v3938_v63  ;;  %v4080_v3 = vmul.f32 %v5578_v44, %v3940_v10 }
 0x35b   :  { %v3808_v51 = vunpack.c.3.s8 %v3692_v53  ;;  %v3934_v32 = vcvt.s32.f32 %v3806_v20  ;;  %v4151_v50 = vpack.c.bf16 %v4081_v35, %v4079_v52  ;;  %v4075_v34 = vmul.f32 %v5559_v24, %v3935_v60 }
 0x35c   :  { %4230 = vmatpush2.bf16.msra.mxu1 %v4154_v17  ;;  %v3803_v38 = vunpack.c.0.s8 %v3693_v48  ;;  %v3805_v13 = vunpack.c.1.s8 %v3693_v48  ;;  %v4077_v40 = vmul.f32 %v5559_v24, %v3937_v33  ;;  %v3802_v19 = vunpack.c.0.s8 %v3692_v53 }
 0x35d   :  { %4231 = vmatprep.subr.bf16.mxu1 %v4153_v57  ;;  %v3936_v29 = vcvt.s32.f32 %v3808_v51  ;;  %v3804_v1 = vunpack.c.1.s8 %v3692_v53  ;;  %v4074_v36 = vmul.f32 %v5578_v44, %v3934_v32  ;;  %v3799_v37 = vunpack.c.2.s8 %v3691_v39  ;;  %v5145_v51 = vld [vmem:[#allocation8 + $0x74] ss:$8 sps:$4 sm:$0xff]   ;;  %v5148_v32 = vld [vmem:[#allocation8 + $0x64] ss:$8 sps:$4 sm:$0xff]  }
 0x35e   :  { %v3931_v0 = vcvt.s32.f32 %v3803_v38  ;;  %v3933_v2 = vcvt.s32.f32 %v3805_v13  ;;  %v3930_v22 = vcvt.s32.f32 %v3802_v19  ;;  %v3801_v43 = vunpack.c.3.s8 %v3691_v39  ;;  %4460 = vmatprep.subr.bf16.mxu0 %v5145_v51  ;;  %v5157_v38 = vld [vmem:[#allocation8 + $0x34] ss:$8 sps:$4 sm:$0xff]   ;;  %v5155_v13 = vld [vmem:[#allocation8 + $0x30] ss:$8 sps:$4 sm:$0xff]  }
 0x35f   :  { %v4076_v15 = vmul.f32 %v5578_v44, %v3936_v29  ;;  %v3932_v11 = vcvt.s32.f32 %v3804_v1  ;;  %v4150_v54 = vpack.c.bf16 %v4080_v3, %v4078_v9  ;;  %v3798_v46 = vunpack.c.2.s8 %v3690_v27  ;;  %v5143_v3 = vld [vmem:[#allocation8 + $0x70] ss:$8 sps:$4 sm:$0xff]   ;;  %v5158_v29 = vld [vmem:[#allocation8 + $0x20] ss:$8 sps:$4 sm:$0xff]   ;;  %v5163_v19 = vld [vmem:[#allocation8 + $0x14] ss:$8 sps:$4 sm:$0xff]  }
 0x360   :  { %4232 = vmatpush2.bf16.msra.mxu1 %v4152_v61  ;;  %v4071_v59 = vmul.f32 %v5559_v24, %v3931_v0  ;;  %v4073_v41 = vmul.f32 %v5559_v24, %v3933_v2  ;;  %v4149_v58 = vpack.c.bf16 %v4077_v40, %v4075_v34  ;;  %v3927_v26 = vcvt.s32.f32 %v3799_v37  ;;  %4461 = vmatpush1.bf16.msra.mxu0 %v5143_v3  ;;  %v5154_v34 = vld [vmem:[#allocation8 + $0x44] ss:$8 sps:$4 sm:$0xff]   ;;  %v5161_v1 = vld [vmem:[#allocation8 + $0x10] ss:$8 sps:$4 sm:$0xff]   ;;  %v5169_v0 = vld [vmem:[#allocation8 + $0xf4] ss:$8 sps:$4 sm:$0xff]  }
 0x361   :  { %4233 = vmatprep.subr.bf16.mxu1 %v4151_v50  ;;  %v3929_v31 = vcvt.s32.f32 %v3801_v43  ;;  %v4148_v25 = vpack.c.bf16 %v4076_v15, %v4074_v36  ;;  %v4070_v4 = vmul.f32 %v5578_v44, %v3930_v22  ;;  %v3800_v14 = vunpack.c.3.s8 %v3690_v27  ;;  %4462 = vmatprep.subr.bf16.mxu0 %v5148_v32  ;;  %v5149_v50 = vld [vmem:[#allocation8 + $0x50] ss:$8 sps:$4 sm:$0xff]   ;;  %v5160_v40 = vld [vmem:[#allocation8 + $0x24] ss:$8 sps:$4 sm:$0xff]   ;;  %v5164_v36 = vld [vmem:[#allocation8] ss:$8 sps:$4 sm:$0xff]  }
 0x362   :  { %v4147_v48 = vpack.c.bf16 %v4073_v41, %v4071_v59  ;;  %v4072_v17 = vmul.f32 %v5578_v44, %v3932_v11  ;;  %v3795_v16 = vunpack.c.0.s8 %v3691_v39  ;;  %v3797_v30 = vunpack.c.1.s8 %v3691_v39  ;;  %v5146_v39 = vld [vmem:[#allocation8 + $0x60] ss:$8 sps:$4 sm:$0xff]   ;;  %v5167_v2 = vld [vmem:[#allocation8 + $0xf0] ss:$8 sps:$4 sm:$0xff]   ;;  %v5172_v37 = vld [vmem:[#allocation8 + $0xe4] ss:$8 sps:$4 sm:$0xff]  }
 0x363   :  { %v3926_v49 = vcvt.s32.f32 %v3798_v46  ;;  %v3928_v23 = vcvt.s32.f32 %v3800_v14  ;;  %v3794_v42 = vunpack.c.0.s8 %v3690_v27  ;;  %v3796_v47 = vunpack.c.1.s8 %v3690_v27  ;;  %v5166_v27 = vld [vmem:[#allocation8 + $0x4] ss:$8 sps:$4 sm:$0xff]   ;;  %v5170_v15 = vld [vmem:[#allocation8 + $0xe0] ss:$8 sps:$4 sm:$0xff]   ;;  %v5175_v22 = vld [vmem:[#allocation8 + $0xd4] ss:$8 sps:$4 sm:$0xff]  }
 0x364   :  { %4234 = vmatpush2.bf16.msra.mxu1 %v4150_v54  ;;  %v4067_v21 = vmul.f32 %v5559_v24, %v3927_v26  ;;  %v4069_v53 = vmul.f32 %v5559_v24, %v3929_v31  ;;  %v3923_v57 = vcvt.s32.f32 %v3795_v16  ;;  %v3925_v12 = vcvt.s32.f32 %v3797_v30  ;;  %4463 = vmatpush1.bf16.msra.mxu0 %v5146_v39  ;;  %v5173_v11 = vld [vmem:[#allocation8 + $0xd0] ss:$8 sps:$4 sm:$0xff]   ;;  %v5178_v43 = vld [vmem:[#allocation8 + $0xc4] ss:$8 sps:$4 sm:$0xff]   ;;  %v5176_v54 = vld [vmem:[#allocation8 + $0xc0] ss:$8 sps:$4 sm:$0xff]  }
 0x365   :  { %4235 = vmatprep.subr.bf16.mxu1 %v4149_v58  ;;  %v4146_v45 = vpack.c.bf16 %v4072_v17, %v4070_v4  ;;  %v4066_v62 = vmul.f32 %v5578_v44, %v3926_v49  ;;  %v4068_v28 = vmul.f32 %v5578_v44, %v3928_v23  ;;  %v3922_v63 = vcvt.s32.f32 %v3794_v42  ;;  %v5181_v59 = vld [vmem:[#allocation8 + $0xb4] ss:$8 sps:$4 sm:$0xff]   ;;  %v5179_v41 = vld [vmem:[#allocation8 + $0xb0] ss:$8 sps:$4 sm:$0xff]   ;;  %v5184_v46 = vld [vmem:[#allocation8 + $0xa4] ss:$8 sps:$4 sm:$0xff]  }
 0x366   :  { %v3924_v10 = vcvt.s32.f32 %v3796_v47  ;;  %v4145_v18 = vpack.c.bf16 %v4069_v53, %v4067_v21  ;;  %v4063_v52 = vmul.f32 %v5559_v24, %v3923_v57  ;;  %v4065_v35 = vmul.f32 %v5559_v24, %v3925_v12  ;;  %v5151_v24 = vld [vmem:[#allocation8 + $0x54] ss:$8 sps:$4 sm:$0xff]   ;;  %v5182_v58 = vld [vmem:[#allocation8 + $0xa0] ss:$8 sps:$4 sm:$0xff]  }
 0x367   :  { %v4144_v60 = vpack.c.bf16 %v4068_v28, %v4066_v62  ;;  %v4062_v20 = vmul.f32 %v5578_v44, %v3922_v63  ;;  %4464 = vmatprep.subr.bf16.mxu0 %v5151_v24  ;;  %v5187_v28 = vld [vmem:[#allocation8 + $0x94] ss:$8 sps:$4 sm:$0xff]   ;;  %v5190_v63 = vld [vmem:[#allocation8 + $0x84] ss:$8 sps:$4 sm:$0xff]   ;;  %v5209_v3 = vld [vmem:[#allocation10 + $0x80] ss:$16 sps:$4 sm:$0xff]  }
 0x368   :  { %4236 = vmatpush2.bf16.msra.mxu1 %v4148_v25  ;;  %v4064_v61 = vmul.f32 %v5578_v44, %v3924_v10  ;;  %v4143_v33 = vpack.c.bf16 %v4065_v35, %v4063_v52  ;;  %4465 = vmatpush1.bf16.msra.mxu0 %v5149_v50  ;;  %v5152_v44 = vld [vmem:[#allocation8 + $0x40] ss:$8 sps:$4 sm:$0xff]   ;;  %v5193_v52 = vld [vmem:[#allocation10 + $0xe4] ss:$16 sps:$4 sm:$0xff]   ;;  %v5196_v35 = vld [vmem:[#allocation10 + $0xec] ss:$16 sps:$4 sm:$0xff]  }
 0x369   :  { %4237 = vmatprep.subr.bf16.mxu1 %v4147_v48  ;;  %4466 = vmatprep.subr.bf16.mxu0 %v5154_v34  ;;  %v5188_v10 = vld [vmem:[#allocation8 + $0x80] ss:$8 sps:$4 sm:$0xff]   ;;  %v5217_v51 = vld [vmem:[#allocation10 + $0x64] ss:$16 sps:$4 sm:$0xff]  }
 0x36a   :  { %v4142_v9 = vpack.c.bf16 %v4064_v61, %v4062_v20  ;;  %v5197_v20 = vld [vmem:[#allocation10 + $0xc0] ss:$16 sps:$4 sm:$0xff]   ;;  %v5205_v61 = vld [vmem:[#allocation10 + $0xa4] ss:$16 sps:$4 sm:$0xff]  }
 0x36b   :  { %v5215_v32 = vld [vmem:[#allocation10 + $0x60] ss:$16 sps:$4 sm:$0xff]   ;;  %v5223_v39 = vld [vmem:[#allocation10 + $0x44] ss:$16 sps:$4 sm:$0xff]  }
 0x36c   :  { %4238 = vmatpush2.bf16.msra.mxu1 %v4146_v45  ;;  %4467 = vmatpush1.bf16.msra.mxu0 %v5152_v44  ;;  %v5221_v24 = vld [vmem:[#allocation10 + $0x40] ss:$16 sps:$4 sm:$0xff]   ;;  %v5229_v50 = vld [vmem:[#allocation10 + $0x24] ss:$16 sps:$4 sm:$0xff]  }
 0x36d   :  { %4239 = vmatprep.subr.bf16.mxu1 %v4145_v18  ;;  %4468 = vmatprep.subr.bf16.mxu0 %v5157_v38  ;;  %v5191_v18 = vld [vmem:[#allocation10 + $0xe0] ss:$16 sps:$4 sm:$0xff]   ;;  %v5235_v44 = vld [vmem:[#allocation10 + $0x4] ss:$16 sps:$4 sm:$0xff]  }
 0x36e   :  { %v5227_v34 = vld [vmem:[#allocation10 + $0x20] ss:$16 sps:$4 sm:$0xff]  }
 0x36f   :  { %v5233_v38 = vld [vmem:[#allocation10] ss:$16 sps:$4 sm:$0xff]  }
 0x370   :  { %4240 = vmatpush2.bf16.msra.mxu1 %v4144_v60  ;;  %4469 = vmatpush1.bf16.msra.mxu0 %v5155_v13  ;;  %v5199_v60 = vld [vmem:[#allocation10 + $0xc4] ss:$16 sps:$4 sm:$0xff]  }
 0x371   :  { %4241 = vmatprep.subr.bf16.mxu1 %v4143_v33  ;;  %4470 = vmatprep.subr.bf16.mxu0 %v5160_v40  ;;  %v5203_v33 = vld [vmem:[#allocation10 + $0xa0] ss:$16 sps:$4 sm:$0xff]   ;;  %v5241_v13 = vld [vmem:[#allocation10 + $0x1e4] ss:$16 sps:$4 sm:$0xff]  }
 0x372   :  { %v5239_v40 = vld [vmem:[#allocation10 + $0x1e0] ss:$16 sps:$4 sm:$0xff]  }
 0x374   :  { %4242 = vmatpush2.bf16.msra.mxu1 %v4142_v9  ;;  %4471 = vmatpush1.bf16.msra.mxu0 %v5158_v29  ;;  %v5211_v9 = vld [vmem:[#allocation10 + $0x84] ss:$16 sps:$4 sm:$0xff]  }
 0x375   :  { %4472 = vmatprep.subr.bf16.mxu0 %v5163_v19  ;;  %4911 = vmatprep.subr.bf16.mxu1 %v5193_v52  ;;  %v5247_v29 = vld [vmem:[#allocation10 + $0x1c4] ss:$16 sps:$4 sm:$0xff]   ;;  %v5245_v19 = vld [vmem:[#allocation10 + $0x1c0] ss:$16 sps:$4 sm:$0xff]   ;;  %v5250_v52 = vld [vmem:[#allocation10 + $0x1cc] ss:$16 sps:$4 sm:$0xff]  }
 0x378   :  { %4473 = vmatpush1.bf16.msra.mxu0 %v5161_v1  ;;  %v5253_v1 = vld [vmem:[#allocation10 + $0x1a4] ss:$16 sps:$4 sm:$0xff]  }
 0x379   :  { %4474 = vmatprep.subr.bf16.mxu0 %v5166_v27  ;;  %v5251_v27 = vld [vmem:[#allocation10 + $0x1a0] ss:$16 sps:$4 sm:$0xff]  }
 0x37c   :  { %4475 = vmatpush1.bf16.msra.mxu0 %v5164_v36  ;;  %v5259_v36 = vld [vmem:[#allocation10 + $0x184] ss:$16 sps:$4 sm:$0xff]  }
 0x37d   :  { %4476 = vmatprep.subr.bf16.mxu0 %v5169_v0  ;;  %v5257_v0 = vld [vmem:[#allocation10 + $0x180] ss:$16 sps:$4 sm:$0xff]  }
 0x380   :  { %4477 = vmatpush2.bf16.msra.mxu0 %v5167_v2  ;;  %v5265_v2 = vld [vmem:[#allocation10 + $0x164] ss:$16 sps:$4 sm:$0xff]  }
 0x381   :  { %4478 = vmatprep.subr.bf16.mxu0 %v5172_v37  ;;  %v5263_v37 = vld [vmem:[#allocation10 + $0x160] ss:$16 sps:$4 sm:$0xff]  }
 0x384   :  { %4479 = vmatpush2.bf16.msra.mxu0 %v5170_v15  ;;  %v5271_v15 = vld [vmem:[#allocation10 + $0x144] ss:$16 sps:$4 sm:$0xff]  }
 0x385   :  { %4480 = vmatprep.subr.bf16.mxu0 %v5175_v22  ;;  %v5269_v22 = vld [vmem:[#allocation10 + $0x140] ss:$16 sps:$4 sm:$0xff]  }
 0x388   :  { %4481 = vmatpush2.bf16.msra.mxu0 %v5173_v11  ;;  %v4158_v11 = vld [vmem:[%s6924_s9] sm:$0x3] }
 0x389   :  { %4482 = vmatprep.subr.bf16.mxu0 %v5178_v43  ;;  %v4163_v43 = vrot.slane %v4158_v11, %v5531_v7 }
 0x38c   :  { %4483 = vmatpush2.bf16.msra.mxu0 %v5176_v54  ;;  %v4167_v54 = vrot.slane %v4158_v11, %v5525_v5 }
 0x38d   :  { %4484 = vmatprep.subr.bf16.mxu0 %v5181_v59 }
 0x390   :  { %4485 = vmatpush2.bf16.msra.mxu0 %v5179_v41 }
 0x391   :  { %4486 = vmatprep.subr.bf16.mxu0 %v5184_v46 }
 0x394   :  { %4487 = vmatpush2.bf16.msra.mxu0 %v5182_v58 }
 0x395   :  { %4488 = vmatprep.subr.bf16.mxu0 %v5187_v28  ;;  %v5230_v28 = vld [vmem:[#allocation10 + $0x28] ss:$16 sps:$4 sm:$0xff]  }
 0x3b9   :  { %v3610_v26 = vpop.f32.mrf.mxu0 }
 0x3ba   :  { %v3611_v31 = vadd.f32 %v3610_v26, %v6848_v56  ;;  %v3651_v25 = vpop.f32.mrf.mxu1 }
 0x3bb   :  { %v3612_v4 = vpop.f32.mrf.mxu0 }
 0x3bc   :  { %v3652_v14 = vadd.f32 %v3651_v25, %v3611_v31  ;;  %v3613_v48 = vadd.f32 %v3612_v4, %v6854_v55  ;;  %v3653_v17 = vpop.f32.mrf.mxu1  ;;  %v5185_v55 = vld [vmem:[#allocation8 + $0x90] ss:$8 sps:$4 sm:$0xff]  }
 0x3bd   :  { %v3614_v16 = vpop.f32.mrf.mxu0  ;;  %4489 = vmatpush2.bf16.msra.mxu0 %v5185_v55  ;;  %v5238_v55 = vld [vmem:[#allocation10 + $0xc] ss:$16 sps:$4 sm:$0xff]  }
 0x3be   :  { %v3654_v30 = vadd.f32 %v3653_v17, %v3613_v48  ;;  %v3655_v49 = vpop.f32.mrf.mxu1  ;;  %v3660_v23 = vmax.f32 %v3652_v14, 0.0  ;;  %4490 = vmatprep.subr.bf16.mxu0 %v5190_v63  ;;  %v5194_v16 = vld [vmem:[#allocation10 + $0xe8] ss:$16 sps:$4 sm:$0xff]  }
 0x3bf   :  { %v3615_v42 = vpop.f32.mrf.mxu0  ;;  %v5202_v49 = vld [vmem:[#allocation10 + $0xcc] ss:$16 sps:$4 sm:$0xff]   ;;  %v5236_v63 = vld [vmem:[#allocation10 + $0x8] ss:$16 sps:$4 sm:$0xff]  }
 0x3c0   :  { %v3661_v47 = vmax.f32 %v3654_v30, 0.0  ;;  %v3656_v21 = vpop.f32.mrf.mxu1  ;;  %v3664_v57 = vpack.c.bf16 %v3660_v23, %v3660_v23  ;;  %v5200_v23 = vld [vmem:[#allocation10 + $0xc8] ss:$16 sps:$4 sm:$0xff]   ;;  %v5208_v42 = vld [vmem:[#allocation10 + $0xac] ss:$16 sps:$4 sm:$0xff]  }
 0x3c1   :  { %4491 = vmatpush2.bf16.msra.mxu0 %v5188_v10  ;;  %v5214_v21 = vld [vmem:[#allocation10 + $0x8c] ss:$16 sps:$4 sm:$0xff]  }
 0x3c2   :  { %v3665_v53 = vpack.c.bf16 %v3661_v47, %v3661_v47  ;;  %4952 = vmatprep.subr.bf16.mxu0 %v5196_v35  ;;  %v5206_v47 = vld [vmem:[#allocation10 + $0xa8] ss:$16 sps:$4 sm:$0xff]   ;;  %v5244_v10 = vld [vmem:[#allocation10 + $0x1ec] ss:$16 sps:$4 sm:$0xff]  }
 0x3c3   :  { %v5248_v35 = vld [vmem:[#allocation10 + $0x1c8] ss:$16 sps:$4 sm:$0xff]  }
 0x3c4   :  { %4243 = vmatprep.mubr.bf16.mxu1 %v3665_v53  ;;  %v5212_v53 = vld [vmem:[#allocation10 + $0x88] ss:$16 sps:$4 sm:$0xff]  }
 0x3c5   :  { %4244 = vmatmul.mubr.bf16.vlgmr.msra.gmra.mxu1 %v3664_v57  ;;  %v5220_v57 = vld [vmem:[#allocation10 + $0x6c] ss:$16 sps:$4 sm:$0xff]  }
 0x3c6   :  { %4912 = vmatpush1.bf16.msra.mxu1 %v5191_v18  ;;  %v5242_v18 = vld [vmem:[#allocation10 + $0x1e8] ss:$16 sps:$4 sm:$0xff]  }
 0x3c7   :  { %4913 = vmatprep.subr.bf16.mxu1 %v5199_v60  ;;  %v5256_v60 = vld [vmem:[#allocation10 + $0x1ac] ss:$16 sps:$4 sm:$0xff]  }
 0x3ca   :  { %4914 = vmatpush1.bf16.msra.mxu1 %v5197_v20  ;;  %v5254_v20 = vld [vmem:[#allocation10 + $0x1a8] ss:$16 sps:$4 sm:$0xff]  }
 0x3cb   :  { %4915 = vmatprep.subr.bf16.mxu1 %v5205_v61  ;;  %v5262_v61 = vld [vmem:[#allocation10 + $0x18c] ss:$16 sps:$4 sm:$0xff]  }
 0x3ce   :  { %4916 = vmatpush1.bf16.msra.mxu1 %v5203_v33  ;;  %v5260_v33 = vld [vmem:[#allocation10 + $0x188] ss:$16 sps:$4 sm:$0xff]  }
 0x3cf   :  { %4917 = vmatprep.subr.bf16.mxu1 %v5211_v9  ;;  %v5268_v9 = vld [vmem:[#allocation10 + $0x16c] ss:$16 sps:$4 sm:$0xff]  }
 0x3d2   :  { %4918 = vmatpush1.bf16.msra.mxu1 %v5209_v3  ;;  %v5266_v3 = vld [vmem:[#allocation10 + $0x168] ss:$16 sps:$4 sm:$0xff]  }
 0x3d3   :  { %4919 = vmatprep.subr.bf16.mxu1 %v5217_v51  ;;  %v5274_v51 = vld [vmem:[#allocation10 + $0x14c] ss:$16 sps:$4 sm:$0xff]  }
 0x3d6   :  { %4920 = vmatpush1.bf16.msra.mxu1 %v5215_v32  ;;  %v5272_v32 = vld [vmem:[#allocation10 + $0x148] ss:$16 sps:$4 sm:$0xff]  }
 0x3d7   :  { %4921 = vmatprep.subr.bf16.mxu1 %v5223_v39  ;;  %v5277_v39 = vld [vmem:[#allocation10 + $0x124] ss:$16 sps:$4 sm:$0xff]  }
 0x3da   :  { %4922 = vmatpush1.bf16.msra.mxu1 %v5221_v24  ;;  %v5280_v24 = vld [vmem:[#allocation10 + $0x12c] ss:$16 sps:$4 sm:$0xff]  }
 0x3db   :  { %4923 = vmatprep.subr.bf16.mxu1 %v5229_v50  ;;  %v5275_v50 = vld [vmem:[#allocation10 + $0x120] ss:$16 sps:$4 sm:$0xff]  }
 0x3de   :  { %4924 = vmatpush1.bf16.msra.mxu1 %v5227_v34  ;;  %v5278_v34 = vld [vmem:[#allocation10 + $0x128] ss:$16 sps:$4 sm:$0xff]  }
 0x3df   :  { %4925 = vmatprep.subr.bf16.mxu1 %v5235_v44  ;;  %v5283_v44 = vld [vmem:[#allocation10 + $0x104] ss:$16 sps:$4 sm:$0xff]  }
 0x3e2   :  { %4926 = vmatpush1.bf16.msra.mxu1 %v5233_v38  ;;  %v5286_v38 = vld [vmem:[#allocation10 + $0x10c] ss:$16 sps:$4 sm:$0xff]  }
 0x3e3   :  { %4927 = vmatprep.subr.bf16.mxu1 %v5241_v13  ;;  %v5281_v13 = vld [vmem:[#allocation10 + $0x100] ss:$16 sps:$4 sm:$0xff]  }
 0x3e6   :  { %4928 = vmatpush2.bf16.msra.mxu1 %v5239_v40  ;;  %v5284_v40 = vld [vmem:[#allocation10 + $0x108] ss:$16 sps:$4 sm:$0xff]  }
 0x3e7   :  { %4929 = vmatprep.subr.bf16.mxu1 %v5247_v29  ;;  %v4288_v29 = vld [vmem:[%s6926_s11] sm:$0x3] }
 0x3ea   :  { %4930 = vmatpush2.bf16.msra.mxu1 %v5245_v19  ;;  %v4293_v19 = vrot.slane %v4288_v29, %v5531_v7 }
 0x3eb   :  { %4931 = vmatprep.subr.bf16.mxu1 %v5253_v1  ;;  %v4297_v1 = vrot.slane %v4288_v29, %v5525_v5 }
 0x3ee   :  { %4932 = vmatpush2.bf16.msra.mxu1 %v5251_v27 }
 0x3ef   :  { %4933 = vmatprep.subr.bf16.mxu1 %v5259_v36 }
 0x3f2   :  { %4934 = vmatpush2.bf16.msra.mxu1 %v5257_v0 }
 0x3f3   :  { %4935 = vmatprep.subr.bf16.mxu1 %v5265_v2 }
 0x3f6   :  { %4936 = vmatpush2.bf16.msra.mxu1 %v5263_v37 }
 0x3f7   :  { %4937 = vmatprep.subr.bf16.mxu1 %v5271_v15 }
 0x3fa   :  { %4938 = vmatpush2.bf16.msra.mxu1 %v5269_v22 }
 0x3fb   :  { %v6889_v12 = vpop.f32.mrf.mxu0  ;;  %4939 = vmatprep.subr.bf16.mxu1 %v5277_v39 }
 0x3fc   :  { %v4205_v59 = vadd.f32 %v6889_v12, %v4163_v43  ;;  %v5218_v12 = vld [vmem:[#allocation10 + $0x68] ss:$16 sps:$4 sm:$0xff]  }
 0x3fd   :  { %v6891_v56 = vpop.f32.mrf.mxu0 }
 0x3fe   :  { %v4207_v46 = vadd.f32 %v6891_v56, %v4167_v54  ;;  %v5226_v56 = vld [vmem:[#allocation10 + $0x4c] ss:$16 sps:$4 sm:$0xff]   ;;  %4940 = vmatpush2.bf16.msra.mxu1 %v5275_v50 }
 0x3ff   :  { %v4208_v45 = vpop.f32.mrf.mxu0  ;;  %4941 = vmatprep.subr.bf16.mxu1 %v5283_v44 }
 0x400   :  { %v5224_v45 = vld [vmem:[#allocation10 + $0x48] ss:$16 sps:$4 sm:$0xff]  }
 0x401   :  { %v4209_v62 = vpop.f32.mrf.mxu0 }
 0x402   :  { %v5232_v62 = vld [vmem:[#allocation10 + $0x2c] ss:$16 sps:$4 sm:$0xff]   ;;  %4942 = vmatpush2.bf16.msra.mxu1 %v5281_v13 }
 0x485   :  { %v4245_v41 = vpop.f32.mrf.mxu1 }
 0x486   :  { %v4246_v58 = vadd.f32 %v4245_v41, %v4205_v59  ;;  %v4569_v59 = vld [vmem:[%s6928_s13] sm:$0xf]  ;;  %s5431_s13 = smov [#allocation11]  }
 0x487   :  { %v4247_v26 = vpop.f32.mrf.mxu1  ;;  %v4574_v41 = vrot.slane %v4569_v59, %v5531_v7  ;;  %s5019_s21 = sshll.u32 %s5431_s13, 4  ;;  %s5020_s21 = int_to_ptr.vmem [resolvable:$true] %s5019_s21 }
 0x488   :  { %v4248_v31 = vadd.f32 %v4247_v26, %v4207_v46  ;;  %v4252_v25 = vmax.f32 %v4246_v58, 0.0  ;;  %v4582_v46 = vrot.slane %v4569_v59, %v5534_v8  ;;  %v4578_v58 = vrot.slane %v4569_v59, %v5525_v5  ;;  %s5389_s22 = scalar_lea.vmem %s5020_s21, 64  ;;  %p5394_p12 = scmp.lt.s32.totalorder %s5020_s21, %s5020_s21 }
 0x489   :  { %v4249_v4 = vpop.f32.mrf.mxu1  ;;  %v4586_v26 = vrot.slane %v4569_v59, %v5528_v6  ;;  %p5390_p11 = scmp.ne.s32.totalorder %s5020_s21, %s5389_s22  ;;  %p5395_p13 = scmp.lt.s32.totalorder %s5389_s22, %s5389_s22 }
 0x48a   :  { %v4253_v14 = vmax.f32 %v4248_v31, 0.0  ;;  %v4254_v30 = vpack.c.bf16 %v4252_v25, %v4252_v25 }
 0x48b   :  { %v4250_v48 = vpop.f32.mrf.mxu1  ;;  %p5396_p0 = por %p5395_p13, %p5394_p12 }
 0x48c   :  { %v4255_v17 = vpack.c.bf16 %v4253_v14, %v4253_v14 }
 0x48d   :  { %p5397_p1 = pnand %p5396_p0, %p5390_p11 }
 0x48e   :  { %4492 = vmatprep.mubr.bf16.mxu0 %v4255_v17 }
 0x48f   :  { %4493 = vmatmul.mubr.bf16.vlgmr.msra.gmra.mxu0 %v4254_v30 }
 0x490   :  { %4953 = vmatpush1.bf16.msra.mxu0 %v5194_v16 }
 0x491   :  { %4954 = vmatprep.subr.bf16.mxu0 %v5202_v49 }
 0x494   :  { %4955 = vmatpush1.bf16.msra.mxu0 %v5200_v23 }
 0x495   :  { %4956 = vmatprep.subr.bf16.mxu0 %v5208_v42 }
 0x498   :  { %4957 = vmatpush1.bf16.msra.mxu0 %v5206_v47 }
 0x499   :  { %4958 = vmatprep.subr.bf16.mxu0 %v5214_v21 }
 0x49c   :  { %4959 = vmatpush1.bf16.msra.mxu0 %v5212_v53 }
 0x49d   :  { %4960 = vmatprep.subr.bf16.mxu0 %v5220_v57 }
 0x4a0   :  { %4961 = vmatpush1.bf16.msra.mxu0 %v5218_v12 }
 0x4a1   :  { %4962 = vmatprep.subr.bf16.mxu0 %v5226_v56 }
 0x4a4   :  { %4963 = vmatpush1.bf16.msra.mxu0 %v5224_v45 }
 0x4a5   :  { %4964 = vmatprep.subr.bf16.mxu0 %v5232_v62 }
 0x4a8   :  { %4965 = vmatpush1.bf16.msra.mxu0 %v5230_v28 }
 0x4a9   :  { %4966 = vmatprep.subr.bf16.mxu0 %v5238_v55 }
 0x4ac   :  { %4967 = vmatpush1.bf16.msra.mxu0 %v5236_v63 }
 0x4ad   :  { %4968 = vmatprep.subr.bf16.mxu0 %v5244_v10 }
 0x4b0   :  { %4969 = vmatpush2.bf16.msra.mxu0 %v5242_v18 }
 0x4b1   :  { %4970 = vmatprep.subr.bf16.mxu0 %v5250_v52 }
 0x4b4   :  { %4971 = vmatpush2.bf16.msra.mxu0 %v5248_v35 }
 0x4b5   :  { %4972 = vmatprep.subr.bf16.mxu0 %v5256_v60 }
 0x4b8   :  { %4973 = vmatpush2.bf16.msra.mxu0 %v5254_v20 }
 0x4b9   :  { %4974 = vmatprep.subr.bf16.mxu0 %v5262_v61 }
 0x4bc   :  { %4975 = vmatpush2.bf16.msra.mxu0 %v5260_v33 }
 0x4bd   :  { %4976 = vmatprep.subr.bf16.mxu0 %v5268_v9 }
 0x4c0   :  { %4977 = vmatpush2.bf16.msra.mxu0 %v5266_v3 }
 0x4c1   :  { %4978 = vmatprep.subr.bf16.mxu0 %v5274_v51 }
 0x4c4   :  { %4979 = vmatpush2.bf16.msra.mxu0 %v5272_v32 }
 0x4c5   :  { %4980 = vmatprep.subr.bf16.mxu0 %v5280_v24 }
 0x4c8   :  { %4981 = vmatpush2.bf16.msra.mxu0 %v5278_v34 }
 0x4c9   :  { %4982 = vmatprep.subr.bf16.mxu0 %v5286_v38 }
 0x4cc   :  { %4983 = vmatpush2.bf16.msra.mxu0 %v5284_v40 }
 0x54f   :  { %v4494_v27 = vpop.f32.mrf.mxu0 }
 0x550   :  { %v4495_v36 = vadd.f32 %v4494_v27, %v4293_v19 }
 0x551   :  { %v4496_v0 = vpop.f32.mrf.mxu0 }
 0x552   :  { %v4497_v2 = vadd.f32 %v4496_v0, %v4297_v1  ;;  %v4501_v37 = vmax.f32 %v4495_v36, 0.0 }
 0x553   :  { %v4498_v15 = vpop.f32.mrf.mxu0 }
 0x554   :  { %v4502_v22 = vmax.f32 %v4497_v2, 0.0  ;;  %v4503_v54 = vpack.c.bf16 %v4501_v37, %v4501_v37 }
 0x555   :  { %v4499_v11 = vpop.f32.mrf.mxu0 }
 0x556   :  { %v4504_v43 = vpack.c.bf16 %v4502_v22, %v4502_v22 }
 0x558   :  { %4943 = vmatprep.mubr.bf16.mxu1 %v4504_v43  ;;  %4984 = vmatprep.mubr.bf16.mxu0 %v4504_v43 }
 0x559   :  { %4944 = vmatmul.mubr.bf16.vlgmr.msra.gmra.mxu1 %v4503_v54  ;;  %4985 = vmatmul.mubr.bf16.vlgmr.msra.gmra.mxu0 %v4503_v54 }
 0x619   :  { %v4945_v31 = vpop.f32.mrf.mxu1  ;;  %v4986_v25 = vpop.f32.mrf.mxu0 }
 0x61a   :  { %v4946_v4 = vadd.f32 %v4945_v31, %v4574_v41  ;;  %v4987_v14 = vadd.f32 %v4986_v25, %v4582_v46 }
 0x61b   :  { %v4947_v48 = vpop.f32.mrf.mxu1  ;;  %v4988_v17 = vpop.f32.mrf.mxu0 }
 0x61c   :  { %v4993_v16 = vmax.f32 %v4946_v4, 0.0  ;;  %v4995_v30 = vmax.f32 %v4987_v14, 0.0  ;;  %v4948_v49 = vadd.f32 %v4947_v48, %v4578_v58  ;;  %v4989_v23 = vadd.f32 %v4988_v17, %v4586_v26 }
 0x61d   :  { %v4949_v42 = vpop.f32.mrf.mxu1  ;;  %v4990_v47 = vpop.f32.mrf.mxu0 }
 0x61e   :  { %v4997_v21 = vadd.f32 %v4995_v30, %v4993_v16  ;;  %v4994_v7 = vmax.f32 %v4948_v49, 0.0  ;;  %v4996_v53 = vmax.f32 %v4989_v23, 0.0 }
 0x61f   :  { %v4950_v8 = vpop.f32.mrf.mxu1  ;;  %v4991_v57 = vpop.f32.mrf.mxu0 }
 0x620   :  { %v4998_v5 = vadd.f32 %v4996_v53, %v4994_v7  ;;  %v4999_v6 = vmul.f32 0.5, %v4997_v21 }
 0x622   :  { %v5000_v12 = vmul.f32 0.5, %v4998_v5 }
 0x624   :  { %v5003_v56 = vcombine.low %v4999_v6, %v5000_v12 }
 0x626   :  { %5127 = vst.sshfl [vmem:[#allocation11] sm:$0x33 pattern:$0x76325410] %v5003_v56 }
 0x627   :  { %5400 = shalt.err (!%p5397_p1)
}
 0x628   :  { %5022 = dma.vmem_to_hbm [thread:$0]  %s5020_s21, 64, %s6929_s14, [#allocation4]  }
 0x629   :  { %5415 = dma.done.wait [#allocation4], 64  }
 0x62a   :  { %5416 = vsyncadd [#allocation4], 4294967232 }
 0x62b   :  { %5026 = vsyncpa [#allocation3], 1 }
 0x62c   :  { %5027 = vsyncpa [#allocation6], 1 }
 0x62d   :  { %5028 = vsyncpa [#allocation9], 1 }
 0x62e   :  { %5029 = vsyncpa [#allocation4], 1 }

</bundles_post_ra>
